<compile_context>
chip_gen: v5e
topology: v5e:2x2
jax: 0.10.0
libtpu: 0.0.40
codegen_flags: <defaults>
</compile_context>

<pallas_src>
import jax
import jax.numpy as jnp
from jax.experimental import pallas as pl
from jax.experimental.pallas import tpu as pltpu


C_OUT = 32                 # conv output channels
POOL_HW = 13               # pooled spatial size (13x13)
NPOS = POOL_HW * POOL_HW   # 169 pooled positions
NTAP = 9                   # 3x3 conv taps
NPOOL = 4                  # 2x2 pool-window offsets
N_CLASSES = 10
N_PAD = 128                # FC output padded to a full lane width
TB = 16                    # images per grid step


def mnist_fused_kernel(p_ref, wci_ref, bconv_ref, wfc_ref, bfc_ref, o_ref):
    # p_ref    : (NPOOL*TB*NTAP, 169) bf16  im2col patches, rows = (offset, image, tap)
    # wci_ref  : (32*TB, TB*9)        bf16  conv weight, block-diagonal over images
    # bconv_ref: (32*TB, 1)           f32   conv bias repeated per image (row c*TB+i)
    # wfc_ref  : (32, 169, 128)       bf16  FC weight per channel, zero-padded 10->128
    # bfc_ref  : (1, 128)             f32   FC bias, zero-padded 10->128
    # o_ref    : (TB, 128)            f32   logits (first 10 lanes valid)
    wci = wci_ref[...]                                              # (512, 144)

    # --- conv: 4 block-diag dots (one per pool offset), 2x2 max fused between them
    pooled = None
    for d in range(NPOOL):
        pd = p_ref[pl.ds(d * TB * NTAP, TB * NTAP), :]              # (144, 169)
        conv_d = jnp.dot(wci, pd, preferred_element_type=jnp.float32)   # (512, 169)
        pooled = conv_d if pooled is None else jnp.maximum(pooled, conv_d)

    # bias + ReLU once, after the max (exact: relu(x + b) is monotone in x).
    act = jnp.maximum(pooled + bconv_ref[...], 0.0).astype(jnp.bfloat16)  # (512, 169)

    # --- FC: logits[i, n] = sum_c act[c*TB + i, :] @ wfc[c, :, n]  (+ bias)
    # Per-channel rows are batch-contiguous slices: no gather / concat.
    logits = jnp.zeros((TB, N_PAD), dtype=jnp.float32)
    for c in range(C_OUT):
        rows_c = act[c * TB:(c + 1) * TB, :]                        # (TB, 169)
        logits = logits + jnp.dot(rows_c, wfc_ref[c],
                                  preferred_element_type=jnp.float32)   # (TB, 128)

    o_ref[...] = logits + bfc_ref[...]


def prepare_params(conv_w, conv_b, fc_w, fc_b):
    """One-time weight repacking (hoisted out of the per-forward path)."""
    w_t = conv_w.reshape(C_OUT, NTAP).astype(jnp.float32)           # (32, 9)
    eye_i = jnp.eye(TB, dtype=jnp.float32)
    # wci[c*TB + i, i2*9 + t] = w_t[c, t] * delta(i, i2): block-diag over images,
    # so the conv dot emits rows already ordered (channel, image).
    wci = (w_t[:, None, None, :] * eye_i[None, :, :, None]).reshape(
        C_OUT * TB, TB * NTAP).astype(jnp.bfloat16)                 # (512, 144)
    bconv = jnp.repeat(conv_b.astype(jnp.float32), TB).reshape(C_OUT * TB, 1)
    # PyTorch Flatten is channel-major: flat index = c*169 + pos.
    wfc = fc_w.reshape(N_CLASSES, C_OUT, NPOS).transpose(1, 2, 0)   # (32, 169, 10)
    wfc = jnp.pad(wfc, ((0, 0), (0, 0), (0, N_PAD - N_CLASSES))).astype(jnp.bfloat16)
    bfc = jnp.pad(fc_b.astype(jnp.float32),
                  (0, N_PAD - N_CLASSES)).reshape(1, N_PAD)          # (1, 128)
    return wci, bconv, wfc, bfc


def _im2col_patches_t(x):
    """(B, 28, 28) -> (B, 36, 169): rows = pool-offset-major conv taps, cols = pooled pos."""
    b = x.shape[0]
    rows = []
    for di, dj in ((0, 0), (0, 1), (1, 0), (1, 1)):        # 2x2 pool-window offsets
        for kh in range(3):
            for kw in range(3):                             # 3x3 conv taps
                sub = x[:, di + kh: di + kh + 2 * POOL_HW: 2,
                        dj + kw: dj + kw + 2 * POOL_HW: 2]  # (B, 13, 13)
                rows.append(sub.reshape(b, NPOS))
    return jnp.stack(rows, axis=1)                          # (B, 36, 169)


@jax.jit
def mnist_forward(x, wci, bconv, wfc, bfc):
    # x: (B, 1, 28, 28)
    b = x.shape[0]
    bp = ((b + TB - 1) // TB) * TB
    nsteps = bp // TB

    pat = _im2col_patches_t(x[:, 0].astype(jnp.float32))            # (B, 36, 169)
    if bp != b:
        pat = jnp.pad(pat, ((0, bp - b), (0, 0), (0, 0)))
    # Per-step row order (pool offset d, image i, tap t): row = d*TB*9 + i*9 + t.
    pat = pat.reshape(nsteps, TB, NPOOL, NTAP, NPOS)
    pat = pat.transpose(0, 2, 1, 3, 4).reshape(nsteps * NPOOL * TB * NTAP, NPOS)
    pat = pat.astype(jnp.bfloat16)
    # TODO(synk): optional further win — do im2col in-kernel from the raw (TB,28,28)
    # block to avoid the host-side gather + ~8x patch expansion in HBM.

    logits_pad = pl.pallas_call(
        mnist_fused_kernel,
        out_shape=jax.ShapeDtypeStruct((bp, N_PAD), jnp.float32),
        grid_spec=pltpu.PrefetchScalarGridSpec(
            num_scalar_prefetch=0,
            grid=(nsteps,),
            in_specs=[
                pl.BlockSpec((NPOOL * TB * NTAP, NPOS), lambda g: (g, 0)),
                pl.BlockSpec((C_OUT * TB, TB * NTAP), lambda g: (0, 0)),
                pl.BlockSpec((C_OUT * TB, 1), lambda g: (0, 0)),
                pl.BlockSpec((C_OUT, NPOS, N_PAD), lambda g: (0, 0, 0)),
                pl.BlockSpec((1, N_PAD), lambda g: (0, 0)),
            ],
            out_specs=pl.BlockSpec((TB, N_PAD), lambda g: (g, 0)),
        ),
        compiler_params=pltpu.CompilerParams(
            dimension_semantics=("parallel",)),
    )(pat, wci, bconv, wfc, bfc)

    return logits_pad[:b, :N_CLASSES]


def ref_forward(x, conv_w, conv_b, fc_w, fc_b):
    # Pure-JAX reference matching the PyTorch module semantics.
    y = jax.lax.conv_general_dilated(
        x, conv_w, window_strides=(1, 1), padding="VALID",
        dimension_numbers=("NCHW", "OIHW", "NCHW"))
    y = jnp.maximum(y + conv_b[None, :, None, None], 0.0)
    y = jax.lax.reduce_window(
        y, -jnp.inf, jax.lax.max,
        window_dimensions=(1, 1, 2, 2), window_strides=(1, 1, 2, 2),
        padding="VALID")
    y = y.reshape(x.shape[0], -1)            # PyTorch Flatten: channel-major
    return y @ fc_w.T + fc_b


if __name__ == "__main__":
    key = jax.random.PRNGKey(0)
    kx, k1, k2, k3, k4 = jax.random.split(key, 5)

    B = 2  # spatial must be 28x28 / 1 channel because Linear expects 32*13*13
    x = jax.random.normal(kx, (B, 1, 28, 28), jnp.float32)
    conv_w = jax.random.normal(k1, (32, 1, 3, 3), jnp.float32) * (1.0 / 3.0)
    conv_b = jax.random.normal(k2, (32,), jnp.float32) * 0.1
    fc_w = jax.random.normal(k3, (10, 32 * 13 * 13), jnp.float32) * (1.0 / jnp.sqrt(5408.0))
    fc_b = jax.random.normal(k4, (10,), jnp.float32) * 0.1

    params = prepare_params(conv_w, conv_b, fc_w, fc_b)   # one-time weight repack
    out = jax.block_until_ready(mnist_forward(x, *params))

    ref = ref_forward(x, conv_w, conv_b, fc_w, fc_b)
    assert out.shape == (B, 10)
    # bf16 matmul operands (f32 accumulation) => slightly looser tolerance.
    assert jnp.allclose(out, ref, atol=5e-2, rtol=5e-2), (out, ref)
    print("KERNEL_OK")
</pallas_src>

<mosaic_0001>
module attributes {stable_mosaic.version = 11 : i64} {
  func.func @mnist_fused_kernel(%arg0: i32, %arg1: memref<576x169xbf16, #tpu.memory_space<vmem>>, %arg2: memref<512x144xbf16, #tpu.memory_space<vmem>>, %arg3: memref<512x1xf32, #tpu.memory_space<vmem>>, %arg4: memref<32x169x128xbf16, #tpu.memory_space<vmem>>, %arg5: memref<1x128xf32, #tpu.memory_space<vmem>>, %arg6: memref<16x128xf32, #tpu.memory_space<vmem>>) attributes {dimension_semantics = [#tpu.dimension_semantics<parallel>], iteration_bounds = array<i64: 1>, scalar_prefetch = 0 : i64, scratch_operands = 0 : i64, tpu.core_type = #tpu.core_type<tc>, window_params = [{transform_indices = @transform_0, window_bounds = array<i64: 576, 169>}, {pipeline_mode = #tpu.pipeline_mode<synchronous>, transform_indices = @transform_1, window_bounds = array<i64: 512, 144>}, {pipeline_mode = #tpu.pipeline_mode<synchronous>, transform_indices = @transform_2, window_bounds = array<i64: 512, 1>}, {pipeline_mode = #tpu.pipeline_mode<synchronous>, transform_indices = @transform_3, window_bounds = array<i64: 32, 169, 128>}, {pipeline_mode = #tpu.pipeline_mode<synchronous>, transform_indices = @transform_4, window_bounds = array<i64: 1, 128>}, {transform_indices = @transform_5, window_bounds = array<i64: 16, 128>}]} {
    %c0 = arith.constant 0 : index
    %c0_0 = arith.constant 0 : index
    %0 = vector.load %arg2[%c0, %c0_0] : memref<512x144xbf16, #tpu.memory_space<vmem>>, vector<512x144xbf16>
    %c0_1 = arith.constant 0 : index
    %c0_2 = arith.constant 0 : index
    %1 = vector.load %arg1[%c0_1, %c0_2] : memref<576x169xbf16, #tpu.memory_space<vmem>>, vector<144x169xbf16>
    %cst = arith.constant dense<0.000000e+00> : vector<512x169xf32>
    %2 = tpu.matmul %0, %1, %cst {dimension_numbers = #tpu.dot_dimension_numbers<[1], [0], [0], [1], [0, 0, 1, 1], [], []>} : vector<512x144xbf16>, vector<144x169xbf16>, vector<512x169xf32> -> vector<512x169xf32>
    %c144 = arith.constant 144 : index
    %c0_3 = arith.constant 0 : index
    %3 = vector.load %arg1[%c144, %c0_3] : memref<576x169xbf16, #tpu.memory_space<vmem>>, vector<144x169xbf16>
    %cst_4 = arith.constant dense<0.000000e+00> : vector<512x169xf32>
    %4 = tpu.matmul %0, %3, %cst_4 {dimension_numbers = #tpu.dot_dimension_numbers<[1], [0], [0], [1], [0, 0, 1, 1], [], []>} : vector<512x144xbf16>, vector<144x169xbf16>, vector<512x169xf32> -> vector<512x169xf32>
    %5 = arith.maximumf %2, %4 : vector<512x169xf32>
    %c288 = arith.constant 288 : index
    %c0_5 = arith.constant 0 : index
    %6 = vector.load %arg1[%c288, %c0_5] : memref<576x169xbf16, #tpu.memory_space<vmem>>, vector<144x169xbf16>
    %cst_6 = arith.constant dense<0.000000e+00> : vector<512x169xf32>
    %7 = tpu.matmul %0, %6, %cst_6 {dimension_numbers = #tpu.dot_dimension_numbers<[1], [0], [0], [1], [0, 0, 1, 1], [], []>} : vector<512x144xbf16>, vector<144x169xbf16>, vector<512x169xf32> -> vector<512x169xf32>
    %8 = arith.maximumf %5, %7 : vector<512x169xf32>
    %c432 = arith.constant 432 : index
    %c0_7 = arith.constant 0 : index
    %9 = vector.load %arg1[%c432, %c0_7] : memref<576x169xbf16, #tpu.memory_space<vmem>>, vector<144x169xbf16>
    %cst_8 = arith.constant dense<0.000000e+00> : vector<512x169xf32>
    %10 = tpu.matmul %0, %9, %cst_8 {dimension_numbers = #tpu.dot_dimension_numbers<[1], [0], [0], [1], [0, 0, 1, 1], [], []>} : vector<512x144xbf16>, vector<144x169xbf16>, vector<512x169xf32> -> vector<512x169xf32>
    %11 = arith.maximumf %8, %10 : vector<512x169xf32>
    %c0_9 = arith.constant 0 : index
    %c0_10 = arith.constant 0 : index
    %12 = vector.load %arg3[%c0_9, %c0_10] : memref<512x1xf32, #tpu.memory_space<vmem>>, vector<512x1xf32>
    %13 = vector.broadcast %12 : vector<512x1xf32> to vector<512x169xf32>
    %14 = arith.addf %11, %13 : vector<512x169xf32>
    %cst_11 = arith.constant 0.000000e+00 : f32
    %15 = vector.broadcast %cst_11 : f32 to vector<512x169xf32>
    %16 = arith.maximumf %14, %15 : vector<512x169xf32>
    %17 = arith.truncf %16 : vector<512x169xf32> to vector<512x169xbf16>
    %cst_12 = arith.constant 0.000000e+00 : f32
    %18 = vector.broadcast %cst_12 : f32 to vector<16x128xf32>
    %19 = vector.extract_strided_slice %17 {offsets = [0, 0], sizes = [16, 169], strides = [1, 1]} : vector<512x169xbf16> to vector<16x169xbf16>
    %c0_13 = arith.constant 0 : index
    %c0_14 = arith.constant 0 : index
    %c0_15 = arith.constant 0 : index
    %20 = vector.load %arg4[%c0_13, %c0_14, %c0_15] : memref<32x169x128xbf16, #tpu.memory_space<vmem>>, vector<1x169x128xbf16>
    %21 = vector.shape_cast %20 : vector<1x169x128xbf16> to vector<169x128xbf16>
    %cst_16 = arith.constant dense<0.000000e+00> : vector<16x128xf32>
    %22 = tpu.matmul %19, %21, %cst_16 {dimension_numbers = #tpu.dot_dimension_numbers<[1], [0], [0], [1], [0, 0, 1, 1], [], []>} : vector<16x169xbf16>, vector<169x128xbf16>, vector<16x128xf32> -> vector<16x128xf32>
    %23 = arith.addf %18, %22 : vector<16x128xf32>
    %24 = vector.extract_strided_slice %17 {offsets = [16, 0], sizes = [16, 169], strides = [1, 1]} : vector<512x169xbf16> to vector<16x169xbf16>
    %c1 = arith.constant 1 : index
    %c0_17 = arith.constant 0 : index
    %c0_18 = arith.constant 0 : index
    %25 = vector.load %arg4[%c1, %c0_17, %c0_18] : memref<32x169x128xbf16, #tpu.memory_space<vmem>>, vector<1x169x128xbf16>
    %26 = vector.shape_cast %25 : vector<1x169x128xbf16> to vector<169x128xbf16>
    %cst_19 = arith.constant dense<0.000000e+00> : vector<16x128xf32>
    %27 = tpu.matmul %24, %26, %cst_19 {dimension_numbers = #tpu.dot_dimension_numbers<[1], [0], [0], [1], [0, 0, 1, 1], [], []>} : vector<16x169xbf16>, vector<169x128xbf16>, vector<16x128xf32> -> vector<16x128xf32>
    %28 = arith.addf %23, %27 : vector<16x128xf32>
    %29 = vector.extract_strided_slice %17 {offsets = [32, 0], sizes = [16, 169], strides = [1, 1]} : vector<512x169xbf16> to vector<16x169xbf16>
    %c2 = arith.constant 2 : index
    %c0_20 = arith.constant 0 : index
    %c0_21 = arith.constant 0 : index
    %30 = vector.load %arg4[%c2, %c0_20, %c0_21] : memref<32x169x128xbf16, #tpu.memory_space<vmem>>, vector<1x169x128xbf16>
    %31 = vector.shape_cast %30 : vector<1x169x128xbf16> to vector<169x128xbf16>
    %cst_22 = arith.constant dense<0.000000e+00> : vector<16x128xf32>
    %32 = tpu.matmul %29, %31, %cst_22 {dimension_numbers = #tpu.dot_dimension_numbers<[1], [0], [0], [1], [0, 0, 1, 1], [], []>} : vector<16x169xbf16>, vector<169x128xbf16>, vector<16x128xf32> -> vector<16x128xf32>
    %33 = arith.addf %28, %32 : vector<16x128xf32>
    %34 = vector.extract_strided_slice %17 {offsets = [48, 0], sizes = [16, 169], strides = [1, 1]} : vector<512x169xbf16> to vector<16x169xbf16>
    %c3 = arith.constant 3 : index
    %c0_23 = arith.constant 0 : index
    %c0_24 = arith.constant 0 : index
    %35 = vector.load %arg4[%c3, %c0_23, %c0_24] : memref<32x169x128xbf16, #tpu.memory_space<vmem>>, vector<1x169x128xbf16>
    %36 = vector.shape_cast %35 : vector<1x169x128xbf16> to vector<169x128xbf16>
    %cst_25 = arith.constant dense<0.000000e+00> : vector<16x128xf32>
    %37 = tpu.matmul %34, %36, %cst_25 {dimension_numbers = #tpu.dot_dimension_numbers<[1], [0], [0], [1], [0, 0, 1, 1], [], []>} : vector<16x169xbf16>, vector<169x128xbf16>, vector<16x128xf32> -> vector<16x128xf32>
    %38 = arith.addf %33, %37 : vector<16x128xf32>
    %39 = vector.extract_strided_slice %17 {offsets = [64, 0], sizes = [16, 169], strides = [1, 1]} : vector<512x169xbf16> to vector<16x169xbf16>
    %c4 = arith.constant 4 : index
    %c0_26 = arith.constant 0 : index
    %c0_27 = arith.constant 0 : index
    %40 = vector.load %arg4[%c4, %c0_26, %c0_27] : memref<32x169x128xbf16, #tpu.memory_space<vmem>>, vector<1x169x128xbf16>
    %41 = vector.shape_cast %40 : vector<1x169x128xbf16> to vector<169x128xbf16>
    %cst_28 = arith.constant dense<0.000000e+00> : vector<16x128xf32>
    %42 = tpu.matmul %39, %41, %cst_28 {dimension_numbers = #tpu.dot_dimension_numbers<[1], [0], [0], [1], [0, 0, 1, 1], [], []>} : vector<16x169xbf16>, vector<169x128xbf16>, vector<16x128xf32> -> vector<16x128xf32>
    %43 = arith.addf %38, %42 : vector<16x128xf32>
    %44 = vector.extract_strided_slice %17 {offsets = [80, 0], sizes = [16, 169], strides = [1, 1]} : vector<512x169xbf16> to vector<16x169xbf16>
    %c5 = arith.constant 5 : index
    %c0_29 = arith.constant 0 : index
    %c0_30 = arith.constant 0 : index
    %45 = vector.load %arg4[%c5, %c0_29, %c0_30] : memref<32x169x128xbf16, #tpu.memory_space<vmem>>, vector<1x169x128xbf16>
    %46 = vector.shape_cast %45 : vector<1x169x128xbf16> to vector<169x128xbf16>
    %cst_31 = arith.constant dense<0.000000e+00> : vector<16x128xf32>
    %47 = tpu.matmul %44, %46, %cst_31 {dimension_numbers = #tpu.dot_dimension_numbers<[1], [0], [0], [1], [0, 0, 1, 1], [], []>} : vector<16x169xbf16>, vector<169x128xbf16>, vector<16x128xf32> -> vector<16x128xf32>
    %48 = arith.addf %43, %47 : vector<16x128xf32>
    %49 = vector.extract_strided_slice %17 {offsets = [96, 0], sizes = [16, 169], strides = [1, 1]} : vector<512x169xbf16> to vector<16x169xbf16>
    %c6 = arith.constant 6 : index
    %c0_32 = arith.constant 0 : index
    %c0_33 = arith.constant 0 : index
    %50 = vector.load %arg4[%c6, %c0_32, %c0_33] : memref<32x169x128xbf16, #tpu.memory_space<vmem>>, vector<1x169x128xbf16>
    %51 = vector.shape_cast %50 : vector<1x169x128xbf16> to vector<169x128xbf16>
    %cst_34 = arith.constant dense<0.000000e+00> : vector<16x128xf32>
    %52 = tpu.matmul %49, %51, %cst_34 {dimension_numbers = #tpu.dot_dimension_numbers<[1], [0], [0], [1], [0, 0, 1, 1], [], []>} : vector<16x169xbf16>, vector<169x128xbf16>, vector<16x128xf32> -> vector<16x128xf32>
    %53 = arith.addf %48, %52 : vector<16x128xf32>
    %54 = vector.extract_strided_slice %17 {offsets = [112, 0], sizes = [16, 169], strides = [1, 1]} : vector<512x169xbf16> to vector<16x169xbf16>
    %c7 = arith.constant 7 : index
    %c0_35 = arith.constant 0 : index
    %c0_36 = arith.constant 0 : index
    %55 = vector.load %arg4[%c7, %c0_35, %c0_36] : memref<32x169x128xbf16, #tpu.memory_space<vmem>>, vector<1x169x128xbf16>
    %56 = vector.shape_cast %55 : vector<1x169x128xbf16> to vector<169x128xbf16>
    %cst_37 = arith.constant dense<0.000000e+00> : vector<16x128xf32>
    %57 = tpu.matmul %54, %56, %cst_37 {dimension_numbers = #tpu.dot_dimension_numbers<[1], [0], [0], [1], [0, 0, 1, 1], [], []>} : vector<16x169xbf16>, vector<169x128xbf16>, vector<16x128xf32> -> vector<16x128xf32>
    %58 = arith.addf %53, %57 : vector<16x128xf32>
    %59 = vector.extract_strided_slice %17 {offsets = [128, 0], sizes = [16, 169], strides = [1, 1]} : vector<512x169xbf16> to vector<16x169xbf16>
    %c8 = arith.constant 8 : index
    %c0_38 = arith.constant 0 : index
    %c0_39 = arith.constant 0 : index
    %60 = vector.load %arg4[%c8, %c0_38, %c0_39] : memref<32x169x128xbf16, #tpu.memory_space<vmem>>, vector<1x169x128xbf16>
    %61 = vector.shape_cast %60 : vector<1x169x128xbf16> to vector<169x128xbf16>
    %cst_40 = arith.constant dense<0.000000e+00> : vector<16x128xf32>
    %62 = tpu.matmul %59, %61, %cst_40 {dimension_numbers = #tpu.dot_dimension_numbers<[1], [0], [0], [1], [0, 0, 1, 1], [], []>} : vector<16x169xbf16>, vector<169x128xbf16>, vector<16x128xf32> -> vector<16x128xf32>
    %63 = arith.addf %58, %62 : vector<16x128xf32>
    %64 = vector.extract_strided_slice %17 {offsets = [144, 0], sizes = [16, 169], strides = [1, 1]} : vector<512x169xbf16> to vector<16x169xbf16>
    %c9 = arith.constant 9 : index
    %c0_41 = arith.constant 0 : index
    %c0_42 = arith.constant 0 : index
    %65 = vector.load %arg4[%c9, %c0_41, %c0_42] : memref<32x169x128xbf16, #tpu.memory_space<vmem>>, vector<1x169x128xbf16>
    %66 = vector.shape_cast %65 : vector<1x169x128xbf16> to vector<169x128xbf16>
    %cst_43 = arith.constant dense<0.000000e+00> : vector<16x128xf32>
    %67 = tpu.matmul %64, %66, %cst_43 {dimension_numbers = #tpu.dot_dimension_numbers<[1], [0], [0], [1], [0, 0, 1, 1], [], []>} : vector<16x169xbf16>, vector<169x128xbf16>, vector<16x128xf32> -> vector<16x128xf32>
    %68 = arith.addf %63, %67 : vector<16x128xf32>
    %69 = vector.extract_strided_slice %17 {offsets = [160, 0], sizes = [16, 169], strides = [1, 1]} : vector<512x169xbf16> to vector<16x169xbf16>
    %c10 = arith.constant 10 : index
    %c0_44 = arith.constant 0 : index
    %c0_45 = arith.constant 0 : index
    %70 = vector.load %arg4[%c10, %c0_44, %c0_45] : memref<32x169x128xbf16, #tpu.memory_space<vmem>>, vector<1x169x128xbf16>
    %71 = vector.shape_cast %70 : vector<1x169x128xbf16> to vector<169x128xbf16>
    %cst_46 = arith.constant dense<0.000000e+00> : vector<16x128xf32>
    %72 = tpu.matmul %69, %71, %cst_46 {dimension_numbers = #tpu.dot_dimension_numbers<[1], [0], [0], [1], [0, 0, 1, 1], [], []>} : vector<16x169xbf16>, vector<169x128xbf16>, vector<16x128xf32> -> vector<16x128xf32>
    %73 = arith.addf %68, %72 : vector<16x128xf32>
    %74 = vector.extract_strided_slice %17 {offsets = [176, 0], sizes = [16, 169], strides = [1, 1]} : vector<512x169xbf16> to vector<16x169xbf16>
    %c11 = arith.constant 11 : index
    %c0_47 = arith.constant 0 : index
    %c0_48 = arith.constant 0 : index
    %75 = vector.load %arg4[%c11, %c0_47, %c0_48] : memref<32x169x128xbf16, #tpu.memory_space<vmem>>, vector<1x169x128xbf16>
    %76 = vector.shape_cast %75 : vector<1x169x128xbf16> to vector<169x128xbf16>
    %cst_49 = arith.constant dense<0.000000e+00> : vector<16x128xf32>
    %77 = tpu.matmul %74, %76, %cst_49 {dimension_numbers = #tpu.dot_dimension_numbers<[1], [0], [0], [1], [0, 0, 1, 1], [], []>} : vector<16x169xbf16>, vector<169x128xbf16>, vector<16x128xf32> -> vector<16x128xf32>
    %78 = arith.addf %73, %77 : vector<16x128xf32>
    %79 = vector.extract_strided_slice %17 {offsets = [192, 0], sizes = [16, 169], strides = [1, 1]} : vector<512x169xbf16> to vector<16x169xbf16>
    %c12 = arith.constant 12 : index
    %c0_50 = arith.constant 0 : index
    %c0_51 = arith.constant 0 : index
    %80 = vector.load %arg4[%c12, %c0_50, %c0_51] : memref<32x169x128xbf16, #tpu.memory_space<vmem>>, vector<1x169x128xbf16>
    %81 = vector.shape_cast %80 : vector<1x169x128xbf16> to vector<169x128xbf16>
    %cst_52 = arith.constant dense<0.000000e+00> : vector<16x128xf32>
    %82 = tpu.matmul %79, %81, %cst_52 {dimension_numbers = #tpu.dot_dimension_numbers<[1], [0], [0], [1], [0, 0, 1, 1], [], []>} : vector<16x169xbf16>, vector<169x128xbf16>, vector<16x128xf32> -> vector<16x128xf32>
    %83 = arith.addf %78, %82 : vector<16x128xf32>
    %84 = vector.extract_strided_slice %17 {offsets = [208, 0], sizes = [16, 169], strides = [1, 1]} : vector<512x169xbf16> to vector<16x169xbf16>
    %c13 = arith.constant 13 : index
    %c0_53 = arith.constant 0 : index
    %c0_54 = arith.constant 0 : index
    %85 = vector.load %arg4[%c13, %c0_53, %c0_54] : memref<32x169x128xbf16, #tpu.memory_space<vmem>>, vector<1x169x128xbf16>
    %86 = vector.shape_cast %85 : vector<1x169x128xbf16> to vector<169x128xbf16>
    %cst_55 = arith.constant dense<0.000000e+00> : vector<16x128xf32>
    %87 = tpu.matmul %84, %86, %cst_55 {dimension_numbers = #tpu.dot_dimension_numbers<[1], [0], [0], [1], [0, 0, 1, 1], [], []>} : vector<16x169xbf16>, vector<169x128xbf16>, vector<16x128xf32> -> vector<16x128xf32>
    %88 = arith.addf %83, %87 : vector<16x128xf32>
    %89 = vector.extract_strided_slice %17 {offsets = [224, 0], sizes = [16, 169], strides = [1, 1]} : vector<512x169xbf16> to vector<16x169xbf16>
    %c14 = arith.constant 14 : index
    %c0_56 = arith.constant 0 : index
    %c0_57 = arith.constant 0 : index
    %90 = vector.load %arg4[%c14, %c0_56, %c0_57] : memref<32x169x128xbf16, #tpu.memory_space<vmem>>, vector<1x169x128xbf16>
    %91 = vector.shape_cast %90 : vector<1x169x128xbf16> to vector<169x128xbf16>
    %cst_58 = arith.constant dense<0.000000e+00> : vector<16x128xf32>
    %92 = tpu.matmul %89, %91, %cst_58 {dimension_numbers = #tpu.dot_dimension_numbers<[1], [0], [0], [1], [0, 0, 1, 1], [], []>} : vector<16x169xbf16>, vector<169x128xbf16>, vector<16x128xf32> -> vector<16x128xf32>
    %93 = arith.addf %88, %92 : vector<16x128xf32>
    %94 = vector.extract_strided_slice %17 {offsets = [240, 0], sizes = [16, 169], strides = [1, 1]} : vector<512x169xbf16> to vector<16x169xbf16>
    %c15 = arith.constant 15 : index
    %c0_59 = arith.constant 0 : index
    %c0_60 = arith.constant 0 : index
    %95 = vector.load %arg4[%c15, %c0_59, %c0_60] : memref<32x169x128xbf16, #tpu.memory_space<vmem>>, vector<1x169x128xbf16>
    %96 = vector.shape_cast %95 : vector<1x169x128xbf16> to vector<169x128xbf16>
    %cst_61 = arith.constant dense<0.000000e+00> : vector<16x128xf32>
    %97 = tpu.matmul %94, %96, %cst_61 {dimension_numbers = #tpu.dot_dimension_numbers<[1], [0], [0], [1], [0, 0, 1, 1], [], []>} : vector<16x169xbf16>, vector<169x128xbf16>, vector<16x128xf32> -> vector<16x128xf32>
    %98 = arith.addf %93, %97 : vector<16x128xf32>
    %99 = vector.extract_strided_slice %17 {offsets = [256, 0], sizes = [16, 169], strides = [1, 1]} : vector<512x169xbf16> to vector<16x169xbf16>
    %c16 = arith.constant 16 : index
    %c0_62 = arith.constant 0 : index
    %c0_63 = arith.constant 0 : index
    %100 = vector.load %arg4[%c16, %c0_62, %c0_63] : memref<32x169x128xbf16, #tpu.memory_space<vmem>>, vector<1x169x128xbf16>
    %101 = vector.shape_cast %100 : vector<1x169x128xbf16> to vector<169x128xbf16>
    %cst_64 = arith.constant dense<0.000000e+00> : vector<16x128xf32>
    %102 = tpu.matmul %99, %101, %cst_64 {dimension_numbers = #tpu.dot_dimension_numbers<[1], [0], [0], [1], [0, 0, 1, 1], [], []>} : vector<16x169xbf16>, vector<169x128xbf16>, vector<16x128xf32> -> vector<16x128xf32>
    %103 = arith.addf %98, %102 : vector<16x128xf32>
    %104 = vector.extract_strided_slice %17 {offsets = [272, 0], sizes = [16, 169], strides = [1, 1]} : vector<512x169xbf16> to vector<16x169xbf16>
    %c17 = arith.constant 17 : index
    %c0_65 = arith.constant 0 : index
    %c0_66 = arith.constant 0 : index
    %105 = vector.load %arg4[%c17, %c0_65, %c0_66] : memref<32x169x128xbf16, #tpu.memory_space<vmem>>, vector<1x169x128xbf16>
    %106 = vector.shape_cast %105 : vector<1x169x128xbf16> to vector<169x128xbf16>
    %cst_67 = arith.constant dense<0.000000e+00> : vector<16x128xf32>
    %107 = tpu.matmul %104, %106, %cst_67 {dimension_numbers = #tpu.dot_dimension_numbers<[1], [0], [0], [1], [0, 0, 1, 1], [], []>} : vector<16x169xbf16>, vector<169x128xbf16>, vector<16x128xf32> -> vector<16x128xf32>
    %108 = arith.addf %103, %107 : vector<16x128xf32>
    %109 = vector.extract_strided_slice %17 {offsets = [288, 0], sizes = [16, 169], strides = [1, 1]} : vector<512x169xbf16> to vector<16x169xbf16>
    %c18 = arith.constant 18 : index
    %c0_68 = arith.constant 0 : index
    %c0_69 = arith.constant 0 : index
    %110 = vector.load %arg4[%c18, %c0_68, %c0_69] : memref<32x169x128xbf16, #tpu.memory_space<vmem>>, vector<1x169x128xbf16>
    %111 = vector.shape_cast %110 : vector<1x169x128xbf16> to vector<169x128xbf16>
    %cst_70 = arith.constant dense<0.000000e+00> : vector<16x128xf32>
    %112 = tpu.matmul %109, %111, %cst_70 {dimension_numbers = #tpu.dot_dimension_numbers<[1], [0], [0], [1], [0, 0, 1, 1], [], []>} : vector<16x169xbf16>, vector<169x128xbf16>, vector<16x128xf32> -> vector<16x128xf32>
    %113 = arith.addf %108, %112 : vector<16x128xf32>
    %114 = vector.extract_strided_slice %17 {offsets = [304, 0], sizes = [16, 169], strides = [1, 1]} : vector<512x169xbf16> to vector<16x169xbf16>
    %c19 = arith.constant 19 : index
    %c0_71 = arith.constant 0 : index
    %c0_72 = arith.constant 0 : index
    %115 = vector.load %arg4[%c19, %c0_71, %c0_72] : memref<32x169x128xbf16, #tpu.memory_space<vmem>>, vector<1x169x128xbf16>
    %116 = vector.shape_cast %115 : vector<1x169x128xbf16> to vector<169x128xbf16>
    %cst_73 = arith.constant dense<0.000000e+00> : vector<16x128xf32>
    %117 = tpu.matmul %114, %116, %cst_73 {dimension_numbers = #tpu.dot_dimension_numbers<[1], [0], [0], [1], [0, 0, 1, 1], [], []>} : vector<16x169xbf16>, vector<169x128xbf16>, vector<16x128xf32> -> vector<16x128xf32>
    %118 = arith.addf %113, %117 : vector<16x128xf32>
    %119 = vector.extract_strided_slice %17 {offsets = [320, 0], sizes = [16, 169], strides = [1, 1]} : vector<512x169xbf16> to vector<16x169xbf16>
    %c20 = arith.constant 20 : index
    %c0_74 = arith.constant 0 : index
    %c0_75 = arith.constant 0 : index
    %120 = vector.load %arg4[%c20, %c0_74, %c0_75] : memref<32x169x128xbf16, #tpu.memory_space<vmem>>, vector<1x169x128xbf16>
    %121 = vector.shape_cast %120 : vector<1x169x128xbf16> to vector<169x128xbf16>
    %cst_76 = arith.constant dense<0.000000e+00> : vector<16x128xf32>
    %122 = tpu.matmul %119, %121, %cst_76 {dimension_numbers = #tpu.dot_dimension_numbers<[1], [0], [0], [1], [0, 0, 1, 1], [], []>} : vector<16x169xbf16>, vector<169x128xbf16>, vector<16x128xf32> -> vector<16x128xf32>
    %123 = arith.addf %118, %122 : vector<16x128xf32>
    %124 = vector.extract_strided_slice %17 {offsets = [336, 0], sizes = [16, 169], strides = [1, 1]} : vector<512x169xbf16> to vector<16x169xbf16>
    %c21 = arith.constant 21 : index
    %c0_77 = arith.constant 0 : index
    %c0_78 = arith.constant 0 : index
    %125 = vector.load %arg4[%c21, %c0_77, %c0_78] : memref<32x169x128xbf16, #tpu.memory_space<vmem>>, vector<1x169x128xbf16>
    %126 = vector.shape_cast %125 : vector<1x169x128xbf16> to vector<169x128xbf16>
    %cst_79 = arith.constant dense<0.000000e+00> : vector<16x128xf32>
    %127 = tpu.matmul %124, %126, %cst_79 {dimension_numbers = #tpu.dot_dimension_numbers<[1], [0], [0], [1], [0, 0, 1, 1], [], []>} : vector<16x169xbf16>, vector<169x128xbf16>, vector<16x128xf32> -> vector<16x128xf32>
    %128 = arith.addf %123, %127 : vector<16x128xf32>
    %129 = vector.extract_strided_slice %17 {offsets = [352, 0], sizes = [16, 169], strides = [1, 1]} : vector<512x169xbf16> to vector<16x169xbf16>
    %c22 = arith.constant 22 : index
    %c0_80 = arith.constant 0 : index
    %c0_81 = arith.constant 0 : index
    %130 = vector.load %arg4[%c22, %c0_80, %c0_81] : memref<32x169x128xbf16, #tpu.memory_space<vmem>>, vector<1x169x128xbf16>
    %131 = vector.shape_cast %130 : vector<1x169x128xbf16> to vector<169x128xbf16>
    %cst_82 = arith.constant dense<0.000000e+00> : vector<16x128xf32>
    %132 = tpu.matmul %129, %131, %cst_82 {dimension_numbers = #tpu.dot_dimension_numbers<[1], [0], [0], [1], [0, 0, 1, 1], [], []>} : vector<16x169xbf16>, vector<169x128xbf16>, vector<16x128xf32> -> vector<16x128xf32>
    %133 = arith.addf %128, %132 : vector<16x128xf32>
    %134 = vector.extract_strided_slice %17 {offsets = [368, 0], sizes = [16, 169], strides = [1, 1]} : vector<512x169xbf16> to vector<16x169xbf16>
    %c23 = arith.constant 23 : index
    %c0_83 = arith.constant 0 : index
    %c0_84 = arith.constant 0 : index
    %135 = vector.load %arg4[%c23, %c0_83, %c0_84] : memref<32x169x128xbf16, #tpu.memory_space<vmem>>, vector<1x169x128xbf16>
    %136 = vector.shape_cast %135 : vector<1x169x128xbf16> to vector<169x128xbf16>
    %cst_85 = arith.constant dense<0.000000e+00> : vector<16x128xf32>
    %137 = tpu.matmul %134, %136, %cst_85 {dimension_numbers = #tpu.dot_dimension_numbers<[1], [0], [0], [1], [0, 0, 1, 1], [], []>} : vector<16x169xbf16>, vector<169x128xbf16>, vector<16x128xf32> -> vector<16x128xf32>
    %138 = arith.addf %133, %137 : vector<16x128xf32>
    %139 = vector.extract_strided_slice %17 {offsets = [384, 0], sizes = [16, 169], strides = [1, 1]} : vector<512x169xbf16> to vector<16x169xbf16>
    %c24 = arith.constant 24 : index
    %c0_86 = arith.constant 0 : index
    %c0_87 = arith.constant 0 : index
    %140 = vector.load %arg4[%c24, %c0_86, %c0_87] : memref<32x169x128xbf16, #tpu.memory_space<vmem>>, vector<1x169x128xbf16>
    %141 = vector.shape_cast %140 : vector<1x169x128xbf16> to vector<169x128xbf16>
    %cst_88 = arith.constant dense<0.000000e+00> : vector<16x128xf32>
    %142 = tpu.matmul %139, %141, %cst_88 {dimension_numbers = #tpu.dot_dimension_numbers<[1], [0], [0], [1], [0, 0, 1, 1], [], []>} : vector<16x169xbf16>, vector<169x128xbf16>, vector<16x128xf32> -> vector<16x128xf32>
    %143 = arith.addf %138, %142 : vector<16x128xf32>
    %144 = vector.extract_strided_slice %17 {offsets = [400, 0], sizes = [16, 169], strides = [1, 1]} : vector<512x169xbf16> to vector<16x169xbf16>
    %c25 = arith.constant 25 : index
    %c0_89 = arith.constant 0 : index
    %c0_90 = arith.constant 0 : index
    %145 = vector.load %arg4[%c25, %c0_89, %c0_90] : memref<32x169x128xbf16, #tpu.memory_space<vmem>>, vector<1x169x128xbf16>
    %146 = vector.shape_cast %145 : vector<1x169x128xbf16> to vector<169x128xbf16>
    %cst_91 = arith.constant dense<0.000000e+00> : vector<16x128xf32>
    %147 = tpu.matmul %144, %146, %cst_91 {dimension_numbers = #tpu.dot_dimension_numbers<[1], [0], [0], [1], [0, 0, 1, 1], [], []>} : vector<16x169xbf16>, vector<169x128xbf16>, vector<16x128xf32> -> vector<16x128xf32>
    %148 = arith.addf %143, %147 : vector<16x128xf32>
    %149 = vector.extract_strided_slice %17 {offsets = [416, 0], sizes = [16, 169], strides = [1, 1]} : vector<512x169xbf16> to vector<16x169xbf16>
    %c26 = arith.constant 26 : index
    %c0_92 = arith.constant 0 : index
    %c0_93 = arith.constant 0 : index
    %150 = vector.load %arg4[%c26, %c0_92, %c0_93] : memref<32x169x128xbf16, #tpu.memory_space<vmem>>, vector<1x169x128xbf16>
    %151 = vector.shape_cast %150 : vector<1x169x128xbf16> to vector<169x128xbf16>
    %cst_94 = arith.constant dense<0.000000e+00> : vector<16x128xf32>
    %152 = tpu.matmul %149, %151, %cst_94 {dimension_numbers = #tpu.dot_dimension_numbers<[1], [0], [0], [1], [0, 0, 1, 1], [], []>} : vector<16x169xbf16>, vector<169x128xbf16>, vector<16x128xf32> -> vector<16x128xf32>
    %153 = arith.addf %148, %152 : vector<16x128xf32>
    %154 = vector.extract_strided_slice %17 {offsets = [432, 0], sizes = [16, 169], strides = [1, 1]} : vector<512x169xbf16> to vector<16x169xbf16>
    %c27 = arith.constant 27 : index
    %c0_95 = arith.constant 0 : index
    %c0_96 = arith.constant 0 : index
    %155 = vector.load %arg4[%c27, %c0_95, %c0_96] : memref<32x169x128xbf16, #tpu.memory_space<vmem>>, vector<1x169x128xbf16>
    %156 = vector.shape_cast %155 : vector<1x169x128xbf16> to vector<169x128xbf16>
    %cst_97 = arith.constant dense<0.000000e+00> : vector<16x128xf32>
    %157 = tpu.matmul %154, %156, %cst_97 {dimension_numbers = #tpu.dot_dimension_numbers<[1], [0], [0], [1], [0, 0, 1, 1], [], []>} : vector<16x169xbf16>, vector<169x128xbf16>, vector<16x128xf32> -> vector<16x128xf32>
    %158 = arith.addf %153, %157 : vector<16x128xf32>
    %159 = vector.extract_strided_slice %17 {offsets = [448, 0], sizes = [16, 169], strides = [1, 1]} : vector<512x169xbf16> to vector<16x169xbf16>
    %c28 = arith.constant 28 : index
    %c0_98 = arith.constant 0 : index
    %c0_99 = arith.constant 0 : index
    %160 = vector.load %arg4[%c28, %c0_98, %c0_99] : memref<32x169x128xbf16, #tpu.memory_space<vmem>>, vector<1x169x128xbf16>
    %161 = vector.shape_cast %160 : vector<1x169x128xbf16> to vector<169x128xbf16>
    %cst_100 = arith.constant dense<0.000000e+00> : vector<16x128xf32>
    %162 = tpu.matmul %159, %161, %cst_100 {dimension_numbers = #tpu.dot_dimension_numbers<[1], [0], [0], [1], [0, 0, 1, 1], [], []>} : vector<16x169xbf16>, vector<169x128xbf16>, vector<16x128xf32> -> vector<16x128xf32>
    %163 = arith.addf %158, %162 : vector<16x128xf32>
    %164 = vector.extract_strided_slice %17 {offsets = [464, 0], sizes = [16, 169], strides = [1, 1]} : vector<512x169xbf16> to vector<16x169xbf16>
    %c29 = arith.constant 29 : index
    %c0_101 = arith.constant 0 : index
    %c0_102 = arith.constant 0 : index
    %165 = vector.load %arg4[%c29, %c0_101, %c0_102] : memref<32x169x128xbf16, #tpu.memory_space<vmem>>, vector<1x169x128xbf16>
    %166 = vector.shape_cast %165 : vector<1x169x128xbf16> to vector<169x128xbf16>
    %cst_103 = arith.constant dense<0.000000e+00> : vector<16x128xf32>
    %167 = tpu.matmul %164, %166, %cst_103 {dimension_numbers = #tpu.dot_dimension_numbers<[1], [0], [0], [1], [0, 0, 1, 1], [], []>} : vector<16x169xbf16>, vector<169x128xbf16>, vector<16x128xf32> -> vector<16x128xf32>
    %168 = arith.addf %163, %167 : vector<16x128xf32>
    %169 = vector.extract_strided_slice %17 {offsets = [480, 0], sizes = [16, 169], strides = [1, 1]} : vector<512x169xbf16> to vector<16x169xbf16>
    %c30 = arith.constant 30 : index
    %c0_104 = arith.constant 0 : index
    %c0_105 = arith.constant 0 : index
    %170 = vector.load %arg4[%c30, %c0_104, %c0_105] : memref<32x169x128xbf16, #tpu.memory_space<vmem>>, vector<1x169x128xbf16>
    %171 = vector.shape_cast %170 : vector<1x169x128xbf16> to vector<169x128xbf16>
    %cst_106 = arith.constant dense<0.000000e+00> : vector<16x128xf32>
    %172 = tpu.matmul %169, %171, %cst_106 {dimension_numbers = #tpu.dot_dimension_numbers<[1], [0], [0], [1], [0, 0, 1, 1], [], []>} : vector<16x169xbf16>, vector<169x128xbf16>, vector<16x128xf32> -> vector<16x128xf32>
    %173 = arith.addf %168, %172 : vector<16x128xf32>
    %174 = vector.extract_strided_slice %17 {offsets = [496, 0], sizes = [16, 169], strides = [1, 1]} : vector<512x169xbf16> to vector<16x169xbf16>
    %c31 = arith.constant 31 : index
    %c0_107 = arith.constant 0 : index
    %c0_108 = arith.constant 0 : index
    %175 = vector.load %arg4[%c31, %c0_107, %c0_108] : memref<32x169x128xbf16, #tpu.memory_space<vmem>>, vector<1x169x128xbf16>
    %176 = vector.shape_cast %175 : vector<1x169x128xbf16> to vector<169x128xbf16>
    %cst_109 = arith.constant dense<0.000000e+00> : vector<16x128xf32>
    %177 = tpu.matmul %174, %176, %cst_109 {dimension_numbers = #tpu.dot_dimension_numbers<[1], [0], [0], [1], [0, 0, 1, 1], [], []>} : vector<16x169xbf16>, vector<169x128xbf16>, vector<16x128xf32> -> vector<16x128xf32>
    %178 = arith.addf %173, %177 : vector<16x128xf32>
    %c0_110 = arith.constant 0 : index
    %c0_111 = arith.constant 0 : index
    %179 = vector.load %arg5[%c0_110, %c0_111] : memref<1x128xf32, #tpu.memory_space<vmem>>, vector<1x128xf32>
    %180 = vector.broadcast %179 : vector<1x128xf32> to vector<16x128xf32>
    %181 = arith.addf %178, %180 : vector<16x128xf32>
    %c0_112 = arith.constant 0 : index
    %c0_113 = arith.constant 0 : index
    %182 = vector.load %arg6[%c0_112, %c0_113] : memref<16x128xf32, #tpu.memory_space<vmem>>, vector<16x128xf32>
    tpu.vector_store %arg6[%c0_112, %c0_113], %181 {strides = array<i32>} : memref<16x128xf32, #tpu.memory_space<vmem>>, vector<16x128xf32>,
    return
  }
  func.func @transform_0(%arg0: i32) -> (i32, i32) {
    %c0_i32 = arith.constant 0 : i32
    %c0_i32_0 = arith.constant 0 : i32
    return %arg0, %c0_i32 : i32, i32
  }
  func.func @transform_1(%arg0: i32) -> (i32, i32) {
    %c0_i32 = arith.constant 0 : i32
    %c0_i32_0 = arith.constant 0 : i32
    %c0_i32_1 = arith.constant 0 : i32
    return %c0_i32, %c0_i32_0 : i32, i32
  }
  func.func @transform_2(%arg0: i32) -> (i32, i32) {
    %c0_i32 = arith.constant 0 : i32
    %c0_i32_0 = arith.constant 0 : i32
    %c0_i32_1 = arith.constant 0 : i32
    return %c0_i32, %c0_i32_0 : i32, i32
  }
  func.func @transform_3(%arg0: i32) -> (i32, i32, i32) {
    %c0_i32 = arith.constant 0 : i32
    %c0_i32_0 = arith.constant 0 : i32
    %c0_i32_1 = arith.constant 0 : i32
    %c0_i32_2 = arith.constant 0 : i32
    return %c0_i32, %c0_i32_0, %c0_i32_1 : i32, i32, i32
  }
  func.func @transform_4(%arg0: i32) -> (i32, i32) {
    %c0_i32 = arith.constant 0 : i32
    %c0_i32_0 = arith.constant 0 : i32
    %c0_i32_1 = arith.constant 0 : i32
    return %c0_i32, %c0_i32_0 : i32, i32
  }
  func.func @transform_5(%arg0: i32) -> (i32, i32) {
    %c0_i32 = arith.constant 0 : i32
    %c0_i32_0 = arith.constant 0 : i32
    return %arg0, %c0_i32 : i32, i32
  }
}

</mosaic_0001>

<bundles_post_ra>
// kernel: mnist_forward.1
= control target key start
LH: loop header
LB: loop body
LE: loop exit
PB: predicated region body
PF: predicated region fallthrough
CT: control target
= control target key end

     0   :  { %vm481_vm0 = vcmask 130048   ;;  %vm4817_vm1 = vcmask 1043456   ;;  %vm4818_vm2 = vcmask 1044480   ;;  %vm4813_vm3 = vcmask 334848   ;;  %s17772_s0 = inlined_call_operand.vmem [shape: bf16[576,169], index: 0, kind: input, shape index: {}]   ;;  %s17773_s1 = inlined_call_operand.vmem [shape: bf16[512,144], index: 1, kind: input, shape index: {}]   ;;  %s17774_s2 = inlined_call_operand.vmem [shape: f32[512,1], index: 2, kind: input, shape index: {}]   ;;  %s17775_s3 = inlined_call_operand.vmem [shape: bf16[32,169,128], index: 3, kind: input, shape index: {}]   ;;  %s17776_s4 = inlined_call_operand.vmem [shape: f32[1,128], index: 4, kind: input, shape index: {}]   ;;  %s17777_s5 = inlined_call_operand.vmem [shape: f32[16,128], index: 5, kind: output, shape index: {}]  }
   0x1   :  { %v9276_v0 = vld [vmem:[%s17772_s0 + $0x70] sm:$0xf]  ;;  %v11963_v1 = vld [vmem:[%s17772_s0 + $0x74] sm:$0xf0]  ;;  %v9284_v2 = vld [vmem:[%s17772_s0 + $0x80] sm:$0xf] }
   0x2   :  { %v9277_v3 = vor.u32 %v11963_v1, %v9276_v0  ;;  %v11965_v4 = vld [vmem:[%s17772_s0 + $0x84] sm:$0xf0]  ;;  %v11962_v5 = vld [vmem:[%s17772_s0 + $0x74] sm:$0xf]  ;;  %v9278_v6 = vld [vmem:[%s17772_s0 + $0x78] sm:$0xf0] }
   0x3   :  { %v9285_v7 = vor.u32 %v11965_v4, %v9284_v2  ;;  %v9281_v8 = vor.u32 %v11962_v5, %v9278_v6  ;;  %v11964_v9 = vld [vmem:[%s17772_s0 + $0x84] sm:$0xf]  ;;  %v9286_v10 = vld [vmem:[%s17772_s0 + $0x88] sm:$0xf0]  ;;  %v9268_v14 = vld [vmem:[%s17772_s0 + $0x60] sm:$0xf] }
   0x4   :  { %v11884_v11 = vld [vmem:[%s17773_s1 + $0x4] sm:$0xf]  ;;  %578 = vmatpush.bf16.msra.mxu0 %v9277_v3  ;;  %v9289_v12 = vor.u32 %v11964_v9, %v9286_v10  ;;  %v8966_v13 = vld [vmem:[%s17773_s1 + $0x8] sm:$0xf0]  ;;  %v11961_v15 = vld [vmem:[%s17772_s0 + $0x64] sm:$0xf0] }
   0x5   :  { %754 = vmatpush.bf16.msra.mxu1 %v9285_v7  ;;  %916 = vmatpush.bf16.msra.mxu2 %v9281_v8  ;;  %v12446_v16 = vor.u32 %v11884_v11, %v8966_v13  ;;  %v9269_v17 = vor.u32 %v11961_v15, %v9268_v14  ;;  %v11960_v18 = vld [vmem:[%s17772_s0 + $0x64] sm:$0xf]  ;;  %v9270_v19 = vld [vmem:[%s17772_s0 + $0x68] sm:$0xf0]  ;;  %v9260_v20 = vld [vmem:[%s17772_s0 + $0x50] sm:$0xf] }
   0x6   :  { %1092 = vmatpush.bf16.msra.mxu3 %v9289_v12  ;;  %v9273_v21 = vor.u32 %v11960_v18, %v9270_v19  ;;  %v11959_v22 = vld [vmem:[%s17772_s0 + $0x54] sm:$0xf0]  ;;  %v11958_v23 = vld [vmem:[%s17772_s0 + $0x54] sm:$0xf]  ;;  %v9262_v24 = vld [vmem:[%s17772_s0 + $0x58] sm:$0xf0] }
   0x7   :  { %v9261_v25 = vor.u32 %v11959_v22, %v9260_v20  ;;  %v9265_v26 = vor.u32 %v11958_v23, %v9262_v24  ;;  %v9252_v27 = vld [vmem:[%s17772_s0 + $0x40] sm:$0xf]  ;;  %v11957_v28 = vld [vmem:[%s17772_s0 + $0x44] sm:$0xf0]  ;;  %v11956_v29 = vld [vmem:[%s17772_s0 + $0x44] sm:$0xf] }
   0x8   :  { %9290 = vmatmul.msk.bf16.vlgmr.msra.gmra.mxu1 %vm481_vm0, %v12446_v16  ;;  %579 = vmatpush.bf16.msra.mxu0 %v9269_v17  ;;  %v9254_v30 = vld [vmem:[%s17772_s0 + $0x48] sm:$0xf0]  ;;  %v9253_v31 = vor.u32 %v11957_v28, %v9252_v27  ;;  %v9244_v33 = vld [vmem:[%s17772_s0 + $0x30] sm:$0xf]  ;;  %v11955_v34 = vld [vmem:[%s17772_s0 + $0x34] sm:$0xf0] }
   0x9   :  { %9322 = vmatmul.msk.bf16.vlgmr.msra.gmra.mxu3 %vm481_vm0, %v12446_v16  ;;  %917 = vmatpush.bf16.msra.mxu2 %v9273_v21  ;;  %v9257_v32 = vor.u32 %v11956_v29, %v9254_v30  ;;  %v11954_v35 = vld [vmem:[%s17772_s0 + $0x34] sm:$0xf]  ;;  %v9246_v36 = vld [vmem:[%s17772_s0 + $0x38] sm:$0xf0]  ;;  %v9245_v37 = vor.u32 %v11955_v34, %v9244_v33  ;;  %v9236_v41 = vld [vmem:[%s17772_s0 + $0x20] sm:$0xf] }
   0xa   :  { %v11886_v38 = vld [vmem:[%s17773_s1 + $0x14] sm:$0xf]  ;;  %v9249_v39 = vor.u32 %v11954_v35, %v9246_v36  ;;  %v8974_v40 = vld [vmem:[%s17773_s1 + $0x18] sm:$0xf0]  ;;  %v11953_v42 = vld [vmem:[%s17772_s0 + $0x24] sm:$0xf0] }
   0xb   :  { %v11952_v43 = vld [vmem:[%s17772_s0 + $0x24] sm:$0xf]  ;;  %v9238_v44 = vld [vmem:[%s17772_s0 + $0x28] sm:$0xf0]  ;;  %v12512_v45 = vor.u32 %v11886_v38, %v8974_v40  ;;  %v9237_v46 = vor.u32 %v11953_v42, %v9236_v41  ;;  %v9420_v47 = vld [vmem:[%s17772_s0 + $0x110] sm:$0xf] }
   0xc   :  { %580 = vmatpush.bf16.msra.mxu0 %v9261_v25  ;;  %v11983_v48 = vld [vmem:[%s17772_s0 + $0x114] sm:$0xf0]  ;;  %v9241_v49 = vor.u32 %v11952_v43, %v9238_v44  ;;  %v9228_v50 = vld [vmem:[%s17772_s0 + $0x10] sm:$0xf]  ;;  %v11950_v53 = vld [vmem:[%s17772_s0 + $0x14] sm:$0xf] }
   0xd   :  { %918 = vmatpush.bf16.msra.mxu2 %v9265_v26  ;;  %v11951_v51 = vld [vmem:[%s17772_s0 + $0x14] sm:$0xf0]  ;;  %v9421_v52 = vor.u32 %v11983_v48, %v9420_v47  ;;  %v9230_v54 = vld [vmem:[%s17772_s0 + $0x18] sm:$0xf0]  ;;  %v9220_v57 = vld [vmem:[%s17772_s0] sm:$0xf] }
   0xe   :  { %v9229_v55 = vor.u32 %v11951_v51, %v9228_v50  ;;  %v9233_v56 = vor.u32 %v11950_v53, %v9230_v54  ;;  %v11949_v58 = vld [vmem:[%s17772_s0 + $0x4] sm:$0xf0]  ;;  %v11948_v59 = vld [vmem:[%s17772_s0 + $0x4] sm:$0xf]  ;;  %v9222_v60 = vld [vmem:[%s17772_s0 + $0x8] sm:$0xf0] }
   0xf   :  { %1538 = vmatpush.bf16.msrb.mxu3 %v9421_v52  ;;  %v9221_v61 = vor.u32 %v11949_v58, %v9220_v57  ;;  %v8964_v62 = vld [vmem:[%s17773_s1] sm:$0xf]  ;;  %v11885_v63 = vld [vmem:[%s17773_s1 + $0x4] sm:$0xf0]  ;;  %v9225_v0 = vor.u32 %v11948_v59, %v9222_v60  ;;  %v11888_v2 = vld [vmem:[%s17773_s1 + $0x24] sm:$0xf] }
  0x10   :  { %581 = vmatpush.bf16.msra.mxu0 %v9253_v31  ;;  %v12554_v1 = vor.u32 %v11885_v63, %v8964_v62  ;;  %v8982_v3 = vld [vmem:[%s17773_s1 + $0x28] sm:$0xf0]  ;;  %v11982_v5 = vld [vmem:[%s17772_s0 + $0x114] sm:$0xf]  ;;  %v9422_v6 = vld [vmem:[%s17772_s0 + $0x118] sm:$0xf0] }
  0x11   :  { %919 = vmatpush.bf16.msra.mxu2 %v9257_v32  ;;  %v12564_v4 = vor.u32 %v11888_v2, %v8982_v3  ;;  %v9425_v7 = vor.u32 %v11982_v5, %v9422_v6  ;;  %v9412_v8 = vld [vmem:[%s17772_s0 + $0x100] sm:$0xf]  ;;  %v11981_v9 = vld [vmem:[%s17772_s0 + $0x104] sm:$0xf0]  ;;  %v8972_v11 = vld [vmem:[%s17773_s1 + $0x10] sm:$0xf] }
  0x12   :  { %v9413_v10 = vor.u32 %v11981_v9, %v9412_v8  ;;  %v11887_v12 = vld [vmem:[%s17773_s1 + $0x14] sm:$0xf0]  ;;  %v11890_v14 = vld [vmem:[%s17773_s1 + $0x34] sm:$0xf]  ;;  %v8990_v15 = vld [vmem:[%s17773_s1 + $0x38] sm:$0xf0] }
  0x13   :  { %18228 = vst [vmem:[#allocation2_spill] sm:$0xff] %v12564_v4  ;;  %v12588_v13 = vor.u32 %v11887_v12, %v8972_v11  ;;  %v12598_v17 = vor.u32 %v11890_v14, %v8990_v15  ;;  %v11980_v18 = vld [vmem:[%s17772_s0 + $0x104] sm:$0xf]  ;;  %v9414_v19 = vld [vmem:[%s17772_s0 + $0x108] sm:$0xf0] }
  0x14   :  { %582 = vmatpush.bf16.msra.mxu0 %v9245_v37  ;;  %1362 = vmatpush.bf16.msrb.mxu1 %v9413_v10  ;;  %v9417_v20 = vor.u32 %v11980_v18, %v9414_v19  ;;  %v8980_v21 = vld [vmem:[%s17773_s1 + $0x20] sm:$0xf]  ;;  %v11889_v22 = vld [vmem:[%s17773_s1 + $0x24] sm:$0xf0]  ;;  %v11892_v24 = vld [vmem:[%s17773_s1 + $0x44] sm:$0xf] }
  0x15   :  { %920 = vmatpush.bf16.msra.mxu2 %v9249_v39  ;;  %18229 = vst [vmem:[#allocation3_spill] sm:$0xff] %v12598_v17  ;;  %v12616_v23 = vor.u32 %v11889_v22, %v8980_v21  ;;  %v8998_v25 = vld [vmem:[%s17773_s1 + $0x48] sm:$0xf0]  ;;  %v8988_v27 = vld [vmem:[%s17773_s1 + $0x30] sm:$0xf] }
  0x16   :  { %v12626_v26 = vor.u32 %v11892_v24, %v8998_v25  ;;  %v11891_v28 = vld [vmem:[%s17773_s1 + $0x34] sm:$0xf0]  ;;  %v11894_v30 = vld [vmem:[%s17773_s1 + $0x54] sm:$0xf]  ;;  %v9006_v31 = vld [vmem:[%s17773_s1 + $0x58] sm:$0xf0] }
  0x17   :  { %18230 = vst [vmem:[#allocation4_spill] sm:$0xff] %v12616_v23  ;;  %v12638_v29 = vor.u32 %v11891_v28, %v8988_v27  ;;  %v12648_v32 = vor.u32 %v11894_v30, %v9006_v31  ;;  %v8996_v33 = vld [vmem:[%s17773_s1 + $0x40] sm:$0xf]  ;;  %v11893_v34 = vld [vmem:[%s17773_s1 + $0x44] sm:$0xf0] }
  0x18   :  { %9291 = vmatmul.msk.bf16.gmra.mxu1 %vm481_vm0, %v12512_v45  ;;  %583 = vmatpush.bf16.msra.mxu0 %v9237_v46  ;;  %18231 = vst [vmem:[#allocation5_spill] sm:$0xff] %v12626_v26  ;;  %v12660_v35 = vor.u32 %v11893_v34, %v8996_v33  ;;  %v11896_v36 = vld [vmem:[%s17773_s1 + $0x64] sm:$0xf]  ;;  %v9014_v37 = vld [vmem:[%s17773_s1 + $0x68] sm:$0xf0] }
  0x19   :  { %9323 = vmatmul.msk.bf16.gmra.mxu3 %vm481_vm0, %v12512_v45  ;;  %921 = vmatpush.bf16.msra.mxu2 %v9241_v49  ;;  %v12670_v38 = vor.u32 %v11896_v36, %v9014_v37  ;;  %v9004_v39 = vld [vmem:[%s17773_s1 + $0x50] sm:$0xf]  ;;  %v11895_v40 = vld [vmem:[%s17773_s1 + $0x54] sm:$0xf0]  ;;  %v11898_v46 = vld [vmem:[%s17773_s1 + $0x74] sm:$0xf] }
  0x1a   :  { %18232 = vst [vmem:[#allocation6_spill] sm:$0xff] %v12660_v35  ;;  %v9404_v41 = vld [vmem:[%s17772_s0 + $0xf0] sm:$0xf]  ;;  %v11979_v42 = vld [vmem:[%s17772_s0 + $0xf4] sm:$0xf0]  ;;  %v12688_v44 = vor.u32 %v11895_v40, %v9004_v39 }
  0x1b   :  { %v9405_v43 = vor.u32 %v11979_v42, %v9404_v41  ;;  %v9022_v47 = vld [vmem:[%s17773_s1 + $0x78] sm:$0xf0]  ;;  %v9012_v49 = vld [vmem:[%s17773_s1 + $0x60] sm:$0xf]  ;;  %v11897_v50 = vld [vmem:[%s17773_s1 + $0x64] sm:$0xf0] }
  0x1c   :  { %584 = vmatpush.bf16.msra.mxu0 %v9229_v55  ;;  %v12698_v48 = vor.u32 %v11898_v46, %v9022_v47  ;;  %v11978_v51 = vld [vmem:[%s17772_s0 + $0xf4] sm:$0xf]  ;;  %v9406_v52 = vld [vmem:[%s17772_s0 + $0xf8] sm:$0xf0]  ;;  %v12716_v54 = vor.u32 %v11897_v50, %v9012_v49  ;;  %v11900_v55 = vld [vmem:[%s17773_s1 + $0x84] sm:$0xf] }
  0x1d   :  { %922 = vmatpush.bf16.msra.mxu2 %v9233_v56  ;;  %1363 = vmatpush.bf16.msrb.mxu1 %v9405_v43  ;;  %v9409_v53 = vor.u32 %v11978_v51, %v9406_v52  ;;  %v9030_v56 = vld [vmem:[%s17773_s1 + $0x88] sm:$0xf0]  ;;  %v9020_v60 = vld [vmem:[%s17773_s1 + $0x70] sm:$0xf]  ;;  %v9038_v2 = vld [vmem:[%s17773_s1 + $0x98] sm:$0xf0] }
  0x1e   :  { %v12726_v57 = vor.u32 %v11900_v55, %v9030_v56  ;;  %v9028_v8 = vld [vmem:[%s17773_s1 + $0x80] sm:$0xf]  ;;  %v11901_v9 = vld [vmem:[%s17773_s1 + $0x84] sm:$0xf0]  ;;  %v11904_v15 = vld [vmem:[%s17773_s1 + $0xa4] sm:$0xf] }
  0x1f   :  { %v12760_v11 = vor.u32 %v11901_v9, %v9028_v8  ;;  %v9046_v18 = vld [vmem:[%s17773_s1 + $0xa8] sm:$0xf0]  ;;  %v9036_v28 = vld [vmem:[%s17773_s1 + $0x90] sm:$0xf]  ;;  %v11903_v31 = vld [vmem:[%s17773_s1 + $0x94] sm:$0xf0] }
  0x20   :  { %585 = vmatpush.bf16.msra.mxu0 %v9221_v61  ;;  %v11899_v61 = vld [vmem:[%s17773_s1 + $0x74] sm:$0xf0]  ;;  %v9396_v33 = vld [vmem:[%s17772_s0 + $0xe0] sm:$0xf]  ;;  %v11977_v34 = vld [vmem:[%s17772_s0 + $0xe4] sm:$0xf0]  ;;  %v12794_v40 = vor.u32 %v11903_v31, %v9036_v28 }
  0x21   :  { %923 = vmatpush.bf16.msra.mxu2 %v9225_v0  ;;  %v12738_v63 = vor.u32 %v11899_v61, %v9020_v60  ;;  %v11902_v0 = vld [vmem:[%s17773_s1 + $0x94] sm:$0xf]  ;;  %v9397_v37 = vor.u32 %v11977_v34, %v9396_v33  ;;  %v9054_v47 = vld [vmem:[%s17773_s1 + $0xb8] sm:$0xf0]  ;;  %v11905_v60 = vld [vmem:[%s17773_s1 + $0xa4] sm:$0xf0] }
  0x22   :  { %v12748_v5 = vor.u32 %v11902_v0, %v9038_v2  ;;  %v11906_v46 = vld [vmem:[%s17773_s1 + $0xb4] sm:$0xf]  ;;  %v11976_v61 = vld [vmem:[%s17772_s0 + $0xe4] sm:$0xf]  ;;  %v9052_v33 = vld [vmem:[%s17773_s1 + $0xb0] sm:$0xf] }
  0x23   :  { %586 = vmatmul.bf16.vlgmr.msra.gmra.mxu0 %v12554_v1  ;;  %1364 = vmatpush.bf16.msrb.mxu1 %v9397_v37  ;;  %v12808_v50 = vor.u32 %v11906_v46, %v9054_v47  ;;  %v11907_v34 = vld [vmem:[%s17773_s1 + $0xb4] sm:$0xf0] }
  0x24   :  { %924 = vmatmul.bf16.vlgmr.msra.gmra.mxu2 %v12554_v1  ;;  %1700 = vmatpush.bf16.msrb.mxu0 %v9417_v20  ;;  %v12772_v20 = vor.u32 %v11904_v15, %v9046_v18 }
  0x25   :  { %1876 = vmatpush.bf16.msrb.mxu2 %v9425_v7  ;;  %18234 = vst [vmem:[#allocation8_spill] sm:$0xff] %v12808_v50 }
  0x26   :  { %18233 = vst [vmem:[#allocation7_spill] sm:$0xff] %v12772_v20 }
  0x28   :  { %9292 = vmatmul.msk.bf16.gmra.mxu1 %vm481_vm0, %v12564_v4  ;;  %1701 = vmatpush.bf16.msrb.mxu0 %v9409_v53 }
  0x29   :  { %9324 = vmatmul.msk.bf16.gmra.mxu3 %vm481_vm0, %v12564_v4 }
  0x33   :  { %591 = vmatmul.bf16.gmra.mxu0 %v12588_v13 }
  0x34   :  { %929 = vmatmul.bf16.gmra.mxu2 %v12588_v13 }
  0x38   :  { %9293 = vmatmul.msk.bf16.gmra.mxu1 %vm481_vm0, %v12598_v17 }
  0x39   :  { %9325 = vmatmul.msk.bf16.gmra.mxu3 %vm481_vm0, %v12598_v17 }
  0x43   :  { %596 = vmatmul.bf16.gmra.mxu0 %v12616_v23 }
  0x44   :  { %934 = vmatmul.bf16.gmra.mxu2 %v12616_v23 }
  0x48   :  { %9294 = vmatmul.msk.bf16.gmra.mxu1 %vm481_vm0, %v12626_v26 }
  0x49   :  { %9326 = vmatmul.msk.bf16.gmra.mxu3 %vm481_vm0, %v12626_v26 }
  0x53   :  { %601 = vmatmul.bf16.gmra.mxu0 %v12638_v29 }
  0x54   :  { %939 = vmatmul.bf16.gmra.mxu2 %v12638_v29 }
  0x58   :  { %9295 = vmatmul.msk.bf16.gmra.mxu1 %vm481_vm0, %v12648_v32 }
  0x59   :  { %9327 = vmatmul.msk.bf16.gmra.mxu3 %vm481_vm0, %v12648_v32 }
  0x63   :  { %606 = vmatmul.bf16.gmra.mxu0 %v12660_v35 }
  0x64   :  { %944 = vmatmul.bf16.gmra.mxu2 %v12660_v35 }
  0x68   :  { %9296 = vmatmul.msk.bf16.gmra.mxu1 %vm481_vm0, %v12670_v38 }
  0x69   :  { %9328 = vmatmul.msk.bf16.gmra.mxu3 %vm481_vm0, %v12670_v38 }
  0x73   :  { %611 = vmatmul.bf16.gmra.mxu0 %v12688_v44 }
  0x74   :  { %949 = vmatmul.bf16.gmra.mxu2 %v12688_v44 }
  0x78   :  { %9297 = vmatmul.msk.bf16.gmra.mxu1 %vm481_vm0, %v12698_v48 }
  0x79   :  { %9329 = vmatmul.msk.bf16.gmra.mxu3 %vm481_vm0, %v12698_v48 }
  0x83   :  { %616 = vmatmul.bf16.gmra.mxu0 %v12716_v54 }
  0x84   :  { %954 = vmatmul.bf16.gmra.mxu2 %v12716_v54 }
  0x85   :  { %v756_v58 = vpop.f32.mrf.mxu1 }
  0x88   :  { %9298 = vmatmul.msk.bf16.gmra.mxu1 %vm481_vm0, %v12726_v57 }
  0x89   :  { %9330 = vmatmul.msk.bf16.gmra.mxu3 %vm481_vm0, %v12726_v57 }
  0x8c   :  { %v1094_v59 = vpop.f32.mrf.mxu3 }
  0x8d   :  { %v758_v62 = vpop.f32.mrf.mxu1 }
  0x93   :  { %621 = vmatmul.bf16.gmra.mxu0 %v12738_v63 }
  0x94   :  { %v1096_v3 = vpop.f32.mrf.mxu3  ;;  %959 = vmatmul.bf16.gmra.mxu2 %v12738_v63 }
  0x95   :  { %v761_v6 = vpop.f32.mrf.mxu1 }
  0x98   :  { %9299 = vmatmul.msk.bf16.gmra.mxu1 %vm481_vm0, %v12748_v5 }
  0x99   :  { %9331 = vmatmul.msk.bf16.gmra.mxu3 %vm481_vm0, %v12748_v5 }
  0x9c   :  { %v1099_v7 = vpop.f32.mrf.mxu3 }
  0x9d   :  { %v763_v10 = vpop.f32.mrf.mxu1 }
  0xa0   :  { %v587_v12 = vpop.f32.mrf.mxu0 }
  0xa1   :  { %v12762_v14 = vadd.f32 %v756_v58, %v587_v12  ;;  %v9044_v58 = vld [vmem:[%s17773_s1 + $0xa0] sm:$0xf]  ;;  %v9062_v12 = vld [vmem:[%s17773_s1 + $0xc8] sm:$0xf0] }
  0xa3   :  { %626 = vmatmul.bf16.gmra.mxu0 %v12760_v11 }
  0xa4   :  { %v1101_v19 = vpop.f32.mrf.mxu3  ;;  %964 = vmatmul.bf16.gmra.mxu2 %v12760_v11 }
  0xa5   :  { %v766_v21 = vpop.f32.mrf.mxu1 }
  0xa7   :  { %v925_v22 = vpop.f32.mrf.mxu2 }
  0xa8   :  { %v12774_v24 = vadd.f32 %v1094_v59, %v925_v22  ;;  %9300 = vmatmul.msk.bf16.gmra.mxu1 %vm481_vm0, %v12772_v20  ;;  %v589_v25 = vpop.f32.mrf.mxu0 }
  0xa9   :  { %9332 = vmatmul.msk.bf16.gmra.mxu3 %vm481_vm0, %v12772_v20  ;;  %v12780_v27 = vadd.f32 %v758_v62, %v589_v25  ;;  %v9398_v62 = vld [vmem:[%s17772_s0 + $0xe8] sm:$0xf0] }
  0xaa   :  { %v9401_v2 = vor.u32 %v11976_v61, %v9398_v62 }
  0xac   :  { %v1104_v30 = vpop.f32.mrf.mxu3  ;;  %1702 = vmatpush.bf16.msrb.mxu0 %v9401_v2 }
  0xad   :  { %v768_v36 = vpop.f32.mrf.mxu1 }
  0xaf   :  { %v927_v39 = vpop.f32.mrf.mxu2 }
  0xb0   :  { %v12796_v41 = vadd.f32 %v1096_v3, %v927_v39  ;;  %v592_v42 = vpop.f32.mrf.mxu0  ;;  %v12860_v39 = vor.u32 %v11907_v34, %v9052_v33  ;;  %v9078_v34 = vld [vmem:[%s17773_s1 + $0xe8] sm:$0xf0] }
  0xb1   :  { %v12798_v43 = vadd.f32 %v761_v6, %v592_v42  ;;  %v12830_v6 = vor.u32 %v11905_v60, %v9044_v58 }
  0xb2   :  { %18240 = vst [vmem:[#allocation14_spill] sm:$0xff] %v12860_v39 }
  0xb3   :  { %631 = vmatmul.bf16.gmra.mxu0 %v12794_v40 }
  0xb4   :  { %v1106_v49 = vpop.f32.mrf.mxu3  ;;  %969 = vmatmul.bf16.gmra.mxu2 %v12794_v40 }
  0xb5   :  { %v771_v51 = vpop.f32.mrf.mxu1 }
  0xb7   :  { %v930_v52 = vpop.f32.mrf.mxu2 }
  0xb8   :  { %v12810_v53 = vadd.f32 %v1099_v7, %v930_v52  ;;  %9301 = vmatmul.msk.bf16.gmra.mxu1 %vm481_vm0, %v12808_v50  ;;  %v594_v55 = vpop.f32.mrf.mxu0  ;;  %v9070_v52 = vld [vmem:[%s17773_s1 + $0xd8] sm:$0xf0] }
  0xb9   :  { %9333 = vmatmul.msk.bf16.gmra.mxu3 %vm481_vm0, %v12808_v50  ;;  %v12816_v56 = vadd.f32 %v763_v10, %v594_v55  ;;  %v11908_v10 = vld [vmem:[%s17773_s1 + $0xc4] sm:$0xf] }
  0xba   :  { %v12844_v18 = vor.u32 %v11908_v10, %v9062_v12 }
  0xbb   :  { %18235 = vst [vmem:[#allocation9_spill] sm:$0xff] %v12816_v56 }
  0xbc   :  { %v1109_v59 = vpop.f32.mrf.mxu3  ;;  %18237 = vst [vmem:[#allocation11_spill] sm:$0xff] %v12844_v18 }
  0xbd   :  { %v773_v0 = vpop.f32.mrf.mxu1 }
  0xbf   :  { %v932_v3 = vpop.f32.mrf.mxu2 }
  0xc0   :  { %v12832_v7 = vadd.f32 %v1101_v19, %v932_v3  ;;  %v597_v8 = vpop.f32.mrf.mxu0  ;;  %v9060_v3 = vld [vmem:[%s17773_s1 + $0xc0] sm:$0xf] }
  0xc1   :  { %v12834_v9 = vadd.f32 %v766_v21, %v597_v8  ;;  %v11909_v8 = vld [vmem:[%s17773_s1 + $0xc4] sm:$0xf0] }
  0xc2   :  { %v12890_v12 = vor.u32 %v11909_v8, %v9060_v3  ;;  %v11911_v8 = vld [vmem:[%s17773_s1 + $0xd4] sm:$0xf0] }
  0xc3   :  { %18236 = vst [vmem:[#allocation10_spill] sm:$0xff] %v12834_v9  ;;  %636 = vmatmul.bf16.gmra.mxu0 %v12830_v6 }
  0xc4   :  { %v1111_v15 = vpop.f32.mrf.mxu3  ;;  %974 = vmatmul.bf16.gmra.mxu2 %v12830_v6  ;;  %18246 = vst [vmem:[#allocation20_spill] sm:$0xff] %v12890_v12 }
  0xc5   :  { %v776_v19 = vpop.f32.mrf.mxu1 }
  0xc7   :  { %v935_v22 = vpop.f32.mrf.mxu2 }
  0xc8   :  { %v12846_v25 = vadd.f32 %v1104_v30, %v935_v22  ;;  %9302 = vmatmul.msk.bf16.gmra.mxu1 %vm481_vm0, %v12844_v18  ;;  %v599_v21 = vpop.f32.mrf.mxu0 }
  0xc9   :  { %9334 = vmatmul.msk.bf16.gmra.mxu3 %vm481_vm0, %v12844_v18  ;;  %v12852_v28 = vadd.f32 %v768_v36, %v599_v21  ;;  %v11910_v36 = vld [vmem:[%s17773_s1 + $0xd4] sm:$0xf] }
  0xca   :  { %18238 = vst [vmem:[#allocation12_spill] sm:$0xff] %v12846_v25  ;;  %v12874_v58 = vor.u32 %v11910_v36, %v9070_v52 }
  0xcb   :  { %18239 = vst [vmem:[#allocation13_spill] sm:$0xff] %v12852_v28 }
  0xcc   :  { %v1114_v31 = vpop.f32.mrf.mxu3  ;;  %18243 = vst [vmem:[#allocation17_spill] sm:$0xff] %v12874_v58 }
  0xcd   :  { %v778_v30 = vpop.f32.mrf.mxu1 }
  0xcf   :  { %v937_v37 = vpop.f32.mrf.mxu2 }
  0xd0   :  { %v12862_v42 = vadd.f32 %v1106_v49, %v937_v37  ;;  %v602_v46 = vpop.f32.mrf.mxu0 }
  0xd1   :  { %v12864_v47 = vadd.f32 %v771_v51, %v602_v46 }
  0xd2   :  { %18241 = vst [vmem:[#allocation15_spill] sm:$0xff] %v12862_v42 }
  0xd3   :  { %18242 = vst [vmem:[#allocation16_spill] sm:$0xff] %v12864_v47  ;;  %641 = vmatmul.bf16.gmra.mxu0 %v12860_v39 }
  0xd4   :  { %v1116_v55 = vpop.f32.mrf.mxu3  ;;  %979 = vmatmul.bf16.gmra.mxu2 %v12860_v39 }
  0xd5   :  { %v781_v49 = vpop.f32.mrf.mxu1 }
  0xd7   :  { %v940_v60 = vpop.f32.mrf.mxu2 }
  0xd8   :  { %v12876_v61 = vadd.f32 %v1109_v59, %v940_v60  ;;  %9303 = vmatmul.msk.bf16.gmra.mxu1 %vm481_vm0, %v12874_v58  ;;  %v604_v51 = vpop.f32.mrf.mxu0 }
  0xd9   :  { %9335 = vmatmul.msk.bf16.gmra.mxu3 %vm481_vm0, %v12874_v58  ;;  %v12882_v62 = vadd.f32 %v773_v0, %v604_v51  ;;  %v11912_v0 = vld [vmem:[%s17773_s1 + $0xe4] sm:$0xf]  ;;  %v9068_v51 = vld [vmem:[%s17773_s1 + $0xd0] sm:$0xf] }
  0xda   :  { %18244 = vst [vmem:[#allocation18_spill] sm:$0xff] %v12876_v61  ;;  %v12904_v46 = vor.u32 %v11912_v0, %v9078_v34  ;;  %v12926_v34 = vor.u32 %v11911_v8, %v9068_v51  ;;  %v9094_v61 = vld [vmem:[%s17773_s1 + $0x108] sm:$0xf0] }
  0xdb   :  { %18245 = vst [vmem:[#allocation19_spill] sm:$0xff] %v12882_v62 }
  0xdc   :  { %v1119_v2 = vpop.f32.mrf.mxu3  ;;  %18249 = vst [vmem:[#allocation23_spill] sm:$0xff] %v12904_v46 }
  0xdd   :  { %v783_v59 = vpop.f32.mrf.mxu1  ;;  %18252 = vst [vmem:[#allocation26_spill] sm:$0xff] %v12926_v34 }
  0xdf   :  { %v942_v10 = vpop.f32.mrf.mxu2 }
  0xe0   :  { %v12892_v22 = vadd.f32 %v1111_v15, %v942_v10  ;;  %v607_v21 = vpop.f32.mrf.mxu0  ;;  %v11975_v10 = vld [vmem:[%s17772_s0 + $0xd4] sm:$0xf0] }
  0xe1   :  { %v12894_v33 = vadd.f32 %v776_v19, %v607_v21 }
  0xe2   :  { %18247 = vst [vmem:[#allocation21_spill] sm:$0xff] %v12892_v22  ;;  %v9086_v22 = vld [vmem:[%s17773_s1 + $0xf8] sm:$0xf0] }
  0xe3   :  { %18248 = vst [vmem:[#allocation22_spill] sm:$0xff] %v12894_v33  ;;  %646 = vmatmul.bf16.gmra.mxu0 %v12890_v12  ;;  %v18408_v33 = vld [vmem:[#allocation17_spill] sm:$0xff] }
  0xe4   :  { %v1121_v37 = vpop.f32.mrf.mxu3  ;;  %984 = vmatmul.bf16.gmra.mxu2 %v12890_v12 }
  0xe5   :  { %v786_v15 = vpop.f32.mrf.mxu1 }
  0xe7   :  { %v945_v36 = vpop.f32.mrf.mxu2 }
  0xe8   :  { %v12906_v52 = vadd.f32 %v1114_v31, %v945_v36  ;;  %9304 = vmatmul.msk.bf16.gmra.mxu1 %vm481_vm0, %v12904_v46  ;;  %v609_v19 = vpop.f32.mrf.mxu0  ;;  %v9388_v31 = vld [vmem:[%s17772_s0 + $0xd0] sm:$0xf] }
  0xe9   :  { %9336 = vmatmul.msk.bf16.gmra.mxu3 %vm481_vm0, %v12904_v46  ;;  %v12912_v60 = vadd.f32 %v778_v30, %v609_v19  ;;  %v9389_v30 = vor.u32 %v11975_v10, %v9388_v31  ;;  %v11914_v46 = vld [vmem:[%s17773_s1 + $0xf4] sm:$0xf] }
  0xea   :  { %18250 = vst [vmem:[#allocation24_spill] sm:$0xff] %v12906_v52  ;;  %v12940_v51 = vor.u32 %v11914_v46, %v9086_v22  ;;  %v11913_v22 = vld [vmem:[%s17773_s1 + $0xe4] sm:$0xf0]  ;;  %v9390_v46 = vld [vmem:[%s17772_s0 + $0xd8] sm:$0xf0] }
  0xeb   :  { %18251 = vst [vmem:[#allocation25_spill] sm:$0xff] %v12912_v60  ;;  %1365 = vmatpush.bf16.msrb.mxu1 %v9389_v30 }
  0xec   :  { %v1124_v3 = vpop.f32.mrf.mxu3  ;;  %18255 = vst [vmem:[#allocation29_spill] sm:$0xff] %v12940_v51 }
  0xed   :  { %v788_v21 = vpop.f32.mrf.mxu1 }
  0xef   :  { %v947_v0 = vpop.f32.mrf.mxu2 }
  0xf0   :  { %v12928_v36 = vadd.f32 %v1116_v55, %v947_v0  ;;  %v612_v19 = vpop.f32.mrf.mxu0  ;;  %v9076_v0 = vld [vmem:[%s17773_s1 + $0xe0] sm:$0xf] }
  0xf1   :  { %v12930_v52 = vadd.f32 %v781_v49, %v612_v19 }
  0xf2   :  { %18253 = vst [vmem:[#allocation27_spill] sm:$0xff] %v12928_v36 }
  0xf3   :  { %18254 = vst [vmem:[#allocation28_spill] sm:$0xff] %v12930_v52  ;;  %651 = vmatmul.bf16.gmra.mxu0 %v12926_v34  ;;  %v11916_v52 = vld [vmem:[%s17773_s1 + $0x104] sm:$0xf] }
  0xf4   :  { %v1126_v31 = vpop.f32.mrf.mxu3  ;;  %989 = vmatmul.bf16.gmra.mxu2 %v12926_v34 }
  0xf5   :  { %v791_v55 = vpop.f32.mrf.mxu1 }
  0xf7   :  { %v950_v8 = vpop.f32.mrf.mxu2 }
  0xf8   :  { %v12942_v10 = vadd.f32 %v1119_v2, %v950_v8  ;;  %9305 = vmatmul.msk.bf16.gmra.mxu1 %vm481_vm0, %v12940_v51  ;;  %v614_v49 = vpop.f32.mrf.mxu0  ;;  %v11974_v2 = vld [vmem:[%s17772_s0 + $0xd4] sm:$0xf] }
  0xf9   :  { %9337 = vmatmul.msk.bf16.gmra.mxu3 %vm481_vm0, %v12940_v51  ;;  %v12948_v30 = vadd.f32 %v783_v59, %v614_v49  ;;  %v9393_v59 = vor.u32 %v11974_v2, %v9390_v46 }
  0xfa   :  { %18256 = vst [vmem:[#allocation30_spill] sm:$0xff] %v12942_v10  ;;  %v12962_v10 = vor.u32 %v11913_v22, %v9076_v0  ;;  %v12976_v0 = vor.u32 %v11916_v52, %v9094_v61  ;;  %v11915_v61 = vld [vmem:[%s17773_s1 + $0xf4] sm:$0xf0] }
  0xfb   :  { %18257 = vst [vmem:[#allocation31_spill] sm:$0xff] %v12948_v30  ;;  %1703 = vmatpush.bf16.msrb.mxu0 %v9393_v59 }
  0xfc   :  { %v1129_v19 = vpop.f32.mrf.mxu3  ;;  %18258 = vst [vmem:[#allocation32_spill] sm:$0xff] %v12962_v10 }
  0xfd   :  { %v793_v8 = vpop.f32.mrf.mxu1  ;;  %18261 = vst [vmem:[#allocation35_spill] sm:$0xff] %v12976_v0 }
  0xff   :  { %v952_v49 = vpop.f32.mrf.mxu2 }
 0x100   :  { %v12964_v51 = vadd.f32 %v1121_v37, %v952_v49  ;;  %v617_v36 = vpop.f32.mrf.mxu0  ;;  %v9084_v49 = vld [vmem:[%s17773_s1 + $0xf0] sm:$0xf] }
 0x101   :  { %v12966_v30 = vadd.f32 %v786_v15, %v617_v36 }
 0x102   :  { %18259 = vst [vmem:[#allocation33_spill] sm:$0xff] %v12964_v51 }
 0x103   :  { %18260 = vst [vmem:[#allocation34_spill] sm:$0xff] %v12966_v30  ;;  %656 = vmatmul.bf16.gmra.mxu0 %v12962_v10 }
 0x104   :  { %v1131_v2 = vpop.f32.mrf.mxu3  ;;  %994 = vmatmul.bf16.gmra.mxu2 %v12962_v10  ;;  %v9118_v10 = vld [vmem:[%s17773_s1 + $0x138] sm:$0xf0] }
 0x105   :  { %v796_v37 = vpop.f32.mrf.mxu1 }
 0x107   :  { %v955_v22 = vpop.f32.mrf.mxu2 }
 0x108   :  { %v12978_v46 = vadd.f32 %v1124_v3, %v955_v22  ;;  %9306 = vmatmul.msk.bf16.gmra.mxu1 %vm481_vm0, %v12976_v0  ;;  %v619_v15 = vpop.f32.mrf.mxu0  ;;  %v12992_v22 = vor.u32 %v11915_v61, %v9084_v49 }
 0x109   :  { %9338 = vmatmul.msk.bf16.gmra.mxu3 %vm481_vm0, %v12976_v0  ;;  %v12984_v36 = vadd.f32 %v788_v21, %v619_v15  ;;  %v11918_v21 = vld [vmem:[%s17773_s1 + $0x114] sm:$0xf]  ;;  %v9102_v15 = vld [vmem:[%s17773_s1 + $0x118] sm:$0xf0] }
 0x10a   :  { %18262 = vst [vmem:[#allocation36_spill] sm:$0xff] %v12978_v46  ;;  %v13006_v49 = vor.u32 %v11918_v21, %v9102_v15  ;;  %v11917_v21 = vld [vmem:[%s17773_s1 + $0x104] sm:$0xf0] }
 0x10b   :  { %18263 = vst [vmem:[#allocation37_spill] sm:$0xff] %v12984_v36 }
 0x10c   :  { %v1134_v59 = vpop.f32.mrf.mxu3  ;;  %18264 = vst [vmem:[#allocation38_spill] sm:$0xff] %v12992_v22 }
 0x10d   :  { %v798_v52 = vpop.f32.mrf.mxu1  ;;  %18267 = vst [vmem:[#allocation41_spill] sm:$0xff] %v13006_v49 }
 0x10f   :  { %v957_v3 = vpop.f32.mrf.mxu2 }
 0x110   :  { %v12994_v46 = vadd.f32 %v1126_v31, %v957_v3  ;;  %v622_v51 = vpop.f32.mrf.mxu0 }
 0x111   :  { %v12996_v30 = vadd.f32 %v791_v55, %v622_v51 }
 0x112   :  { %18265 = vst [vmem:[#allocation39_spill] sm:$0xff] %v12994_v46 }
 0x113   :  { %18266 = vst [vmem:[#allocation40_spill] sm:$0xff] %v12996_v30  ;;  %661 = vmatmul.bf16.gmra.mxu0 %v12992_v22  ;;  %v9092_v30 = vld [vmem:[%s17773_s1 + $0x100] sm:$0xf] }
 0x114   :  { %v1136_v0 = vpop.f32.mrf.mxu3  ;;  %999 = vmatmul.bf16.gmra.mxu2 %v12992_v22 }
 0x115   :  { %v801_v31 = vpop.f32.mrf.mxu1 }
 0x117   :  { %v960_v61 = vpop.f32.mrf.mxu2 }
 0x118   :  { %v13008_v3 = vadd.f32 %v1129_v19, %v960_v61  ;;  %9307 = vmatmul.msk.bf16.gmra.mxu1 %vm481_vm0, %v13006_v49  ;;  %v624_v51 = vpop.f32.mrf.mxu0  ;;  %v13022_v61 = vor.u32 %v11917_v21, %v9092_v30 }
 0x119   :  { %9339 = vmatmul.msk.bf16.gmra.mxu3 %vm481_vm0, %v13006_v49  ;;  %v13014_v55 = vadd.f32 %v793_v8, %v624_v51  ;;  %v11920_v8 = vld [vmem:[%s17773_s1 + $0x124] sm:$0xf]  ;;  %v9110_v51 = vld [vmem:[%s17773_s1 + $0x128] sm:$0xf0] }
 0x11a   :  { %18268 = vst [vmem:[#allocation42_spill] sm:$0xff] %v13008_v3  ;;  %v13036_v30 = vor.u32 %v11920_v8, %v9110_v51  ;;  %v11919_v8 = vld [vmem:[%s17773_s1 + $0x114] sm:$0xf0]  ;;  %v11973_v51 = vld [vmem:[%s17772_s0 + $0xc4] sm:$0xf0] }
 0x11b   :  { %18269 = vst [vmem:[#allocation43_spill] sm:$0xff] %v13014_v55  ;;  %v11922_v55 = vld [vmem:[%s17773_s1 + $0x134] sm:$0xf] }
 0x11c   :  { %v1139_v46 = vpop.f32.mrf.mxu3  ;;  %18270 = vst [vmem:[#allocation44_spill] sm:$0xff] %v13022_v61 }
 0x11d   :  { %v803_v19 = vpop.f32.mrf.mxu1  ;;  %18273 = vst [vmem:[#allocation47_spill] sm:$0xff] %v13036_v30 }
 0x11f   :  { %v962_v15 = vpop.f32.mrf.mxu2 }
 0x120   :  { %v13024_v3 = vadd.f32 %v1131_v2, %v962_v15  ;;  %v627_v22 = vpop.f32.mrf.mxu0 }
 0x121   :  { %v13026_v36 = vadd.f32 %v796_v37, %v627_v22 }
 0x122   :  { %18271 = vst [vmem:[#allocation45_spill] sm:$0xff] %v13024_v3  ;;  %v9100_v3 = vld [vmem:[%s17773_s1 + $0x110] sm:$0xf] }
 0x123   :  { %18272 = vst [vmem:[#allocation46_spill] sm:$0xff] %v13026_v36  ;;  %666 = vmatmul.bf16.gmra.mxu0 %v13022_v61 }
 0x124   :  { %v1141_v49 = vpop.f32.mrf.mxu3  ;;  %1004 = vmatmul.bf16.gmra.mxu2 %v13022_v61 }
 0x125   :  { %v806_v2 = vpop.f32.mrf.mxu1 }
 0x127   :  { %v965_v21 = vpop.f32.mrf.mxu2 }
 0x128   :  { %v13038_v15 = vadd.f32 %v1134_v59, %v965_v21  ;;  %9308 = vmatmul.msk.bf16.gmra.mxu1 %vm481_vm0, %v13036_v30  ;;  %v629_v37 = vpop.f32.mrf.mxu0  ;;  %v9380_v59 = vld [vmem:[%s17772_s0 + $0xc0] sm:$0xf] }
 0x129   :  { %9340 = vmatmul.msk.bf16.gmra.mxu3 %vm481_vm0, %v13036_v30  ;;  %v13044_v22 = vadd.f32 %v798_v52, %v629_v37  ;;  %v9381_v52 = vor.u32 %v11973_v51, %v9380_v59 }
 0x12a   :  { %18274 = vst [vmem:[#allocation48_spill] sm:$0xff] %v13038_v15  ;;  %v13058_v15 = vor.u32 %v11919_v8, %v9100_v3  ;;  %v13072_v3 = vor.u32 %v11922_v55, %v9118_v10  ;;  %v11921_v10 = vld [vmem:[%s17773_s1 + $0x124] sm:$0xf0]  ;;  %v9382_v55 = vld [vmem:[%s17772_s0 + $0xc8] sm:$0xf0] }
 0x12b   :  { %18275 = vst [vmem:[#allocation49_spill] sm:$0xff] %v13044_v22  ;;  %1366 = vmatpush.bf16.msrb.mxu1 %v9381_v52  ;;  %v9108_v52 = vld [vmem:[%s17773_s1 + $0x120] sm:$0xf] }
 0x12c   :  { %v1144_v36 = vpop.f32.mrf.mxu3  ;;  %18276 = vst [vmem:[#allocation50_spill] sm:$0xff] %v13058_v15 }
 0x12d   :  { %v808_v21 = vpop.f32.mrf.mxu1  ;;  %18279 = vst [vmem:[#allocation53_spill] sm:$0xff] %v13072_v3 }
 0x12f   :  { %v967_v37 = vpop.f32.mrf.mxu2 }
 0x130   :  { %v13060_v30 = vadd.f32 %v1136_v0, %v967_v37  ;;  %v632_v22 = vpop.f32.mrf.mxu0 }
 0x131   :  { %v13062_v61 = vadd.f32 %v801_v31, %v632_v22 }
 0x132   :  { %18277 = vst [vmem:[#allocation51_spill] sm:$0xff] %v13060_v30 }
 0x133   :  { %18278 = vst [vmem:[#allocation52_spill] sm:$0xff] %v13062_v61  ;;  %671 = vmatmul.bf16.gmra.mxu0 %v13058_v15  ;;  %v11924_v61 = vld [vmem:[%s17773_s1 + $0x144] sm:$0xf] }
 0x134   :  { %v1146_v59 = vpop.f32.mrf.mxu3  ;;  %1009 = vmatmul.bf16.gmra.mxu2 %v13058_v15  ;;  %v9126_v15 = vld [vmem:[%s17773_s1 + $0x148] sm:$0xf0] }
 0x135   :  { %v811_v0 = vpop.f32.mrf.mxu1 }
 0x137   :  { %v970_v8 = vpop.f32.mrf.mxu2 }
 0x138   :  { %v13074_v51 = vadd.f32 %v1139_v46, %v970_v8  ;;  %9309 = vmatmul.msk.bf16.gmra.mxu1 %vm481_vm0, %v13072_v3  ;;  %v634_v31 = vpop.f32.mrf.mxu0  ;;  %v11972_v46 = vld [vmem:[%s17772_s0 + $0xc4] sm:$0xf] }
 0x139   :  { %9341 = vmatmul.msk.bf16.gmra.mxu3 %vm481_vm0, %v13072_v3  ;;  %v13080_v22 = vadd.f32 %v803_v19, %v634_v31  ;;  %v9385_v19 = vor.u32 %v11972_v46, %v9382_v55 }
 0x13a   :  { %18280 = vst [vmem:[#allocation54_spill] sm:$0xff] %v13074_v51  ;;  %v13094_v51 = vor.u32 %v11921_v10, %v9108_v52  ;;  %v13108_v52 = vor.u32 %v11924_v61, %v9126_v15  ;;  %v11923_v61 = vld [vmem:[%s17773_s1 + $0x134] sm:$0xf0] }
 0x13b   :  { %18281 = vst [vmem:[#allocation55_spill] sm:$0xff] %v13080_v22  ;;  %1704 = vmatpush.bf16.msrb.mxu0 %v9385_v19 }
 0x13c   :  { %v1149_v37 = vpop.f32.mrf.mxu3  ;;  %18282 = vst [vmem:[#allocation56_spill] sm:$0xff] %v13094_v51 }
 0x13d   :  { %v813_v8 = vpop.f32.mrf.mxu1  ;;  %18285 = vst [vmem:[#allocation59_spill] sm:$0xff] %v13108_v52 }
 0x13f   :  { %v972_v31 = vpop.f32.mrf.mxu2 }
 0x140   :  { %v13096_v3 = vadd.f32 %v1141_v49, %v972_v31  ;;  %v637_v30 = vpop.f32.mrf.mxu0  ;;  %v9116_v31 = vld [vmem:[%s17773_s1 + $0x130] sm:$0xf] }
 0x141   :  { %v13098_v22 = vadd.f32 %v806_v2, %v637_v30 }
 0x142   :  { %18283 = vst [vmem:[#allocation57_spill] sm:$0xff] %v13096_v3 }
 0x143   :  { %18284 = vst [vmem:[#allocation58_spill] sm:$0xff] %v13098_v22  ;;  %676 = vmatmul.bf16.gmra.mxu0 %v13094_v51 }
 0x144   :  { %v1151_v46 = vpop.f32.mrf.mxu3  ;;  %1014 = vmatmul.bf16.gmra.mxu2 %v13094_v51  ;;  %v9150_v51 = vld [vmem:[%s17773_s1 + $0x178] sm:$0xf0] }
 0x145   :  { %v816_v49 = vpop.f32.mrf.mxu1 }
 0x147   :  { %v975_v10 = vpop.f32.mrf.mxu2 }
 0x148   :  { %v13110_v55 = vadd.f32 %v1144_v36, %v975_v10  ;;  %9310 = vmatmul.msk.bf16.gmra.mxu1 %vm481_vm0, %v13108_v52  ;;  %v639_v30 = vpop.f32.mrf.mxu0  ;;  %v13124_v10 = vor.u32 %v11923_v61, %v9116_v31 }
 0x149   :  { %9342 = vmatmul.msk.bf16.gmra.mxu3 %vm481_vm0, %v13108_v52  ;;  %v13116_v2 = vadd.f32 %v808_v21, %v639_v30  ;;  %v11926_v21 = vld [vmem:[%s17773_s1 + $0x154] sm:$0xf]  ;;  %v9134_v30 = vld [vmem:[%s17773_s1 + $0x158] sm:$0xf0] }
 0x14a   :  { %18286 = vst [vmem:[#allocation60_spill] sm:$0xff] %v13110_v55  ;;  %v13138_v31 = vor.u32 %v11926_v21, %v9134_v30  ;;  %v11925_v21 = vld [vmem:[%s17773_s1 + $0x144] sm:$0xf0] }
 0x14b   :  { %18287 = vst [vmem:[#allocation61_spill] sm:$0xff] %v13116_v2 }
 0x14c   :  { %v1154_v19 = vpop.f32.mrf.mxu3  ;;  %18288 = vst [vmem:[#allocation62_spill] sm:$0xff] %v13124_v10 }
 0x14d   :  { %v818_v36 = vpop.f32.mrf.mxu1  ;;  %18291 = vst [vmem:[#allocation65_spill] sm:$0xff] %v13138_v31 }
 0x14f   :  { %v977_v15 = vpop.f32.mrf.mxu2 }
 0x150   :  { %v13126_v55 = vadd.f32 %v1146_v59, %v977_v15  ;;  %v642_v3 = vpop.f32.mrf.mxu0 }
 0x151   :  { %v13128_v22 = vadd.f32 %v811_v0, %v642_v3 }
 0x152   :  { %18289 = vst [vmem:[#allocation63_spill] sm:$0xff] %v13126_v55 }
 0x153   :  { %18290 = vst [vmem:[#allocation64_spill] sm:$0xff] %v13128_v22  ;;  %681 = vmatmul.bf16.gmra.mxu0 %v13124_v10  ;;  %v9124_v22 = vld [vmem:[%s17773_s1 + $0x140] sm:$0xf] }
 0x154   :  { %v1156_v52 = vpop.f32.mrf.mxu3  ;;  %1019 = vmatmul.bf16.gmra.mxu2 %v13124_v10 }
 0x155   :  { %v821_v59 = vpop.f32.mrf.mxu1 }
 0x157   :  { %v980_v61 = vpop.f32.mrf.mxu2 }
 0x158   :  { %v13140_v15 = vadd.f32 %v1149_v37, %v980_v61  ;;  %9311 = vmatmul.msk.bf16.gmra.mxu1 %vm481_vm0, %v13138_v31  ;;  %v644_v3 = vpop.f32.mrf.mxu0  ;;  %v13154_v61 = vor.u32 %v11925_v21, %v9124_v22 }
 0x159   :  { %9343 = vmatmul.msk.bf16.gmra.mxu3 %vm481_vm0, %v13138_v31  ;;  %v13146_v0 = vadd.f32 %v813_v8, %v644_v3  ;;  %v11928_v8 = vld [vmem:[%s17773_s1 + $0x164] sm:$0xf]  ;;  %v9142_v3 = vld [vmem:[%s17773_s1 + $0x168] sm:$0xf0] }
 0x15a   :  { %18292 = vst [vmem:[#allocation66_spill] sm:$0xff] %v13140_v15  ;;  %v13168_v22 = vor.u32 %v11928_v8, %v9142_v3  ;;  %v11927_v8 = vld [vmem:[%s17773_s1 + $0x154] sm:$0xf0] }
 0x15b   :  { %18293 = vst [vmem:[#allocation67_spill] sm:$0xff] %v13146_v0  ;;  %v11971_v3 = vld [vmem:[%s17772_s0 + $0xb4] sm:$0xf0]  ;;  %v11930_v0 = vld [vmem:[%s17773_s1 + $0x174] sm:$0xf] }
 0x15c   :  { %v1159_v55 = vpop.f32.mrf.mxu3  ;;  %18294 = vst [vmem:[#allocation68_spill] sm:$0xff] %v13154_v61 }
 0x15d   :  { %v823_v37 = vpop.f32.mrf.mxu1  ;;  %18297 = vst [vmem:[#allocation71_spill] sm:$0xff] %v13168_v22 }
 0x15f   :  { %v982_v30 = vpop.f32.mrf.mxu2 }
 0x160   :  { %v13156_v15 = vadd.f32 %v1151_v46, %v982_v30  ;;  %v647_v10 = vpop.f32.mrf.mxu0 }
 0x161   :  { %v13158_v2 = vadd.f32 %v816_v49, %v647_v10 }
 0x162   :  { %18295 = vst [vmem:[#allocation69_spill] sm:$0xff] %v13156_v15  ;;  %v9132_v15 = vld [vmem:[%s17773_s1 + $0x150] sm:$0xf] }
 0x163   :  { %18296 = vst [vmem:[#allocation70_spill] sm:$0xff] %v13158_v2  ;;  %686 = vmatmul.bf16.gmra.mxu0 %v13154_v61 }
 0x164   :  { %v1161_v31 = vpop.f32.mrf.mxu3  ;;  %1024 = vmatmul.bf16.gmra.mxu2 %v13154_v61 }
 0x165   :  { %v826_v46 = vpop.f32.mrf.mxu1 }
 0x167   :  { %v985_v21 = vpop.f32.mrf.mxu2 }
 0x168   :  { %v13170_v30 = vadd.f32 %v1154_v19, %v985_v21  ;;  %9312 = vmatmul.msk.bf16.gmra.mxu1 %vm481_vm0, %v13168_v22  ;;  %v649_v49 = vpop.f32.mrf.mxu0  ;;  %v9372_v19 = vld [vmem:[%s17772_s0 + $0xb0] sm:$0xf] }
 0x169   :  { %9344 = vmatmul.msk.bf16.gmra.mxu3 %vm481_vm0, %v13168_v22  ;;  %v13176_v10 = vadd.f32 %v818_v36, %v649_v49  ;;  %v9373_v36 = vor.u32 %v11971_v3, %v9372_v19 }
 0x16a   :  { %18298 = vst [vmem:[#allocation72_spill] sm:$0xff] %v13170_v30  ;;  %v13190_v30 = vor.u32 %v11927_v8, %v9132_v15  ;;  %v13204_v15 = vor.u32 %v11930_v0, %v9150_v51  ;;  %v11929_v51 = vld [vmem:[%s17773_s1 + $0x164] sm:$0xf0]  ;;  %v9374_v0 = vld [vmem:[%s17772_s0 + $0xb8] sm:$0xf0] }
 0x16b   :  { %18299 = vst [vmem:[#allocation73_spill] sm:$0xff] %v13176_v10  ;;  %1367 = vmatpush.bf16.msrb.mxu1 %v9373_v36  ;;  %v9140_v36 = vld [vmem:[%s17773_s1 + $0x160] sm:$0xf] }
 0x16c   :  { %v1164_v2 = vpop.f32.mrf.mxu3  ;;  %18300 = vst [vmem:[#allocation74_spill] sm:$0xff] %v13190_v30 }
 0x16d   :  { %v828_v21 = vpop.f32.mrf.mxu1  ;;  %18303 = vst [vmem:[#allocation77_spill] sm:$0xff] %v13204_v15 }
 0x16f   :  { %v987_v49 = vpop.f32.mrf.mxu2 }
 0x170   :  { %v13192_v22 = vadd.f32 %v1156_v52, %v987_v49  ;;  %v652_v10 = vpop.f32.mrf.mxu0 }
 0x171   :  { %v13194_v61 = vadd.f32 %v821_v59, %v652_v10 }
 0x172   :  { %18301 = vst [vmem:[#allocation75_spill] sm:$0xff] %v13192_v22 }
 0x173   :  { %18302 = vst [vmem:[#allocation76_spill] sm:$0xff] %v13194_v61  ;;  %691 = vmatmul.bf16.gmra.mxu0 %v13190_v30  ;;  %v11932_v61 = vld [vmem:[%s17773_s1 + $0x184] sm:$0xf] }
 0x174   :  { %v1166_v19 = vpop.f32.mrf.mxu3  ;;  %1029 = vmatmul.bf16.gmra.mxu2 %v13190_v30  ;;  %v9158_v30 = vld [vmem:[%s17773_s1 + $0x188] sm:$0xf0] }
 0x175   :  { %v831_v52 = vpop.f32.mrf.mxu1 }
 0x177   :  { %v990_v8 = vpop.f32.mrf.mxu2 }
 0x178   :  { %v13206_v3 = vadd.f32 %v1159_v55, %v990_v8  ;;  %9313 = vmatmul.msk.bf16.gmra.mxu1 %vm481_vm0, %v13204_v15  ;;  %v654_v59 = vpop.f32.mrf.mxu0  ;;  %v11970_v55 = vld [vmem:[%s17772_s0 + $0xb4] sm:$0xf] }
 0x179   :  { %9345 = vmatmul.msk.bf16.gmra.mxu3 %vm481_vm0, %v13204_v15  ;;  %v13212_v10 = vadd.f32 %v823_v37, %v654_v59  ;;  %v9377_v37 = vor.u32 %v11970_v55, %v9374_v0 }
 0x17a   :  { %18304 = vst [vmem:[#allocation78_spill] sm:$0xff] %v13206_v3  ;;  %v13226_v3 = vor.u32 %v11929_v51, %v9140_v36  ;;  %v13240_v36 = vor.u32 %v11932_v61, %v9158_v30  ;;  %v11931_v61 = vld [vmem:[%s17773_s1 + $0x174] sm:$0xf0] }
 0x17b   :  { %18305 = vst [vmem:[#allocation79_spill] sm:$0xff] %v13212_v10  ;;  %1705 = vmatpush.bf16.msrb.mxu0 %v9377_v37 }
 0x17c   :  { %v1169_v49 = vpop.f32.mrf.mxu3  ;;  %18306 = vst [vmem:[#allocation80_spill] sm:$0xff] %v13226_v3 }
 0x17d   :  { %v833_v8 = vpop.f32.mrf.mxu1  ;;  %18309 = vst [vmem:[#allocation83_spill] sm:$0xff] %v13240_v36 }
 0x17f   :  { %v992_v59 = vpop.f32.mrf.mxu2 }
 0x180   :  { %v13228_v15 = vadd.f32 %v1161_v31, %v992_v59  ;;  %v657_v22 = vpop.f32.mrf.mxu0  ;;  %v9148_v59 = vld [vmem:[%s17773_s1 + $0x170] sm:$0xf] }
 0x181   :  { %v13230_v10 = vadd.f32 %v826_v46, %v657_v22 }
 0x182   :  { %18307 = vst [vmem:[#allocation81_spill] sm:$0xff] %v13228_v15 }
 0x183   :  { %18308 = vst [vmem:[#allocation82_spill] sm:$0xff] %v13230_v10  ;;  %696 = vmatmul.bf16.gmra.mxu0 %v13226_v3 }
 0x184   :  { %v1171_v55 = vpop.f32.mrf.mxu3  ;;  %1034 = vmatmul.bf16.gmra.mxu2 %v13226_v3  ;;  %v9182_v3 = vld [vmem:[%s17773_s1 + $0x1b8] sm:$0xf0] }
 0x185   :  { %v836_v31 = vpop.f32.mrf.mxu1 }
 0x187   :  { %v995_v51 = vpop.f32.mrf.mxu2 }
 0x188   :  { %v13242_v0 = vadd.f32 %v1164_v2, %v995_v51  ;;  %9314 = vmatmul.msk.bf16.gmra.mxu1 %vm481_vm0, %v13240_v36  ;;  %v659_v22 = vpop.f32.mrf.mxu0  ;;  %v13256_v51 = vor.u32 %v11931_v61, %v9148_v59 }
 0x189   :  { %9346 = vmatmul.msk.bf16.gmra.mxu3 %vm481_vm0, %v13240_v36  ;;  %v13248_v46 = vadd.f32 %v828_v21, %v659_v22  ;;  %v11934_v21 = vld [vmem:[%s17773_s1 + $0x194] sm:$0xf]  ;;  %v9166_v22 = vld [vmem:[%s17773_s1 + $0x198] sm:$0xf0] }
 0x18a   :  { %18310 = vst [vmem:[#allocation84_spill] sm:$0xff] %v13242_v0  ;;  %v13270_v59 = vor.u32 %v11934_v21, %v9166_v22  ;;  %v11933_v21 = vld [vmem:[%s17773_s1 + $0x184] sm:$0xf0] }
 0x18b   :  { %18311 = vst [vmem:[#allocation85_spill] sm:$0xff] %v13248_v46 }
 0x18c   :  { %v1174_v37 = vpop.f32.mrf.mxu3  ;;  %18312 = vst [vmem:[#allocation86_spill] sm:$0xff] %v13256_v51 }
 0x18d   :  { %v838_v2 = vpop.f32.mrf.mxu1  ;;  %18315 = vst [vmem:[#allocation89_spill] sm:$0xff] %v13270_v59 }
 0x18f   :  { %v997_v30 = vpop.f32.mrf.mxu2 }
 0x190   :  { %v13258_v0 = vadd.f32 %v1166_v19, %v997_v30  ;;  %v662_v15 = vpop.f32.mrf.mxu0 }
 0x191   :  { %v13260_v10 = vadd.f32 %v831_v52, %v662_v15 }
 0x192   :  { %18313 = vst [vmem:[#allocation87_spill] sm:$0xff] %v13258_v0 }
 0x193   :  { %18314 = vst [vmem:[#allocation88_spill] sm:$0xff] %v13260_v10  ;;  %701 = vmatmul.bf16.gmra.mxu0 %v13256_v51  ;;  %v9156_v10 = vld [vmem:[%s17773_s1 + $0x180] sm:$0xf] }
 0x194   :  { %v1176_v36 = vpop.f32.mrf.mxu3  ;;  %1039 = vmatmul.bf16.gmra.mxu2 %v13256_v51 }
 0x195   :  { %v841_v19 = vpop.f32.mrf.mxu1 }
 0x197   :  { %v1000_v61 = vpop.f32.mrf.mxu2 }
 0x198   :  { %v13272_v30 = vadd.f32 %v1169_v49, %v1000_v61  ;;  %9315 = vmatmul.msk.bf16.gmra.mxu1 %vm481_vm0, %v13270_v59  ;;  %v664_v15 = vpop.f32.mrf.mxu0  ;;  %v13286_v61 = vor.u32 %v11933_v21, %v9156_v10 }
 0x199   :  { %9347 = vmatmul.msk.bf16.gmra.mxu3 %vm481_vm0, %v13270_v59  ;;  %v13278_v52 = vadd.f32 %v833_v8, %v664_v15  ;;  %v11936_v8 = vld [vmem:[%s17773_s1 + $0x1a4] sm:$0xf]  ;;  %v9174_v15 = vld [vmem:[%s17773_s1 + $0x1a8] sm:$0xf0] }
 0x19a   :  { %18316 = vst [vmem:[#allocation90_spill] sm:$0xff] %v13272_v30  ;;  %v13300_v10 = vor.u32 %v11936_v8, %v9174_v15  ;;  %v11935_v8 = vld [vmem:[%s17773_s1 + $0x194] sm:$0xf0]  ;;  %v11969_v15 = vld [vmem:[%s17772_s0 + $0xa4] sm:$0xf0] }
 0x19b   :  { %18317 = vst [vmem:[#allocation91_spill] sm:$0xff] %v13278_v52  ;;  %v11938_v52 = vld [vmem:[%s17773_s1 + $0x1b4] sm:$0xf] }
 0x19c   :  { %v1179_v0 = vpop.f32.mrf.mxu3  ;;  %18318 = vst [vmem:[#allocation92_spill] sm:$0xff] %v13286_v61 }
 0x19d   :  { %v843_v49 = vpop.f32.mrf.mxu1  ;;  %18321 = vst [vmem:[#allocation95_spill] sm:$0xff] %v13300_v10 }
 0x19f   :  { %v1002_v22 = vpop.f32.mrf.mxu2 }
 0x1a0   :  { %v13288_v30 = vadd.f32 %v1171_v55, %v1002_v22  ;;  %v667_v51 = vpop.f32.mrf.mxu0 }
 0x1a1   :  { %v13290_v46 = vadd.f32 %v836_v31, %v667_v51 }
 0x1a2   :  { %18319 = vst [vmem:[#allocation93_spill] sm:$0xff] %v13288_v30  ;;  %v9164_v30 = vld [vmem:[%s17773_s1 + $0x190] sm:$0xf] }
 0x1a3   :  { %18320 = vst [vmem:[#allocation94_spill] sm:$0xff] %v13290_v46  ;;  %706 = vmatmul.bf16.gmra.mxu0 %v13286_v61 }
 0x1a4   :  { %v1181_v59 = vpop.f32.mrf.mxu3  ;;  %1044 = vmatmul.bf16.gmra.mxu2 %v13286_v61 }
 0x1a5   :  { %v846_v55 = vpop.f32.mrf.mxu1 }
 0x1a7   :  { %v1005_v21 = vpop.f32.mrf.mxu2 }
 0x1a8   :  { %v13302_v22 = vadd.f32 %v1174_v37, %v1005_v21  ;;  %9316 = vmatmul.msk.bf16.gmra.mxu1 %vm481_vm0, %v13300_v10  ;;  %v669_v31 = vpop.f32.mrf.mxu0  ;;  %v9364_v37 = vld [vmem:[%s17772_s0 + $0xa0] sm:$0xf] }
 0x1a9   :  { %9348 = vmatmul.msk.bf16.gmra.mxu3 %vm481_vm0, %v13300_v10  ;;  %v13308_v51 = vadd.f32 %v838_v2, %v669_v31  ;;  %v9365_v2 = vor.u32 %v11969_v15, %v9364_v37 }
 0x1aa   :  { %18322 = vst [vmem:[#allocation96_spill] sm:$0xff] %v13302_v22  ;;  %v13322_v22 = vor.u32 %v11935_v8, %v9164_v30  ;;  %v13336_v30 = vor.u32 %v11938_v52, %v9182_v3  ;;  %v11937_v3 = vld [vmem:[%s17773_s1 + $0x1a4] sm:$0xf0]  ;;  %v9366_v52 = vld [vmem:[%s17772_s0 + $0xa8] sm:$0xf0] }
 0x1ab   :  { %18323 = vst [vmem:[#allocation97_spill] sm:$0xff] %v13308_v51  ;;  %1368 = vmatpush.bf16.msrb.mxu1 %v9365_v2  ;;  %v9172_v2 = vld [vmem:[%s17773_s1 + $0x1a0] sm:$0xf] }
 0x1ac   :  { %v1184_v46 = vpop.f32.mrf.mxu3  ;;  %18324 = vst [vmem:[#allocation98_spill] sm:$0xff] %v13322_v22 }
 0x1ad   :  { %v848_v21 = vpop.f32.mrf.mxu1  ;;  %18327 = vst [vmem:[#allocation101_spill] sm:$0xff] %v13336_v30 }
 0x1af   :  { %v1007_v31 = vpop.f32.mrf.mxu2 }
 0x1b0   :  { %v13324_v10 = vadd.f32 %v1176_v36, %v1007_v31  ;;  %v672_v51 = vpop.f32.mrf.mxu0 }
 0x1b1   :  { %v13326_v61 = vadd.f32 %v841_v19, %v672_v51 }
 0x1b2   :  { %18325 = vst [vmem:[#allocation99_spill] sm:$0xff] %v13324_v10 }
 0x1b3   :  { %18326 = vst [vmem:[#allocation100_spill] sm:$0xff] %v13326_v61  ;;  %711 = vmatmul.bf16.gmra.mxu0 %v13322_v22  ;;  %v11940_v61 = vld [vmem:[%s17773_s1 + $0x1c4] sm:$0xf] }
 0x1b4   :  { %v1186_v37 = vpop.f32.mrf.mxu3  ;;  %1049 = vmatmul.bf16.gmra.mxu2 %v13322_v22  ;;  %v9190_v22 = vld [vmem:[%s17773_s1 + $0x1c8] sm:$0xf0] }
 0x1b5   :  { %v851_v36 = vpop.f32.mrf.mxu1 }
 0x1b7   :  { %v1010_v8 = vpop.f32.mrf.mxu2 }
 0x1b8   :  { %v13338_v15 = vadd.f32 %v1179_v0, %v1010_v8  ;;  %9317 = vmatmul.msk.bf16.gmra.mxu1 %vm481_vm0, %v13336_v30  ;;  %v674_v19 = vpop.f32.mrf.mxu0  ;;  %v11968_v0 = vld [vmem:[%s17772_s0 + $0xa4] sm:$0xf] }
 0x1b9   :  { %9349 = vmatmul.msk.bf16.gmra.mxu3 %vm481_vm0, %v13336_v30  ;;  %v13344_v51 = vadd.f32 %v843_v49, %v674_v19  ;;  %v9369_v49 = vor.u32 %v11968_v0, %v9366_v52 }
 0x1ba   :  { %18328 = vst [vmem:[#allocation102_spill] sm:$0xff] %v13338_v15  ;;  %v13358_v15 = vor.u32 %v11937_v3, %v9172_v2  ;;  %v13372_v2 = vor.u32 %v11940_v61, %v9190_v22  ;;  %v11939_v61 = vld [vmem:[%s17773_s1 + $0x1b4] sm:$0xf0] }
 0x1bb   :  { %18329 = vst [vmem:[#allocation103_spill] sm:$0xff] %v13344_v51  ;;  %1706 = vmatpush.bf16.msrb.mxu0 %v9369_v49 }
 0x1bc   :  { %v1189_v31 = vpop.f32.mrf.mxu3  ;;  %18330 = vst [vmem:[#allocation104_spill] sm:$0xff] %v13358_v15 }
 0x1bd   :  { %v853_v8 = vpop.f32.mrf.mxu1  ;;  %18333 = vst [vmem:[#allocation107_spill] sm:$0xff] %v13372_v2 }
 0x1bf   :  { %v1012_v19 = vpop.f32.mrf.mxu2 }
 0x1c0   :  { %v13360_v30 = vadd.f32 %v1181_v59, %v1012_v19  ;;  %v677_v10 = vpop.f32.mrf.mxu0  ;;  %v9180_v19 = vld [vmem:[%s17773_s1 + $0x1b0] sm:$0xf] }
 0x1c1   :  { %v13362_v51 = vadd.f32 %v846_v55, %v677_v10 }
 0x1c2   :  { %18331 = vst [vmem:[#allocation105_spill] sm:$0xff] %v13360_v30 }
 0x1c3   :  { %18332 = vst [vmem:[#allocation106_spill] sm:$0xff] %v13362_v51  ;;  %716 = vmatmul.bf16.gmra.mxu0 %v13358_v15 }
 0x1c4   :  { %v1191_v0 = vpop.f32.mrf.mxu3  ;;  %1054 = vmatmul.bf16.gmra.mxu2 %v13358_v15 }
 0x1c5   :  { %v856_v59 = vpop.f32.mrf.mxu1 }
 0x1c7   :  { %v1015_v3 = vpop.f32.mrf.mxu2 }
 0x1c8   :  { %v13374_v52 = vadd.f32 %v1184_v46, %v1015_v3  ;;  %9318 = vmatmul.msk.bf16.gmra.mxu1 %vm481_vm0, %v13372_v2  ;;  %v679_v10 = vpop.f32.mrf.mxu0  ;;  %v13388_v3 = vor.u32 %v11939_v61, %v9180_v19 }
 0x1c9   :  { %9350 = vmatmul.msk.bf16.gmra.mxu3 %vm481_vm0, %v13372_v2  ;;  %v13380_v55 = vadd.f32 %v848_v21, %v679_v10  ;;  %v11942_v21 = vld [vmem:[%s17773_s1 + $0x1d4] sm:$0xf]  ;;  %v9198_v10 = vld [vmem:[%s17773_s1 + $0x1d8] sm:$0xf0] }
 0x1ca   :  { %18334 = vst [vmem:[#allocation108_spill] sm:$0xff] %v13374_v52  ;;  %v13402_v19 = vor.u32 %v11942_v21, %v9198_v10  ;;  %v11941_v21 = vld [vmem:[%s17773_s1 + $0x1c4] sm:$0xf0] }
 0x1cb   :  { %18335 = vst [vmem:[#allocation109_spill] sm:$0xff] %v13380_v55 }
 0x1cc   :  { %v1194_v49 = vpop.f32.mrf.mxu3  ;;  %18336 = vst [vmem:[#allocation110_spill] sm:$0xff] %v13388_v3 }
 0x1cd   :  { %v858_v46 = vpop.f32.mrf.mxu1  ;;  %18339 = vst [vmem:[#allocation113_spill] sm:$0xff] %v13402_v19 }
 0x1cf   :  { %v1017_v22 = vpop.f32.mrf.mxu2 }
 0x1d0   :  { %v13390_v52 = vadd.f32 %v1186_v37, %v1017_v22  ;;  %v682_v30 = vpop.f32.mrf.mxu0 }
 0x1d1   :  { %v13392_v51 = vadd.f32 %v851_v36, %v682_v30 }
 0x1d2   :  { %18337 = vst [vmem:[#allocation111_spill] sm:$0xff] %v13390_v52 }
 0x1d3   :  { %18338 = vst [vmem:[#allocation112_spill] sm:$0xff] %v13392_v51  ;;  %721 = vmatmul.bf16.gmra.mxu0 %v13388_v3  ;;  %v9188_v51 = vld [vmem:[%s17773_s1 + $0x1c0] sm:$0xf] }
 0x1d4   :  { %v1196_v2 = vpop.f32.mrf.mxu3  ;;  %1059 = vmatmul.bf16.gmra.mxu2 %v13388_v3 }
 0x1d5   :  { %v861_v37 = vpop.f32.mrf.mxu1 }
 0x1d7   :  { %v1020_v61 = vpop.f32.mrf.mxu2 }
 0x1d8   :  { %v13404_v22 = vadd.f32 %v1189_v31, %v1020_v61  ;;  %9319 = vmatmul.msk.bf16.gmra.mxu1 %vm481_vm0, %v13402_v19  ;;  %v684_v30 = vpop.f32.mrf.mxu0  ;;  %v13418_v61 = vor.u32 %v11941_v21, %v9188_v51  ;;  %v9356_v51 = vld [vmem:[%s17772_s0 + $0x90] sm:$0xf] }
 0x1d9   :  { %9351 = vmatmul.msk.bf16.gmra.mxu3 %vm481_vm0, %v13402_v19  ;;  %v13410_v36 = vadd.f32 %v853_v8, %v684_v30  ;;  %v11944_v8 = vld [vmem:[%s17773_s1 + $0x1e4] sm:$0xf]  ;;  %v9206_v30 = vld [vmem:[%s17773_s1 + $0x1e8] sm:$0xf0] }
 0x1da   :  { %18340 = vst [vmem:[#allocation114_spill] sm:$0xff] %v13404_v22 }
 0x1db   :  { %18341 = vst [vmem:[#allocation115_spill] sm:$0xff] %v13410_v36 }
 0x1dc   :  { %v1199_v52 = vpop.f32.mrf.mxu3  ;;  %18342 = vst [vmem:[#allocation116_spill] sm:$0xff] %v13418_v61 }
 0x1dd   :  { %v863_v31 = vpop.f32.mrf.mxu1 }
 0x1df   :  { %v1022_v10 = vpop.f32.mrf.mxu2 }
 0x1e0   :  { %v13420_v22 = vadd.f32 %v1191_v0, %v1022_v10  ;;  %v687_v3 = vpop.f32.mrf.mxu0  ;;  %v11967_v0 = vld [vmem:[%s17772_s0 + $0x94] sm:$0xf0] }
 0x1e1   :  { %v13422_v55 = vadd.f32 %v856_v59, %v687_v3  ;;  %v13438_v3 = vor.u32 %v11944_v8, %v9206_v30  ;;  %v9357_v21 = vor.u32 %v11967_v0, %v9356_v51  ;;  %v9196_v8 = vld [vmem:[%s17773_s1 + $0x1d0] sm:$0xf]  ;;  %v11943_v30 = vld [vmem:[%s17773_s1 + $0x1d4] sm:$0xf0] }
 0x1e2   :  { %18343 = vst [vmem:[#allocation117_spill] sm:$0xff] %v13420_v22  ;;  %v13454_v51 = vor.u32 %v11943_v30, %v9196_v8 }
 0x1e3   :  { %18344 = vst [vmem:[#allocation118_spill] sm:$0xff] %v13422_v55  ;;  %726 = vmatmul.bf16.gmra.mxu0 %v13418_v61  ;;  %1369 = vmatpush.bf16.msrb.mxu1 %v9357_v21 }
 0x1e4   :  { %v1201_v59 = vpop.f32.mrf.mxu3  ;;  %1064 = vmatmul.bf16.gmra.mxu2 %v13418_v61  ;;  %18345 = vst [vmem:[#allocation119_spill] sm:$0xff] %v13438_v3 }
 0x1e5   :  { %v866_v10 = vpop.f32.mrf.mxu1  ;;  %18348 = vst [vmem:[#allocation122_spill] sm:$0xff] %v13454_v51 }
 0x1e7   :  { %v1025_v22 = vpop.f32.mrf.mxu2 }
 0x1e8   :  { %v13440_v19 = vadd.f32 %v1194_v49, %v1025_v22  ;;  %9320 = vmatmul.msk.bf16.gmra.mxu1 %vm481_vm0, %v13438_v3  ;;  %v689_v55 = vpop.f32.mrf.mxu0 }
 0x1e9   :  { %9352 = vmatmul.msk.bf16.gmra.mxu3 %vm481_vm0, %v13438_v3  ;;  %v13446_v36 = vadd.f32 %v858_v46, %v689_v55  ;;  %v11946_v55 = vld [vmem:[%s17773_s1 + $0x1f4] sm:$0xf]  ;;  %v9214_v46 = vld [vmem:[%s17773_s1 + $0x1f8] sm:$0xf0] }
 0x1ea   :  { %18346 = vst [vmem:[#allocation120_spill] sm:$0xff] %v13440_v19  ;;  %v13468_v8 = vor.u32 %v11946_v55, %v9214_v46  ;;  %v11945_v55 = vld [vmem:[%s17773_s1 + $0x1e4] sm:$0xf0]  ;;  %v9358_v46 = vld [vmem:[%s17772_s0 + $0x98] sm:$0xf0] }
 0x1eb   :  { %18347 = vst [vmem:[#allocation121_spill] sm:$0xff] %v13446_v36 }
 0x1ec   :  { %v1204_v15 = vpop.f32.mrf.mxu3  ;;  %18351 = vst [vmem:[#allocation125_spill] sm:$0xff] %v13468_v8 }
 0x1ed   :  { %v868_v49 = vpop.f32.mrf.mxu1 }
 0x1ef   :  { %v1027_v22 = vpop.f32.mrf.mxu2 }
 0x1f0   :  { %v13456_v0 = vadd.f32 %v1196_v2, %v1027_v22  ;;  %v692_v21 = vpop.f32.mrf.mxu0 }
 0x1f1   :  { %v13458_v19 = vadd.f32 %v861_v37, %v692_v21 }
 0x1f2   :  { %18349 = vst [vmem:[#allocation123_spill] sm:$0xff] %v13456_v0  ;;  %v9204_v0 = vld [vmem:[%s17773_s1 + $0x1e0] sm:$0xf] }
 0x1f3   :  { %18350 = vst [vmem:[#allocation124_spill] sm:$0xff] %v13458_v19  ;;  %731 = vmatmul.bf16.gmra.mxu0 %v13454_v51 }
 0x1f4   :  { %v1206_v3 = vpop.f32.mrf.mxu3  ;;  %1069 = vmatmul.bf16.gmra.mxu2 %v13454_v51 }
 0x1f5   :  { %v871_v2 = vpop.f32.mrf.mxu1 }
 0x1f7   :  { %v1030_v30 = vpop.f32.mrf.mxu2 }
 0x1f8   :  { %v13470_v22 = vadd.f32 %v1199_v52, %v1030_v30  ;;  %9321 = vmatmul.msk.bf16.gmra.mxu1 %vm481_vm0, %v13468_v8  ;;  %v694_v37 = vpop.f32.mrf.mxu0  ;;  %v11966_v52 = vld [vmem:[%s17772_s0 + $0x94] sm:$0xf] }
 0x1f9   :  { %9353 = vmatmul.msk.bf16.gmra.mxu3 %vm481_vm0, %v13468_v8  ;;  %v13476_v21 = vadd.f32 %v863_v31, %v694_v37  ;;  %v9361_v31 = vor.u32 %v11966_v52, %v9358_v46 }
 0x1fa   :  { %18352 = vst [vmem:[#allocation126_spill] sm:$0xff] %v13470_v22  ;;  %v13490_v22 = vor.u32 %v11945_v55, %v9204_v0 }
 0x1fb   :  { %18353 = vst [vmem:[#allocation127_spill] sm:$0xff] %v13476_v21  ;;  %1707 = vmatpush.bf16.msrb.mxu0 %v9361_v31 }
 0x1fc   :  { %v1209_v19 = vpop.f32.mrf.mxu3 }
 0x1fd   :  { %v873_v30 = vpop.f32.mrf.mxu1 }
 0x1ff   :  { %v1032_v37 = vpop.f32.mrf.mxu2 }
 0x200   :  { %v13492_v8 = vadd.f32 %v1201_v59, %v1032_v37  ;;  %v697_v21 = vpop.f32.mrf.mxu0 }
 0x201   :  { %v13494_v51 = vadd.f32 %v866_v10, %v697_v21  ;;  %v9212_v10 = vld [vmem:[%s17773_s1 + $0x1f0] sm:$0xf]  ;;  %v11947_v21 = vld [vmem:[%s17773_s1 + $0x1f4] sm:$0xf0] }
 0x202   :  { %18354 = vst [vmem:[#allocation128_spill] sm:$0xff] %v13492_v8 }
 0x203   :  { %18355 = vst [vmem:[#allocation129_spill] sm:$0xff] %v13494_v51  ;;  %736 = vmatmul.bf16.gmra.mxu0 %v13490_v22 }
 0x204   :  { %v1211_v36 = vpop.f32.mrf.mxu3  ;;  %1074 = vmatmul.bf16.gmra.mxu2 %v13490_v22 }
 0x205   :  { %v876_v61 = vpop.f32.mrf.mxu1 }
 0x207   :  { %v1035_v58 = vpop.f32.mrf.mxu2 }
 0x208   :  { %v13498_v34 = vadd.f32 %v1204_v15, %v1035_v58  ;;  %1370 = vmatmul.bf16.vlgmr.msrb.gmra.mxu1 %v12554_v1  ;;  %v699_v52 = vpop.f32.mrf.mxu0  ;;  %v13511_v15 = vor.u32 %v11947_v21, %v9212_v10 }
 0x209   :  { %9426 = vmatmul.msk.bf16.vlgmr.msrb.gmra.mxu3 %vm481_vm0, %v12446_v16  ;;  %v13503_v59 = vadd.f32 %v868_v49, %v699_v52 }
 0x20a   :  { %18356 = vst [vmem:[#allocation130_spill] sm:$0xff] %v13498_v34 }
 0x20b   :  { %18357 = vst [vmem:[#allocation131_spill] sm:$0xff] %v13503_v59 }
 0x20c   :  { %v1214_v0 = vpop.f32.mrf.mxu3  ;;  %18358 = vst [vmem:[#allocation132_spill] sm:$0xff] %v13511_v15 }
 0x20d   :  { %v878_v55 = vpop.f32.mrf.mxu1 }
 0x20f   :  { %v1037_v58 = vpop.f32.mrf.mxu2 }
 0x210   :  { %v13513_v46 = vadd.f32 %v1206_v3, %v1037_v58  ;;  %v702_v31 = vpop.f32.mrf.mxu0  ;;  %v9556_v3 = vld [vmem:[%s17772_s0 + $0x1a0] sm:$0xf] }
 0x211   :  { %v13515_v37 = vadd.f32 %v871_v2, %v702_v31  ;;  %v12001_v2 = vld [vmem:[%s17772_s0 + $0x1a4] sm:$0xf0] }
 0x212   :  { %18359 = vst [vmem:[#allocation133_spill] sm:$0xff] %v13513_v46  ;;  %v9557_v21 = vor.u32 %v12001_v2, %v9556_v3  ;;  %v11999_v2 = vld [vmem:[%s17772_s0 + $0x194] sm:$0xf0] }
 0x213   :  { %18360 = vst [vmem:[#allocation134_spill] sm:$0xff] %v13515_v37  ;;  %741 = vmatmul.bf16.gmra.mxu0 %v13511_v15 }
 0x214   :  { %v1216_v49 = vpop.f32.mrf.mxu3  ;;  %1079 = vmatmul.bf16.gmra.mxu2 %v13511_v15  ;;  %2450 = vmatpush.bf16.msra.mxu3 %v9557_v21 }
 0x215   :  { %v881_v52 = vpop.f32.mrf.mxu1 }
 0x217   :  { %v1040_v34 = vpop.f32.mrf.mxu2 }
 0x218   :  { %v13519_v8 = vadd.f32 %v1209_v19, %v1040_v34  ;;  %1375 = vmatmul.bf16.gmra.mxu1 %v12588_v13  ;;  %v704_v59 = vpop.f32.mrf.mxu0 }
 0x219   :  { %9427 = vmatmul.msk.bf16.gmra.mxu3 %vm481_vm0, %v12512_v45  ;;  %v13530_v10 = vadd.f32 %v873_v30, %v704_v59 }
 0x21a   :  { %18361 = vst [vmem:[#allocation135_spill] sm:$0xff] %v13519_v8 }
 0x21b   :  { %18362 = vst [vmem:[#allocation136_spill] sm:$0xff] %v13530_v10 }
 0x21c   :  { %v1219_v34 = vpop.f32.mrf.mxu3 }
 0x21d   :  { %v883_v19 = vpop.f32.mrf.mxu1 }
 0x21f   :  { %v1042_v58 = vpop.f32.mrf.mxu2 }
 0x220   :  { %v13532_v31 = vadd.f32 %v1211_v36, %v1042_v58  ;;  %v707_v8 = vpop.f32.mrf.mxu0  ;;  %v12000_v36 = vld [vmem:[%s17772_s0 + $0x1a4] sm:$0xf] }
 0x221   :  { %v13534_v46 = vadd.f32 %v876_v61, %v707_v8  ;;  %v9558_v61 = vld [vmem:[%s17772_s0 + $0x1a8] sm:$0xf0] }
 0x222   :  { %18363 = vst [vmem:[#allocation137_spill] sm:$0xff] %v13532_v31  ;;  %v9561_v3 = vor.u32 %v12000_v36, %v9558_v61 }
 0x223   :  { %18364 = vst [vmem:[#allocation138_spill] sm:$0xff] %v13534_v46  ;;  %1708 = vmatmul.bf16.vlgmr.msrb.gmra.mxu0 %v12554_v1 }
 0x224   :  { %v1221_v37 = vpop.f32.mrf.mxu3  ;;  %9458 = vmatmul.msk.bf16.vlgmr.msrb.gmra.mxu2 %vm481_vm0, %v12446_v16 }
 0x225   :  { %v886_v15 = vpop.f32.mrf.mxu1  ;;  %2788 = vmatpush.bf16.msra.mxu2 %v9561_v3 }
 0x227   :  { %v1045_v51 = vpop.f32.mrf.mxu2 }
 0x228   :  { %v13539_v30 = vadd.f32 %v1214_v0, %v1045_v51  ;;  %1380 = vmatmul.bf16.gmra.mxu1 %v12616_v23  ;;  %v709_v59 = vpop.f32.mrf.mxu0  ;;  %v9548_v0 = vld [vmem:[%s17772_s0 + $0x190] sm:$0xf] }
 0x229   :  { %9428 = vmatmul.msk.bf16.gmra.mxu3 %vm481_vm0, %v12564_v4  ;;  %v13550_v8 = vadd.f32 %v878_v55, %v709_v59  ;;  %v9549_v58 = vor.u32 %v11999_v2, %v9548_v0 }
 0x22a   :  { %18365 = vst [vmem:[#allocation139_spill] sm:$0xff] %v13539_v30 }
 0x22b   :  { %18366 = vst [vmem:[#allocation140_spill] sm:$0xff] %v13550_v8  ;;  %2274 = vmatpush.bf16.msra.mxu1 %v9549_v58 }
 0x22c   :  { %v1224_v51 = vpop.f32.mrf.mxu3 }
 0x22d   :  { %v888_v21 = vpop.f32.mrf.mxu1 }
 0x22f   :  { %v1047_v30 = vpop.f32.mrf.mxu2 }
 0x230   :  { %v13558_v31 = vadd.f32 %v1216_v49, %v1047_v30  ;;  %v712_v46 = vpop.f32.mrf.mxu0  ;;  %v9550_v30 = vld [vmem:[%s17772_s0 + $0x198] sm:$0xf0] }
 0x231   :  { %v13560_v55 = vadd.f32 %v881_v52, %v712_v46  ;;  %v11998_v52 = vld [vmem:[%s17772_s0 + $0x194] sm:$0xf] }
 0x232   :  { %18367 = vst [vmem:[#allocation141_spill] sm:$0xff] %v13558_v31 }
 0x233   :  { %18368 = vst [vmem:[#allocation142_spill] sm:$0xff] %v13560_v55  ;;  %1713 = vmatmul.bf16.gmra.mxu0 %v12588_v13 }
 0x234   :  { %v1226_v59 = vpop.f32.mrf.mxu3  ;;  %9459 = vmatmul.msk.bf16.gmra.mxu2 %vm481_vm0, %v12512_v45 }
 0x235   :  { %v891_v36 = vpop.f32.mrf.mxu1 }
 0x237   :  { %v1050_v61 = vpop.f32.mrf.mxu2 }
 0x238   :  { %v13565_v3 = vadd.f32 %v1219_v34, %v1050_v61  ;;  %1385 = vmatmul.bf16.gmra.mxu1 %v12638_v29  ;;  %v714_v0 = vpop.f32.mrf.mxu0  ;;  %v9553_v34 = vor.u32 %v11998_v52, %v9550_v30 }
 0x239   :  { %9429 = vmatmul.msk.bf16.gmra.mxu3 %vm481_vm0, %v12598_v17  ;;  %v13570_v49 = vadd.f32 %v883_v19, %v714_v0 }
 0x23a   :  { %18369 = vst [vmem:[#allocation143_spill] sm:$0xff] %v13565_v3  ;;  %2612 = vmatpush.bf16.msra.mxu0 %v9553_v34  ;;  %v18604_v8 = vld [vmem:[#allocation142_spill] sm:$0xff] }
 0x23b   :  { %18370 = vst [vmem:[#allocation144_spill] sm:$0xff] %v13570_v49 }
 0x23c   :  { %v1229_v46 = vpop.f32.mrf.mxu3 }
 0x23d   :  { %v893_v2 = vpop.f32.mrf.mxu1 }
 0x23f   :  { %v1052_v58 = vpop.f32.mrf.mxu2 }
 0x240   :  { %v13578_v61 = vadd.f32 %v1221_v37, %v1052_v58  ;;  %v717_v3 = vpop.f32.mrf.mxu0 }
 0x241   :  { %v13580_v31 = vadd.f32 %v886_v15, %v717_v3 }
 0x242   :  { %18371 = vst [vmem:[#allocation145_spill] sm:$0xff] %v13578_v61 }
 0x243   :  { %18372 = vst [vmem:[#allocation146_spill] sm:$0xff] %v13580_v31  ;;  %1718 = vmatmul.bf16.gmra.mxu0 %v12616_v23 }
 0x244   :  { %v1231_v19 = vpop.f32.mrf.mxu3  ;;  %9460 = vmatmul.msk.bf16.gmra.mxu2 %vm481_vm0, %v12564_v4 }
 0x245   :  { %v896_v0 = vpop.f32.mrf.mxu1 }
 0x247   :  { %v1055_v49 = vpop.f32.mrf.mxu2 }
 0x248   :  { %v13585_v55 = vadd.f32 %v1224_v51, %v1055_v49  ;;  %1390 = vmatmul.bf16.gmra.mxu1 %v12660_v35  ;;  %v719_v52 = vpop.f32.mrf.mxu0 }
 0x249   :  { %9430 = vmatmul.msk.bf16.gmra.mxu3 %vm481_vm0, %v12626_v26  ;;  %v13590_v37 = vadd.f32 %v888_v21, %v719_v52 }
 0x24a   :  { %18373 = vst [vmem:[#allocation147_spill] sm:$0xff] %v13585_v55 }
 0x24b   :  { %18374 = vst [vmem:[#allocation148_spill] sm:$0xff] %v13590_v37 }
 0x24c   :  { %v1234_v15 = vpop.f32.mrf.mxu3 }
 0x24d   :  { %v898_v3 = vpop.f32.mrf.mxu1 }
 0x24f   :  { %v1057_v30 = vpop.f32.mrf.mxu2 }
 0x250   :  { %v13592_v34 = vadd.f32 %v1226_v59, %v1057_v30  ;;  %v722_v58 = vpop.f32.mrf.mxu0 }
 0x251   :  { %v13594_v61 = vadd.f32 %v891_v36, %v722_v58 }
 0x252   :  { %18375 = vst [vmem:[#allocation149_spill] sm:$0xff] %v13592_v34 }
 0x253   :  { %18376 = vst [vmem:[#allocation150_spill] sm:$0xff] %v13594_v61  ;;  %1723 = vmatmul.bf16.gmra.mxu0 %v12638_v29 }
 0x254   :  { %v1236_v51 = vpop.f32.mrf.mxu3  ;;  %9461 = vmatmul.msk.bf16.gmra.mxu2 %vm481_vm0, %v12598_v17 }
 0x255   :  { %v901_v49 = vpop.f32.mrf.mxu1 }
 0x257   :  { %v1060_v55 = vpop.f32.mrf.mxu2 }
 0x258   :  { %v13599_v31 = vadd.f32 %v1229_v46, %v1060_v55  ;;  %1395 = vmatmul.bf16.gmra.mxu1 %v12688_v44  ;;  %v724_v21 = vpop.f32.mrf.mxu0 }
 0x259   :  { %9431 = vmatmul.msk.bf16.gmra.mxu3 %vm481_vm0, %v12648_v32  ;;  %v13604_v59 = vadd.f32 %v893_v2, %v724_v21 }
 0x25a   :  { %18377 = vst [vmem:[#allocation151_spill] sm:$0xff] %v13599_v31 }
 0x25b   :  { %18378 = vst [vmem:[#allocation152_spill] sm:$0xff] %v13604_v59 }
 0x25c   :  { %v1239_v36 = vpop.f32.mrf.mxu3 }
 0x25d   :  { %v903_v52 = vpop.f32.mrf.mxu1 }
 0x25f   :  { %v1062_v30 = vpop.f32.mrf.mxu2 }
 0x260   :  { %v13606_v58 = vadd.f32 %v1231_v19, %v1062_v30  ;;  %v727_v34 = vpop.f32.mrf.mxu0  ;;  %v9540_v30 = vld [vmem:[%s17772_s0 + $0x180] sm:$0xf] }
 0x261   :  { %v13608_v61 = vadd.f32 %v896_v0, %v727_v34 }
 0x262   :  { %18379 = vst [vmem:[#allocation153_spill] sm:$0xff] %v13606_v58 }
 0x263   :  { %18380 = vst [vmem:[#allocation154_spill] sm:$0xff] %v13608_v61  ;;  %1728 = vmatmul.bf16.gmra.mxu0 %v12660_v35 }
 0x264   :  { %v1241_v55 = vpop.f32.mrf.mxu3  ;;  %9462 = vmatmul.msk.bf16.gmra.mxu2 %vm481_vm0, %v12626_v26 }
 0x265   :  { %v906_v46 = vpop.f32.mrf.mxu1 }
 0x267   :  { %v1065_v31 = vpop.f32.mrf.mxu2 }
 0x268   :  { %v13613_v17 = vadd.f32 %v1234_v15, %v1065_v31  ;;  %1400 = vmatmul.bf16.gmra.mxu1 %v12716_v54  ;;  %v729_v2 = vpop.f32.mrf.mxu0  ;;  %v11997_v31 = vld [vmem:[%s17772_s0 + $0x184] sm:$0xf0] }
 0x269   :  { %9432 = vmatmul.msk.bf16.gmra.mxu3 %vm481_vm0, %v12670_v38  ;;  %v13618_v19 = vadd.f32 %v898_v3, %v729_v2  ;;  %v9541_v58 = vor.u32 %v11997_v31, %v9540_v30 }
 0x26a   :  { %18381 = vst [vmem:[#allocation155_spill] sm:$0xff] %v13613_v17 }
 0x26b   :  { %18382 = vst [vmem:[#allocation156_spill] sm:$0xff] %v13618_v19  ;;  %2275 = vmatpush.bf16.msra.mxu1 %v9541_v58 }
 0x26c   :  { %v1244_v0 = vpop.f32.mrf.mxu3 }
 0x26d   :  { %v908_v34 = vpop.f32.mrf.mxu1 }
 0x26f   :  { %v1067_v21 = vpop.f32.mrf.mxu2 }
 0x270   :  { %v13626_v15 = vadd.f32 %v1236_v51, %v1067_v21  ;;  %v732_v17 = vpop.f32.mrf.mxu0  ;;  %v11996_v21 = vld [vmem:[%s17772_s0 + $0x184] sm:$0xf] }
 0x271   :  { %v13628_v61 = vadd.f32 %v901_v49, %v732_v17 }
 0x272   :  { %18383 = vst [vmem:[#allocation157_spill] sm:$0xff] %v13626_v15 }
 0x273   :  { %18384 = vst [vmem:[#allocation158_spill] sm:$0xff] %v13628_v61  ;;  %1733 = vmatmul.bf16.gmra.mxu0 %v12688_v44 }
 0x274   :  { %v1246_v3 = vpop.f32.mrf.mxu3  ;;  %9463 = vmatmul.msk.bf16.gmra.mxu2 %vm481_vm0, %v12648_v32 }
 0x275   :  { %v911_v2 = vpop.f32.mrf.mxu1 }
 0x277   :  { %v1070_v19 = vpop.f32.mrf.mxu2 }
 0x278   :  { %v13633_v26 = vadd.f32 %v1239_v36, %v1070_v19  ;;  %1405 = vmatmul.bf16.gmra.mxu1 %v12738_v63  ;;  %v734_v35 = vpop.f32.mrf.mxu0  ;;  %v9542_v36 = vld [vmem:[%s17772_s0 + $0x188] sm:$0xf0] }
 0x279   :  { %9433 = vmatmul.msk.bf16.gmra.mxu3 %vm481_vm0, %v12698_v48  ;;  %v13638_v51 = vadd.f32 %v903_v52, %v734_v35  ;;  %v9545_v31 = vor.u32 %v11996_v21, %v9542_v36 }
 0x27a   :  { %18385 = vst [vmem:[#allocation159_spill] sm:$0xff] %v13633_v26 }
 0x27b   :  { %18386 = vst [vmem:[#allocation160_spill] sm:$0xff] %v13638_v51  ;;  %2613 = vmatpush.bf16.msra.mxu0 %v9545_v31 }
 0x27c   :  { %v1249_v17 = vpop.f32.mrf.mxu3 }
 0x27d   :  { %v913_v49 = vpop.f32.mrf.mxu1 }
 0x27f   :  { %v1072_v58 = vpop.f32.mrf.mxu2 }
 0x280   :  { %v13646_v19 = vadd.f32 %v1241_v55, %v1072_v58  ;;  %v737_v30 = vpop.f32.mrf.mxu0 }
 0x281   :  { %v13648_v26 = vadd.f32 %v906_v46, %v737_v30 }
 0x282   :  { %18387 = vst [vmem:[#allocation161_spill] sm:$0xff] %v13646_v19 }
 0x283   :  { %18388 = vst [vmem:[#allocation162_spill] sm:$0xff] %v13648_v26  ;;  %1738 = vmatmul.bf16.gmra.mxu0 %v12716_v54 }
 0x284   :  { %v1251_v35 = vpop.f32.mrf.mxu3  ;;  %9464 = vmatmul.msk.bf16.gmra.mxu2 %vm481_vm0, %v12670_v38 }
 0x285   :  { %v1371_v52 = vpop.f32.mrf.mxu1 }
 0x287   :  { %v1075_v15 = vpop.f32.mrf.mxu2 }
 0x288   :  { %v13653_v51 = vadd.f32 %v1244_v0, %v1075_v15  ;;  %1410 = vmatmul.bf16.gmra.mxu1 %v12760_v11  ;;  %v739_v61 = vpop.f32.mrf.mxu0 }
 0x289   :  { %9434 = vmatmul.msk.bf16.gmra.mxu3 %vm481_vm0, %v12726_v57  ;;  %v13658_v55 = vadd.f32 %v908_v34, %v739_v61 }
 0x28a   :  { %18389 = vst [vmem:[#allocation163_spill] sm:$0xff] %v13653_v51 }
 0x28b   :  { %18390 = vst [vmem:[#allocation164_spill] sm:$0xff] %v13658_v55 }
 0x28c   :  { %v1540_v46 = vpop.f32.mrf.mxu3 }
 0x28d   :  { %v13660_v58 = vadd.f32 %v1540_v46, %v1371_v52  ;;  %v1373_v21 = vpop.f32.mrf.mxu1 }
 0x28f   :  { %v1077_v30 = vpop.f32.mrf.mxu2 }
 0x290   :  { %v13664_v31 = vadd.f32 %v1246_v3, %v1077_v30  ;;  %v742_v0 = vpop.f32.mrf.mxu0 }
 0x291   :  { %v13666_v15 = vadd.f32 %v911_v2, %v742_v0 }
 0x292   :  { %18391 = vst [vmem:[#allocation165_spill] sm:$0xff] %v13664_v31 }
 0x293   :  { %18392 = vst [vmem:[#allocation166_spill] sm:$0xff] %v13666_v15  ;;  %1743 = vmatmul.bf16.gmra.mxu0 %v12738_v63 }
 0x294   :  { %v1542_v51 = vpop.f32.mrf.mxu3  ;;  %9465 = vmatmul.msk.bf16.gmra.mxu2 %vm481_vm0, %v12698_v48 }
 0x295   :  { %v13671_v61 = vadd.f32 %v1542_v51, %v1373_v21  ;;  %v1376_v34 = vpop.f32.mrf.mxu1 }
 0x297   :  { %v1080_v46 = vpop.f32.mrf.mxu2 }
 0x298   :  { %v13675_v36 = vadd.f32 %v1249_v17, %v1080_v46  ;;  %1415 = vmatmul.bf16.gmra.mxu1 %v12794_v40  ;;  %v744_v3 = vpop.f32.mrf.mxu0 }
 0x299   :  { %9435 = vmatmul.msk.bf16.gmra.mxu3 %vm481_vm0, %v12748_v5  ;;  %v13680_v2 = vadd.f32 %v913_v49, %v744_v3 }
 0x29a   :  { %18393 = vst [vmem:[#allocation167_spill] sm:$0xff] %v13675_v36 }
 0x29b   :  { %18394 = vst [vmem:[#allocation168_spill] sm:$0xff] %v13680_v2  ;;  %v18664_v2 = vld [vmem:[#allocation9_spill] sm:$0xff] }
 0x29c   :  { %v1545_v30 = vpop.f32.mrf.mxu3 }
 0x29d   :  { %v13682_v0 = vadd.f32 %v1545_v30, %v1376_v34  ;;  %v1378_v51 = vpop.f32.mrf.mxu1 }
 0x29f   :  { %v1082_v31 = vpop.f32.mrf.mxu2 }
 0x2a0   :  { %v13686_v52 = vadd.f32 %v1251_v35, %v1082_v31  ;;  %v1709_v17 = vpop.f32.mrf.mxu0 }
 0x2a2   :  { %18395 = vst [vmem:[#allocation169_spill] sm:$0xff] %v13686_v52 }
 0x2a3   :  { %1748 = vmatmul.bf16.gmra.mxu0 %v12760_v11 }
 0x2a4   :  { %v1547_v46 = vpop.f32.mrf.mxu3  ;;  %9466 = vmatmul.msk.bf16.gmra.mxu2 %vm481_vm0, %v12726_v57 }
 0x2a5   :  { %v13691_v36 = vadd.f32 %v1547_v46, %v1378_v51  ;;  %v1381_v49 = vpop.f32.mrf.mxu1 }
 0x2a7   :  { %18396 = vst [vmem:[#allocation170_spill] sm:$0xff] %v13691_v36  ;;  %v1878_v3 = vpop.f32.mrf.mxu2 }
 0x2a8   :  { %v13695_v30 = vadd.f32 %v1878_v3, %v1709_v17  ;;  %1420 = vmatmul.bf16.gmra.mxu1 %v12830_v6  ;;  %v1711_v35 = vpop.f32.mrf.mxu0  ;;  %v9532_v17 = vld [vmem:[%s17772_s0 + $0x170] sm:$0xf]  ;;  %v11995_v3 = vld [vmem:[%s17772_s0 + $0x174] sm:$0xf0] }
 0x2a9   :  { %9436 = vmatmul.msk.bf16.gmra.mxu3 %vm481_vm0, %v12772_v20  ;;  %v9533_v31 = vor.u32 %v11995_v3, %v9532_v17 }
 0x2ab   :  { %2276 = vmatpush.bf16.msra.mxu1 %v9533_v31 }
 0x2ac   :  { %v1550_v21 = vpop.f32.mrf.mxu3 }
 0x2ad   :  { %v13702_v52 = vadd.f32 %v1550_v21, %v1381_v49  ;;  %v1383_v51 = vpop.f32.mrf.mxu1 }
 0x2af   :  { %18397 = vst [vmem:[#allocation171_spill] sm:$0xff] %v13702_v52  ;;  %v1880_v34 = vpop.f32.mrf.mxu2 }
 0x2b0   :  { %v13712_v36 = vadd.f32 %v1880_v34, %v1711_v35  ;;  %v1714_v56 = vpop.f32.mrf.mxu0 }
 0x2b3   :  { %1753 = vmatmul.bf16.gmra.mxu0 %v12794_v40 }
 0x2b4   :  { %v1552_v49 = vpop.f32.mrf.mxu3  ;;  %9467 = vmatmul.msk.bf16.gmra.mxu2 %vm481_vm0, %v12748_v5 }
 0x2b5   :  { %v13719_v46 = vadd.f32 %v1552_v49, %v1383_v51  ;;  %v1386_v52 = vpop.f32.mrf.mxu1 }
 0x2b7   :  { %18398 = vst [vmem:[#allocation172_spill] sm:$0xff] %v13719_v46  ;;  %v1883_v34 = vpop.f32.mrf.mxu2 }
 0x2b8   :  { %v13723_v35 = vadd.f32 %v1883_v34, %v1714_v56  ;;  %1425 = vmatmul.bf16.gmra.mxu1 %v12860_v39  ;;  %v1716_v17 = vpop.f32.mrf.mxu0  ;;  %v11994_v56 = vld [vmem:[%s17772_s0 + $0x174] sm:$0xf]  ;;  %v9534_v34 = vld [vmem:[%s17772_s0 + $0x178] sm:$0xf0] }
 0x2b9   :  { %9437 = vmatmul.msk.bf16.gmra.mxu3 %vm481_vm0, %v12808_v50  ;;  %v9537_v31 = vor.u32 %v11994_v56, %v9534_v34 }
 0x2bb   :  { %2614 = vmatpush.bf16.msra.mxu0 %v9537_v31 }
 0x2bc   :  { %v1555_v3 = vpop.f32.mrf.mxu3 }
 0x2bd   :  { %v13730_v21 = vadd.f32 %v1555_v3, %v1386_v52  ;;  %v1388_v51 = vpop.f32.mrf.mxu1 }
 0x2bf   :  { %18399 = vst [vmem:[#allocation173_spill] sm:$0xff] %v13730_v21  ;;  %v1885_v9 = vpop.f32.mrf.mxu2 }
 0x2c0   :  { %v13740_v46 = vadd.f32 %v1885_v9, %v1716_v17  ;;  %v1719_v28 = vpop.f32.mrf.mxu0 }
 0x2c2   :  { %18400 = vst [vmem:[#allocation174_spill] sm:$0xff] %v13740_v46 }
 0x2c3   :  { %1758 = vmatmul.bf16.gmra.mxu0 %v12830_v6 }
 0x2c4   :  { %v1557_v3 = vpop.f32.mrf.mxu3  ;;  %9468 = vmatmul.msk.bf16.gmra.mxu2 %vm481_vm0, %v12772_v20 }
 0x2c5   :  { %v13747_v49 = vadd.f32 %v1557_v3, %v1388_v51  ;;  %v1391_v21 = vpop.f32.mrf.mxu1 }
 0x2c7   :  { %18401 = vst [vmem:[#allocation175_spill] sm:$0xff] %v13747_v49  ;;  %v1888_v9 = vpop.f32.mrf.mxu2 }
 0x2c8   :  { %v13751_v17 = vadd.f32 %v1888_v9, %v1719_v28  ;;  %1430 = vmatmul.bf16.gmra.mxu1 %v12890_v12  ;;  %v1721_v56 = vpop.f32.mrf.mxu0 }
 0x2c9   :  { %9438 = vmatmul.msk.bf16.gmra.mxu3 %vm481_vm0, %v12844_v18 }
 0x2ca   :  { %18402 = vst [vmem:[#allocation176_spill] sm:$0xff] %v13751_v17 }
 0x2cc   :  { %v1560_v34 = vpop.f32.mrf.mxu3 }
 0x2cd   :  { %v13758_v52 = vadd.f32 %v1560_v34, %v1391_v21  ;;  %v1393_v51 = vpop.f32.mrf.mxu1 }
 0x2cf   :  { %18403 = vst [vmem:[#allocation177_spill] sm:$0xff] %v13758_v52  ;;  %v1890_v47 = vpop.f32.mrf.mxu2 }
 0x2d0   :  { %v13762_v49 = vadd.f32 %v1890_v47, %v1721_v56  ;;  %v1724_v28 = vpop.f32.mrf.mxu0  ;;  %v18407_v47 = vld [vmem:[#allocation26_spill] sm:$0xff] }
 0x2d2   :  { %18404 = vst [vmem:[#allocation178_spill] sm:$0xff] %v13762_v49 }
 0x2d3   :  { %1763 = vmatmul.bf16.gmra.mxu0 %v12860_v39 }
 0x2d4   :  { %v1562_v62 = vpop.f32.mrf.mxu3  ;;  %9469 = vmatmul.msk.bf16.gmra.mxu2 %vm481_vm0, %v12808_v50 }
 0x2d5   :  { %v13769_v31 = vadd.f32 %v1562_v62, %v1393_v51  ;;  %v1396_v21 = vpop.f32.mrf.mxu1  ;;  %v18418_v51 = vld [vmem:[#allocation23_spill] sm:$0xff] }
 0x2d7   :  { %18405 = vst [vmem:[#allocation179_spill] sm:$0xff] %v13769_v31  ;;  %v1893_v3 = vpop.f32.mrf.mxu2 }
 0x2d8   :  { %v13773_v52 = vadd.f32 %v1893_v3, %v1724_v28  ;;  %1435 = vmatmul.bf16.gmra.mxu1 %v18407_v47  ;;  %v1726_v56 = vpop.f32.mrf.mxu0 }
 0x2d9   :  { %9439 = vmatmul.msk.bf16.gmra.mxu3 %vm481_vm0, %v18408_v33 }
 0x2da   :  { %18406 = vst [vmem:[#allocation180_spill] sm:$0xff] %v13773_v52 }
 0x2dc   :  { %v1565_v42 = vpop.f32.mrf.mxu3 }
 0x2dd   :  { %v13780_v17 = vadd.f32 %v1565_v42, %v1396_v21  ;;  %v1398_v62 = vpop.f32.mrf.mxu1 }
 0x2df   :  { %18410 = vst [vmem:[#allocation181_spill] sm:$0xff] %v13780_v17  ;;  %v1895_v34 = vpop.f32.mrf.mxu2 }
 0x2e0   :  { %v13784_v31 = vadd.f32 %v1895_v34, %v1726_v56  ;;  %v1729_v3 = vpop.f32.mrf.mxu0  ;;  %v18417_v34 = vld [vmem:[#allocation32_spill] sm:$0xff] }
 0x2e2   :  { %18412 = vst [vmem:[#allocation182_spill] sm:$0xff] %v13784_v31 }
 0x2e3   :  { %1768 = vmatmul.bf16.gmra.mxu0 %v12890_v12 }
 0x2e4   :  { %v1567_v46 = vpop.f32.mrf.mxu3  ;;  %9470 = vmatmul.msk.bf16.gmra.mxu2 %vm481_vm0, %v12844_v18 }
 0x2e5   :  { %v13791_v49 = vadd.f32 %v1567_v46, %v1398_v62  ;;  %v1401_v42 = vpop.f32.mrf.mxu1 }
 0x2e7   :  { %18414 = vst [vmem:[#allocation183_spill] sm:$0xff] %v13791_v49  ;;  %v1898_v25 = vpop.f32.mrf.mxu2 }
 0x2e8   :  { %v13795_v17 = vadd.f32 %v1898_v25, %v1729_v3  ;;  %1440 = vmatmul.bf16.gmra.mxu1 %v18417_v34  ;;  %v1731_v56 = vpop.f32.mrf.mxu0  ;;  %v9524_v25 = vld [vmem:[%s17772_s0 + $0x160] sm:$0xf]  ;;  %v11993_v3 = vld [vmem:[%s17772_s0 + $0x164] sm:$0xf0] }
 0x2e9   :  { %9440 = vmatmul.msk.bf16.gmra.mxu3 %vm481_vm0, %v18418_v51  ;;  %v9525_v31 = vor.u32 %v11993_v3, %v9524_v25  ;;  %v18427_v25 = vld [vmem:[#allocation38_spill] sm:$0xff] }
 0x2ea   :  { %18416 = vst [vmem:[#allocation184_spill] sm:$0xff] %v13795_v17 }
 0x2eb   :  { %2277 = vmatpush.bf16.msra.mxu1 %v9525_v31 }
 0x2ec   :  { %v1570_v28 = vpop.f32.mrf.mxu3 }
 0x2ed   :  { %v13802_v9 = vadd.f32 %v1570_v28, %v1401_v42  ;;  %v1403_v46 = vpop.f32.mrf.mxu1  ;;  %v18428_v42 = vld [vmem:[#allocation29_spill] sm:$0xff] }
 0x2ef   :  { %18420 = vst [vmem:[#allocation185_spill] sm:$0xff] %v13802_v9  ;;  %v1900_v52 = vpop.f32.mrf.mxu2 }
 0x2f0   :  { %v13812_v49 = vadd.f32 %v1900_v52, %v1731_v56  ;;  %v1734_v21 = vpop.f32.mrf.mxu0 }
 0x2f2   :  { %18422 = vst [vmem:[#allocation186_spill] sm:$0xff] %v13812_v49 }
 0x2f3   :  { %1773 = vmatmul.bf16.gmra.mxu0 %v18407_v47 }
 0x2f4   :  { %v1572_v18 = vpop.f32.mrf.mxu3  ;;  %9471 = vmatmul.msk.bf16.gmra.mxu2 %vm481_vm0, %v18408_v33 }
 0x2f5   :  { %v13819_v9 = vadd.f32 %v1572_v18, %v1403_v46  ;;  %v1406_v62 = vpop.f32.mrf.mxu1 }
 0x2f7   :  { %18424 = vst [vmem:[#allocation187_spill] sm:$0xff] %v13819_v9  ;;  %v1903_v52 = vpop.f32.mrf.mxu2 }
 0x2f8   :  { %v13823_v56 = vadd.f32 %v1903_v52, %v1734_v21  ;;  %1445 = vmatmul.bf16.gmra.mxu1 %v18427_v25  ;;  %v1736_v3 = vpop.f32.mrf.mxu0  ;;  %v11992_v21 = vld [vmem:[%s17772_s0 + $0x164] sm:$0xf]  ;;  %v9526_v52 = vld [vmem:[%s17772_s0 + $0x168] sm:$0xf0] }
 0x2f9   :  { %9441 = vmatmul.msk.bf16.gmra.mxu3 %vm481_vm0, %v18428_v42  ;;  %v9529_v49 = vor.u32 %v11992_v21, %v9526_v52  ;;  %v18437_v21 = vld [vmem:[#allocation44_spill] sm:$0xff] }
 0x2fa   :  { %18426 = vst [vmem:[#allocation188_spill] sm:$0xff] %v13823_v56 }
 0x2fb   :  { %2615 = vmatpush.bf16.msra.mxu0 %v9529_v49 }
 0x2fc   :  { %v1575_v28 = vpop.f32.mrf.mxu3 }
 0x2fd   :  { %v13830_v33 = vadd.f32 %v1575_v28, %v1406_v62  ;;  %v1408_v18 = vpop.f32.mrf.mxu1  ;;  %v18438_v28 = vld [vmem:[#allocation35_spill] sm:$0xff] }
 0x2ff   :  { %18430 = vst [vmem:[#allocation189_spill] sm:$0xff] %v13830_v33  ;;  %v1905_v60 = vpop.f32.mrf.mxu2 }
 0x300   :  { %v13840_v9 = vadd.f32 %v1905_v60, %v1736_v3  ;;  %v1739_v17 = vpop.f32.mrf.mxu0 }
 0x302   :  { %18432 = vst [vmem:[#allocation190_spill] sm:$0xff] %v13840_v9 }
 0x303   :  { %1778 = vmatmul.bf16.gmra.mxu0 %v18417_v34 }
 0x304   :  { %v1577_v47 = vpop.f32.mrf.mxu3  ;;  %9472 = vmatmul.msk.bf16.gmra.mxu2 %vm481_vm0, %v18418_v51 }
 0x305   :  { %v13847_v33 = vadd.f32 %v1577_v47, %v1408_v18  ;;  %v1411_v46 = vpop.f32.mrf.mxu1  ;;  %v18448_v18 = vld [vmem:[#allocation41_spill] sm:$0xff] }
 0x307   :  { %18434 = vst [vmem:[#allocation191_spill] sm:$0xff] %v13847_v33  ;;  %v1908_v60 = vpop.f32.mrf.mxu2 }
 0x308   :  { %v13851_v3 = vadd.f32 %v1908_v60, %v1739_v17  ;;  %1450 = vmatmul.bf16.gmra.mxu1 %v18437_v21  ;;  %v1741_v52 = vpop.f32.mrf.mxu0 }
 0x309   :  { %9442 = vmatmul.msk.bf16.gmra.mxu3 %vm481_vm0, %v18438_v28 }
 0x30a   :  { %18436 = vst [vmem:[#allocation192_spill] sm:$0xff] %v13851_v3 }
 0x30c   :  { %v1580_v62 = vpop.f32.mrf.mxu3 }
 0x30d   :  { %v13858_v51 = vadd.f32 %v1580_v62, %v1411_v46  ;;  %v1413_v47 = vpop.f32.mrf.mxu1 }
 0x30f   :  { %18440 = vst [vmem:[#allocation193_spill] sm:$0xff] %v13858_v51  ;;  %v1910_v31 = vpop.f32.mrf.mxu2 }
 0x310   :  { %v13862_v33 = vadd.f32 %v1910_v31, %v1741_v52  ;;  %v1744_v17 = vpop.f32.mrf.mxu0  ;;  %v18447_v31 = vld [vmem:[#allocation50_spill] sm:$0xff] }
 0x312   :  { %18442 = vst [vmem:[#allocation194_spill] sm:$0xff] %v13862_v33 }
 0x313   :  { %1783 = vmatmul.bf16.gmra.mxu0 %v18427_v25 }
 0x314   :  { %v1582_v12 = vpop.f32.mrf.mxu3  ;;  %9473 = vmatmul.msk.bf16.gmra.mxu2 %vm481_vm0, %v18428_v42 }
 0x315   :  { %v13869_v9 = vadd.f32 %v1582_v12, %v1413_v47  ;;  %v1416_v46 = vpop.f32.mrf.mxu1  ;;  %v18458_v47 = vld [vmem:[#allocation47_spill] sm:$0xff] }
 0x317   :  { %18444 = vst [vmem:[#allocation195_spill] sm:$0xff] %v13869_v9  ;;  %v1913_v34 = vpop.f32.mrf.mxu2 }
 0x318   :  { %v13873_v51 = vadd.f32 %v1913_v34, %v1744_v17  ;;  %1455 = vmatmul.bf16.gmra.mxu1 %v18447_v31  ;;  %v1746_v52 = vpop.f32.mrf.mxu0 }
 0x319   :  { %9443 = vmatmul.msk.bf16.gmra.mxu3 %vm481_vm0, %v18448_v18 }
 0x31a   :  { %18446 = vst [vmem:[#allocation196_spill] sm:$0xff] %v13873_v51 }
 0x31c   :  { %v1585_v60 = vpop.f32.mrf.mxu3 }
 0x31d   :  { %v13880_v49 = vadd.f32 %v1585_v60, %v1416_v46  ;;  %v1418_v12 = vpop.f32.mrf.mxu1 }
 0x31f   :  { %18450 = vst [vmem:[#allocation197_spill] sm:$0xff] %v13880_v49  ;;  %v1915_v3 = vpop.f32.mrf.mxu2 }
 0x320   :  { %v13884_v9 = vadd.f32 %v1915_v3, %v1746_v52  ;;  %v1749_v34 = vpop.f32.mrf.mxu0  ;;  %v18457_v3 = vld [vmem:[#allocation56_spill] sm:$0xff] }
 0x322   :  { %18452 = vst [vmem:[#allocation198_spill] sm:$0xff] %v13884_v9 }
 0x323   :  { %1788 = vmatmul.bf16.gmra.mxu0 %v18437_v21 }
 0x324   :  { %v1587_v25 = vpop.f32.mrf.mxu3  ;;  %9474 = vmatmul.msk.bf16.gmra.mxu2 %vm481_vm0, %v18438_v28 }
 0x325   :  { %v13891_v33 = vadd.f32 %v1587_v25, %v1418_v12  ;;  %v1421_v60 = vpop.f32.mrf.mxu1 }
 0x327   :  { %18454 = vst [vmem:[#allocation199_spill] sm:$0xff] %v13891_v33  ;;  %v1918_v42 = vpop.f32.mrf.mxu2 }
 0x328   :  { %v13895_v49 = vadd.f32 %v1918_v42, %v1749_v34  ;;  %1460 = vmatmul.bf16.gmra.mxu1 %v18457_v3  ;;  %v1751_v52 = vpop.f32.mrf.mxu0  ;;  %v9516_v42 = vld [vmem:[%s17772_s0 + $0x150] sm:$0xf]  ;;  %v11991_v34 = vld [vmem:[%s17772_s0 + $0x154] sm:$0xf0] }
 0x329   :  { %9444 = vmatmul.msk.bf16.gmra.mxu3 %vm481_vm0, %v18458_v47  ;;  %v9517_v9 = vor.u32 %v11991_v34, %v9516_v42  ;;  %v18467_v42 = vld [vmem:[#allocation62_spill] sm:$0xff] }
 0x32a   :  { %18456 = vst [vmem:[#allocation200_spill] sm:$0xff] %v13895_v49 }
 0x32b   :  { %2278 = vmatpush.bf16.msra.mxu1 %v9517_v9 }
 0x32c   :  { %v1590_v17 = vpop.f32.mrf.mxu3 }
 0x32d   :  { %v13902_v56 = vadd.f32 %v1590_v17, %v1421_v60  ;;  %v1423_v25 = vpop.f32.mrf.mxu1  ;;  %v18468_v60 = vld [vmem:[#allocation53_spill] sm:$0xff] }
 0x32f   :  { %18460 = vst [vmem:[#allocation201_spill] sm:$0xff] %v13902_v56  ;;  %v1920_v51 = vpop.f32.mrf.mxu2 }
 0x330   :  { %v13912_v33 = vadd.f32 %v1920_v51, %v1751_v52  ;;  %v1754_v46 = vpop.f32.mrf.mxu0 }
 0x332   :  { %18462 = vst [vmem:[#allocation202_spill] sm:$0xff] %v13912_v33 }
 0x333   :  { %1793 = vmatmul.bf16.gmra.mxu0 %v18447_v31 }
 0x334   :  { %v1592_v28 = vpop.f32.mrf.mxu3  ;;  %9475 = vmatmul.msk.bf16.gmra.mxu2 %vm481_vm0, %v18448_v18 }
 0x335   :  { %v13919_v56 = vadd.f32 %v1592_v28, %v1423_v25  ;;  %v1426_v12 = vpop.f32.mrf.mxu1 }
 0x337   :  { %18464 = vst [vmem:[#allocation203_spill] sm:$0xff] %v13919_v56  ;;  %v1923_v51 = vpop.f32.mrf.mxu2 }
 0x338   :  { %v13923_v52 = vadd.f32 %v1923_v51, %v1754_v46  ;;  %1465 = vmatmul.bf16.gmra.mxu1 %v18467_v42  ;;  %v1756_v34 = vpop.f32.mrf.mxu0  ;;  %v11990_v46 = vld [vmem:[%s17772_s0 + $0x154] sm:$0xf]  ;;  %v9518_v51 = vld [vmem:[%s17772_s0 + $0x158] sm:$0xf0] }
 0x339   :  { %9445 = vmatmul.msk.bf16.gmra.mxu3 %vm481_vm0, %v18468_v60  ;;  %v9521_v33 = vor.u32 %v11990_v46, %v9518_v51  ;;  %v18477_v46 = vld [vmem:[#allocation68_spill] sm:$0xff] }
 0x33a   :  { %18466 = vst [vmem:[#allocation204_spill] sm:$0xff] %v13923_v52 }
 0x33b   :  { %2616 = vmatpush.bf16.msra.mxu0 %v9521_v33 }
 0x33c   :  { %v1595_v17 = vpop.f32.mrf.mxu3 }
 0x33d   :  { %v13930_v18 = vadd.f32 %v1595_v17, %v1426_v12  ;;  %v1428_v28 = vpop.f32.mrf.mxu1  ;;  %v18478_v17 = vld [vmem:[#allocation59_spill] sm:$0xff] }
 0x33f   :  { %18470 = vst [vmem:[#allocation205_spill] sm:$0xff] %v13930_v18  ;;  %v1925_v62 = vpop.f32.mrf.mxu2 }
 0x340   :  { %v13940_v56 = vadd.f32 %v1925_v62, %v1756_v34  ;;  %v1759_v49 = vpop.f32.mrf.mxu0 }
 0x342   :  { %18472 = vst [vmem:[#allocation206_spill] sm:$0xff] %v13940_v56 }
 0x343   :  { %1798 = vmatmul.bf16.gmra.mxu0 %v18457_v3 }
 0x344   :  { %v1597_v31 = vpop.f32.mrf.mxu3  ;;  %9476 = vmatmul.msk.bf16.gmra.mxu2 %vm481_vm0, %v18458_v47 }
 0x345   :  { %v13947_v18 = vadd.f32 %v1597_v31, %v1428_v28  ;;  %v1431_v25 = vpop.f32.mrf.mxu1  ;;  %v18488_v28 = vld [vmem:[#allocation65_spill] sm:$0xff] }
 0x347   :  { %18474 = vst [vmem:[#allocation207_spill] sm:$0xff] %v13947_v18  ;;  %v1928_v62 = vpop.f32.mrf.mxu2 }
 0x348   :  { %v13951_v34 = vadd.f32 %v1928_v62, %v1759_v49  ;;  %1470 = vmatmul.bf16.gmra.mxu1 %v18477_v46  ;;  %v1761_v51 = vpop.f32.mrf.mxu0 }
 0x349   :  { %9446 = vmatmul.msk.bf16.gmra.mxu3 %vm481_vm0, %v18478_v17 }
 0x34a   :  { %18476 = vst [vmem:[#allocation208_spill] sm:$0xff] %v13951_v34 }
 0x34c   :  { %v1600_v12 = vpop.f32.mrf.mxu3 }
 0x34d   :  { %v13958_v47 = vadd.f32 %v1600_v12, %v1431_v25  ;;  %v1433_v31 = vpop.f32.mrf.mxu1 }
 0x34f   :  { %18480 = vst [vmem:[#allocation209_spill] sm:$0xff] %v13958_v47  ;;  %v1930_v9 = vpop.f32.mrf.mxu2 }
 0x350   :  { %v13962_v18 = vadd.f32 %v1930_v9, %v1761_v51  ;;  %v1764_v49 = vpop.f32.mrf.mxu0  ;;  %v18487_v9 = vld [vmem:[#allocation74_spill] sm:$0xff] }
 0x352   :  { %18482 = vst [vmem:[#allocation210_spill] sm:$0xff] %v13962_v18 }
 0x353   :  { %1803 = vmatmul.bf16.gmra.mxu0 %v18467_v42 }
 0x354   :  { %v1602_v21 = vpop.f32.mrf.mxu3  ;;  %9477 = vmatmul.msk.bf16.gmra.mxu2 %vm481_vm0, %v18468_v60 }
 0x355   :  { %v13969_v56 = vadd.f32 %v1602_v21, %v1433_v31  ;;  %v1436_v25 = vpop.f32.mrf.mxu1  ;;  %v18498_v31 = vld [vmem:[#allocation71_spill] sm:$0xff] }
 0x357   :  { %18484 = vst [vmem:[#allocation211_spill] sm:$0xff] %v13969_v56  ;;  %v1933_v3 = vpop.f32.mrf.mxu2 }
 0x358   :  { %v13973_v47 = vadd.f32 %v1933_v3, %v1764_v49  ;;  %1475 = vmatmul.bf16.gmra.mxu1 %v18487_v9  ;;  %v1766_v51 = vpop.f32.mrf.mxu0 }
 0x359   :  { %9447 = vmatmul.msk.bf16.gmra.mxu3 %vm481_vm0, %v18488_v28 }
 0x35a   :  { %18486 = vst [vmem:[#allocation212_spill] sm:$0xff] %v13973_v47 }
 0x35c   :  { %v1605_v62 = vpop.f32.mrf.mxu3 }
 0x35d   :  { %v13980_v33 = vadd.f32 %v1605_v62, %v1436_v25  ;;  %v1438_v21 = vpop.f32.mrf.mxu1 }
 0x35f   :  { %18490 = vst [vmem:[#allocation213_spill] sm:$0xff] %v13980_v33  ;;  %v1935_v34 = vpop.f32.mrf.mxu2 }
 0x360   :  { %v13984_v56 = vadd.f32 %v1935_v34, %v1766_v51  ;;  %v1769_v3 = vpop.f32.mrf.mxu0  ;;  %v18497_v34 = vld [vmem:[#allocation80_spill] sm:$0xff] }
 0x362   :  { %18492 = vst [vmem:[#allocation214_spill] sm:$0xff] %v13984_v56 }
 0x363   :  { %1808 = vmatmul.bf16.gmra.mxu0 %v18477_v46 }
 0x364   :  { %v1607_v42 = vpop.f32.mrf.mxu3  ;;  %9478 = vmatmul.msk.bf16.gmra.mxu2 %vm481_vm0, %v18478_v17 }
 0x365   :  { %v13991_v18 = vadd.f32 %v1607_v42, %v1438_v21  ;;  %v1441_v62 = vpop.f32.mrf.mxu1 }
 0x367   :  { %18494 = vst [vmem:[#allocation215_spill] sm:$0xff] %v13991_v18  ;;  %v1938_v60 = vpop.f32.mrf.mxu2 }
 0x368   :  { %v13995_v33 = vadd.f32 %v1938_v60, %v1769_v3  ;;  %1480 = vmatmul.bf16.gmra.mxu1 %v18497_v34  ;;  %v1771_v51 = vpop.f32.mrf.mxu0  ;;  %v9508_v60 = vld [vmem:[%s17772_s0 + $0x140] sm:$0xf]  ;;  %v11989_v3 = vld [vmem:[%s17772_s0 + $0x144] sm:$0xf0] }
 0x369   :  { %9448 = vmatmul.msk.bf16.gmra.mxu3 %vm481_vm0, %v18498_v31  ;;  %v9509_v56 = vor.u32 %v11989_v3, %v9508_v60  ;;  %v18507_v60 = vld [vmem:[#allocation86_spill] sm:$0xff] }
 0x36a   :  { %18496 = vst [vmem:[#allocation216_spill] sm:$0xff] %v13995_v33 }
 0x36b   :  { %2279 = vmatpush.bf16.msra.mxu1 %v9509_v56 }
 0x36c   :  { %v1610_v49 = vpop.f32.mrf.mxu3 }
 0x36d   :  { %v14002_v52 = vadd.f32 %v1610_v49, %v1441_v62  ;;  %v1443_v42 = vpop.f32.mrf.mxu1  ;;  %v18508_v62 = vld [vmem:[#allocation77_spill] sm:$0xff] }
 0x36f   :  { %18500 = vst [vmem:[#allocation217_spill] sm:$0xff] %v14002_v52  ;;  %v1940_v47 = vpop.f32.mrf.mxu2 }
 0x370   :  { %v14012_v18 = vadd.f32 %v1940_v47, %v1771_v51  ;;  %v1774_v25 = vpop.f32.mrf.mxu0 }
 0x372   :  { %18502 = vst [vmem:[#allocation218_spill] sm:$0xff] %v14012_v18 }
 0x373   :  { %1813 = vmatmul.bf16.gmra.mxu0 %v18487_v9 }
 0x374   :  { %v1612_v17 = vpop.f32.mrf.mxu3  ;;  %9479 = vmatmul.msk.bf16.gmra.mxu2 %vm481_vm0, %v18488_v28 }
 0x375   :  { %v14019_v52 = vadd.f32 %v1612_v17, %v1443_v42  ;;  %v1446_v21 = vpop.f32.mrf.mxu1 }
 0x377   :  { %18504 = vst [vmem:[#allocation219_spill] sm:$0xff] %v14019_v52  ;;  %v1943_v47 = vpop.f32.mrf.mxu2 }
 0x378   :  { %v14023_v51 = vadd.f32 %v1943_v47, %v1774_v25  ;;  %1485 = vmatmul.bf16.gmra.mxu1 %v18507_v60  ;;  %v1776_v3 = vpop.f32.mrf.mxu0  ;;  %v11988_v25 = vld [vmem:[%s17772_s0 + $0x144] sm:$0xf]  ;;  %v9510_v47 = vld [vmem:[%s17772_s0 + $0x148] sm:$0xf0] }
 0x379   :  { %9449 = vmatmul.msk.bf16.gmra.mxu3 %vm481_vm0, %v18508_v62  ;;  %v9513_v18 = vor.u32 %v11988_v25, %v9510_v47  ;;  %v18517_v25 = vld [vmem:[#allocation92_spill] sm:$0xff] }
 0x37a   :  { %18506 = vst [vmem:[#allocation220_spill] sm:$0xff] %v14023_v51 }
 0x37b   :  { %2617 = vmatpush.bf16.msra.mxu0 %v9513_v18 }
 0x37c   :  { %v1615_v49 = vpop.f32.mrf.mxu3 }
 0x37d   :  { %v14030_v28 = vadd.f32 %v1615_v49, %v1446_v21  ;;  %v1448_v17 = vpop.f32.mrf.mxu1  ;;  %v18518_v49 = vld [vmem:[#allocation83_spill] sm:$0xff] }
 0x37f   :  { %18510 = vst [vmem:[#allocation221_spill] sm:$0xff] %v14030_v28  ;;  %v1945_v12 = vpop.f32.mrf.mxu2 }
 0x380   :  { %v14040_v52 = vadd.f32 %v1945_v12, %v1776_v3  ;;  %v1779_v33 = vpop.f32.mrf.mxu0 }
 0x382   :  { %18512 = vst [vmem:[#allocation222_spill] sm:$0xff] %v14040_v52 }
 0x383   :  { %1818 = vmatmul.bf16.gmra.mxu0 %v18497_v34 }
 0x384   :  { %v1617_v9 = vpop.f32.mrf.mxu3  ;;  %9480 = vmatmul.msk.bf16.gmra.mxu2 %vm481_vm0, %v18498_v31 }
 0x385   :  { %v14047_v28 = vadd.f32 %v1617_v9, %v1448_v17  ;;  %v1451_v42 = vpop.f32.mrf.mxu1  ;;  %v18528_v17 = vld [vmem:[#allocation89_spill] sm:$0xff] }
 0x387   :  { %18514 = vst [vmem:[#allocation223_spill] sm:$0xff] %v14047_v28  ;;  %v1948_v12 = vpop.f32.mrf.mxu2 }
 0x388   :  { %v14051_v3 = vadd.f32 %v1948_v12, %v1779_v33  ;;  %1490 = vmatmul.bf16.gmra.mxu1 %v18517_v25  ;;  %v1781_v47 = vpop.f32.mrf.mxu0 }
 0x389   :  { %9450 = vmatmul.msk.bf16.gmra.mxu3 %vm481_vm0, %v18518_v49 }
 0x38a   :  { %18516 = vst [vmem:[#allocation224_spill] sm:$0xff] %v14051_v3 }
 0x38c   :  { %v1620_v21 = vpop.f32.mrf.mxu3 }
 0x38d   :  { %v14058_v31 = vadd.f32 %v1620_v21, %v1451_v42  ;;  %v1453_v9 = vpop.f32.mrf.mxu1 }
 0x38f   :  { %18520 = vst [vmem:[#allocation225_spill] sm:$0xff] %v14058_v31  ;;  %v1950_v56 = vpop.f32.mrf.mxu2 }
 0x390   :  { %v14062_v28 = vadd.f32 %v1950_v56, %v1781_v47  ;;  %v1784_v33 = vpop.f32.mrf.mxu0  ;;  %v18527_v56 = vld [vmem:[#allocation98_spill] sm:$0xff] }
 0x392   :  { %18522 = vst [vmem:[#allocation226_spill] sm:$0xff] %v14062_v28 }
 0x393   :  { %1823 = vmatmul.bf16.gmra.mxu0 %v18507_v60 }
 0x394   :  { %v1622_v46 = vpop.f32.mrf.mxu3  ;;  %9481 = vmatmul.msk.bf16.gmra.mxu2 %vm481_vm0, %v18508_v62 }
 0x395   :  { %v14069_v52 = vadd.f32 %v1622_v46, %v1453_v9  ;;  %v1456_v42 = vpop.f32.mrf.mxu1  ;;  %v18538_v9 = vld [vmem:[#allocation95_spill] sm:$0xff] }
 0x397   :  { %18524 = vst [vmem:[#allocation227_spill] sm:$0xff] %v14069_v52  ;;  %v1953_v34 = vpop.f32.mrf.mxu2 }
 0x398   :  { %v14073_v31 = vadd.f32 %v1953_v34, %v1784_v33  ;;  %1495 = vmatmul.bf16.gmra.mxu1 %v18527_v56  ;;  %v1786_v47 = vpop.f32.mrf.mxu0 }
 0x399   :  { %9451 = vmatmul.msk.bf16.gmra.mxu3 %vm481_vm0, %v18528_v17 }
 0x39a   :  { %18526 = vst [vmem:[#allocation228_spill] sm:$0xff] %v14073_v31 }
 0x39c   :  { %v1625_v12 = vpop.f32.mrf.mxu3 }
 0x39d   :  { %v14080_v18 = vadd.f32 %v1625_v12, %v1456_v42  ;;  %v1458_v46 = vpop.f32.mrf.mxu1 }
 0x39f   :  { %18530 = vst [vmem:[#allocation229_spill] sm:$0xff] %v14080_v18  ;;  %v1955_v3 = vpop.f32.mrf.mxu2 }
 0x3a0   :  { %v14084_v52 = vadd.f32 %v1955_v3, %v1786_v47  ;;  %v1789_v34 = vpop.f32.mrf.mxu0  ;;  %v18537_v3 = vld [vmem:[#allocation104_spill] sm:$0xff] }
 0x3a2   :  { %18532 = vst [vmem:[#allocation230_spill] sm:$0xff] %v14084_v52 }
 0x3a3   :  { %1828 = vmatmul.bf16.gmra.mxu0 %v18517_v25 }
 0x3a4   :  { %v1627_v60 = vpop.f32.mrf.mxu3  ;;  %9482 = vmatmul.msk.bf16.gmra.mxu2 %vm481_vm0, %v18518_v49 }
 0x3a5   :  { %v14091_v28 = vadd.f32 %v1627_v60, %v1458_v46  ;;  %v1461_v12 = vpop.f32.mrf.mxu1 }
 0x3a7   :  { %18534 = vst [vmem:[#allocation231_spill] sm:$0xff] %v14091_v28  ;;  %v1958_v62 = vpop.f32.mrf.mxu2 }
 0x3a8   :  { %v14095_v18 = vadd.f32 %v1958_v62, %v1789_v34  ;;  %1500 = vmatmul.bf16.gmra.mxu1 %v18537_v3  ;;  %v1791_v47 = vpop.f32.mrf.mxu0  ;;  %v9500_v62 = vld [vmem:[%s17772_s0 + $0x130] sm:$0xf]  ;;  %v11987_v34 = vld [vmem:[%s17772_s0 + $0x134] sm:$0xf0] }
 0x3a9   :  { %9452 = vmatmul.msk.bf16.gmra.mxu3 %vm481_vm0, %v18538_v9  ;;  %v9501_v52 = vor.u32 %v11987_v34, %v9500_v62  ;;  %v18547_v62 = vld [vmem:[#allocation110_spill] sm:$0xff] }
 0x3aa   :  { %18536 = vst [vmem:[#allocation232_spill] sm:$0xff] %v14095_v18 }
 0x3ab   :  { %2280 = vmatpush.bf16.msra.mxu1 %v9501_v52 }
 0x3ac   :  { %v1630_v33 = vpop.f32.mrf.mxu3 }
 0x3ad   :  { %v14102_v51 = vadd.f32 %v1630_v33, %v1461_v12  ;;  %v1463_v60 = vpop.f32.mrf.mxu1  ;;  %v18548_v12 = vld [vmem:[#allocation101_spill] sm:$0xff] }
 0x3af   :  { %18540 = vst [vmem:[#allocation233_spill] sm:$0xff] %v14102_v51  ;;  %v1960_v31 = vpop.f32.mrf.mxu2 }
 0x3b0   :  { %v14112_v28 = vadd.f32 %v1960_v31, %v1791_v47  ;;  %v1794_v42 = vpop.f32.mrf.mxu0 }
 0x3b2   :  { %18542 = vst [vmem:[#allocation234_spill] sm:$0xff] %v14112_v28 }
 0x3b3   :  { %1833 = vmatmul.bf16.gmra.mxu0 %v18527_v56 }
 0x3b4   :  { %v1632_v49 = vpop.f32.mrf.mxu3  ;;  %9483 = vmatmul.msk.bf16.gmra.mxu2 %vm481_vm0, %v18528_v17 }
 0x3b5   :  { %v14119_v51 = vadd.f32 %v1632_v49, %v1463_v60  ;;  %v1466_v46 = vpop.f32.mrf.mxu1 }
 0x3b7   :  { %18544 = vst [vmem:[#allocation235_spill] sm:$0xff] %v14119_v51  ;;  %v1963_v31 = vpop.f32.mrf.mxu2 }
 0x3b8   :  { %v14123_v47 = vadd.f32 %v1963_v31, %v1794_v42  ;;  %1505 = vmatmul.bf16.gmra.mxu1 %v18547_v62  ;;  %v1796_v34 = vpop.f32.mrf.mxu0  ;;  %v11986_v42 = vld [vmem:[%s17772_s0 + $0x134] sm:$0xf]  ;;  %v9502_v31 = vld [vmem:[%s17772_s0 + $0x138] sm:$0xf0] }
 0x3b9   :  { %9453 = vmatmul.msk.bf16.gmra.mxu3 %vm481_vm0, %v18548_v12  ;;  %v9505_v28 = vor.u32 %v11986_v42, %v9502_v31  ;;  %v18557_v42 = vld [vmem:[#allocation116_spill] sm:$0xff] }
 0x3ba   :  { %18546 = vst [vmem:[#allocation236_spill] sm:$0xff] %v14123_v47 }
 0x3bb   :  { %2618 = vmatpush.bf16.msra.mxu0 %v9505_v28 }
 0x3bc   :  { %v1635_v33 = vpop.f32.mrf.mxu3 }
 0x3bd   :  { %v14130_v17 = vadd.f32 %v1635_v33, %v1466_v46  ;;  %v1468_v49 = vpop.f32.mrf.mxu1  ;;  %v18558_v33 = vld [vmem:[#allocation107_spill] sm:$0xff] }
 0x3bf   :  { %18550 = vst [vmem:[#allocation110_spill] sm:$0xff] %v14130_v17  ;;  %v1965_v21 = vpop.f32.mrf.mxu2 }
 0x3c0   :  { %v14140_v51 = vadd.f32 %v1965_v21, %v1796_v34  ;;  %v1799_v18 = vpop.f32.mrf.mxu0 }
 0x3c2   :  { %18552 = vst [vmem:[#allocation237_spill] sm:$0xff] %v14140_v51 }
 0x3c3   :  { %1838 = vmatmul.bf16.gmra.mxu0 %v18537_v3 }
 0x3c4   :  { %v1637_v56 = vpop.f32.mrf.mxu3  ;;  %9484 = vmatmul.msk.bf16.gmra.mxu2 %vm481_vm0, %v18538_v9 }
 0x3c5   :  { %v14147_v17 = vadd.f32 %v1637_v56, %v1468_v49  ;;  %v1471_v60 = vpop.f32.mrf.mxu1  ;;  %v18568_v49 = vld [vmem:[#allocation113_spill] sm:$0xff] }
 0x3c7   :  { %18554 = vst [vmem:[#allocation238_spill] sm:$0xff] %v14147_v17  ;;  %v1968_v21 = vpop.f32.mrf.mxu2 }
 0x3c8   :  { %v14151_v34 = vadd.f32 %v1968_v21, %v1799_v18  ;;  %1510 = vmatmul.bf16.gmra.mxu1 %v18557_v42  ;;  %v1801_v31 = vpop.f32.mrf.mxu0 }
 0x3c9   :  { %9454 = vmatmul.msk.bf16.gmra.mxu3 %vm481_vm0, %v18558_v33 }
 0x3ca   :  { %18556 = vst [vmem:[#allocation239_spill] sm:$0xff] %v14151_v34 }
 0x3cc   :  { %v1640_v46 = vpop.f32.mrf.mxu3 }
 0x3cd   :  { %v14158_v9 = vadd.f32 %v1640_v46, %v1471_v60  ;;  %v1473_v56 = vpop.f32.mrf.mxu1 }
 0x3cf   :  { %18560 = vst [vmem:[#allocation240_spill] sm:$0xff] %v14158_v9  ;;  %v1970_v52 = vpop.f32.mrf.mxu2 }
 0x3d0   :  { %v14162_v17 = vadd.f32 %v1970_v52, %v1801_v31  ;;  %v1804_v18 = vpop.f32.mrf.mxu0  ;;  %v18567_v52 = vld [vmem:[#allocation122_spill] sm:$0xff] }
 0x3d2   :  { %18562 = vst [vmem:[#allocation241_spill] sm:$0xff] %v14162_v17  ;;  %v9492_v17 = vld [vmem:[%s17772_s0 + $0x120] sm:$0xf] }
 0x3d3   :  { %1843 = vmatmul.bf16.gmra.mxu0 %v18547_v62 }
 0x3d4   :  { %v1642_v25 = vpop.f32.mrf.mxu3  ;;  %9485 = vmatmul.msk.bf16.gmra.mxu2 %vm481_vm0, %v18548_v12 }
 0x3d5   :  { %v14169_v51 = vadd.f32 %v1642_v25, %v1473_v56  ;;  %v1476_v60 = vpop.f32.mrf.mxu1 }
 0x3d7   :  { %18564 = vst [vmem:[#allocation242_spill] sm:$0xff] %v14169_v51  ;;  %v1973_v3 = vpop.f32.mrf.mxu2 }
 0x3d8   :  { %v14173_v9 = vadd.f32 %v1973_v3, %v1804_v18  ;;  %1515 = vmatmul.bf16.gmra.mxu1 %v18567_v52  ;;  %v1806_v31 = vpop.f32.mrf.mxu0 }
 0x3d9   :  { %9455 = vmatmul.msk.bf16.gmra.mxu3 %vm481_vm0, %v18568_v49 }
 0x3da   :  { %18566 = vst [vmem:[#allocation243_spill] sm:$0xff] %v14173_v9  ;;  %v18577_v9 = vld [vmem:[#allocation119_spill] sm:$0xff] }
 0x3dc   :  { %v1645_v21 = vpop.f32.mrf.mxu3 }
 0x3dd   :  { %v14180_v28 = vadd.f32 %v1645_v21, %v1476_v60  ;;  %v1478_v25 = vpop.f32.mrf.mxu1  ;;  %v11985_v21 = vld [vmem:[%s17772_s0 + $0x124] sm:$0xf0] }
 0x3df   :  { %18570 = vst [vmem:[#allocation122_spill] sm:$0xff] %v14180_v28  ;;  %v1975_v34 = vpop.f32.mrf.mxu2 }
 0x3e0   :  { %v14184_v51 = vadd.f32 %v1975_v34, %v1806_v31  ;;  %v1809_v3 = vpop.f32.mrf.mxu0  ;;  %v9493_v34 = vor.u32 %v11985_v21, %v9492_v17 }
 0x3e2   :  { %18572 = vst [vmem:[#allocation244_spill] sm:$0xff] %v14184_v51  ;;  %2281 = vmatpush.bf16.msra.mxu1 %v9493_v34 }
 0x3e3   :  { %1848 = vmatmul.bf16.gmra.mxu0 %v18557_v42 }
 0x3e4   :  { %v1647_v60 = vpop.f32.mrf.mxu3  ;;  %9486 = vmatmul.msk.bf16.gmra.mxu2 %vm481_vm0, %v18558_v33 }
 0x3e5   :  { %v14197_v31 = vadd.f32 %v1647_v60, %v1478_v25  ;;  %v1481_v12 = vpop.f32.mrf.mxu1  ;;  %v18587_v60 = vld [vmem:[#allocation125_spill] sm:$0xff] }
 0x3e7   :  { %18574 = vst [vmem:[#allocation245_spill] sm:$0xff] %v14197_v31  ;;  %v1978_v18 = vpop.f32.mrf.mxu2 }
 0x3e8   :  { %v14201_v28 = vadd.f32 %v1978_v18, %v1809_v3  ;;  %1520 = vmatmul.bf16.gmra.mxu1 %v13490_v22  ;;  %v1811_v56 = vpop.f32.mrf.mxu0 }
 0x3e9   :  { %9456 = vmatmul.msk.bf16.gmra.mxu3 %vm481_vm0, %v18577_v9 }
 0x3ea   :  { %18576 = vst [vmem:[#allocation246_spill] sm:$0xff] %v14201_v28 }
 0x3ec   :  { %v1650_v17 = vpop.f32.mrf.mxu3 }
 0x3ed   :  { %v14208_v25 = vadd.f32 %v1650_v17, %v1481_v12  ;;  %v1483_v21 = vpop.f32.mrf.mxu1 }
 0x3ef   :  { %18579 = vst [vmem:[#allocation247_spill] sm:$0xff] %v14208_v25  ;;  %v1980_v51 = vpop.f32.mrf.mxu2 }
 0x3f0   :  { %v14212_v31 = vadd.f32 %v1980_v51, %v1811_v56  ;;  %v1814_v3 = vpop.f32.mrf.mxu0  ;;  %v18586_v51 = vld [vmem:[#allocation132_spill] sm:$0xff] }
 0x3f2   :  { %18581 = vst [vmem:[#allocation248_spill] sm:$0xff] %v14212_v31 }
 0x3f3   :  { %1853 = vmatmul.bf16.gmra.mxu0 %v18567_v52 }
 0x3f4   :  { %v1652_v42 = vpop.f32.mrf.mxu3  ;;  %9487 = vmatmul.msk.bf16.gmra.mxu2 %vm481_vm0, %v18568_v49 }
 0x3f5   :  { %v14219_v33 = vadd.f32 %v1652_v42, %v1483_v21  ;;  %v1486_v12 = vpop.f32.mrf.mxu1 }
 0x3f7   :  { %18583 = vst [vmem:[#allocation249_spill] sm:$0xff] %v14219_v33  ;;  %v1983_v34 = vpop.f32.mrf.mxu2 }
 0x3f8   :  { %v14223_v25 = vadd.f32 %v1983_v34, %v1814_v3  ;;  %1525 = vmatmul.bf16.gmra.mxu1 %v18586_v51  ;;  %v1816_v56 = vpop.f32.mrf.mxu0  ;;  %v11984_v34 = vld [vmem:[%s17772_s0 + $0x124] sm:$0xf]  ;;  %v9494_v3 = vld [vmem:[%s17772_s0 + $0x128] sm:$0xf0] }
 0x3f9   :  { %9457 = vmatmul.msk.bf16.gmra.mxu3 %vm481_vm0, %v18587_v60  ;;  %v9497_v31 = vor.u32 %v11984_v34, %v9494_v3 }
 0x3fa   :  { %18585 = vst [vmem:[#allocation250_spill] sm:$0xff] %v14223_v25 }
 0x3fb   :  { %2619 = vmatpush.bf16.msra.mxu0 %v9497_v31  ;;  %v18595_v31 = vld [vmem:[#allocation130_spill] sm:$0xff] }
 0x3fc   :  { %v1655_v18 = vpop.f32.mrf.mxu3 }
 0x3fd   :  { %v14230_v47 = vadd.f32 %v1655_v18, %v1486_v12  ;;  %v1488_v42 = vpop.f32.mrf.mxu1 }
 0x3ff   :  { %18589 = vst [vmem:[#allocation132_spill] sm:$0xff] %v14230_v47  ;;  %v1985_v28 = vpop.f32.mrf.mxu2 }
 0x400   :  { %v14240_v33 = vadd.f32 %v1985_v28, %v1816_v56  ;;  %v1819_v17 = vpop.f32.mrf.mxu0 }
 0x402   :  { %18591 = vst [vmem:[#allocation125_spill] sm:$0xff] %v14240_v33 }
 0x403   :  { %1858 = vmatmul.bf16.gmra.mxu0 %v13490_v22 }
 0x404   :  { %v1657_v49 = vpop.f32.mrf.mxu3  ;;  %9488 = vmatmul.msk.bf16.gmra.mxu2 %vm481_vm0, %v18577_v9 }
 0x405   :  { %v14247_v47 = vadd.f32 %v1657_v49, %v1488_v42  ;;  %v1491_v21 = vpop.f32.mrf.mxu1 }
 0x407   :  { %18593 = vst [vmem:[#allocation251_spill] sm:$0xff] %v14247_v47  ;;  %v1988_v28 = vpop.f32.mrf.mxu2 }
 0x408   :  { %v14251_v56 = vadd.f32 %v1988_v28, %v1819_v17  ;;  %2282 = vmatmul.bf16.vlgmr.msra.gmra.mxu1 %v12554_v1  ;;  %v1821_v34 = vpop.f32.mrf.mxu0 }
 0x409   :  { %9562 = vmatmul.msk.bf16.vlgmr.msra.gmra.mxu3 %vm481_vm0, %v12446_v16 }
 0x40a   :  { %18594 = vst [vmem:[#allocation252_spill] sm:$0xff] %v14251_v56 }
 0x40c   :  { %v1660_v12 = vpop.f32.mrf.mxu3 }
 0x40d   :  { %v14258_v33 = vadd.f32 %v1660_v12, %v1491_v21  ;;  %v1493_v49 = vpop.f32.mrf.mxu1 }
 0x40f   :  { %18596 = vst [vmem:[#allocation130_spill] sm:$0xff] %v14258_v33  ;;  %v1990_v25 = vpop.f32.mrf.mxu2 }
 0x410   :  { %v14262_v47 = vadd.f32 %v1990_v25, %v1821_v34  ;;  %v1824_v17 = vpop.f32.mrf.mxu0  ;;  %v9684_v34 = vld [vmem:[%s17772_s0 + $0x220] sm:$0xf] }
 0x412   :  { %18598 = vst [vmem:[#allocation253_spill] sm:$0xff] %v14262_v47 }
 0x413   :  { %1863 = vmatmul.bf16.gmra.mxu0 %v18586_v51 }
 0x414   :  { %v1662_v46 = vpop.f32.mrf.mxu3  ;;  %9489 = vmatmul.msk.bf16.gmra.mxu2 %vm481_vm0, %v18587_v60 }
 0x415   :  { %v14269_v3 = vadd.f32 %v1662_v46, %v1493_v49  ;;  %v1496_v21 = vpop.f32.mrf.mxu1  ;;  %v9692_v46 = vld [vmem:[%s17772_s0 + $0x230] sm:$0xf]  ;;  %v12019_v49 = vld [vmem:[%s17772_s0 + $0x234] sm:$0xf0] }
 0x416   :  { %v9693_v12 = vor.u32 %v12019_v49, %v9692_v46 }
 0x417   :  { %18600 = vst [vmem:[#allocation254_spill] sm:$0xff] %v14269_v3  ;;  %v1993_v18 = vpop.f32.mrf.mxu2 }
 0x418   :  { %v14273_v33 = vadd.f32 %v1993_v18, %v1824_v17  ;;  %2287 = vmatmul.bf16.gmra.mxu1 %v12588_v13  ;;  %v1826_v25 = vpop.f32.mrf.mxu0  ;;  %3362 = vmatpush.bf16.msrb.mxu3 %v9693_v12 }
 0x419   :  { %9563 = vmatmul.msk.bf16.gmra.mxu3 %vm481_vm0, %v12512_v45 }
 0x41a   :  { %18601 = vst [vmem:[#allocation255_spill] sm:$0xff] %v14273_v33 }
 0x41c   :  { %v1665_v18 = vpop.f32.mrf.mxu3 }
 0x41d   :  { %v14286_v17 = vadd.f32 %v1665_v18, %v1496_v21  ;;  %v1498_v3 = vpop.f32.mrf.mxu1 }
 0x41f   :  { %18603 = vst [vmem:[#allocation256_spill] sm:$0xff] %v14286_v17  ;;  %v1995_v28 = vpop.f32.mrf.mxu2 }
 0x420   :  { %v14290_v42 = vadd.f32 %v1995_v28, %v1826_v25  ;;  %v1829_v10 = vpop.f32.mrf.mxu0 }
 0x422   :  { %18605 = vst [vmem:[#allocation142_spill] sm:$0xff] %v14290_v42 }
 0x423   :  { %2620 = vmatmul.bf16.vlgmr.msra.gmra.mxu0 %v12554_v1 }
 0x424   :  { %v1667_v56 = vpop.f32.mrf.mxu3  ;;  %9594 = vmatmul.msk.bf16.vlgmr.msra.gmra.mxu2 %vm481_vm0, %v12446_v16 }
 0x425   :  { %v14297_v21 = vadd.f32 %v1667_v56, %v1498_v3  ;;  %v1501_v46 = vpop.f32.mrf.mxu1  ;;  %v12018_v56 = vld [vmem:[%s17772_s0 + $0x234] sm:$0xf]  ;;  %v9694_v3 = vld [vmem:[%s17772_s0 + $0x238] sm:$0xf0] }
 0x426   :  { %v9697_v49 = vor.u32 %v12018_v56, %v9694_v3 }
 0x427   :  { %18607 = vst [vmem:[#allocation257_spill] sm:$0xff] %v14297_v21  ;;  %v1998_v18 = vpop.f32.mrf.mxu2 }
 0x428   :  { %v14301_v47 = vadd.f32 %v1998_v18, %v1829_v10  ;;  %2292 = vmatmul.bf16.gmra.mxu1 %v12616_v23  ;;  %v1831_v28 = vpop.f32.mrf.mxu0  ;;  %3700 = vmatpush.bf16.msrb.mxu2 %v9697_v49 }
 0x429   :  { %9564 = vmatmul.msk.bf16.gmra.mxu3 %vm481_vm0, %v12564_v4 }
 0x42a   :  { %18609 = vst [vmem:[#allocation258_spill] sm:$0xff] %v14301_v47  ;;  %v12017_v47 = vld [vmem:[%s17772_s0 + $0x224] sm:$0xf0] }
 0x42b   :  { %v9685_v3 = vor.u32 %v12017_v47, %v9684_v34  ;;  %v18617_v34 = vld [vmem:[#allocation3_spill] sm:$0xff] }
 0x42c   :  { %v1670_v10 = vpop.f32.mrf.mxu3 }
 0x42d   :  { %v14314_v18 = vadd.f32 %v1670_v10, %v1501_v46  ;;  %v1503_v21 = vpop.f32.mrf.mxu1  ;;  %3186 = vmatpush.bf16.msrb.mxu1 %v9685_v3 }
 0x42f   :  { %18611 = vst [vmem:[#allocation259_spill] sm:$0xff] %v14314_v18  ;;  %v2000_v33 = vpop.f32.mrf.mxu2 }
 0x430   :  { %v14324_v25 = vadd.f32 %v2000_v33, %v1831_v28  ;;  %v1834_v56 = vpop.f32.mrf.mxu0 }
 0x432   :  { %18613 = vst [vmem:[#allocation260_spill] sm:$0xff] %v14324_v25 }
 0x433   :  { %2625 = vmatmul.bf16.gmra.mxu0 %v12588_v13 }
 0x434   :  { %v1672_v49 = vpop.f32.mrf.mxu3  ;;  %9595 = vmatmul.msk.bf16.gmra.mxu2 %vm481_vm0, %v12512_v45 }
 0x435   :  { %v14331_v42 = vadd.f32 %v1672_v49, %v1503_v21  ;;  %v1506_v18 = vpop.f32.mrf.mxu1 }
 0x437   :  { %18615 = vst [vmem:[#allocation261_spill] sm:$0xff] %v14331_v42  ;;  %v2003_v33 = vpop.f32.mrf.mxu2 }
 0x438   :  { %v14335_v28 = vadd.f32 %v2003_v33, %v1834_v56  ;;  %2297 = vmatmul.bf16.gmra.mxu1 %v12638_v29  ;;  %v1836_v47 = vpop.f32.mrf.mxu0  ;;  %v12016_v56 = vld [vmem:[%s17772_s0 + $0x224] sm:$0xf]  ;;  %v9686_v33 = vld [vmem:[%s17772_s0 + $0x228] sm:$0xf0] }
 0x439   :  { %9565 = vmatmul.msk.bf16.gmra.mxu3 %vm481_vm0, %v18617_v34  ;;  %v9689_v10 = vor.u32 %v12016_v56, %v9686_v33  ;;  %v18625_v56 = vld [vmem:[#allocation6_spill] sm:$0xff] }
 0x43a   :  { %18616 = vst [vmem:[#allocation262_spill] sm:$0xff] %v14335_v28 }
 0x43b   :  { %3524 = vmatpush.bf16.msrb.mxu0 %v9689_v10 }
 0x43c   :  { %v1675_v25 = vpop.f32.mrf.mxu3 }
 0x43d   :  { %v14342_v46 = vadd.f32 %v1675_v25, %v1506_v18  ;;  %v1508_v21 = vpop.f32.mrf.mxu1  ;;  %v18626_v18 = vld [vmem:[#allocation5_spill] sm:$0xff] }
 0x43f   :  { %18619 = vst [vmem:[#allocation3_spill] sm:$0xff] %v14342_v46  ;;  %v2005_v12 = vpop.f32.mrf.mxu2 }
 0x440   :  { %v14352_v42 = vadd.f32 %v2005_v12, %v1836_v47  ;;  %v1839_v37 = vpop.f32.mrf.mxu0 }
 0x442   :  { %18621 = vst [vmem:[#allocation263_spill] sm:$0xff] %v14352_v42 }
 0x443   :  { %2630 = vmatmul.bf16.gmra.mxu0 %v12616_v23 }
 0x444   :  { %v1677_v17 = vpop.f32.mrf.mxu3  ;;  %9596 = vmatmul.msk.bf16.gmra.mxu2 %vm481_vm0, %v12564_v4 }
 0x445   :  { %v14359_v46 = vadd.f32 %v1677_v17, %v1508_v21  ;;  %v1511_v49 = vpop.f32.mrf.mxu1 }
 0x447   :  { %18623 = vst [vmem:[#allocation264_spill] sm:$0xff] %v14359_v46  ;;  %v2008_v12 = vpop.f32.mrf.mxu2 }
 0x448   :  { %v14363_v47 = vadd.f32 %v2008_v12, %v1839_v37  ;;  %2302 = vmatmul.bf16.gmra.mxu1 %v18625_v56  ;;  %v1841_v33 = vpop.f32.mrf.mxu0 }
 0x449   :  { %9566 = vmatmul.msk.bf16.gmra.mxu3 %vm481_vm0, %v18626_v18 }
 0x44a   :  { %18624 = vst [vmem:[#allocation265_spill] sm:$0xff] %v14363_v47 }
 0x44c   :  { %v1680_v25 = vpop.f32.mrf.mxu3 }
 0x44d   :  { %v14370_v3 = vadd.f32 %v1680_v25, %v1511_v49  ;;  %v1513_v17 = vpop.f32.mrf.mxu1 }
 0x44f   :  { %18628 = vst [vmem:[#allocation6_spill] sm:$0xff] %v14370_v3  ;;  %v2010_v28 = vpop.f32.mrf.mxu2 }
 0x450   :  { %v14374_v46 = vadd.f32 %v2010_v28, %v1841_v33  ;;  %v1844_v37 = vpop.f32.mrf.mxu0  ;;  %v18635_v33 = vld [vmem:[#allocation151_spill] sm:$0xff] }
 0x452   :  { %18630 = vst [vmem:[#allocation5_spill] sm:$0xff] %v14374_v46 }
 0x453   :  { %2635 = vmatmul.bf16.gmra.mxu0 %v12638_v29 }
 0x454   :  { %v1682_v23 = vpop.f32.mrf.mxu3  ;;  %9597 = vmatmul.msk.bf16.gmra.mxu2 %vm481_vm0, %v18617_v34 }
 0x455   :  { %v14381_v42 = vadd.f32 %v1682_v23, %v1513_v17  ;;  %v1516_v49 = vpop.f32.mrf.mxu1  ;;  %v18637_v17 = vld [vmem:[#allocation158_spill] sm:$0xff] }
 0x457   :  { %18632 = vst [vmem:[#allocation266_spill] sm:$0xff] %v14381_v42  ;;  %v2013_v4 = vpop.f32.mrf.mxu2 }
 0x458   :  { %v14385_v3 = vadd.f32 %v2013_v4, %v1844_v37  ;;  %2307 = vmatmul.bf16.gmra.mxu1 %v12688_v44  ;;  %v1846_v28 = vpop.f32.mrf.mxu0 }
 0x459   :  { %9567 = vmatmul.msk.bf16.gmra.mxu3 %vm481_vm0, %v12648_v32 }
 0x45a   :  { %18634 = vst [vmem:[#allocation267_spill] sm:$0xff] %v14385_v3 }
 0x45c   :  { %v1685_v46 = vpop.f32.mrf.mxu3 }
 0x45d   :  { %v14392_v12 = vadd.f32 %v1685_v46, %v1516_v49  ;;  %v1518_v23 = vpop.f32.mrf.mxu1 }
 0x45f   :  { %18636 = vst [vmem:[#allocation151_spill] sm:$0xff] %v14392_v12  ;;  %v2015_v47 = vpop.f32.mrf.mxu2 }
 0x460   :  { %v14396_v42 = vadd.f32 %v2015_v47, %v1846_v28  ;;  %v1849_v4 = vpop.f32.mrf.mxu0  ;;  %v18643_v28 = vld [vmem:[#allocation155_spill] sm:$0xff] }
 0x462   :  { %18638 = vst [vmem:[#allocation158_spill] sm:$0xff] %v14396_v42 }
 0x463   :  { %2640 = vmatmul.bf16.gmra.mxu0 %v18625_v56 }
 0x464   :  { %v1687_v10 = vpop.f32.mrf.mxu3  ;;  %9598 = vmatmul.msk.bf16.gmra.mxu2 %vm481_vm0, %v18626_v18 }
 0x465   :  { %v14403_v59 = vadd.f32 %v1687_v10, %v1518_v23  ;;  %v1521_v46 = vpop.f32.mrf.mxu1 }
 0x467   :  { %18640 = vst [vmem:[#allocation268_spill] sm:$0xff] %v14403_v59  ;;  %v2018_v21 = vpop.f32.mrf.mxu2 }
 0x468   :  { %v14407_v12 = vadd.f32 %v2018_v21, %v1849_v4  ;;  %2312 = vmatmul.bf16.gmra.mxu1 %v12716_v54  ;;  %v1851_v47 = vpop.f32.mrf.mxu0  ;;  %v9676_v21 = vld [vmem:[%s17772_s0 + $0x210] sm:$0xf]  ;;  %v12015_v4 = vld [vmem:[%s17772_s0 + $0x214] sm:$0xf0] }
 0x469   :  { %9568 = vmatmul.msk.bf16.gmra.mxu3 %vm481_vm0, %v12670_v38  ;;  %v9677_v25 = vor.u32 %v12015_v4, %v9676_v21 }
 0x46a   :  { %18642 = vst [vmem:[#allocation269_spill] sm:$0xff] %v14407_v12 }
 0x46b   :  { %3187 = vmatpush.bf16.msrb.mxu1 %v9677_v25  ;;  %v18649_v25 = vld [vmem:[#allocation159_spill] sm:$0xff] }
 0x46c   :  { %v1690_v42 = vpop.f32.mrf.mxu3 }
 0x46d   :  { %v14414_v37 = vadd.f32 %v1690_v42, %v1521_v46  ;;  %v1523_v10 = vpop.f32.mrf.mxu1  ;;  %v18646_v42 = vld [vmem:[#allocation157_spill] sm:$0xff] }
 0x46f   :  { %18644 = vst [vmem:[#allocation155_spill] sm:$0xff] %v14414_v37  ;;  %v2020_v3 = vpop.f32.mrf.mxu2 }
 0x470   :  { %v14424_v59 = vadd.f32 %v2020_v3, %v1851_v47  ;;  %v1854_v49 = vpop.f32.mrf.mxu0 }
 0x472   :  { %18645 = vst [vmem:[#allocation270_spill] sm:$0xff] %v14424_v59 }
 0x473   :  { %2645 = vmatmul.bf16.gmra.mxu0 %v12688_v44 }
 0x474   :  { %v1692_v23 = vpop.f32.mrf.mxu3  ;;  %9599 = vmatmul.msk.bf16.gmra.mxu2 %vm481_vm0, %v12648_v32 }
 0x475   :  { %v14431_v37 = vadd.f32 %v1692_v23, %v1523_v10  ;;  %v1526_v26 = vpop.f32.mrf.mxu1 }
 0x477   :  { %18647 = vst [vmem:[#allocation157_spill] sm:$0xff] %v14431_v37  ;;  %v2023_v3 = vpop.f32.mrf.mxu2 }
 0x478   :  { %v14435_v47 = vadd.f32 %v2023_v3, %v1854_v49  ;;  %2317 = vmatmul.bf16.gmra.mxu1 %v12738_v63  ;;  %v1856_v21 = vpop.f32.mrf.mxu0  ;;  %v12014_v49 = vld [vmem:[%s17772_s0 + $0x214] sm:$0xf]  ;;  %v9678_v3 = vld [vmem:[%s17772_s0 + $0x218] sm:$0xf0] }
 0x479   :  { %9569 = vmatmul.msk.bf16.gmra.mxu3 %vm481_vm0, %v12698_v48  ;;  %v9681_v4 = vor.u32 %v12014_v49, %v9678_v3 }
 0x47a   :  { %18648 = vst [vmem:[#allocation271_spill] sm:$0xff] %v14435_v47 }
 0x47b   :  { %3525 = vmatpush.bf16.msrb.mxu0 %v9681_v4  ;;  %v18653_v4 = vld [vmem:[#allocation163_spill] sm:$0xff] }
 0x47c   :  { %v1695_v46 = vpop.f32.mrf.mxu3 }
 0x47d   :  { %v14442_v59 = vadd.f32 %v1695_v46, %v1526_v26  ;;  %v1528_v10 = vpop.f32.mrf.mxu1 }
 0x47f   :  { %18650 = vst [vmem:[#allocation159_spill] sm:$0xff] %v14442_v59  ;;  %v2025_v12 = vpop.f32.mrf.mxu2 }
 0x480   :  { %v14452_v37 = vadd.f32 %v2025_v12, %v1856_v21  ;;  %v1859_v55 = vpop.f32.mrf.mxu0 }
 0x482   :  { %18651 = vst [vmem:[#allocation272_spill] sm:$0xff] %v14452_v37 }
 0x483   :  { %2650 = vmatmul.bf16.gmra.mxu0 %v12716_v54 }
 0x484   :  { %v1697_v46 = vpop.f32.mrf.mxu3  ;;  %9600 = vmatmul.msk.bf16.gmra.mxu2 %vm481_vm0, %v12670_v38 }
 0x485   :  { %v14459_v23 = vadd.f32 %v1697_v46, %v1528_v10  ;;  %v2283_v59 = vpop.f32.mrf.mxu1  ;;  %v18654_v46 = vmax.f32 %v12762_v14, %v13660_v58  ;;  %v18657_v14 = vmax.f32 %v12780_v27, %v13671_v61  ;;  %v18661_v27 = vmax.f32 %v12798_v43, %v13682_v0 }
 0x487   :  { %18652 = vst [vmem:[#allocation273_spill] sm:$0xff] %v14459_v23  ;;  %v2028_v12 = vpop.f32.mrf.mxu2  ;;  %v18656_v23 = vld [vmem:[#allocation165_spill] sm:$0xff] }
 0x488   :  { %v14463_v21 = vadd.f32 %v2028_v12, %v1859_v55  ;;  %2322 = vmatmul.bf16.gmra.mxu1 %v12760_v11  ;;  %v1861_v49 = vpop.f32.mrf.mxu0 }
 0x489   :  { %9570 = vmatmul.msk.bf16.gmra.mxu3 %vm481_vm0, %v12726_v57 }
 0x48c   :  { %v2452_v26 = vpop.f32.mrf.mxu3 }
 0x48d   :  { %v2453_v37 = vadd.f32 %v2452_v26, %v2283_v59  ;;  %v2285_v10 = vpop.f32.mrf.mxu1 }
 0x48f   :  { %v14473_v19 = vmax.f32 %v18654_v46, %v2453_v37  ;;  %v2030_v15 = vpop.f32.mrf.mxu2  ;;  %v18660_v46 = vld [vmem:[#allocation167_spill] sm:$0xff] }
 0x490   :  { %v14475_v55 = vadd.f32 %v2030_v15, %v1861_v49  ;;  %v1864_v12 = vpop.f32.mrf.mxu0 }
 0x492   :  { %18655 = vst [vmem:[#allocation163_spill] sm:$0xff] %v14475_v55 }
 0x493   :  { %2655 = vmatmul.bf16.gmra.mxu0 %v12738_v63 }
 0x494   :  { %v2454_v47 = vpop.f32.mrf.mxu3  ;;  %9601 = vmatmul.msk.bf16.gmra.mxu2 %vm481_vm0, %v12698_v48 }
 0x495   :  { %v2455_v59 = vadd.f32 %v2454_v47, %v2285_v10  ;;  %v2288_v26 = vpop.f32.mrf.mxu1 }
 0x497   :  { %v14485_v58 = vmax.f32 %v18657_v14, %v2455_v59  ;;  %v2033_v37 = vpop.f32.mrf.mxu2 }
 0x498   :  { %v14487_v15 = vadd.f32 %v2033_v37, %v1864_v12  ;;  %2327 = vmatmul.bf16.gmra.mxu1 %v12794_v40  ;;  %v1866_v49 = vpop.f32.mrf.mxu0  ;;  %v18669_v37 = vld [vmem:[#allocation10_spill] sm:$0xff] }
 0x499   :  { %18658 = vst [vmem:[#allocation165_spill] sm:$0xff] %v14485_v58  ;;  %9571 = vmatmul.msk.bf16.gmra.mxu3 %vm481_vm0, %v12748_v5 }
 0x49a   :  { %18659 = vst [vmem:[#allocation274_spill] sm:$0xff] %v14487_v15  ;;  %v18665_v15 = vld [vmem:[#allocation170_spill] sm:$0xff] }
 0x49b   :  { %v18666_v43 = vmax.f32 %v18664_v2, %v18665_v15  ;;  %v18670_v2 = vld [vmem:[#allocation171_spill] sm:$0xff] }
 0x49c   :  { %v2457_v3 = vpop.f32.mrf.mxu3  ;;  %v18671_v15 = vmax.f32 %v18669_v37, %v18670_v2  ;;  %v18675_v2 = vld [vmem:[#allocation13_spill] sm:$0xff] }
 0x49d   :  { %v2458_v47 = vadd.f32 %v2457_v3, %v2288_v26  ;;  %v2290_v10 = vpop.f32.mrf.mxu1 }
 0x49f   :  { %v14497_v61 = vmax.f32 %v18661_v27, %v2458_v47  ;;  %v2035_v59 = vpop.f32.mrf.mxu2 }
 0x4a0   :  { %v14499_v12 = vadd.f32 %v2035_v59, %v1866_v49  ;;  %v2621_v14 = vpop.f32.mrf.mxu0  ;;  %v18667_v59 = vmax.f32 %v12774_v24, %v13695_v30 }
 0x4a2   :  { %18662 = vst [vmem:[#allocation167_spill] sm:$0xff] %v14499_v12 }
 0x4a3   :  { %2660 = vmatmul.bf16.gmra.mxu0 %v12760_v11 }
 0x4a4   :  { %v2459_v55 = vpop.f32.mrf.mxu3  ;;  %9602 = vmatmul.msk.bf16.gmra.mxu2 %vm481_vm0, %v12726_v57 }
 0x4a5   :  { %v2460_v3 = vadd.f32 %v2459_v55, %v2290_v10  ;;  %v2293_v26 = vpop.f32.mrf.mxu1 }
 0x4a7   :  { %v14509_v0 = vmax.f32 %v18666_v43, %v2460_v3  ;;  %v2790_v47 = vpop.f32.mrf.mxu2  ;;  %v9668_v43 = vld [vmem:[%s17772_s0 + $0x200] sm:$0xf] }
 0x4a8   :  { %v2791_v49 = vadd.f32 %v2790_v47, %v2621_v14  ;;  %2332 = vmatmul.bf16.gmra.mxu1 %v12830_v6  ;;  %v2623_v27 = vpop.f32.mrf.mxu0  ;;  %v12013_v47 = vld [vmem:[%s17772_s0 + $0x204] sm:$0xf0] }
 0x4a9   :  { %9572 = vmatmul.msk.bf16.gmra.mxu3 %vm481_vm0, %v12772_v20 }
 0x4aa   :  { %v14517_v58 = vmax.f32 %v18667_v59, %v2791_v49  ;;  %v9669_v49 = vor.u32 %v12013_v47, %v9668_v43 }
 0x4ac   :  { %18668 = vst [vmem:[#allocation9_spill] sm:$0xff] %v14517_v58  ;;  %v2462_v55 = vpop.f32.mrf.mxu3  ;;  %3188 = vmatpush.bf16.msrb.mxu1 %v9669_v49 }
 0x4ad   :  { %v2463_v10 = vadd.f32 %v2462_v55, %v2293_v26  ;;  %v2295_v12 = vpop.f32.mrf.mxu1  ;;  %v18673_v26 = vmax.f32 %v12796_v41, %v13712_v36  ;;  %v18679_v36 = vmax.f32 %v12810_v53, %v13723_v35 }
 0x4af   :  { %v14522_v3 = vmax.f32 %v18671_v15, %v2463_v10  ;;  %v2792_v14 = vpop.f32.mrf.mxu2  ;;  %v18676_v15 = vld [vmem:[#allocation172_spill] sm:$0xff] }
 0x4b0   :  { %v2793_v24 = vadd.f32 %v2792_v14, %v2623_v27  ;;  %v2626_v30 = vpop.f32.mrf.mxu0 }
 0x4b1   :  { %18672 = vst [vmem:[#allocation170_spill] sm:$0xff] %v14522_v3  ;;  %v18677_v3 = vmax.f32 %v18675_v2, %v18676_v15  ;;  %v12012_v2 = vld [vmem:[%s17772_s0 + $0x204] sm:$0xf]  ;;  %v9670_v15 = vld [vmem:[%s17772_s0 + $0x208] sm:$0xf0] }
 0x4b2   :  { %v14533_v59 = vmax.f32 %v18673_v26, %v2793_v24  ;;  %v18681_v26 = vld [vmem:[#allocation16_spill] sm:$0xff] }
 0x4b3   :  { %2665 = vmatmul.bf16.gmra.mxu0 %v12794_v40 }
 0x4b4   :  { %18674 = vst [vmem:[#allocation10_spill] sm:$0xff] %v14533_v59  ;;  %v2464_v37 = vpop.f32.mrf.mxu3  ;;  %9603 = vmatmul.msk.bf16.gmra.mxu2 %vm481_vm0, %v12748_v5  ;;  %v18703_v59 = vld [vmem:[#allocation178_spill] sm:$0xff] }
 0x4b5   :  { %v2465_v55 = vadd.f32 %v2464_v37, %v2295_v12  ;;  %v2298_v10 = vpop.f32.mrf.mxu1  ;;  %v18682_v37 = vld [vmem:[#allocation173_spill] sm:$0xff] }
 0x4b7   :  { %v14541_v27 = vmax.f32 %v18677_v3, %v2465_v55  ;;  %v2795_v14 = vpop.f32.mrf.mxu2  ;;  %v18683_v3 = vmax.f32 %v18681_v26, %v18682_v37  ;;  %v18688_v37 = vld [vmem:[#allocation19_spill] sm:$0xff] }
 0x4b8   :  { %v2796_v43 = vadd.f32 %v2795_v14, %v2626_v30  ;;  %2337 = vmatmul.bf16.gmra.mxu1 %v12860_v39  ;;  %v2628_v41 = vpop.f32.mrf.mxu0  ;;  %v9673_v14 = vor.u32 %v12012_v2, %v9670_v15  ;;  %v18692_v15 = vld [vmem:[#allocation20_spill] sm:$0xff] }
 0x4b9   :  { %18678 = vst [vmem:[#allocation171_spill] sm:$0xff] %v14541_v27  ;;  %9573 = vmatmul.msk.bf16.gmra.mxu3 %vm481_vm0, %v12808_v50  ;;  %v18698_v27 = vld [vmem:[#allocation22_spill] sm:$0xff] }
 0x4ba   :  { %v14549_v47 = vmax.f32 %v18679_v36, %v2796_v43  ;;  %3526 = vmatpush.bf16.msrb.mxu0 %v9673_v14  ;;  %v18694_v14 = vld [vmem:[#allocation12_spill] sm:$0xff] }
 0x4bc   :  { %18680 = vst [vmem:[#allocation13_spill] sm:$0xff] %v14549_v47  ;;  %v2467_v12 = vpop.f32.mrf.mxu3 }
 0x4bd   :  { %v2468_v24 = vadd.f32 %v2467_v12, %v2298_v10  ;;  %v2300_v49 = vpop.f32.mrf.mxu1  ;;  %v18685_v10 = vld [vmem:[#allocation174_spill] sm:$0xff] }
 0x4be   :  { %v18686_v43 = vmax.f32 %v12832_v7, %v18685_v10  ;;  %v18695_v10 = vld [vmem:[#allocation176_spill] sm:$0xff] }
 0x4bf   :  { %v14554_v55 = vmax.f32 %v18683_v3, %v2468_v24  ;;  %v2797_v30 = vpop.f32.mrf.mxu2  ;;  %v18689_v3 = vld [vmem:[#allocation175_spill] sm:$0xff] }
 0x4c0   :  { %v2798_v53 = vadd.f32 %v2797_v30, %v2628_v41  ;;  %v2631_v35 = vpop.f32.mrf.mxu0 }
 0x4c1   :  { %18684 = vst [vmem:[#allocation172_spill] sm:$0xff] %v14554_v55  ;;  %v18690_v55 = vmax.f32 %v18688_v37, %v18689_v3  ;;  %v18699_v37 = vld [vmem:[#allocation177_spill] sm:$0xff] }
 0x4c2   :  { %v14565_v36 = vmax.f32 %v18686_v43, %v2798_v53  ;;  %v18693_v53 = vld [vmem:[#allocation11_spill] sm:$0xff]  ;;  %v18696_v43 = vmax.f32 %v18694_v14, %v18695_v10  ;;  %v18706_v10 = vld [vmem:[#allocation25_spill] sm:$0xff] }
 0x4c3   :  { %2670 = vmatmul.bf16.gmra.mxu0 %v12830_v6 }
 0x4c4   :  { %18687 = vst [vmem:[#allocation16_spill] sm:$0xff] %v14565_v36  ;;  %v2469_v12 = vpop.f32.mrf.mxu3  ;;  %9604 = vmatmul.msk.bf16.gmra.mxu2 %vm481_vm0, %v12772_v20 }
 0x4c5   :  { %v2470_v24 = vadd.f32 %v2469_v12, %v2300_v49  ;;  %v2303_v26 = vpop.f32.mrf.mxu1 }
 0x4c7   :  { %v14573_v41 = vmax.f32 %v18690_v55, %v2470_v24  ;;  %v2800_v30 = vpop.f32.mrf.mxu2  ;;  %v18700_v55 = vmax.f32 %v18698_v27, %v18699_v37  ;;  %v18707_v27 = vld [vmem:[#allocation179_spill] sm:$0xff]  ;;  %v18710_v37 = vld [vmem:[#allocation26_spill] sm:$0xff] }
 0x4c8   :  { %v2801_v2 = vadd.f32 %v2800_v30, %v2631_v35  ;;  %2342 = vmatmul.bf16.gmra.mxu1 %v18692_v15  ;;  %v2633_v7 = vpop.f32.mrf.mxu0 }
 0x4c9   :  { %18691 = vst [vmem:[#allocation173_spill] sm:$0xff] %v14573_v41  ;;  %9574 = vmatmul.msk.bf16.gmra.mxu3 %vm481_vm0, %v18693_v53  ;;  %v18702_v41 = vld [vmem:[#allocation15_spill] sm:$0xff] }
 0x4ca   :  { %v14581_v36 = vmax.f32 %v18696_v43, %v2801_v2  ;;  %v18704_v58 = vmax.f32 %v18702_v41, %v18703_v59  ;;  %v18708_v43 = vmax.f32 %v18706_v10, %v18707_v27  ;;  %v18712_v41 = vld [vmem:[#allocation18_spill] sm:$0xff]  ;;  %v18717_v10 = vld [vmem:[#allocation181_spill] sm:$0xff] }
 0x4cc   :  { %18697 = vst [vmem:[#allocation174_spill] sm:$0xff] %v14581_v36  ;;  %v2472_v49 = vpop.f32.mrf.mxu3  ;;  %v18721_v36 = vld [vmem:[#allocation182_spill] sm:$0xff] }
 0x4cd   :  { %v2473_v12 = vadd.f32 %v2472_v49, %v2303_v26  ;;  %v2305_v47 = vpop.f32.mrf.mxu1 }
 0x4cf   :  { %v14586_v24 = vmax.f32 %v18700_v55, %v2473_v12  ;;  %v2802_v35 = vpop.f32.mrf.mxu2  ;;  %v18713_v55 = vld [vmem:[#allocation180_spill] sm:$0xff] }
 0x4d0   :  { %v2803_v3 = vadd.f32 %v2802_v35, %v2633_v7  ;;  %v2636_v30 = vpop.f32.mrf.mxu0  ;;  %v18714_v35 = vmax.f32 %v18712_v41, %v18713_v55  ;;  %v18724_v55 = vld [vmem:[#allocation31_spill] sm:$0xff] }
 0x4d1   :  { %18701 = vst [vmem:[#allocation19_spill] sm:$0xff] %v14586_v24  ;;  %v18716_v24 = vld [vmem:[#allocation28_spill] sm:$0xff] }
 0x4d2   :  { %v14591_v20 = vmax.f32 %v18704_v58, %v2803_v3  ;;  %v18711_v58 = vld [vmem:[#allocation17_spill] sm:$0xff] }
 0x4d3   :  { %2675 = vmatmul.bf16.gmra.mxu0 %v12860_v39 }
 0x4d4   :  { %18705 = vst [vmem:[#allocation175_spill] sm:$0xff] %v14591_v20  ;;  %v2474_v2 = vpop.f32.mrf.mxu3  ;;  %9605 = vmatmul.msk.bf16.gmra.mxu2 %vm481_vm0, %v12808_v50 }
 0x4d5   :  { %v2475_v26 = vadd.f32 %v2474_v2, %v2305_v47  ;;  %v2308_v14 = vpop.f32.mrf.mxu1 }
 0x4d7   :  { %v14599_v49 = vmax.f32 %v18708_v43, %v2475_v26  ;;  %v2805_v7 = vpop.f32.mrf.mxu2  ;;  %v18718_v26 = vmax.f32 %v18716_v24, %v18717_v10  ;;  %v18725_v24 = vld [vmem:[#allocation183_spill] sm:$0xff]  ;;  %v18728_v10 = vld [vmem:[#allocation32_spill] sm:$0xff] }
 0x4d8   :  { %v2806_v12 = vadd.f32 %v2805_v7, %v2636_v30  ;;  %2347 = vmatmul.bf16.gmra.mxu1 %v18710_v37  ;;  %v2638_v59 = vpop.f32.mrf.mxu0 }
 0x4d9   :  { %18709 = vst [vmem:[#allocation12_spill] sm:$0xff] %v14599_v49  ;;  %9575 = vmatmul.msk.bf16.gmra.mxu3 %vm481_vm0, %v18711_v58  ;;  %v18720_v49 = vld [vmem:[#allocation21_spill] sm:$0xff] }
 0x4da   :  { %v14607_v3 = vmax.f32 %v18714_v35, %v2806_v12  ;;  %v18722_v50 = vmax.f32 %v18720_v49, %v18721_v36  ;;  %v18726_v35 = vmax.f32 %v18724_v55, %v18725_v24  ;;  %v18730_v49 = vld [vmem:[#allocation24_spill] sm:$0xff]  ;;  %v18735_v55 = vld [vmem:[#allocation185_spill] sm:$0xff] }
 0x4dc   :  { %18715 = vst [vmem:[#allocation176_spill] sm:$0xff] %v14607_v3  ;;  %v2477_v47 = vpop.f32.mrf.mxu3 }
 0x4dd   :  { %v2478_v2 = vadd.f32 %v2477_v47, %v2308_v14  ;;  %v2310_v20 = vpop.f32.mrf.mxu1 }
 0x4df   :  { %v14612_v27 = vmax.f32 %v18718_v26, %v2478_v2  ;;  %v2807_v30 = vpop.f32.mrf.mxu2  ;;  %v18731_v26 = vld [vmem:[#allocation184_spill] sm:$0xff] }
 0x4e0   :  { %v2808_v43 = vadd.f32 %v2807_v30, %v2638_v59  ;;  %v2641_v7 = vpop.f32.mrf.mxu0  ;;  %v18732_v30 = vmax.f32 %v18730_v49, %v18731_v26 }
 0x4e1   :  { %18719 = vst [vmem:[#allocation22_spill] sm:$0xff] %v14612_v27  ;;  %v18734_v27 = vld [vmem:[#allocation34_spill] sm:$0xff] }
 0x4e2   :  { %v14617_v39 = vmax.f32 %v18722_v50, %v2808_v43  ;;  %v18729_v50 = vld [vmem:[#allocation23_spill] sm:$0xff] }
 0x4e3   :  { %2680 = vmatmul.bf16.gmra.mxu0 %v18692_v15 }
 0x4e4   :  { %18723 = vst [vmem:[#allocation177_spill] sm:$0xff] %v14617_v39  ;;  %v2479_v12 = vpop.f32.mrf.mxu3  ;;  %9606 = vmatmul.msk.bf16.gmra.mxu2 %vm481_vm0, %v18693_v53 }
 0x4e5   :  { %v2480_v14 = vadd.f32 %v2479_v12, %v2310_v20  ;;  %v2313_v41 = vpop.f32.mrf.mxu1 }
 0x4e7   :  { %v14625_v47 = vmax.f32 %v18726_v35, %v2480_v14  ;;  %v2810_v59 = vpop.f32.mrf.mxu2  ;;  %v18736_v14 = vmax.f32 %v18734_v27, %v18735_v55  ;;  %v9660_v35 = vld [vmem:[%s17772_s0 + $0x1f0] sm:$0xf] }
 0x4e8   :  { %v2811_v2 = vadd.f32 %v2810_v59, %v2641_v7  ;;  %2352 = vmatmul.bf16.gmra.mxu1 %v18728_v10  ;;  %v2643_v36 = vpop.f32.mrf.mxu0  ;;  %v12011_v59 = vld [vmem:[%s17772_s0 + $0x1f4] sm:$0xf0] }
 0x4e9   :  { %18727 = vst [vmem:[#allocation15_spill] sm:$0xff] %v14625_v47  ;;  %9576 = vmatmul.msk.bf16.gmra.mxu3 %vm481_vm0, %v18729_v50  ;;  %v9661_v26 = vor.u32 %v12011_v59, %v9660_v35  ;;  %v18746_v59 = vld [vmem:[#allocation38_spill] sm:$0xff] }
 0x4ea   :  { %v14633_v43 = vmax.f32 %v18732_v30, %v2811_v2  ;;  %v18738_v30 = vld [vmem:[#allocation27_spill] sm:$0xff] }
 0x4eb   :  { %3189 = vmatpush.bf16.msrb.mxu1 %v9661_v26  ;;  %v18748_v26 = vld [vmem:[#allocation30_spill] sm:$0xff] }
 0x4ec   :  { %18733 = vst [vmem:[#allocation178_spill] sm:$0xff] %v14633_v43  ;;  %v2482_v20 = vpop.f32.mrf.mxu3 }
 0x4ed   :  { %v2483_v12 = vadd.f32 %v2482_v20, %v2313_v41  ;;  %v2315_v39 = vpop.f32.mrf.mxu1  ;;  %v18739_v41 = vld [vmem:[#allocation186_spill] sm:$0xff] }
 0x4ee   :  { %v18740_v20 = vmax.f32 %v18738_v30, %v18739_v41  ;;  %v18747_v30 = vld [vmem:[#allocation29_spill] sm:$0xff]  ;;  %v18749_v41 = vld [vmem:[#allocation188_spill] sm:$0xff] }
 0x4ef   :  { %v14638_v24 = vmax.f32 %v18736_v14, %v2483_v12  ;;  %v2812_v7 = vpop.f32.mrf.mxu2  ;;  %v18742_v14 = vld [vmem:[#allocation37_spill] sm:$0xff] }
 0x4f0   :  { %v2813_v49 = vadd.f32 %v2812_v7, %v2643_v36  ;;  %v2646_v2 = vpop.f32.mrf.mxu0 }
 0x4f1   :  { %18737 = vst [vmem:[#allocation25_spill] sm:$0xff] %v14638_v24  ;;  %v18743_v24 = vld [vmem:[#allocation187_spill] sm:$0xff] }
 0x4f2   :  { %v14649_v43 = vmax.f32 %v18740_v20, %v2813_v49  ;;  %v18744_v47 = vmax.f32 %v18742_v14, %v18743_v24  ;;  %v18750_v20 = vmax.f32 %v18748_v26, %v18749_v41  ;;  %v18753_v24 = vld [vmem:[#allocation189_spill] sm:$0xff]  ;;  %v12010_v14 = vld [vmem:[%s17772_s0 + $0x1f4] sm:$0xf] }
 0x4f3   :  { %2685 = vmatmul.bf16.gmra.mxu0 %v18710_v37  ;;  %v18775_v37 = vld [vmem:[#allocation194_spill] sm:$0xff] }
 0x4f4   :  { %18741 = vst [vmem:[#allocation179_spill] sm:$0xff] %v14649_v43  ;;  %v2484_v27 = vpop.f32.mrf.mxu3  ;;  %9607 = vmatmul.msk.bf16.gmra.mxu2 %vm481_vm0, %v18711_v58  ;;  %v18752_v58 = vld [vmem:[#allocation40_spill] sm:$0xff] }
 0x4f5   :  { %v2485_v12 = vadd.f32 %v2484_v27, %v2315_v39  ;;  %v2318_v55 = vpop.f32.mrf.mxu1 }
 0x4f7   :  { %v14657_v36 = vmax.f32 %v18744_v47, %v2485_v12  ;;  %v2815_v7 = vpop.f32.mrf.mxu2  ;;  %v18754_v47 = vmax.f32 %v18752_v58, %v18753_v24 }
 0x4f8   :  { %v2816_v35 = vadd.f32 %v2815_v7, %v2646_v2  ;;  %2357 = vmatmul.bf16.gmra.mxu1 %v18746_v59  ;;  %v2648_v49 = vpop.f32.mrf.mxu0  ;;  %v9662_v7 = vld [vmem:[%s17772_s0 + $0x1f8] sm:$0xf0] }
 0x4f9   :  { %18745 = vst [vmem:[#allocation18_spill] sm:$0xff] %v14657_v36  ;;  %9577 = vmatmul.msk.bf16.gmra.mxu3 %vm481_vm0, %v18747_v30  ;;  %v9665_v41 = vor.u32 %v12010_v14, %v9662_v7  ;;  %v18764_v7 = vld [vmem:[#allocation44_spill] sm:$0xff] }
 0x4fa   :  { %v14665_v43 = vmax.f32 %v18750_v20, %v2816_v35  ;;  %v18756_v20 = vld [vmem:[#allocation33_spill] sm:$0xff] }
 0x4fb   :  { %3527 = vmatpush.bf16.msrb.mxu0 %v9665_v41  ;;  %v18766_v41 = vld [vmem:[#allocation36_spill] sm:$0xff] }
 0x4fc   :  { %18751 = vst [vmem:[#allocation180_spill] sm:$0xff] %v14665_v43  ;;  %v2487_v39 = vpop.f32.mrf.mxu3 }
 0x4fd   :  { %v2488_v27 = vadd.f32 %v2487_v39, %v2318_v55  ;;  %v2320_v3 = vpop.f32.mrf.mxu1  ;;  %v18757_v55 = vld [vmem:[#allocation190_spill] sm:$0xff] }
 0x4fe   :  { %v18758_v39 = vmax.f32 %v18756_v20, %v18757_v55  ;;  %v18765_v20 = vld [vmem:[#allocation35_spill] sm:$0xff]  ;;  %v18767_v55 = vld [vmem:[#allocation192_spill] sm:$0xff] }
 0x4ff   :  { %v14670_v12 = vmax.f32 %v18754_v47, %v2488_v27  ;;  %v2817_v2 = vpop.f32.mrf.mxu2  ;;  %v18760_v47 = vld [vmem:[#allocation43_spill] sm:$0xff] }
 0x500   :  { %v2818_v26 = vadd.f32 %v2817_v2, %v2648_v49  ;;  %v2651_v35 = vpop.f32.mrf.mxu0 }
 0x501   :  { %18755 = vst [vmem:[#allocation28_spill] sm:$0xff] %v14670_v12  ;;  %v18761_v12 = vld [vmem:[#allocation191_spill] sm:$0xff] }
 0x502   :  { %v14681_v43 = vmax.f32 %v18758_v39, %v2818_v26  ;;  %v18762_v36 = vmax.f32 %v18760_v47, %v18761_v12  ;;  %v18768_v39 = vmax.f32 %v18766_v41, %v18767_v55  ;;  %v18771_v12 = vld [vmem:[#allocation193_spill] sm:$0xff] }
 0x503   :  { %2690 = vmatmul.bf16.gmra.mxu0 %v18728_v10  ;;  %v18770_v10 = vld [vmem:[#allocation46_spill] sm:$0xff]  ;;  %v18778_v55 = vld [vmem:[#allocation49_spill] sm:$0xff] }
 0x504   :  { %18759 = vst [vmem:[#allocation181_spill] sm:$0xff] %v14681_v43  ;;  %v2489_v58 = vpop.f32.mrf.mxu3  ;;  %9608 = vmatmul.msk.bf16.gmra.mxu2 %vm481_vm0, %v18729_v50 }
 0x505   :  { %v2490_v27 = vadd.f32 %v2489_v58, %v2320_v3  ;;  %v2323_v24 = vpop.f32.mrf.mxu1 }
 0x507   :  { %v14689_v49 = vmax.f32 %v18762_v36, %v2490_v27  ;;  %v2820_v2 = vpop.f32.mrf.mxu2  ;;  %v18772_v36 = vmax.f32 %v18770_v10, %v18771_v12  ;;  %v18779_v10 = vld [vmem:[#allocation195_spill] sm:$0xff]  ;;  %v18782_v12 = vld [vmem:[#allocation50_spill] sm:$0xff] }
 0x508   :  { %v2821_v14 = vadd.f32 %v2820_v2, %v2651_v35  ;;  %2362 = vmatmul.bf16.gmra.mxu1 %v18764_v7  ;;  %v2653_v26 = vpop.f32.mrf.mxu0 }
 0x509   :  { %18763 = vst [vmem:[#allocation21_spill] sm:$0xff] %v14689_v49  ;;  %9578 = vmatmul.msk.bf16.gmra.mxu3 %vm481_vm0, %v18765_v20  ;;  %v18774_v49 = vld [vmem:[#allocation39_spill] sm:$0xff] }
 0x50a   :  { %v14697_v43 = vmax.f32 %v18768_v39, %v2821_v14  ;;  %v18776_v53 = vmax.f32 %v18774_v49, %v18775_v37  ;;  %v18780_v39 = vmax.f32 %v18778_v55, %v18779_v10  ;;  %v18784_v49 = vld [vmem:[#allocation42_spill] sm:$0xff]  ;;  %v18789_v55 = vld [vmem:[#allocation197_spill] sm:$0xff] }
 0x50c   :  { %18769 = vst [vmem:[#allocation182_spill] sm:$0xff] %v14697_v43  ;;  %v2492_v3 = vpop.f32.mrf.mxu3  ;;  %v18793_v43 = vld [vmem:[#allocation198_spill] sm:$0xff] }
 0x50d   :  { %v2493_v58 = vadd.f32 %v2492_v3, %v2323_v24  ;;  %v2325_v50 = vpop.f32.mrf.mxu1 }
 0x50f   :  { %v14702_v27 = vmax.f32 %v18772_v36, %v2493_v58  ;;  %v2822_v35 = vpop.f32.mrf.mxu2  ;;  %v18785_v36 = vld [vmem:[#allocation196_spill] sm:$0xff] }
 0x510   :  { %v2823_v47 = vadd.f32 %v2822_v35, %v2653_v26  ;;  %v2656_v2 = vpop.f32.mrf.mxu0  ;;  %v18786_v35 = vmax.f32 %v18784_v49, %v18785_v36  ;;  %v18796_v36 = vld [vmem:[#allocation55_spill] sm:$0xff] }
 0x511   :  { %18773 = vst [vmem:[#allocation31_spill] sm:$0xff] %v14702_v27  ;;  %v18788_v27 = vld [vmem:[#allocation52_spill] sm:$0xff] }
 0x512   :  { %v14707_v15 = vmax.f32 %v18776_v53, %v2823_v47  ;;  %v18783_v53 = vld [vmem:[#allocation41_spill] sm:$0xff] }
 0x513   :  { %2695 = vmatmul.bf16.gmra.mxu0 %v18746_v59 }
 0x514   :  { %18777 = vst [vmem:[#allocation183_spill] sm:$0xff] %v14707_v15  ;;  %v2494_v14 = vpop.f32.mrf.mxu3  ;;  %9609 = vmatmul.msk.bf16.gmra.mxu2 %vm481_vm0, %v18747_v30 }
 0x515   :  { %v2495_v24 = vadd.f32 %v2494_v14, %v2325_v50  ;;  %v2328_v41 = vpop.f32.mrf.mxu1 }
 0x517   :  { %v14715_v3 = vmax.f32 %v18780_v39, %v2495_v24  ;;  %v2825_v26 = vpop.f32.mrf.mxu2  ;;  %v18790_v24 = vmax.f32 %v18788_v27, %v18789_v55  ;;  %v18797_v27 = vld [vmem:[#allocation199_spill] sm:$0xff]  ;;  %v18800_v55 = vld [vmem:[#allocation56_spill] sm:$0xff] }
 0x518   :  { %v2826_v58 = vadd.f32 %v2825_v26, %v2656_v2  ;;  %2367 = vmatmul.bf16.gmra.mxu1 %v18782_v12  ;;  %v2658_v37 = vpop.f32.mrf.mxu0 }
 0x519   :  { %18781 = vst [vmem:[#allocation24_spill] sm:$0xff] %v14715_v3  ;;  %9579 = vmatmul.msk.bf16.gmra.mxu3 %vm481_vm0, %v18783_v53  ;;  %v18792_v3 = vld [vmem:[#allocation45_spill] sm:$0xff] }
 0x51a   :  { %v14723_v47 = vmax.f32 %v18786_v35, %v2826_v58  ;;  %v18794_v30 = vmax.f32 %v18792_v3, %v18793_v43  ;;  %v18798_v35 = vmax.f32 %v18796_v36, %v18797_v27  ;;  %v18802_v3 = vld [vmem:[#allocation48_spill] sm:$0xff]  ;;  %v18807_v36 = vld [vmem:[#allocation201_spill] sm:$0xff] }
 0x51c   :  { %18787 = vst [vmem:[#allocation184_spill] sm:$0xff] %v14723_v47  ;;  %v2497_v50 = vpop.f32.mrf.mxu3 }
 0x51d   :  { %v2498_v14 = vadd.f32 %v2497_v50, %v2328_v41  ;;  %v2330_v15 = vpop.f32.mrf.mxu1 }
 0x51f   :  { %v14728_v10 = vmax.f32 %v18790_v24, %v2498_v14  ;;  %v2827_v2 = vpop.f32.mrf.mxu2  ;;  %v18803_v24 = vld [vmem:[#allocation200_spill] sm:$0xff] }
 0x520   :  { %v2828_v39 = vadd.f32 %v2827_v2, %v2658_v37  ;;  %v2661_v26 = vpop.f32.mrf.mxu0  ;;  %v18804_v2 = vmax.f32 %v18802_v3, %v18803_v24 }
 0x521   :  { %18791 = vst [vmem:[#allocation34_spill] sm:$0xff] %v14728_v10  ;;  %v18806_v10 = vld [vmem:[#allocation58_spill] sm:$0xff] }
 0x522   :  { %v14733_v59 = vmax.f32 %v18794_v30, %v2828_v39  ;;  %v18801_v30 = vld [vmem:[#allocation47_spill] sm:$0xff] }
 0x523   :  { %2700 = vmatmul.bf16.gmra.mxu0 %v18764_v7 }
 0x524   :  { %18795 = vst [vmem:[#allocation185_spill] sm:$0xff] %v14733_v59  ;;  %v2499_v58 = vpop.f32.mrf.mxu3  ;;  %9610 = vmatmul.msk.bf16.gmra.mxu2 %vm481_vm0, %v18765_v20 }
 0x525   :  { %v2500_v41 = vadd.f32 %v2499_v58, %v2330_v15  ;;  %v2333_v49 = vpop.f32.mrf.mxu1 }
 0x527   :  { %v14741_v50 = vmax.f32 %v18798_v35, %v2500_v41  ;;  %v2830_v37 = vpop.f32.mrf.mxu2  ;;  %v18808_v41 = vmax.f32 %v18806_v10, %v18807_v36  ;;  %v9652_v35 = vld [vmem:[%s17772_s0 + $0x1e0] sm:$0xf] }
 0x528   :  { %v2831_v14 = vadd.f32 %v2830_v37, %v2661_v26  ;;  %2372 = vmatmul.bf16.gmra.mxu1 %v18800_v55  ;;  %v2663_v43 = vpop.f32.mrf.mxu0  ;;  %v12009_v37 = vld [vmem:[%s17772_s0 + $0x1e4] sm:$0xf0] }
 0x529   :  { %18799 = vst [vmem:[#allocation27_spill] sm:$0xff] %v14741_v50  ;;  %9580 = vmatmul.msk.bf16.gmra.mxu3 %vm481_vm0, %v18801_v30  ;;  %v9653_v24 = vor.u32 %v12009_v37, %v9652_v35  ;;  %v18818_v37 = vld [vmem:[#allocation62_spill] sm:$0xff] }
 0x52a   :  { %v14749_v39 = vmax.f32 %v18804_v2, %v2831_v14  ;;  %v18810_v2 = vld [vmem:[#allocation51_spill] sm:$0xff] }
 0x52b   :  { %3190 = vmatpush.bf16.msrb.mxu1 %v9653_v24  ;;  %v18820_v24 = vld [vmem:[#allocation54_spill] sm:$0xff] }
 0x52c   :  { %18805 = vst [vmem:[#allocation186_spill] sm:$0xff] %v14749_v39  ;;  %v2502_v15 = vpop.f32.mrf.mxu3 }
 0x52d   :  { %v2503_v58 = vadd.f32 %v2502_v15, %v2333_v49  ;;  %v2335_v59 = vpop.f32.mrf.mxu1  ;;  %v18811_v49 = vld [vmem:[#allocation202_spill] sm:$0xff] }
 0x52e   :  { %v18812_v15 = vmax.f32 %v18810_v2, %v18811_v49  ;;  %v18819_v2 = vld [vmem:[#allocation53_spill] sm:$0xff]  ;;  %v18821_v49 = vld [vmem:[#allocation204_spill] sm:$0xff] }
 0x52f   :  { %v14754_v27 = vmax.f32 %v18808_v41, %v2503_v58  ;;  %v2832_v26 = vpop.f32.mrf.mxu2  ;;  %v18814_v41 = vld [vmem:[#allocation61_spill] sm:$0xff] }
 0x530   :  { %v2833_v3 = vadd.f32 %v2832_v26, %v2663_v43  ;;  %v2666_v14 = vpop.f32.mrf.mxu0 }
 0x531   :  { %18809 = vst [vmem:[#allocation37_spill] sm:$0xff] %v14754_v27  ;;  %v18815_v27 = vld [vmem:[#allocation203_spill] sm:$0xff] }
 0x532   :  { %v14765_v39 = vmax.f32 %v18812_v15, %v2833_v3  ;;  %v18816_v50 = vmax.f32 %v18814_v41, %v18815_v27  ;;  %v18822_v15 = vmax.f32 %v18820_v24, %v18821_v49  ;;  %v18825_v27 = vld [vmem:[#allocation205_spill] sm:$0xff]  ;;  %v12008_v41 = vld [vmem:[%s17772_s0 + $0x1e4] sm:$0xf] }
 0x533   :  { %2705 = vmatmul.bf16.gmra.mxu0 %v18782_v12  ;;  %v18847_v12 = vld [vmem:[#allocation210_spill] sm:$0xff] }
 0x534   :  { %18813 = vst [vmem:[#allocation187_spill] sm:$0xff] %v14765_v39  ;;  %v2504_v10 = vpop.f32.mrf.mxu3  ;;  %9611 = vmatmul.msk.bf16.gmra.mxu2 %vm481_vm0, %v18783_v53  ;;  %v18824_v53 = vld [vmem:[#allocation64_spill] sm:$0xff] }
 0x535   :  { %v2505_v58 = vadd.f32 %v2504_v10, %v2335_v59  ;;  %v2338_v36 = vpop.f32.mrf.mxu1 }
 0x537   :  { %v14773_v43 = vmax.f32 %v18816_v50, %v2505_v58  ;;  %v2835_v26 = vpop.f32.mrf.mxu2  ;;  %v18826_v50 = vmax.f32 %v18824_v53, %v18825_v27 }
 0x538   :  { %v2836_v35 = vadd.f32 %v2835_v26, %v2666_v14  ;;  %2377 = vmatmul.bf16.gmra.mxu1 %v18818_v37  ;;  %v2668_v3 = vpop.f32.mrf.mxu0  ;;  %v9654_v26 = vld [vmem:[%s17772_s0 + $0x1e8] sm:$0xf0] }
 0x539   :  { %18817 = vst [vmem:[#allocation30_spill] sm:$0xff] %v14773_v43  ;;  %9581 = vmatmul.msk.bf16.gmra.mxu3 %vm481_vm0, %v18819_v2  ;;  %v9657_v49 = vor.u32 %v12008_v41, %v9654_v26  ;;  %v18836_v26 = vld [vmem:[#allocation68_spill] sm:$0xff] }
 0x53a   :  { %v14781_v39 = vmax.f32 %v18822_v15, %v2836_v35  ;;  %v18828_v15 = vld [vmem:[#allocation57_spill] sm:$0xff] }
 0x53b   :  { %3528 = vmatpush.bf16.msrb.mxu0 %v9657_v49  ;;  %v18838_v49 = vld [vmem:[#allocation60_spill] sm:$0xff] }
 0x53c   :  { %18823 = vst [vmem:[#allocation188_spill] sm:$0xff] %v14781_v39  ;;  %v2507_v59 = vpop.f32.mrf.mxu3 }
 0x53d   :  { %v2508_v10 = vadd.f32 %v2507_v59, %v2338_v36  ;;  %v2340_v47 = vpop.f32.mrf.mxu1  ;;  %v18829_v36 = vld [vmem:[#allocation206_spill] sm:$0xff] }
 0x53e   :  { %v18830_v59 = vmax.f32 %v18828_v15, %v18829_v36  ;;  %v18837_v15 = vld [vmem:[#allocation59_spill] sm:$0xff]  ;;  %v18839_v36 = vld [vmem:[#allocation208_spill] sm:$0xff] }
 0x53f   :  { %v14786_v58 = vmax.f32 %v18826_v50, %v2508_v10  ;;  %v2837_v14 = vpop.f32.mrf.mxu2  ;;  %v18832_v50 = vld [vmem:[#allocation67_spill] sm:$0xff] }
 0x540   :  { %v2838_v24 = vadd.f32 %v2837_v14, %v2668_v3  ;;  %v2671_v35 = vpop.f32.mrf.mxu0 }
 0x541   :  { %18827 = vst [vmem:[#allocation40_spill] sm:$0xff] %v14786_v58  ;;  %v18833_v58 = vld [vmem:[#allocation207_spill] sm:$0xff] }
 0x542   :  { %v14797_v39 = vmax.f32 %v18830_v59, %v2838_v24  ;;  %v18834_v43 = vmax.f32 %v18832_v50, %v18833_v58  ;;  %v18840_v59 = vmax.f32 %v18838_v49, %v18839_v36  ;;  %v18843_v58 = vld [vmem:[#allocation209_spill] sm:$0xff] }
 0x543   :  { %2710 = vmatmul.bf16.gmra.mxu0 %v18800_v55  ;;  %v18842_v55 = vld [vmem:[#allocation70_spill] sm:$0xff]  ;;  %v18850_v36 = vld [vmem:[#allocation73_spill] sm:$0xff] }
 0x544   :  { %18831 = vst [vmem:[#allocation189_spill] sm:$0xff] %v14797_v39  ;;  %v2509_v53 = vpop.f32.mrf.mxu3  ;;  %9612 = vmatmul.msk.bf16.gmra.mxu2 %vm481_vm0, %v18801_v30 }
 0x545   :  { %v2510_v10 = vadd.f32 %v2509_v53, %v2340_v47  ;;  %v2343_v27 = vpop.f32.mrf.mxu1 }
 0x547   :  { %v14805_v3 = vmax.f32 %v18834_v43, %v2510_v10  ;;  %v2840_v14 = vpop.f32.mrf.mxu2  ;;  %v18844_v43 = vmax.f32 %v18842_v55, %v18843_v58  ;;  %v18851_v55 = vld [vmem:[#allocation211_spill] sm:$0xff]  ;;  %v18854_v58 = vld [vmem:[#allocation74_spill] sm:$0xff] }
 0x548   :  { %v2841_v41 = vadd.f32 %v2840_v14, %v2671_v35  ;;  %2382 = vmatmul.bf16.gmra.mxu1 %v18836_v26  ;;  %v2673_v24 = vpop.f32.mrf.mxu0 }
 0x549   :  { %18835 = vst [vmem:[#allocation33_spill] sm:$0xff] %v14805_v3  ;;  %9582 = vmatmul.msk.bf16.gmra.mxu3 %vm481_vm0, %v18837_v15  ;;  %v18846_v3 = vld [vmem:[#allocation63_spill] sm:$0xff] }
 0x54a   :  { %v14813_v39 = vmax.f32 %v18840_v59, %v2841_v41  ;;  %v18848_v20 = vmax.f32 %v18846_v3, %v18847_v12  ;;  %v18852_v59 = vmax.f32 %v18850_v36, %v18851_v55  ;;  %v18856_v3 = vld [vmem:[#allocation66_spill] sm:$0xff]  ;;  %v18861_v36 = vld [vmem:[#allocation213_spill] sm:$0xff] }
 0x54c   :  { %18841 = vst [vmem:[#allocation190_spill] sm:$0xff] %v14813_v39  ;;  %v2512_v47 = vpop.f32.mrf.mxu3  ;;  %v18865_v39 = vld [vmem:[#allocation214_spill] sm:$0xff] }
 0x54d   :  { %v2513_v53 = vadd.f32 %v2512_v47, %v2343_v27  ;;  %v2345_v30 = vpop.f32.mrf.mxu1 }
 0x54f   :  { %v14818_v10 = vmax.f32 %v18844_v43, %v2513_v53  ;;  %v2842_v35 = vpop.f32.mrf.mxu2  ;;  %v18857_v43 = vld [vmem:[#allocation212_spill] sm:$0xff] }
 0x550   :  { %v2843_v50 = vadd.f32 %v2842_v35, %v2673_v24  ;;  %v2676_v14 = vpop.f32.mrf.mxu0  ;;  %v18858_v35 = vmax.f32 %v18856_v3, %v18857_v43  ;;  %v18868_v43 = vld [vmem:[#allocation79_spill] sm:$0xff] }
 0x551   :  { %18845 = vst [vmem:[#allocation43_spill] sm:$0xff] %v14818_v10  ;;  %v18860_v10 = vld [vmem:[#allocation76_spill] sm:$0xff] }
 0x552   :  { %v14823_v7 = vmax.f32 %v18848_v20, %v2843_v50  ;;  %v18855_v20 = vld [vmem:[#allocation65_spill] sm:$0xff] }
 0x553   :  { %2715 = vmatmul.bf16.gmra.mxu0 %v18818_v37 }
 0x554   :  { %18849 = vst [vmem:[#allocation191_spill] sm:$0xff] %v14823_v7  ;;  %v2514_v41 = vpop.f32.mrf.mxu3  ;;  %9613 = vmatmul.msk.bf16.gmra.mxu2 %vm481_vm0, %v18819_v2 }
 0x555   :  { %v2515_v27 = vadd.f32 %v2514_v41, %v2345_v30  ;;  %v2348_v49 = vpop.f32.mrf.mxu1 }
 0x557   :  { %v14831_v47 = vmax.f32 %v18852_v59, %v2515_v27  ;;  %v2845_v24 = vpop.f32.mrf.mxu2  ;;  %v18862_v27 = vmax.f32 %v18860_v10, %v18861_v36  ;;  %v18869_v10 = vld [vmem:[#allocation215_spill] sm:$0xff]  ;;  %v18872_v36 = vld [vmem:[#allocation80_spill] sm:$0xff] }
 0x558   :  { %v2846_v53 = vadd.f32 %v2845_v24, %v2676_v14  ;;  %2387 = vmatmul.bf16.gmra.mxu1 %v18854_v58  ;;  %v2678_v12 = vpop.f32.mrf.mxu0 }
 0x559   :  { %18853 = vst [vmem:[#allocation36_spill] sm:$0xff] %v14831_v47  ;;  %9583 = vmatmul.msk.bf16.gmra.mxu3 %vm481_vm0, %v18855_v20  ;;  %v18864_v47 = vld [vmem:[#allocation69_spill] sm:$0xff] }
 0x55a   :  { %v14839_v50 = vmax.f32 %v18858_v35, %v2846_v53  ;;  %v18866_v2 = vmax.f32 %v18864_v47, %v18865_v39  ;;  %v18870_v35 = vmax.f32 %v18868_v43, %v18869_v10  ;;  %v18874_v47 = vld [vmem:[#allocation72_spill] sm:$0xff]  ;;  %v18879_v43 = vld [vmem:[#allocation217_spill] sm:$0xff] }
 0x55c   :  { %18859 = vst [vmem:[#allocation192_spill] sm:$0xff] %v14839_v50  ;;  %v2517_v30 = vpop.f32.mrf.mxu3 }
 0x55d   :  { %v2518_v41 = vadd.f32 %v2517_v30, %v2348_v49  ;;  %v2350_v7 = vpop.f32.mrf.mxu1 }
 0x55f   :  { %v14844_v55 = vmax.f32 %v18862_v27, %v2518_v41  ;;  %v2847_v14 = vpop.f32.mrf.mxu2  ;;  %v18875_v27 = vld [vmem:[#allocation216_spill] sm:$0xff] }
 0x560   :  { %v2848_v59 = vadd.f32 %v2847_v14, %v2678_v12  ;;  %v2681_v24 = vpop.f32.mrf.mxu0  ;;  %v18876_v14 = vmax.f32 %v18874_v47, %v18875_v27 }
 0x561   :  { %18863 = vst [vmem:[#allocation46_spill] sm:$0xff] %v14844_v55  ;;  %v18878_v55 = vld [vmem:[#allocation82_spill] sm:$0xff] }
 0x562   :  { %v14849_v37 = vmax.f32 %v18866_v2, %v2848_v59  ;;  %v18873_v2 = vld [vmem:[#allocation71_spill] sm:$0xff] }
 0x563   :  { %2720 = vmatmul.bf16.gmra.mxu0 %v18836_v26 }
 0x564   :  { %18867 = vst [vmem:[#allocation193_spill] sm:$0xff] %v14849_v37  ;;  %v2519_v53 = vpop.f32.mrf.mxu3  ;;  %9614 = vmatmul.msk.bf16.gmra.mxu2 %vm481_vm0, %v18837_v15 }
 0x565   :  { %v2520_v49 = vadd.f32 %v2519_v53, %v2350_v7  ;;  %v2353_v3 = vpop.f32.mrf.mxu1 }
 0x567   :  { %v14857_v30 = vmax.f32 %v18870_v35, %v2520_v49  ;;  %v2850_v12 = vpop.f32.mrf.mxu2  ;;  %v18880_v49 = vmax.f32 %v18878_v55, %v18879_v43  ;;  %v9644_v35 = vld [vmem:[%s17772_s0 + $0x1d0] sm:$0xf] }
 0x568   :  { %v2851_v41 = vadd.f32 %v2850_v12, %v2681_v24  ;;  %2392 = vmatmul.bf16.gmra.mxu1 %v18872_v36  ;;  %v2683_v39 = vpop.f32.mrf.mxu0  ;;  %v12007_v12 = vld [vmem:[%s17772_s0 + $0x1d4] sm:$0xf0] }
 0x569   :  { %18871 = vst [vmem:[#allocation39_spill] sm:$0xff] %v14857_v30  ;;  %9584 = vmatmul.msk.bf16.gmra.mxu3 %vm481_vm0, %v18873_v2  ;;  %v9645_v27 = vor.u32 %v12007_v12, %v9644_v35  ;;  %v18890_v12 = vld [vmem:[#allocation86_spill] sm:$0xff] }
 0x56a   :  { %v14865_v59 = vmax.f32 %v18876_v14, %v2851_v41  ;;  %v18882_v14 = vld [vmem:[#allocation75_spill] sm:$0xff] }
 0x56b   :  { %3191 = vmatpush.bf16.msrb.mxu1 %v9645_v27  ;;  %v18892_v27 = vld [vmem:[#allocation78_spill] sm:$0xff] }
 0x56c   :  { %18877 = vst [vmem:[#allocation194_spill] sm:$0xff] %v14865_v59  ;;  %v2522_v7 = vpop.f32.mrf.mxu3 }
 0x56d   :  { %v2523_v53 = vadd.f32 %v2522_v7, %v2353_v3  ;;  %v2355_v37 = vpop.f32.mrf.mxu1  ;;  %v18883_v3 = vld [vmem:[#allocation218_spill] sm:$0xff] }
 0x56e   :  { %v18884_v7 = vmax.f32 %v18882_v14, %v18883_v3  ;;  %v18891_v14 = vld [vmem:[#allocation77_spill] sm:$0xff]  ;;  %v18893_v3 = vld [vmem:[#allocation220_spill] sm:$0xff] }
 0x56f   :  { %v14870_v10 = vmax.f32 %v18880_v49, %v2523_v53  ;;  %v2852_v24 = vpop.f32.mrf.mxu2  ;;  %v18886_v49 = vld [vmem:[#allocation85_spill] sm:$0xff] }
 0x570   :  { %v2853_v47 = vadd.f32 %v2852_v24, %v2683_v39  ;;  %v2686_v41 = vpop.f32.mrf.mxu0 }
 0x571   :  { %18881 = vst [vmem:[#allocation49_spill] sm:$0xff] %v14870_v10  ;;  %v18887_v10 = vld [vmem:[#allocation219_spill] sm:$0xff] }
 0x572   :  { %v14881_v59 = vmax.f32 %v18884_v7, %v2853_v47  ;;  %v18888_v30 = vmax.f32 %v18886_v49, %v18887_v10  ;;  %v18894_v7 = vmax.f32 %v18892_v27, %v18893_v3  ;;  %v18897_v10 = vld [vmem:[#allocation221_spill] sm:$0xff]  ;;  %v12006_v49 = vld [vmem:[%s17772_s0 + $0x1d4] sm:$0xf] }
 0x573   :  { %2725 = vmatmul.bf16.gmra.mxu0 %v18854_v58  ;;  %v18919_v58 = vld [vmem:[#allocation226_spill] sm:$0xff] }
 0x574   :  { %18885 = vst [vmem:[#allocation195_spill] sm:$0xff] %v14881_v59  ;;  %v2524_v55 = vpop.f32.mrf.mxu3  ;;  %9615 = vmatmul.msk.bf16.gmra.mxu2 %vm481_vm0, %v18855_v20  ;;  %v18896_v20 = vld [vmem:[#allocation88_spill] sm:$0xff] }
 0x575   :  { %v2525_v53 = vadd.f32 %v2524_v55, %v2355_v37  ;;  %v2358_v43 = vpop.f32.mrf.mxu1 }
 0x577   :  { %v14889_v39 = vmax.f32 %v18888_v30, %v2525_v53  ;;  %v2855_v24 = vpop.f32.mrf.mxu2  ;;  %v18898_v30 = vmax.f32 %v18896_v20, %v18897_v10 }
 0x578   :  { %v2856_v35 = vadd.f32 %v2855_v24, %v2686_v41  ;;  %2397 = vmatmul.bf16.gmra.mxu1 %v18890_v12  ;;  %v2688_v47 = vpop.f32.mrf.mxu0  ;;  %v9646_v24 = vld [vmem:[%s17772_s0 + $0x1d8] sm:$0xf0] }
 0x579   :  { %18889 = vst [vmem:[#allocation42_spill] sm:$0xff] %v14889_v39  ;;  %9585 = vmatmul.msk.bf16.gmra.mxu3 %vm481_vm0, %v18891_v14  ;;  %v9649_v3 = vor.u32 %v12006_v49, %v9646_v24  ;;  %v18908_v24 = vld [vmem:[#allocation92_spill] sm:$0xff] }
 0x57a   :  { %v14897_v59 = vmax.f32 %v18894_v7, %v2856_v35  ;;  %v18900_v7 = vld [vmem:[#allocation81_spill] sm:$0xff] }
 0x57b   :  { %3529 = vmatpush.bf16.msrb.mxu0 %v9649_v3  ;;  %v18910_v3 = vld [vmem:[#allocation84_spill] sm:$0xff] }
 0x57c   :  { %18895 = vst [vmem:[#allocation196_spill] sm:$0xff] %v14897_v59  ;;  %v2527_v37 = vpop.f32.mrf.mxu3 }
 0x57d   :  { %v2528_v55 = vadd.f32 %v2527_v37, %v2358_v43  ;;  %v2360_v50 = vpop.f32.mrf.mxu1  ;;  %v18901_v43 = vld [vmem:[#allocation222_spill] sm:$0xff] }
 0x57e   :  { %v18902_v37 = vmax.f32 %v18900_v7, %v18901_v43  ;;  %v18909_v7 = vld [vmem:[#allocation83_spill] sm:$0xff]  ;;  %v18911_v43 = vld [vmem:[#allocation224_spill] sm:$0xff] }
 0x57f   :  { %v14902_v53 = vmax.f32 %v18898_v30, %v2528_v55  ;;  %v2857_v41 = vpop.f32.mrf.mxu2  ;;  %v18904_v30 = vld [vmem:[#allocation91_spill] sm:$0xff] }
 0x580   :  { %v2858_v27 = vadd.f32 %v2857_v41, %v2688_v47  ;;  %v2691_v35 = vpop.f32.mrf.mxu0 }
 0x581   :  { %18899 = vst [vmem:[#allocation52_spill] sm:$0xff] %v14902_v53  ;;  %v18905_v53 = vld [vmem:[#allocation223_spill] sm:$0xff] }
 0x582   :  { %v14913_v59 = vmax.f32 %v18902_v37, %v2858_v27  ;;  %v18906_v39 = vmax.f32 %v18904_v30, %v18905_v53  ;;  %v18912_v37 = vmax.f32 %v18910_v3, %v18911_v43  ;;  %v18915_v53 = vld [vmem:[#allocation225_spill] sm:$0xff] }
 0x583   :  { %2730 = vmatmul.bf16.gmra.mxu0 %v18872_v36  ;;  %v18914_v36 = vld [vmem:[#allocation94_spill] sm:$0xff]  ;;  %v18922_v43 = vld [vmem:[#allocation97_spill] sm:$0xff] }
 0x584   :  { %18903 = vst [vmem:[#allocation197_spill] sm:$0xff] %v14913_v59  ;;  %v2529_v20 = vpop.f32.mrf.mxu3  ;;  %9616 = vmatmul.msk.bf16.gmra.mxu2 %vm481_vm0, %v18873_v2 }
 0x585   :  { %v2530_v55 = vadd.f32 %v2529_v20, %v2360_v50  ;;  %v2363_v10 = vpop.f32.mrf.mxu1 }
 0x587   :  { %v14921_v47 = vmax.f32 %v18906_v39, %v2530_v55  ;;  %v2860_v41 = vpop.f32.mrf.mxu2  ;;  %v18916_v39 = vmax.f32 %v18914_v36, %v18915_v53  ;;  %v18923_v36 = vld [vmem:[#allocation227_spill] sm:$0xff]  ;;  %v18926_v53 = vld [vmem:[#allocation98_spill] sm:$0xff] }
 0x588   :  { %v2861_v49 = vadd.f32 %v2860_v41, %v2691_v35  ;;  %2402 = vmatmul.bf16.gmra.mxu1 %v18908_v24  ;;  %v2693_v27 = vpop.f32.mrf.mxu0 }
 0x589   :  { %18907 = vst [vmem:[#allocation45_spill] sm:$0xff] %v14921_v47  ;;  %9586 = vmatmul.msk.bf16.gmra.mxu3 %vm481_vm0, %v18909_v7  ;;  %v18918_v47 = vld [vmem:[#allocation87_spill] sm:$0xff] }
 0x58a   :  { %v14929_v59 = vmax.f32 %v18912_v37, %v2861_v49  ;;  %v18920_v15 = vmax.f32 %v18918_v47, %v18919_v58  ;;  %v18924_v37 = vmax.f32 %v18922_v43, %v18923_v36  ;;  %v18928_v47 = vld [vmem:[#allocation90_spill] sm:$0xff]  ;;  %v18933_v43 = vld [vmem:[#allocation229_spill] sm:$0xff] }
 0x58c   :  { %18913 = vst [vmem:[#allocation198_spill] sm:$0xff] %v14929_v59  ;;  %v2532_v50 = vpop.f32.mrf.mxu3  ;;  %v18937_v59 = vld [vmem:[#allocation230_spill] sm:$0xff] }
 0x58d   :  { %v2533_v20 = vadd.f32 %v2532_v50, %v2363_v10  ;;  %v2365_v2 = vpop.f32.mrf.mxu1 }
 0x58f   :  { %v14934_v55 = vmax.f32 %v18916_v39, %v2533_v20  ;;  %v2862_v35 = vpop.f32.mrf.mxu2  ;;  %v18929_v39 = vld [vmem:[#allocation228_spill] sm:$0xff] }
 0x590   :  { %v2863_v30 = vadd.f32 %v2862_v35, %v2693_v27  ;;  %v2696_v41 = vpop.f32.mrf.mxu0  ;;  %v18930_v35 = vmax.f32 %v18928_v47, %v18929_v39  ;;  %v18940_v39 = vld [vmem:[#allocation103_spill] sm:$0xff] }
 0x591   :  { %18917 = vst [vmem:[#allocation55_spill] sm:$0xff] %v14934_v55  ;;  %v18932_v55 = vld [vmem:[#allocation100_spill] sm:$0xff] }
 0x592   :  { %v14939_v26 = vmax.f32 %v18920_v15, %v2863_v30  ;;  %v18927_v15 = vld [vmem:[#allocation89_spill] sm:$0xff] }
 0x593   :  { %2735 = vmatmul.bf16.gmra.mxu0 %v18890_v12 }
 0x594   :  { %18921 = vst [vmem:[#allocation199_spill] sm:$0xff] %v14939_v26  ;;  %v2534_v49 = vpop.f32.mrf.mxu3  ;;  %9617 = vmatmul.msk.bf16.gmra.mxu2 %vm481_vm0, %v18891_v14 }
 0x595   :  { %v2535_v10 = vadd.f32 %v2534_v49, %v2365_v2  ;;  %v2368_v3 = vpop.f32.mrf.mxu1 }
 0x597   :  { %v14947_v50 = vmax.f32 %v18924_v37, %v2535_v10  ;;  %v2865_v27 = vpop.f32.mrf.mxu2  ;;  %v18934_v10 = vmax.f32 %v18932_v55, %v18933_v43  ;;  %v18941_v55 = vld [vmem:[#allocation231_spill] sm:$0xff]  ;;  %v18944_v43 = vld [vmem:[#allocation104_spill] sm:$0xff] }
 0x598   :  { %v2866_v20 = vadd.f32 %v2865_v27, %v2696_v41  ;;  %2407 = vmatmul.bf16.gmra.mxu1 %v18926_v53  ;;  %v2698_v58 = vpop.f32.mrf.mxu0 }
 0x599   :  { %18925 = vst [vmem:[#allocation48_spill] sm:$0xff] %v14947_v50  ;;  %9587 = vmatmul.msk.bf16.gmra.mxu3 %vm481_vm0, %v18927_v15  ;;  %v18936_v50 = vld [vmem:[#allocation93_spill] sm:$0xff] }
 0x59a   :  { %v14955_v30 = vmax.f32 %v18930_v35, %v2866_v20  ;;  %v18938_v14 = vmax.f32 %v18936_v50, %v18937_v59  ;;  %v18942_v35 = vmax.f32 %v18940_v39, %v18941_v55  ;;  %v18946_v50 = vld [vmem:[#allocation96_spill] sm:$0xff]  ;;  %v18951_v39 = vld [vmem:[#allocation233_spill] sm:$0xff] }
 0x59c   :  { %18931 = vst [vmem:[#allocation200_spill] sm:$0xff] %v14955_v30  ;;  %v2537_v2 = vpop.f32.mrf.mxu3  ;;  %v18967_v30 = vld [vmem:[#allocation112_spill] sm:$0xff] }
 0x59d   :  { %v2538_v49 = vadd.f32 %v2537_v2, %v2368_v3  ;;  %v2370_v26 = vpop.f32.mrf.mxu1 }
 0x59f   :  { %v14960_v36 = vmax.f32 %v18934_v10, %v2538_v49  ;;  %v2867_v41 = vpop.f32.mrf.mxu2  ;;  %v18947_v10 = vld [vmem:[#allocation232_spill] sm:$0xff] }
 0x5a0   :  { %v2868_v37 = vadd.f32 %v2867_v41, %v2698_v58  ;;  %v2701_v27 = vpop.f32.mrf.mxu0  ;;  %v18948_v41 = vmax.f32 %v18946_v50, %v18947_v10 }
 0x5a1   :  { %18935 = vst [vmem:[#allocation58_spill] sm:$0xff] %v14960_v36  ;;  %v18950_v36 = vld [vmem:[#allocation106_spill] sm:$0xff] }
 0x5a2   :  { %v14965_v12 = vmax.f32 %v18938_v14, %v2868_v37  ;;  %v18945_v14 = vld [vmem:[#allocation95_spill] sm:$0xff] }
 0x5a3   :  { %2740 = vmatmul.bf16.gmra.mxu0 %v18908_v24 }
 0x5a4   :  { %18939 = vst [vmem:[#allocation201_spill] sm:$0xff] %v14965_v12  ;;  %v2539_v20 = vpop.f32.mrf.mxu3  ;;  %9618 = vmatmul.msk.bf16.gmra.mxu2 %vm481_vm0, %v18909_v7 }
 0x5a5   :  { %v2540_v3 = vadd.f32 %v2539_v20, %v2370_v26  ;;  %v2373_v47 = vpop.f32.mrf.mxu1 }
 0x5a7   :  { %v14973_v2 = vmax.f32 %v18942_v35, %v2540_v3  ;;  %v2870_v58 = vpop.f32.mrf.mxu2  ;;  %v18952_v3 = vmax.f32 %v18950_v36, %v18951_v39  ;;  %v9636_v35 = vld [vmem:[%s17772_s0 + $0x1c0] sm:$0xf] }
 0x5a8   :  { %v2871_v49 = vadd.f32 %v2870_v58, %v2701_v27  ;;  %2412 = vmatmul.bf16.gmra.mxu1 %v18944_v43  ;;  %v2703_v59 = vpop.f32.mrf.mxu0  ;;  %v12005_v58 = vld [vmem:[%s17772_s0 + $0x1c4] sm:$0xf0] }
 0x5a9   :  { %18943 = vst [vmem:[#allocation51_spill] sm:$0xff] %v14973_v2  ;;  %9588 = vmatmul.msk.bf16.gmra.mxu3 %vm481_vm0, %v18945_v14  ;;  %v9637_v10 = vor.u32 %v12005_v58, %v9636_v35 }
 0x5aa   :  { %v14981_v37 = vmax.f32 %v18948_v41, %v2871_v49  ;;  %v18954_v41 = vld [vmem:[#allocation99_spill] sm:$0xff] }
 0x5ab   :  { %3192 = vmatpush.bf16.msrb.mxu1 %v9637_v10  ;;  %v18963_v10 = vld [vmem:[#allocation102_spill] sm:$0xff] }
 0x5ac   :  { %18949 = vst [vmem:[#allocation202_spill] sm:$0xff] %v14981_v37  ;;  %v2542_v26 = vpop.f32.mrf.mxu3 }
 0x5ad   :  { %v2543_v20 = vadd.f32 %v2542_v26, %v2373_v47  ;;  %v2375_v12 = vpop.f32.mrf.mxu1  ;;  %v18955_v47 = vld [vmem:[#allocation234_spill] sm:$0xff] }
 0x5ae   :  { %v18956_v26 = vmax.f32 %v18954_v41, %v18955_v47  ;;  %v18964_v41 = vld [vmem:[#allocation236_spill] sm:$0xff] }
 0x5af   :  { %v14986_v55 = vmax.f32 %v18952_v3, %v2543_v20  ;;  %v2872_v27 = vpop.f32.mrf.mxu2  ;;  %v18958_v3 = vld [vmem:[#allocation109_spill] sm:$0xff]  ;;  %v18965_v47 = vmax.f32 %v18963_v10, %v18964_v41 }
 0x5b0   :  { %v2873_v50 = vadd.f32 %v2872_v27, %v2703_v59  ;;  %v2706_v49 = vpop.f32.mrf.mxu0 }
 0x5b1   :  { %18953 = vst [vmem:[#allocation61_spill] sm:$0xff] %v14986_v55  ;;  %v18959_v55 = vld [vmem:[#allocation235_spill] sm:$0xff] }
 0x5b2   :  { %v14997_v37 = vmax.f32 %v18956_v26, %v2873_v50  ;;  %v18960_v2 = vmax.f32 %v18958_v3, %v18959_v55  ;;  %v18962_v50 = vld [vmem:[#allocation101_spill] sm:$0xff]  ;;  %v18968_v55 = vld [vmem:[#allocation110_spill] sm:$0xff] }
 0x5b3   :  { %2745 = vmatmul.bf16.gmra.mxu0 %v18926_v53  ;;  %v12004_v3 = vld [vmem:[%s17772_s0 + $0x1c4] sm:$0xf] }
 0x5b4   :  { %18957 = vst [vmem:[#allocation203_spill] sm:$0xff] %v14997_v37  ;;  %v2544_v36 = vpop.f32.mrf.mxu3  ;;  %9619 = vmatmul.msk.bf16.gmra.mxu2 %vm481_vm0, %v18927_v15  ;;  %v18990_v15 = vld [vmem:[#allocation241_spill] sm:$0xff] }
 0x5b5   :  { %v2545_v20 = vadd.f32 %v2544_v36, %v2375_v12  ;;  %v2378_v39 = vpop.f32.mrf.mxu1 }
 0x5b7   :  { %v15005_v59 = vmax.f32 %v18960_v2, %v2545_v20  ;;  %v2875_v27 = vpop.f32.mrf.mxu2  ;;  %v18969_v2 = vmax.f32 %v18967_v30, %v18968_v55 }
 0x5b8   :  { %v2876_v35 = vadd.f32 %v2875_v27, %v2706_v49  ;;  %2417 = vmatmul.bf16.gmra.mxu1 %v18547_v62  ;;  %v2708_v58 = vpop.f32.mrf.mxu0  ;;  %v9638_v27 = vld [vmem:[%s17772_s0 + $0x1c8] sm:$0xf0] }
 0x5b9   :  { %18961 = vst [vmem:[#allocation54_spill] sm:$0xff] %v15005_v59  ;;  %9589 = vmatmul.msk.bf16.gmra.mxu3 %vm481_vm0, %v18962_v50  ;;  %v9641_v41 = vor.u32 %v12004_v3, %v9638_v27  ;;  %v18979_v27 = vld [vmem:[#allocation116_spill] sm:$0xff] }
 0x5ba   :  { %v15013_v26 = vmax.f32 %v18965_v47, %v2876_v35  ;;  %v18971_v47 = vld [vmem:[#allocation105_spill] sm:$0xff] }
 0x5bb   :  { %3530 = vmatpush.bf16.msrb.mxu0 %v9641_v41  ;;  %v18981_v41 = vld [vmem:[#allocation108_spill] sm:$0xff] }
 0x5bc   :  { %18966 = vst [vmem:[#allocation204_spill] sm:$0xff] %v15013_v26  ;;  %v2547_v12 = vpop.f32.mrf.mxu3 }
 0x5bd   :  { %v2548_v36 = vadd.f32 %v2547_v12, %v2378_v39  ;;  %v2380_v37 = vpop.f32.mrf.mxu1  ;;  %v18972_v39 = vld [vmem:[#allocation237_spill] sm:$0xff] }
 0x5be   :  { %v18973_v12 = vmax.f32 %v18971_v47, %v18972_v39  ;;  %v18980_v47 = vld [vmem:[#allocation107_spill] sm:$0xff] }
 0x5bf   :  { %v15018_v20 = vmax.f32 %v18969_v2, %v2548_v36  ;;  %v2877_v49 = vpop.f32.mrf.mxu2  ;;  %v18975_v2 = vld [vmem:[#allocation115_spill] sm:$0xff] }
 0x5c0   :  { %v2878_v10 = vadd.f32 %v2877_v49, %v2708_v58  ;;  %v2711_v35 = vpop.f32.mrf.mxu0  ;;  %v18982_v39 = vld [vmem:[#allocation239_spill] sm:$0xff] }
 0x5c1   :  { %18970 = vst [vmem:[#allocation64_spill] sm:$0xff] %v15018_v20  ;;  %v18976_v20 = vld [vmem:[#allocation238_spill] sm:$0xff] }
 0x5c2   :  { %v15029_v26 = vmax.f32 %v18973_v12, %v2878_v10  ;;  %v18977_v59 = vmax.f32 %v18975_v2, %v18976_v20  ;;  %v18983_v12 = vmax.f32 %v18981_v41, %v18982_v39  ;;  %v18986_v20 = vld [vmem:[#allocation240_spill] sm:$0xff]  ;;  %v18993_v39 = vld [vmem:[#allocation121_spill] sm:$0xff] }
 0x5c3   :  { %2750 = vmatmul.bf16.gmra.mxu0 %v18944_v43  ;;  %v18985_v43 = vld [vmem:[#allocation118_spill] sm:$0xff] }
 0x5c4   :  { %18974 = vst [vmem:[#allocation205_spill] sm:$0xff] %v15029_v26  ;;  %v2549_v30 = vpop.f32.mrf.mxu3  ;;  %9620 = vmatmul.msk.bf16.gmra.mxu2 %vm481_vm0, %v18945_v14 }
 0x5c5   :  { %v2550_v36 = vadd.f32 %v2549_v30, %v2380_v37  ;;  %v2383_v55 = vpop.f32.mrf.mxu1 }
 0x5c7   :  { %v15037_v58 = vmax.f32 %v18977_v59, %v2550_v36  ;;  %v2880_v49 = vpop.f32.mrf.mxu2  ;;  %v18987_v59 = vmax.f32 %v18985_v43, %v18986_v20  ;;  %v18994_v43 = vld [vmem:[#allocation242_spill] sm:$0xff]  ;;  %v18999_v20 = vld [vmem:[#allocation243_spill] sm:$0xff] }
 0x5c8   :  { %v2881_v3 = vadd.f32 %v2880_v49, %v2711_v35  ;;  %2422 = vmatmul.bf16.gmra.mxu1 %v18979_v27  ;;  %v2713_v10 = vpop.f32.mrf.mxu0 }
 0x5c9   :  { %18978 = vst [vmem:[#allocation57_spill] sm:$0xff] %v15037_v58  ;;  %9590 = vmatmul.msk.bf16.gmra.mxu3 %vm481_vm0, %v18980_v47  ;;  %v18989_v58 = vld [vmem:[#allocation111_spill] sm:$0xff] }
 0x5ca   :  { %v15045_v26 = vmax.f32 %v18983_v12, %v2881_v3  ;;  %v18991_v53 = vmax.f32 %v18989_v58, %v18990_v15  ;;  %v18995_v12 = vmax.f32 %v18993_v39, %v18994_v43  ;;  %v18998_v58 = vld [vmem:[#allocation114_spill] sm:$0xff] }
 0x5cb   :  { %v19002_v39 = vld [vmem:[#allocation122_spill] sm:$0xff] }
 0x5cc   :  { %18984 = vst [vmem:[#allocation206_spill] sm:$0xff] %v15045_v26  ;;  %v2552_v37 = vpop.f32.mrf.mxu3 }
 0x5cd   :  { %v2553_v30 = vadd.f32 %v2552_v37, %v2383_v55  ;;  %v2385_v14 = vpop.f32.mrf.mxu1 }
 0x5cf   :  { %v15050_v36 = vmax.f32 %v18987_v59, %v2553_v30  ;;  %v2882_v35 = vpop.f32.mrf.mxu2  ;;  %v19000_v59 = vmax.f32 %v18998_v58, %v18999_v20 }
 0x5d0   :  { %v2883_v2 = vadd.f32 %v2882_v35, %v2713_v10  ;;  %v2716_v49 = vpop.f32.mrf.mxu0 }
 0x5d1   :  { %18988 = vst [vmem:[#allocation67_spill] sm:$0xff] %v15050_v36  ;;  %v19005_v36 = vld [vmem:[#allocation244_spill] sm:$0xff] }
 0x5d2   :  { %v15055_v7 = vmax.f32 %v18991_v53, %v2883_v2  ;;  %v18997_v53 = vld [vmem:[#allocation113_spill] sm:$0xff] }
 0x5d3   :  { %2755 = vmatmul.bf16.gmra.mxu0 %v18547_v62 }
 0x5d4   :  { %18992 = vst [vmem:[#allocation207_spill] sm:$0xff] %v15055_v7  ;;  %v2554_v3 = vpop.f32.mrf.mxu3  ;;  %9621 = vmatmul.msk.bf16.gmra.mxu2 %vm481_vm0, %v18962_v50  ;;  %v19001_v7 = vld [vmem:[#allocation124_spill] sm:$0xff] }
 0x5d5   :  { %v2555_v55 = vadd.f32 %v2554_v3, %v2385_v14  ;;  %v2388_v41 = vpop.f32.mrf.mxu1 }
 0x5d7   :  { %v15063_v37 = vmax.f32 %v18995_v12, %v2555_v55  ;;  %v2885_v10 = vpop.f32.mrf.mxu2  ;;  %v19003_v55 = vmax.f32 %v19001_v7, %v19002_v39  ;;  %v12003_v7 = vld [vmem:[%s17772_s0 + $0x1b4] sm:$0xf0] }
 0x5d8   :  { %v2886_v30 = vadd.f32 %v2885_v10, %v2716_v49  ;;  %2427 = vmatmul.bf16.gmra.mxu1 %v18567_v52  ;;  %v2718_v15 = vpop.f32.mrf.mxu0 }
 0x5d9   :  { %18996 = vst [vmem:[#allocation60_spill] sm:$0xff] %v15063_v37  ;;  %9591 = vmatmul.msk.bf16.gmra.mxu3 %vm481_vm0, %v18997_v53  ;;  %v19004_v37 = vld [vmem:[#allocation117_spill] sm:$0xff] }
 0x5da   :  { %v15071_v35 = vmax.f32 %v19000_v59, %v2886_v30  ;;  %v19006_v26 = vmax.f32 %v19004_v37, %v19005_v36  ;;  %v19008_v36 = vld [vmem:[#allocation245_spill] sm:$0xff] }
 0x5dc   :  { %v2557_v14 = vpop.f32.mrf.mxu3 }
 0x5dd   :  { %v2558_v2 = vadd.f32 %v2557_v14, %v2388_v41  ;;  %v2390_v3 = vpop.f32.mrf.mxu1  ;;  %v9628_v41 = vld [vmem:[%s17772_s0 + $0x1b0] sm:$0xf] }
 0x5df   :  { %v15076_v43 = vmax.f32 %v19003_v55, %v2558_v2  ;;  %v2887_v49 = vpop.f32.mrf.mxu2  ;;  %v19010_v55 = vld [vmem:[#allocation120_spill] sm:$0xff] }
 0x5e0   :  { %v2888_v12 = vadd.f32 %v2887_v49, %v2718_v15  ;;  %v2721_v10 = vpop.f32.mrf.mxu0  ;;  %v9629_v15 = vor.u32 %v12003_v7, %v9628_v41  ;;  %v19011_v49 = vld [vmem:[#allocation246_spill] sm:$0xff] }
 0x5e2   :  { %v15081_v50 = vmax.f32 %v19006_v26, %v2888_v12  ;;  %3193 = vmatpush.bf16.msrb.mxu1 %v9629_v15  ;;  %v19007_v26 = vld [vmem:[#allocation127_spill] sm:$0xff]  ;;  %v19012_v12 = vmax.f32 %v19010_v55, %v19011_v49  ;;  %v12378_v15 = vmov 0  }
 0x5e3   :  { %2760 = vmatmul.bf16.gmra.mxu0 %v18979_v27  ;;  %v19009_v37 = vmax.f32 %v19007_v26, %v19008_v36  ;;  %12374 = vset.pattern.permute.xlu0 %v12378_v15  ;;  %v19015_v26 = vld [vmem:[#allocation247_spill] sm:$0xff] }
 0x5e4   :  { %v2559_v30 = vpop.f32.mrf.mxu3  ;;  %9622 = vmatmul.msk.bf16.gmra.mxu2 %vm481_vm0, %v18980_v47  ;;  %12376 = vset.pattern.permute.xlu2 %v12378_v15  ;;  %v19018_v49 = vld [vmem:[#allocation123_spill] sm:$0xff] }
 0x5e5   :  { %v2560_v58 = vadd.f32 %v2559_v30, %v2390_v3  ;;  %v2393_v20 = vpop.f32.mrf.mxu1  ;;  %12375 = vset.pattern.permute.xlu1 %v12378_v15 }
 0x5e7   :  { %v15095_v59 = vmax.f32 %v19009_v37, %v2560_v58  ;;  %v2890_v14 = vpop.f32.mrf.mxu2  ;;  %v19014_v58 = vld [vmem:[#allocation129_spill] sm:$0xff] }
 0x5e8   :  { %v2891_v2 = vadd.f32 %v2890_v14, %v2721_v10  ;;  %2432 = vmatmul.bf16.gmra.mxu1 %v13490_v22  ;;  %v2723_v39 = vpop.f32.mrf.mxu0  ;;  %v3992_v10 = vld [vmem:[%s17774_s2 + $0x10] sm:$0xff]  ;;  %v19016_v36 = vmax.f32 %v19014_v58, %v19015_v26  ;;  %v19023_v58 = vld [vmem:[#allocation249_spill] sm:$0xff] }
 0x5e9   :  { %9592 = vmatmul.msk.bf16.gmra.mxu3 %vm481_vm0, %v18577_v9  ;;  %4066 = vperm.xlu0 %12374, %v3992_v10  }
 0x5ea   :  { %v15103_v41 = vmax.f32 %v19012_v12, %v2891_v2 }
 0x5ec   :  { %19013 = vst [vmem:[#allocation208_spill] sm:$0xff] %v15103_v41  ;;  %v2562_v3 = vpop.f32.mrf.mxu3 }
 0x5ed   :  { %v2563_v7 = vadd.f32 %v2562_v3, %v2393_v20  ;;  %v2395_v30 = vpop.f32.mrf.mxu1  ;;  %v19019_v20 = vld [vmem:[#allocation248_spill] sm:$0xff] }
 0x5ee   :  { %v19020_v12 = vmax.f32 %v19018_v49, %v19019_v20 }
 0x5ef   :  { %v15111_v37 = vmax.f32 %v19016_v36, %v2563_v7  ;;  %v2892_v14 = vpop.f32.mrf.mxu2  ;;  %v3993_v7 = vld [vmem:[%s17774_s2 + $0x18] sm:$0xff] }
 0x5f0   :  { %v2893_v2 = vadd.f32 %v2892_v14, %v2723_v39  ;;  %v2726_v55 = vpop.f32.mrf.mxu0  ;;  %v19022_v39 = vld [vmem:[#allocation131_spill] sm:$0xff] }
 0x5f1   :  { %19017 = vst [vmem:[#allocation70_spill] sm:$0xff] %v15111_v37  ;;  %4071 = vperm.xlu0 %12374, %v3993_v7   ;;  %v19024_v26 = vmax.f32 %v19022_v39, %v19023_v58  ;;  %v19031_v39 = vld [vmem:[#allocation132_spill] sm:$0xff] }
 0x5f2   :  { %v15116_v3 = vmax.f32 %v19020_v12, %v2893_v2 }
 0x5f3   :  { %2765 = vmatmul.bf16.gmra.mxu0 %v18567_v52 }
 0x5f4   :  { %19021 = vst [vmem:[#allocation209_spill] sm:$0xff] %v15116_v3  ;;  %v2564_v41 = vpop.f32.mrf.mxu3  ;;  %9623 = vmatmul.msk.bf16.gmra.mxu2 %vm481_vm0, %v18997_v53 }
 0x5f5   :  { %v2565_v15 = vadd.f32 %v2564_v41, %v2395_v30  ;;  %v2398_v10 = vpop.f32.mrf.mxu1  ;;  %v19026_v41 = vld [vmem:[#allocation126_spill] sm:$0xff] }
 0x5f6   :  { %v19027_v30 = vld [vmem:[#allocation250_spill] sm:$0xff] }
 0x5f7   :  { %v15127_v36 = vmax.f32 %v19024_v26, %v2565_v15  ;;  %v2895_v14 = vpop.f32.mrf.mxu2  ;;  %v19028_v20 = vmax.f32 %v19026_v41, %v19027_v30  ;;  %v3998_v15 = vld [vmem:[%s17774_s2 + $0x40] sm:$0xff]  ;;  %v12002_v41 = vld [vmem:[%s17772_s0 + $0x1b4] sm:$0xf] }
 0x5f8   :  { %v2896_v2 = vadd.f32 %v2895_v14, %v2726_v55  ;;  %2437 = vmatmul.bf16.gmra.mxu1 %v18586_v51  ;;  %v2728_v49 = vpop.f32.mrf.mxu0  ;;  %v19030_v55 = vld [vmem:[#allocation134_spill] sm:$0xff] }
 0x5f9   :  { %19025 = vst [vmem:[#allocation63_spill] sm:$0xff] %v15127_v36  ;;  %9593 = vmatmul.msk.bf16.gmra.mxu3 %vm481_vm0, %v18587_v60  ;;  %4096 = vperm.xlu0 %12374, %v3998_v15   ;;  %v19032_v58 = vmax.f32 %v19030_v55, %v19031_v39 }
 0x5fa   :  { %v15135_v12 = vmax.f32 %v19028_v20, %v2896_v2  ;;  %v19034_v20 = vld [vmem:[#allocation128_spill] sm:$0xff] }
 0x5fc   :  { %19029 = vst [vmem:[#allocation210_spill] sm:$0xff] %v15135_v12  ;;  %v2567_v3 = vpop.f32.mrf.mxu3  ;;  %v19035_v12 = vld [vmem:[#allocation125_spill] sm:$0xff] }
 0x5fd   :  { %v2568_v7 = vadd.f32 %v2567_v3, %v2398_v10  ;;  %v2400_v37 = vpop.f32.mrf.mxu1  ;;  %v9630_v3 = vld [vmem:[%s17772_s0 + $0x1b8] sm:$0xf0]  ;;  %v19036_v15 = vmax.f32 %v19034_v20, %v19035_v12  ;;  %v19038_v12 = vld [vmem:[#allocation136_spill] sm:$0xff] }
 0x5fe   :  { %v9633_v30 = vor.u32 %v12002_v41, %v9630_v3  ;;  %v19042_v20 = vld [vmem:[#allocation252_spill] sm:$0xff] }
 0x5ff   :  { %v15143_v26 = vmax.f32 %v19032_v58, %v2568_v7  ;;  %v2897_v14 = vpop.f32.mrf.mxu2  ;;  %v3991_v58 = vld [vmem:[%s17774_s2 + $0x8] sm:$0xff] }
 0x600   :  { %v2898_v10 = vadd.f32 %v2897_v14, %v2728_v49  ;;  %v2731_v2 = vpop.f32.mrf.mxu0  ;;  %3531 = vmatpush.bf16.msrb.mxu0 %v9633_v30  ;;  %v3996_v49 = vld [vmem:[%s17774_s2 + $0x30] sm:$0xff]  ;;  %v19039_v14 = vld [vmem:[#allocation251_spill] sm:$0xff] }
 0x601   :  { %19033 = vst [vmem:[#allocation73_spill] sm:$0xff] %v15143_v26  ;;  %4086 = vperm.xlu2 %12376, %v3996_v49   ;;  %4061 = vperm.xlu0 %12374, %v3991_v58   ;;  %v19040_v41 = vmax.f32 %v19038_v12, %v19039_v14  ;;  %v19045_v12 = vld [vmem:[#allocation130_spill] sm:$0xff] }
 0x602   :  { %v15154_v36 = vmax.f32 %v19036_v15, %v2898_v10  ;;  %v19043_v15 = vmax.f32 %v18595_v31, %v19042_v20  ;;  %v19049_v31 = vld [vmem:[#allocation253_spill] sm:$0xff] }
 0x603   :  { %2770 = vmatmul.bf16.gmra.mxu0 %v13490_v22 }
 0x604   :  { %19037 = vst [vmem:[#allocation211_spill] sm:$0xff] %v15154_v36  ;;  %v2569_v7 = vpop.f32.mrf.mxu3  ;;  %9624 = vmatmul.msk.bf16.gmra.mxu2 %vm481_vm0, %v18577_v9  ;;  %v19048_v9 = vld [vmem:[#allocation133_spill] sm:$0xff] }
 0x605   :  { %v2570_v55 = vadd.f32 %v2569_v7, %v2400_v37  ;;  %v2403_v39 = vpop.f32.mrf.mxu1 }
 0x607   :  { %v15168_v3 = vmax.f32 %v19040_v41, %v2570_v55  ;;  %v2900_v10 = vpop.f32.mrf.mxu2  ;;  %v3997_v55 = vld [vmem:[%s17774_s2 + $0x38] sm:$0xff] }
 0x608   :  { %v2901_v30 = vadd.f32 %v2900_v10, %v2731_v2  ;;  %3194 = vmatmul.bf16.vlgmr.msrb.gmra.mxu1 %v12554_v1  ;;  %v2733_v37 = vpop.f32.mrf.mxu0  ;;  %v19044_v2 = vld [vmem:[#allocation138_spill] sm:$0xff] }
 0x609   :  { %19041 = vst [vmem:[#allocation66_spill] sm:$0xff] %v15168_v3  ;;  %9698 = vmatmul.msk.bf16.vlgmr.msrb.gmra.mxu3 %vm481_vm0, %v12446_v16  ;;  %4091 = vperm.xlu2 %12376, %v3997_v55   ;;  %v19046_v14 = vmax.f32 %v19044_v2, %v19045_v12  ;;  %v19053_v55 = vld [vmem:[#allocation254_spill] sm:$0xff] }
 0x60a   :  { %v15176_v7 = vmax.f32 %v19043_v15, %v2901_v30  ;;  %v19050_v30 = vmax.f32 %v19048_v9, %v19049_v31 }
 0x60c   :  { %v2572_v49 = vpop.f32.mrf.mxu3 }
 0x60d   :  { %v2573_v58 = vadd.f32 %v2572_v49, %v2403_v39  ;;  %v2405_v36 = vpop.f32.mrf.mxu1 }
 0x60f   :  { %v15184_v41 = vmax.f32 %v19046_v14, %v2573_v58  ;;  %v2902_v10 = vpop.f32.mrf.mxu2  ;;  %v3990_v58 = vld [vmem:[%s17774_s2] sm:$0xff] }
 0x610   :  { %v2903_v3 = vadd.f32 %v2902_v10, %v2733_v37  ;;  %v2736_v26 = vpop.f32.mrf.mxu0  ;;  %v19052_v37 = vld [vmem:[#allocation140_spill] sm:$0xff]  ;;  %v19057_v10 = vld [vmem:[#allocation255_spill] sm:$0xff] }
 0x611   :  { %19047 = vst [vmem:[#allocation212_spill] sm:$0xff] %v15184_v41  ;;  %4056 = vperm.xlu2 %12376, %v3990_v58   ;;  %v19054_v2 = vmax.f32 %v19052_v37, %v19053_v55  ;;  %v12379_v37 = vmov 65535  }
 0x612   :  { %v15189_v20 = vmax.f32 %v19050_v30, %v2903_v3  ;;  %v4819_v55 = vsel %vm4817_vm1, 4294967295, %v12379_v37 }
 0x613   :  { %2775 = vmatmul.bf16.gmra.mxu0 %v18586_v51 }
 0x614   :  { %19051 = vst [vmem:[#allocation76_spill] sm:$0xff] %v15189_v20  ;;  %v2574_v39 = vpop.f32.mrf.mxu3  ;;  %9625 = vmatmul.msk.bf16.gmra.mxu2 %vm481_vm0, %v18587_v60 }
 0x615   :  { %v2575_v15 = vadd.f32 %v2574_v39, %v2405_v36  ;;  %v2408_v49 = vpop.f32.mrf.mxu1  ;;  %v19056_v36 = vld [vmem:[#allocation135_spill] sm:$0xff] }
 0x616   :  { %v19058_v31 = vmax.f32 %v19056_v36, %v19057_v10  ;;  %v9826_v39 = vld [vmem:[%s17775_s3 + $0xa8] sm:$0xf]  ;;  %v19060_v10 = vld [vmem:[#allocation256_spill] sm:$0xff] }
 0x617   :  { %v15200_v12 = vmax.f32 %v19054_v2, %v2575_v15  ;;  %v2905_v9 = vpop.f32.mrf.mxu2  ;;  %v12041_v15 = vld [vmem:[%s17775_s3 + $0xa8] sm:$0x10] }
 0x618   :  { %v2906_v3 = vadd.f32 %v2905_v9, %v2736_v26  ;;  %3199 = vmatmul.bf16.gmra.mxu1 %v12588_v13  ;;  %v2738_v14 = vpop.f32.mrf.mxu0  ;;  %v9827_v26 = vor.u32 %v12041_v15, %v9826_v39 }
 0x619   :  { %19055 = vst [vmem:[#allocation213_spill] sm:$0xff] %v15200_v12  ;;  %9699 = vmatmul.msk.bf16.gmra.mxu3 %vm481_vm0, %v12512_v45  ;;  %v15216_v12 = vsel %vm4818_vm2, %v4819_v55, 0 }
 0x61a   :  { %v15208_v30 = vmax.f32 %v19058_v31, %v2906_v3  ;;  %v3994_v3 = vld [vmem:[%s17774_s2 + $0x20] sm:$0xff]  ;;  %v4822_v36 = vand.u32 %v9827_v26, %v15216_v12  ;;  %v19061_v31 = vmax.f32 %v18604_v8, %v19060_v10  ;;  %v3995_v8 = vld [vmem:[%s17774_s2 + $0x28] sm:$0xff] }
 0x61b   :  { %4076 = vperm.xlu1 %12375, %v3994_v3  }
 0x61c   :  { %19059 = vst [vmem:[#allocation69_spill] sm:$0xff] %v15208_v30  ;;  %v2577_v58 = vpop.f32.mrf.mxu3  ;;  %4843 = vmatpush.bf16.msra.mxu3 %v4822_v36 }
 0x61d   :  { %v2578_v2 = vadd.f32 %v2577_v58, %v2408_v49  ;;  %v2410_v9 = vpop.f32.mrf.mxu1  ;;  %v19063_v49 = vld [vmem:[#allocation137_spill] sm:$0xff]  ;;  %v19064_v58 = vld [vmem:[#allocation142_spill] sm:$0xff] }
 0x61e   :  { %v19065_v37 = vmax.f32 %v19063_v49, %v19064_v58  ;;  %v19072_v49 = vld [vmem:[#allocation2_spill] sm:$0xff] }
 0x61f   :  { %v15225_v30 = vmax.f32 %v19061_v31, %v2578_v2  ;;  %v2907_v39 = vpop.f32.mrf.mxu2  ;;  %v19068_v2 = vld [vmem:[#allocation257_spill] sm:$0xff] }
 0x620   :  { %v2908_v15 = vadd.f32 %v2907_v39, %v2738_v14  ;;  %v2741_v20 = vpop.f32.mrf.mxu0  ;;  %v19067_v14 = vld [vmem:[#allocation144_spill] sm:$0xff] }
 0x621   :  { %19062 = vst [vmem:[#allocation214_spill] sm:$0xff] %v15225_v30  ;;  %v19069_v36 = vmax.f32 %v19067_v14, %v19068_v2  ;;  %v19078_v2 = vld [vmem:[#allocation259_spill] sm:$0xff] }
 0x622   :  { %v15230_v55 = vmax.f32 %v19065_v37, %v2908_v15  ;;  %v19071_v15 = vld [vmem:[#allocation4_spill] sm:$0xff]  ;;  %v12049_v37 = vld [vmem:[%s17775_s3 + $0xe8] sm:$0xff] }
 0x623   :  { %3532 = vmatmul.bf16.vlgmr.msrb.gmra.mxu0 %v12554_v1  ;;  %4081 = vperm.xlu1 %12375, %v3995_v8  }
 0x624   :  { %19066 = vst [vmem:[#allocation79_spill] sm:$0xff] %v15230_v55  ;;  %v2579_v41 = vpop.f32.mrf.mxu3  ;;  %9730 = vmatmul.msk.bf16.vlgmr.msrb.gmra.mxu2 %vm481_vm0, %v12446_v16  ;;  %v19073_v16 = vld [vmem:[#allocation139_spill] sm:$0xff] }
 0x625   :  { %v2580_v26 = vadd.f32 %v2579_v41, %v2410_v9  ;;  %v2413_v3 = vpop.f32.mrf.mxu1  ;;  %v19074_v41 = vld [vmem:[#allocation258_spill] sm:$0xff]  ;;  %5063 = vmatpush.bf16.msra.mxu2 %v12049_v37 }
 0x626   :  { %v19075_v9 = vmax.f32 %v19073_v16, %v19074_v41  ;;  %v12038_v16 = vld [vmem:[%s17775_s3 + $0x90] sm:$0xff] }
 0x627   :  { %v15241_v10 = vmax.f32 %v19069_v36, %v2580_v26  ;;  %v2910_v31 = vpop.f32.mrf.mxu2  ;;  %4824 = vmatpush.bf16.msra.mxu1 %v12038_v16 }
 0x628   :  { %v2911_v39 = vadd.f32 %v2910_v31, %v2741_v20  ;;  %3204 = vmatmul.bf16.gmra.mxu1 %v19071_v15  ;;  %v2743_v1 = vpop.f32.mrf.mxu0  ;;  %v19077_v20 = vld [vmem:[#allocation146_spill] sm:$0xff] }
 0x629   :  { %19070 = vst [vmem:[#allocation215_spill] sm:$0xff] %v15241_v10  ;;  %9700 = vmatmul.msk.bf16.gmra.mxu3 %vm481_vm0, %v19072_v49  ;;  %v19079_v36 = vmax.f32 %v19077_v20, %v19078_v2  ;;  %v19085_v20 = vld [vmem:[#allocation261_spill] sm:$0xff] }
 0x62a   :  { %v15249_v58 = vmax.f32 %v19075_v9, %v2911_v39  ;;  %v19080_v9 = vld [vmem:[#allocation141_spill] sm:$0xff] }
 0x62c   :  { %19076 = vst [vmem:[#allocation72_spill] sm:$0xff] %v15249_v58  ;;  %v2582_v8 = vpop.f32.mrf.mxu3  ;;  %v19081_v58 = vld [vmem:[#allocation260_spill] sm:$0xff] }
 0x62d   :  { %v2583_v26 = vadd.f32 %v2582_v8, %v2413_v3  ;;  %v2415_v14 = vpop.f32.mrf.mxu1  ;;  %v19082_v55 = vmax.f32 %v19080_v9, %v19081_v58 }
 0x62f   :  { %v15257_v31 = vmax.f32 %v19079_v36, %v2583_v26  ;;  %v2912_v10 = vpop.f32.mrf.mxu2  ;;  %v19084_v26 = vld [vmem:[#allocation148_spill] sm:$0xff] }
 0x630   :  { %v2913_v39 = vadd.f32 %v2912_v10, %v2743_v1  ;;  %v2746_v41 = vpop.f32.mrf.mxu0  ;;  %v19086_v2 = vmax.f32 %v19084_v26, %v19085_v20  ;;  %v19093_v26 = vld [vmem:[#allocation3_spill] sm:$0xff] }
 0x632   :  { %v15265_v30 = vmax.f32 %v19082_v55, %v2913_v39  ;;  %v19089_v55 = vld [vmem:[#allocation262_spill] sm:$0xff] }
 0x633   :  { %3537 = vmatmul.bf16.gmra.mxu0 %v12588_v13  ;;  %v19088_v13 = vld [vmem:[#allocation143_spill] sm:$0xff] }
 0x634   :  { %19083 = vst [vmem:[#allocation216_spill] sm:$0xff] %v15265_v30  ;;  %v2584_v3 = vpop.f32.mrf.mxu3  ;;  %9731 = vmatmul.msk.bf16.gmra.mxu2 %vm481_vm0, %v12512_v45  ;;  %v19090_v16 = vmax.f32 %v19088_v13, %v19089_v55  ;;  %v19096_v30 = vld [vmem:[#allocation145_spill] sm:$0xff]  ;;  %v19097_v13 = vld [vmem:[#allocation263_spill] sm:$0xff] }
 0x635   :  { %v2585_v37 = vadd.f32 %v2584_v3, %v2415_v14  ;;  %v2418_v8 = vpop.f32.mrf.mxu1  ;;  %v19092_v3 = vld [vmem:[#allocation150_spill] sm:$0xff] }
 0x637   :  { %v15273_v36 = vmax.f32 %v19086_v2, %v2585_v37  ;;  %v2915_v10 = vpop.f32.mrf.mxu2  ;;  %v19094_v37 = vmax.f32 %v19092_v3, %v19093_v26  ;;  %v12027_v2 = vld [vmem:[%s17775_s3 + $0x38] sm:$0xff]  ;;  %v19101_v3 = vld [vmem:[#allocation264_spill] sm:$0xff] }
 0x638   :  { %v2916_v1 = vadd.f32 %v2915_v10, %v2746_v41  ;;  %3209 = vmatmul.bf16.gmra.mxu1 %v12638_v29  ;;  %v2748_v58 = vpop.f32.mrf.mxu0  ;;  %4932 = vmatpush.bf16.msra.mxu0 %v12027_v2 }
 0x639   :  { %19087 = vst [vmem:[#allocation82_spill] sm:$0xff] %v15273_v36  ;;  %9701 = vmatmul.msk.bf16.gmra.mxu3 %vm481_vm0, %v18617_v34 }
 0x63a   :  { %v15281_v39 = vmax.f32 %v19090_v16, %v2916_v1  ;;  %v19098_v1 = vmax.f32 %v19096_v30, %v19097_v13 }
 0x63c   :  { %19091 = vst [vmem:[#allocation217_spill] sm:$0xff] %v15281_v39  ;;  %v2587_v45 = vpop.f32.mrf.mxu3 }
 0x63d   :  { %v2588_v14 = vadd.f32 %v2587_v45, %v2418_v8  ;;  %v2420_v9 = vpop.f32.mrf.mxu1 }
 0x63f   :  { %v15286_v20 = vmax.f32 %v19094_v37, %v2588_v14  ;;  %v2917_v41 = vpop.f32.mrf.mxu2  ;;  %v3999_v14 = vld [vmem:[%s17774_s2 + $0x48] sm:$0xff] }
 0x640   :  { %v2918_v10 = vadd.f32 %v2917_v41, %v2748_v58  ;;  %v2751_v36 = vpop.f32.mrf.mxu0  ;;  %4101 = vperm.xlu1 %12375, %v3999_v14   ;;  %v19100_v58 = vld [vmem:[#allocation152_spill] sm:$0xff]  ;;  %v19109_v14 = vld [vmem:[#allocation6_spill] sm:$0xff] }
 0x641   :  { %19095 = vst [vmem:[#allocation75_spill] sm:$0xff] %v15286_v20  ;;  %v19102_v26 = vmax.f32 %v19100_v58, %v19101_v3 }
 0x642   :  { %v15294_v55 = vmax.f32 %v19098_v1, %v2918_v10 }
 0x643   :  { %3542 = vmatmul.bf16.gmra.mxu0 %v19071_v15 }
 0x644   :  { %19099 = vst [vmem:[#allocation218_spill] sm:$0xff] %v15294_v55  ;;  %v2589_v8 = vpop.f32.mrf.mxu3  ;;  %9732 = vmatmul.msk.bf16.gmra.mxu2 %vm481_vm0, %v19072_v49  ;;  %v19104_v49 = vld [vmem:[#allocation147_spill] sm:$0xff]  ;;  %v19112_v55 = vld [vmem:[#allocation149_spill] sm:$0xff] }
 0x645   :  { %v2590_v16 = vadd.f32 %v2589_v8, %v2420_v9  ;;  %v2423_v45 = vpop.f32.mrf.mxu1  ;;  %v19105_v9 = vld [vmem:[#allocation265_spill] sm:$0xff] }
 0x646   :  { %v19106_v2 = vmax.f32 %v19104_v49, %v19105_v9  ;;  %v19113_v49 = vld [vmem:[#allocation5_spill] sm:$0xff] }
 0x647   :  { %v15305_v37 = vmax.f32 %v19102_v26, %v2590_v16  ;;  %v2920_v30 = vpop.f32.mrf.mxu2  ;;  %v4000_v16 = vld [vmem:[%s17774_s2 + $0x50] sm:$0xff] }
 0x648   :  { %v2921_v41 = vadd.f32 %v2920_v30, %v2751_v36  ;;  %3214 = vmatmul.bf16.gmra.mxu1 %v18625_v56  ;;  %v2753_v15 = vpop.f32.mrf.mxu0  ;;  %4106 = vperm.xlu1 %12375, %v4000_v16   ;;  %v19108_v36 = vld [vmem:[#allocation154_spill] sm:$0xff]  ;;  %v19116_v16 = vld [vmem:[#allocation156_spill] sm:$0xff] }
 0x649   :  { %19103 = vst [vmem:[#allocation85_spill] sm:$0xff] %v15305_v37  ;;  %9702 = vmatmul.msk.bf16.gmra.mxu3 %vm481_vm0, %v18626_v18  ;;  %v19110_v58 = vmax.f32 %v19108_v36, %v19109_v14  ;;  %v19117_v36 = vld [vmem:[#allocation266_spill] sm:$0xff] }
 0x64a   :  { %v15313_v10 = vmax.f32 %v19106_v2, %v2921_v41  ;;  %v19114_v41 = vmax.f32 %v19112_v55, %v19113_v49 }
 0x64c   :  { %19107 = vst [vmem:[#allocation219_spill] sm:$0xff] %v15313_v10  ;;  %v2592_v13 = vpop.f32.mrf.mxu3 }
 0x64d   :  { %v2593_v1 = vadd.f32 %v2592_v13, %v2423_v45  ;;  %v2425_v8 = vpop.f32.mrf.mxu1 }
 0x64f   :  { %v15321_v3 = vmax.f32 %v19110_v58, %v2593_v1  ;;  %v2922_v26 = vpop.f32.mrf.mxu2  ;;  %v19118_v1 = vmax.f32 %v19116_v16, %v19117_v36 }
 0x650   :  { %v2923_v30 = vadd.f32 %v2922_v26, %v2753_v15  ;;  %v2756_v37 = vpop.f32.mrf.mxu0 }
 0x651   :  { %19111 = vst [vmem:[#allocation78_spill] sm:$0xff] %v15321_v3 }
 0x652   :  { %v15326_v9 = vmax.f32 %v19114_v41, %v2923_v30  ;;  %v4004_v41 = vld [vmem:[%s17774_s2 + $0x70] sm:$0xff] }
 0x653   :  { %3547 = vmatmul.bf16.gmra.mxu0 %v12638_v29  ;;  %v19120_v29 = vld [vmem:[#allocation267_spill] sm:$0xff]  ;;  %4126 = vperm.xlu0 %12374, %v4004_v41  }
 0x654   :  { %19115 = vst [vmem:[#allocation220_spill] sm:$0xff] %v15326_v9  ;;  %v2594_v45 = vpop.f32.mrf.mxu3  ;;  %9733 = vmatmul.msk.bf16.gmra.mxu2 %vm481_vm0, %v18617_v34  ;;  %v19121_v26 = vmax.f32 %v18635_v33, %v19120_v29  ;;  %v19127_v33 = vld [vmem:[#allocation158_spill] sm:$0xff] }
 0x655   :  { %v2595_v2 = vadd.f32 %v2594_v45, %v2425_v8  ;;  %v2428_v13 = vpop.f32.mrf.mxu1 }
 0x657   :  { %v15334_v14 = vmax.f32 %v19118_v1, %v2595_v2  ;;  %v2925_v15 = vpop.f32.mrf.mxu2 }
 0x658   :  { %v2926_v58 = vadd.f32 %v2925_v15, %v2756_v37  ;;  %3219 = vmatmul.bf16.gmra.mxu1 %v12688_v44  ;;  %v2758_v55 = vpop.f32.mrf.mxu0  ;;  %v19123_v37 = vld [vmem:[#allocation151_spill] sm:$0xff]  ;;  %v19126_v15 = vld [vmem:[#allocation153_spill] sm:$0xff] }
 0x659   :  { %19119 = vst [vmem:[#allocation88_spill] sm:$0xff] %v15334_v14  ;;  %9703 = vmatmul.msk.bf16.gmra.mxu3 %vm481_vm0, %v12648_v32  ;;  %v19124_v45 = vmax.f32 %v18637_v17, %v19123_v37  ;;  %v4003_v17 = vld [vmem:[%s17774_s2 + $0x68] sm:$0xff]  ;;  %v19207_v14 = vld [vmem:[#allocation25_spill] sm:$0xff] }
 0x65a   :  { %v15342_v30 = vmax.f32 %v19121_v26, %v2926_v58  ;;  %v19128_v58 = vmax.f32 %v19126_v15, %v19127_v33  ;;  %v12048_v15 = vld [vmem:[%s17775_s3 + $0xe0] sm:$0xff] }
 0x65b   :  { %4121 = vperm.xlu0 %12374, %v4003_v17   ;;  %5064 = vmatpush.bf16.msra.mxu2 %v12048_v15  ;;  %v19138_v17 = vld [vmem:[#allocation155_spill] sm:$0xff] }
 0x65c   :  { %19122 = vst [vmem:[#allocation221_spill] sm:$0xff] %v15342_v30  ;;  %v2597_v34 = vpop.f32.mrf.mxu3 }
 0x65d   :  { %v2598_v8 = vadd.f32 %v2597_v34, %v2428_v13  ;;  %v2430_v49 = vpop.f32.mrf.mxu1 }
 0x65f   :  { %v15350_v2 = vmax.f32 %v19124_v45, %v2598_v8  ;;  %v2927_v16 = vpop.f32.mrf.mxu2  ;;  %v19131_v8 = vld [vmem:[#allocation268_spill] sm:$0xff] }
 0x660   :  { %v2928_v36 = vadd.f32 %v2927_v16, %v2758_v55  ;;  %v2761_v1 = vpop.f32.mrf.mxu0  ;;  %v19130_v55 = vld [vmem:[#allocation160_spill] sm:$0xff] }
 0x661   :  { %19125 = vst [vmem:[#allocation81_spill] sm:$0xff] %v15350_v2  ;;  %v19132_v41 = vmax.f32 %v19130_v55, %v19131_v8 }
 0x662   :  { %v15355_v29 = vmax.f32 %v19128_v58, %v2928_v36 }
 0x663   :  { %3552 = vmatmul.bf16.gmra.mxu0 %v18625_v56 }
 0x664   :  { %19129 = vst [vmem:[#allocation222_spill] sm:$0xff] %v15355_v29  ;;  %v2599_v13 = vpop.f32.mrf.mxu3  ;;  %9734 = vmatmul.msk.bf16.gmra.mxu2 %vm481_vm0, %v18626_v18  ;;  %v19134_v18 = vld [vmem:[#allocation269_spill] sm:$0xff] }
 0x665   :  { %v2600_v26 = vadd.f32 %v2599_v13, %v2430_v49  ;;  %v2433_v34 = vpop.f32.mrf.mxu1  ;;  %v19135_v49 = vmax.f32 %v18643_v28, %v19134_v18 }
 0x667   :  { %v15366_v37 = vmax.f32 %v19132_v41, %v2600_v26  ;;  %v2930_v45 = vpop.f32.mrf.mxu2  ;;  %v19137_v26 = vld [vmem:[#allocation162_spill] sm:$0xff]  ;;  %v12037_v41 = vld [vmem:[%s17775_s3 + $0x88] sm:$0xff] }
 0x668   :  { %v2931_v16 = vadd.f32 %v2930_v45, %v2761_v1  ;;  %3224 = vmatmul.bf16.gmra.mxu1 %v12716_v54  ;;  %v2763_v56 = vpop.f32.mrf.mxu0  ;;  %v4001_v1 = vld [vmem:[%s17774_s2 + $0x58] sm:$0xff]  ;;  %v19139_v55 = vmax.f32 %v19137_v26, %v19138_v17 }
 0x669   :  { %19133 = vst [vmem:[#allocation91_spill] sm:$0xff] %v15366_v37  ;;  %9704 = vmatmul.msk.bf16.gmra.mxu3 %vm481_vm0, %v12670_v38  ;;  %4111 = vperm.xlu2 %12376, %v4001_v1   ;;  %v4005_v1 = vld [vmem:[%s17774_s2 + $0x78] sm:$0xff] }
 0x66a   :  { %v15374_v36 = vmax.f32 %v19135_v49, %v2931_v16  ;;  %4825 = vmatpush.bf16.msra.mxu1 %v12037_v41  ;;  %4131 = vperm.xlu1 %12375, %v4005_v1   ;;  %v19145_v26 = vld [vmem:[#allocation157_spill] sm:$0xff]  ;;  %v19151_v1 = vld [vmem:[#allocation166_spill] sm:$0xff] }
 0x66c   :  { %19136 = vst [vmem:[#allocation223_spill] sm:$0xff] %v15374_v36  ;;  %v2602_v33 = vpop.f32.mrf.mxu3 }
 0x66d   :  { %v2603_v58 = vadd.f32 %v2602_v33, %v2433_v34  ;;  %v2435_v13 = vpop.f32.mrf.mxu1  ;;  %v19141_v34 = vld [vmem:[#allocation270_spill] sm:$0xff] }
 0x66e   :  { %v19142_v18 = vmax.f32 %v18646_v42, %v19141_v34  ;;  %v19144_v42 = vld [vmem:[#allocation164_spill] sm:$0xff] }
 0x66f   :  { %v15385_v8 = vmax.f32 %v19139_v55, %v2603_v58  ;;  %v2932_v28 = vpop.f32.mrf.mxu2  ;;  %v19146_v17 = vmax.f32 %v19144_v42, %v19145_v26 }
 0x670   :  { %v2933_v45 = vadd.f32 %v2932_v28, %v2763_v56  ;;  %v2766_v16 = vpop.f32.mrf.mxu0  ;;  %v4002_v56 = vld [vmem:[%s17774_s2 + $0x60] sm:$0xff] }
 0x671   :  { %19140 = vst [vmem:[#allocation92_spill] sm:$0xff] %v15385_v8  ;;  %4116 = vperm.xlu2 %12376, %v4002_v56   ;;  %v19152_v56 = vld [vmem:[#allocation159_spill] sm:$0xff] }
 0x672   :  { %v15393_v49 = vmax.f32 %v19142_v18, %v2933_v45  ;;  %v19153_v42 = vmax.f32 %v19151_v1, %v19152_v56  ;;  %v19159_v1 = vld [vmem:[#allocation168_spill] sm:$0xff]  ;;  %v19160_v56 = vld [vmem:[#allocation273_spill] sm:$0xff] }
 0x673   :  { %3557 = vmatmul.bf16.gmra.mxu0 %v12688_v44 }
 0x674   :  { %19143 = vst [vmem:[#allocation84_spill] sm:$0xff] %v15393_v49  ;;  %v2604_v15 = vpop.f32.mrf.mxu3  ;;  %9735 = vmatmul.msk.bf16.gmra.mxu2 %vm481_vm0, %v12648_v32 }
 0x675   :  { %v2605_v33 = vadd.f32 %v2604_v15, %v2435_v13  ;;  %v2438_v58 = vpop.f32.mrf.mxu1  ;;  %v19148_v13 = vld [vmem:[#allocation271_spill] sm:$0xff] }
 0x676   :  { %v19149_v41 = vmax.f32 %v18649_v25, %v19148_v13 }
 0x677   :  { %v15407_v44 = vmax.f32 %v19146_v17, %v2605_v33  ;;  %v2935_v55 = vpop.f32.mrf.mxu2  ;;  %v4008_v33 = vld [vmem:[%s17774_s2 + $0x90] sm:$0xff] }
 0x678   :  { %v2936_v28 = vadd.f32 %v2935_v55, %v2766_v16  ;;  %3229 = vmatmul.bf16.gmra.mxu1 %v12738_v63  ;;  %v2768_v32 = vpop.f32.mrf.mxu0  ;;  %v4006_v16 = vld [vmem:[%s17774_s2 + $0x80] sm:$0xff]  ;;  %4146 = vperm.xlu1 %12375, %v4008_v33  }
 0x679   :  { %19147 = vst [vmem:[#allocation224_spill] sm:$0xff] %v15407_v44  ;;  %9705 = vmatmul.msk.bf16.gmra.mxu3 %vm481_vm0, %v12698_v48  ;;  %4136 = vperm.xlu0 %12374, %v4006_v16  }
 0x67a   :  { %v15415_v45 = vmax.f32 %v19149_v41, %v2936_v28  ;;  %v19156_v28 = vld [vmem:[#allocation272_spill] sm:$0xff] }
 0x67c   :  { %19150 = vst [vmem:[#allocation94_spill] sm:$0xff] %v15415_v45  ;;  %v2607_v34 = vpop.f32.mrf.mxu3 }
 0x67d   :  { %v2608_v18 = vadd.f32 %v2607_v34, %v2438_v58  ;;  %v2440_v15 = vpop.f32.mrf.mxu1  ;;  %v19155_v58 = vld [vmem:[#allocation161_spill] sm:$0xff]  ;;  %v12026_v34 = vld [vmem:[%s17775_s3 + $0x30] sm:$0xff] }
 0x67e   :  { %v19157_v13 = vmax.f32 %v19155_v58, %v19156_v28  ;;  %4933 = vmatpush.bf16.msra.mxu0 %v12026_v34 }
 0x67f   :  { %v15426_v26 = vmax.f32 %v19153_v42, %v2608_v18  ;;  %v2937_v25 = vpop.f32.mrf.mxu2  ;;  %v19161_v42 = vmax.f32 %v19159_v1, %v19160_v56  ;;  %v19165_v56 = vld [vmem:[#allocation163_spill] sm:$0xff] }
 0x680   :  { %v2938_v17 = vadd.f32 %v2937_v25, %v2768_v32  ;;  %v2771_v55 = vpop.f32.mrf.mxu0  ;;  %v4007_v32 = vld [vmem:[%s17774_s2 + $0x88] sm:$0xff] }
 0x681   :  { %19154 = vst [vmem:[#allocation225_spill] sm:$0xff] %v15426_v26  ;;  %4141 = vperm.xlu1 %12375, %v4007_v32  }
 0x682   :  { %v15431_v41 = vmax.f32 %v19157_v13, %v2938_v17 }
 0x683   :  { %3562 = vmatmul.bf16.gmra.mxu0 %v12716_v54 }
 0x684   :  { %19158 = vst [vmem:[#allocation87_spill] sm:$0xff] %v15431_v41  ;;  %v2609_v33 = vpop.f32.mrf.mxu3  ;;  %9736 = vmatmul.msk.bf16.gmra.mxu2 %vm481_vm0, %v12670_v38  ;;  %v19163_v38 = vmax.f32 %v18653_v4, %v14463_v21 }
 0x685   :  { %v2610_v18 = vadd.f32 %v2609_v33, %v2440_v15  ;;  %v3195_v16 = vpop.f32.mrf.mxu1 }
 0x687   :  { %v15445_v54 = vmax.f32 %v19161_v42, %v2610_v18  ;;  %v2940_v25 = vpop.f32.mrf.mxu2  ;;  %v19166_v42 = vmax.f32 %v18656_v23, %v19165_v56  ;;  %v19169_v23 = vld [vmem:[#allocation274_spill] sm:$0xff] }
 0x688   :  { %v2941_v17 = vadd.f32 %v2940_v25, %v2771_v55  ;;  %3234 = vmatmul.bf16.gmra.mxu1 %v12760_v11  ;;  %v2773_v58 = vpop.f32.mrf.mxu0  ;;  %v15456_v55 = vpop.permute.xlu0 %4066 }
 0x689   :  { %19162 = vst [vmem:[#allocation226_spill] sm:$0xff] %v15445_v54  ;;  %9706 = vmatmul.msk.bf16.gmra.mxu3 %vm481_vm0, %v12726_v57  ;;  %v15463_v54 = vpop.permute.xlu2 %4086 }
 0x68a   :  { %v15453_v15 = vmax.f32 %v19163_v38, %v2941_v17 }
 0x68c   :  { %19164 = vst [vmem:[#allocation97_spill] sm:$0xff] %v15453_v15  ;;  %v3364_v28 = vpop.f32.mrf.mxu3 }
 0x68d   :  { %v3365_v13 = vadd.f32 %v3364_v28, %v3195_v16  ;;  %v3197_v34 = vpop.f32.mrf.mxu1  ;;  %v19168_v16 = vld [vmem:[#allocation165_spill] sm:$0xff] }
 0x68f   :  { %v3862_v33 = vmax.f32 %v14473_v19, %v3365_v13  ;;  %v2942_v18 = vpop.f32.mrf.mxu2  ;;  %v19170_v13 = vmax.f32 %v18660_v46, %v19169_v23 }
 0x690   :  { %v2943_v32 = vadd.f32 %v2942_v18, %v2773_v58  ;;  %v2776_v1 = vpop.f32.mrf.mxu0  ;;  %v15477_v18 = vpop.permute.xlu0 %4071 }
 0x692   :  { %v15461_v25 = vmax.f32 %v19166_v42, %v2943_v32 }
 0x693   :  { %3567 = vmatmul.bf16.gmra.mxu0 %v12738_v63 }
 0x694   :  { %19167 = vst [vmem:[#allocation227_spill] sm:$0xff] %v15461_v25  ;;  %v3366_v21 = vpop.f32.mrf.mxu3  ;;  %9737 = vmatmul.msk.bf16.gmra.mxu2 %vm481_vm0, %v12698_v48  ;;  %v19178_v25 = vld [vmem:[#allocation170_spill] sm:$0xff] }
 0x695   :  { %v3367_v4 = vadd.f32 %v3366_v21, %v3197_v34  ;;  %v3200_v19 = vpop.f32.mrf.mxu1  ;;  %v15479_v34 = vpop.permute.xlu2 %4091 }
 0x697   :  { %v3864_v17 = vmax.f32 %v19168_v16, %v3367_v4  ;;  %v2945_v58 = vpop.f32.mrf.mxu2  ;;  %v19172_v16 = vld [vmem:[#allocation169_spill] sm:$0xff] }
 0x698   :  { %v2946_v38 = vadd.f32 %v2945_v58, %v2776_v1  ;;  %3239 = vmatmul.bf16.gmra.mxu1 %v12794_v40  ;;  %v2778_v28 = vpop.f32.mrf.mxu0  ;;  %v4010_v1 = vld [vmem:[%s17774_s2 + $0xa0] sm:$0xff]  ;;  %v19173_v58 = vld [vmem:[#allocation167_spill] sm:$0xff] }
 0x699   :  { %9707 = vmatmul.msk.bf16.gmra.mxu3 %vm481_vm0, %v12748_v5  ;;  %4156 = vperm.xlu1 %12375, %v4010_v1  }
 0x69a   :  { %v15475_v63 = vmax.f32 %v19170_v13, %v2946_v38  ;;  %v19174_v38 = vmax.f32 %v19172_v16, %v19173_v58  ;;  %v15496_v13 = vpop.permute.xlu0 %4096  ;;  %v19176_v16 = vld [vmem:[#allocation7_spill] sm:$0xff]  ;;  %v19177_v58 = vld [vmem:[#allocation9_spill] sm:$0xff] }
 0x69c   :  { %19171 = vst [vmem:[#allocation90_spill] sm:$0xff] %v15475_v63  ;;  %v3369_v48 = vpop.f32.mrf.mxu3 }
 0x69d   :  { %v15481_v32 = vadd.f32 %v3369_v48, %v3200_v19  ;;  %v3202_v56 = vpop.f32.mrf.mxu1 }
 0x69f   :  { %v3866_v42 = vmax.f32 %v14497_v61, %v15481_v32  ;;  %v2947_v21 = vpop.f32.mrf.mxu2  ;;  %v4057_v61 = vpop.permute.xlu2 %4056 }
 0x6a0   :  { %v2948_v46 = vadd.f32 %v2947_v21, %v2778_v28  ;;  %v3533_v4 = vpop.f32.mrf.mxu0  ;;  %v4009_v28 = vld [vmem:[%s17774_s2 + $0x98] sm:$0xff] }
 0x6a1   :  { %4151 = vperm.xlu2 %12376, %v4009_v28   ;;  %v12036_v28 = vld [vmem:[%s17775_s3 + $0x80] sm:$0xff] }
 0x6a2   :  { %v15491_v23 = vmax.f32 %v19174_v38, %v2948_v46  ;;  %4826 = vmatpush.bf16.msra.mxu1 %v12036_v28 }
 0x6a3   :  { %3572 = vmatmul.bf16.gmra.mxu0 %v12760_v11  ;;  %v4374_v11 = vadd.f32 %v4057_v61, %v3862_v33 }
 0x6a4   :  { %19175 = vst [vmem:[#allocation228_spill] sm:$0xff] %v15491_v23  ;;  %v3371_v19 = vpop.f32.mrf.mxu3  ;;  %9738 = vmatmul.msk.bf16.gmra.mxu2 %vm481_vm0, %v12726_v57 }
 0x6a5   :  { %v15498_v48 = vadd.f32 %v3371_v19, %v3202_v56  ;;  %v3205_v1 = vpop.f32.mrf.mxu1  ;;  %v4502_v63 = vmax.f32 %v4374_v11, 0.0 }
 0x6a7   :  { %v3702_v32 = vpop.f32.mrf.mxu2 }
 0x6a8   :  { %v3703_v21 = vadd.f32 %v3702_v32, %v3533_v4  ;;  %3244 = vmatmul.bf16.gmra.mxu1 %v12830_v6  ;;  %v3535_v46 = vpop.f32.mrf.mxu0  ;;  %v4062_v32 = vpop.permute.xlu0 %4061 }
 0x6a9   :  { %9708 = vmatmul.msk.bf16.gmra.mxu3 %vm481_vm0, %v19176_v16 }
 0x6aa   :  { %v3863_v57 = vmax.f32 %v19177_v58, %v3703_v21  ;;  %v19179_v58 = vld [vmem:[#allocation10_spill] sm:$0xff] }
 0x6ac   :  { %v4375_v38 = vadd.f32 %v4057_v61, %v3863_v57  ;;  %v3374_v23 = vpop.f32.mrf.mxu3  ;;  %v4376_v61 = vadd.f32 %v4062_v32, %v3864_v17 }
 0x6ad   :  { %v15506_v56 = vadd.f32 %v3374_v23, %v3205_v1  ;;  %v3207_v19 = vpop.f32.mrf.mxu1  ;;  %v12047_v1 = vld [vmem:[%s17775_s3 + $0xd8] sm:$0xff] }
 0x6ae   :  { %v4503_v4 = vmax.f32 %v4375_v38, 0.0  ;;  %5065 = vmatpush.bf16.msra.mxu2 %v12047_v1  ;;  %v19180_v38 = vld [vmem:[#allocation171_spill] sm:$0xff]  ;;  %v4378_v1 = vadd.f32 %v15456_v55, %v3866_v42  ;;  %v4016_v42 = vld [vmem:[%s17774_s2 + $0xd0] sm:$0xff] }
 0x6af   :  { %v3704_v15 = vpop.f32.mrf.mxu2 }
 0x6b0   :  { %v4630_v33 = vpack.c.bf16 %v4503_v4, %v4502_v63  ;;  %v3705_v41 = vadd.f32 %v3704_v15, %v3535_v46  ;;  %v3538_v21 = vpop.f32.mrf.mxu0  ;;  %v4504_v63 = vmax.f32 %v4376_v61, 0.0 }
 0x6b2   :  { %v3865_v23 = vmax.f32 %v19179_v58, %v3705_v41  ;;  %v4013_v41 = vld [vmem:[%s17774_s2 + $0xb8] sm:$0xff]  ;;  %v19181_v58 = vld [vmem:[#allocation14_spill] sm:$0xff]  ;;  %v4854_v28 = vunpack.c.l.b16 %v4630_v33  ;;  %v4855_v44 = vunpack.c.h.b16 %v4630_v33  ;;  %v4011_v33 = vld [vmem:[%s17774_s2 + $0xa8] sm:$0xff] }
 0x6b3   :  { %3577 = vmatmul.bf16.gmra.mxu0 %v12794_v40  ;;  %v4012_v40 = vld [vmem:[%s17774_s2 + $0xb0] sm:$0xff]  ;;  %4171 = vperm.xlu0 %12374, %v4013_v41   ;;  %v19183_v41 = vld [vmem:[#allocation13_spill] sm:$0xff] }
 0x6b4   :  { %v4377_v11 = vadd.f32 %v4062_v32, %v3865_v23  ;;  %v3376_v57 = vpop.f32.mrf.mxu3  ;;  %9739 = vmatmul.msk.bf16.gmra.mxu2 %vm481_vm0, %v12748_v5  ;;  %4166 = vperm.xlu2 %12376, %v4012_v40  }
 0x6b5   :  { %v15523_v15 = vadd.f32 %v3376_v57, %v3207_v19  ;;  %v3210_v17 = vpop.f32.mrf.mxu1  ;;  %v19182_v57 = vld [vmem:[#allocation8_spill] sm:$0xff] }
 0x6b6   :  { %v4505_v46 = vmax.f32 %v4377_v11, 0.0 }
 0x6b7   :  { %v3707_v19 = vpop.f32.mrf.mxu2 }
 0x6b8   :  { %v4631_v4 = vpack.c.bf16 %v4505_v46, %v4504_v63  ;;  %v3708_v32 = vadd.f32 %v3707_v19, %v3538_v21  ;;  %3249 = vmatmul.bf16.gmra.mxu1 %v19181_v58  ;;  %v3540_v23 = vpop.f32.mrf.mxu0 }
 0x6b9   :  { %9709 = vmatmul.msk.bf16.gmra.mxu3 %vm481_vm0, %v19182_v57 }
 0x6ba   :  { %v4856_v61 = vunpack.c.l.b16 %v4631_v4  ;;  %v4857_v11 = vunpack.c.h.b16 %v4631_v4  ;;  %v3867_v40 = vmax.f32 %v19183_v41, %v3708_v32  ;;  %v4506_v4 = vmax.f32 %v4378_v1, 0.0 }
 0x6bb   :  { %4186 = vperm.xlu0 %12374, %v4016_v42   ;;  %v19185_v41 = vmax.f32 %v14509_v0, %v15498_v48  ;;  %v4015_v48 = vld [vmem:[%s17774_s2 + $0xc8] sm:$0xff] }
 0x6bc   :  { %v15538_v26 = vpack.c.b16 %v4857_v11, %v4855_v44  ;;  %v4379_v5 = vadd.f32 %v15456_v55, %v3867_v40  ;;  %v3379_v63 = vpop.f32.mrf.mxu3  ;;  %v15541_v21 = vpack.c.b16 %v4856_v61, %v4854_v28  ;;  %4161 = vperm.xlu2 %12376, %v4011_v33   ;;  %v19184_v44 = vld [vmem:[#allocation172_spill] sm:$0xff]  ;;  %v19191_v55 = vld [vmem:[#allocation174_spill] sm:$0xff] }
 0x6bd   :  { %v15543_v46 = vadd.f32 %v3379_v63, %v3210_v17  ;;  %v3212_v19 = vpop.f32.mrf.mxu1  ;;  %v4380_v40 = vadd.f32 %v15477_v18, %v19185_v41  ;;  %v19186_v63 = vld [vmem:[#allocation16_spill] sm:$0xff] }
 0x6be   :  { %v4507_v32 = vmax.f32 %v4379_v5, 0.0  ;;  %v12025_v5 = vld [vmem:[%s17775_s3 + $0x28] sm:$0xff]  ;;  %v19188_v41 = vld [vmem:[#allocation20_spill] sm:$0xff] }
 0x6bf   :  { %v3709_v28 = vpop.f32.mrf.mxu2  ;;  %4934 = vmatpush.bf16.msra.mxu0 %v12025_v5 }
 0x6c0   :  { %v4632_v61 = vpack.c.bf16 %v4507_v32, %v4506_v4  ;;  %v3710_v17 = vadd.f32 %v3709_v28, %v3540_v23  ;;  %v3543_v11 = vpop.f32.mrf.mxu0  ;;  %v4077_v23 = vpop.permute.xlu1 %4076  ;;  %v4508_v4 = vmax.f32 %v4380_v40, 0.0 }
 0x6c2   :  { %v3869_v37 = vmax.f32 %v19186_v63, %v3710_v17  ;;  %v4741_v5 = vunpack.c.l.b16 %v4632_v61  ;;  %v4742_v40 = vunpack.c.h.b16 %v4632_v61 }
 0x6c3   :  { %3582 = vmatmul.bf16.gmra.mxu0 %v12830_v6  ;;  %4181 = vperm.xlu0 %12374, %v4015_v48   ;;  %v19187_v6 = vld [vmem:[#allocation173_spill] sm:$0xff] }
 0x6c4   :  { %v4381_v1 = vadd.f32 %v15477_v18, %v3869_v37  ;;  %v3381_v42 = vpop.f32.mrf.mxu3  ;;  %9740 = vmatmul.msk.bf16.gmra.mxu2 %vm481_vm0, %v19176_v16 }
 0x6c5   :  { %v15565_v33 = vadd.f32 %v3381_v42, %v3212_v19  ;;  %v3215_v0 = vpop.f32.mrf.mxu1  ;;  %v19189_v19 = vmax.f32 %v19178_v25, %v15506_v56  ;;  %v19190_v42 = vld [vmem:[#allocation11_spill] sm:$0xff] }
 0x6c6   :  { %v4509_v32 = vmax.f32 %v4381_v1, 0.0 }
 0x6c7   :  { %v3712_v37 = vpop.f32.mrf.mxu2  ;;  %v4382_v63 = vadd.f32 %v4077_v23, %v19189_v19 }
 0x6c8   :  { %v4633_v18 = vpack.c.bf16 %v4509_v32, %v4508_v4  ;;  %v3713_v17 = vadd.f32 %v3712_v37, %v3543_v11  ;;  %3254 = vmatmul.bf16.gmra.mxu1 %v19188_v41  ;;  %v3545_v16 = vpop.f32.mrf.mxu0  ;;  %v12040_v32 = vld [vmem:[%s17775_s3 + $0xa0] sm:$0xff]  ;;  %v4082_v61 = vpop.permute.xlu1 %4081 }
 0x6c9   :  { %9710 = vmatmul.msk.bf16.gmra.mxu3 %vm481_vm0, %v19190_v42  ;;  %v4510_v19 = vmax.f32 %v4382_v63, 0.0 }
 0x6ca   :  { %v4743_v1 = vunpack.c.l.b16 %v4633_v18  ;;  %v4744_v48 = vunpack.c.h.b16 %v4633_v18  ;;  %v3871_v45 = vmax.f32 %v19191_v55, %v3713_v17  ;;  %4844 = vmatpush.bf16.msra.mxu3 %v12040_v32  ;;  %v19192_v18 = vld [vmem:[#allocation19_spill] sm:$0xff] }
 0x6cc   :  { %v15579_v28 = vpack.c.b16 %v4744_v48, %v4742_v40  ;;  %v4383_v4 = vadd.f32 %v4077_v23, %v3871_v45  ;;  %v3384_v11 = vpop.f32.mrf.mxu3  ;;  %v15584_v37 = vpack.c.b16 %v4743_v1, %v4741_v5  ;;  %v19193_v48 = vmax.f32 %v19180_v38, %v15523_v15  ;;  %v19194_v5 = vld [vmem:[#allocation175_spill] sm:$0xff]  ;;  %v4014_v15 = vld [vmem:[%s17774_s2 + $0xc0] sm:$0xff] }
 0x6cd   :  { %v15586_v25 = vadd.f32 %v3384_v11, %v3215_v0  ;;  %v3217_v56 = vpop.f32.mrf.mxu1  ;;  %4176 = vperm.xlu2 %12376, %v4014_v15  }
 0x6ce   :  { %v4511_v49 = vmax.f32 %v4383_v4, 0.0  ;;  %v4384_v8 = vadd.f32 %v4082_v61, %v19193_v48 }
 0x6cf   :  { %v3878_v55 = vmax.f32 %v19192_v18, %v15586_v25  ;;  %v3714_v17 = vpop.f32.mrf.mxu2 }
 0x6d0   :  { %v4634_v40 = vpack.c.bf16 %v4511_v49, %v4510_v19  ;;  %v3715_v45 = vadd.f32 %v3714_v17, %v3545_v16  ;;  %v3548_v23 = vpop.f32.mrf.mxu0  ;;  %v4017_v49 = vld [vmem:[%s17774_s2 + $0xd8] sm:$0xff]  ;;  %v4512_v38 = vmax.f32 %v4384_v8, 0.0 }
 0x6d1   :  { %4191 = vperm.xlu1 %12375, %v4017_v49   ;;  %v19199_v49 = vld [vmem:[#allocation176_spill] sm:$0xff] }
 0x6d2   :  { %v3873_v1 = vmax.f32 %v19194_v5, %v3715_v45  ;;  %v19197_v45 = vmax.f32 %v19184_v44, %v15543_v46  ;;  %v4985_v5 = vunpack.c.l.b16 %v4634_v40  ;;  %v4986_v8 = vunpack.c.h.b16 %v4634_v40  ;;  %v4020_v44 = vld [vmem:[%s17774_s2 + $0xf0] sm:$0xff]  ;;  %v4018_v40 = vld [vmem:[%s17774_s2 + $0xe0] sm:$0xff] }
 0x6d3   :  { %3587 = vmatmul.bf16.gmra.mxu0 %v19181_v58  ;;  %v19195_v58 = vld [vmem:[#allocation12_spill] sm:$0xff]  ;;  %4196 = vperm.xlu0 %12374, %v4018_v40  }
 0x6d4   :  { %v4385_v0 = vadd.f32 %v4082_v61, %v3873_v1  ;;  %v3386_v63 = vpop.f32.mrf.mxu3  ;;  %9741 = vmatmul.msk.bf16.gmra.mxu2 %vm481_vm0, %v19182_v57  ;;  %v19196_v61 = vld [vmem:[#allocation26_spill] sm:$0xff]  ;;  %v4386_v48 = vadd.f32 %v15463_v54, %v19197_v45  ;;  %v19198_v1 = vld [vmem:[#allocation17_spill] sm:$0xff] }
 0x6d5   :  { %v15597_v4 = vadd.f32 %v3386_v63, %v3217_v56  ;;  %v3220_v11 = vpop.f32.mrf.mxu1 }
 0x6d6   :  { %v4513_v16 = vmax.f32 %v4385_v0, 0.0 }
 0x6d7   :  { %v3717_v19 = vpop.f32.mrf.mxu2 }
 0x6d8   :  { %v4635_v57 = vpack.c.bf16 %v4513_v16, %v4512_v38  ;;  %v3718_v56 = vadd.f32 %v3717_v19, %v3548_v23  ;;  %3259 = vmatmul.bf16.gmra.mxu1 %v19196_v61  ;;  %v3550_v17 = vpop.f32.mrf.mxu0 }
 0x6d9   :  { %9711 = vmatmul.msk.bf16.gmra.mxu3 %vm481_vm0, %v19198_v1  ;;  %4206 = vperm.xlu1 %12375, %v4020_v44  }
 0x6da   :  { %v4987_v0 = vunpack.c.l.b16 %v4635_v57  ;;  %v4988_v63 = vunpack.c.h.b16 %v4635_v57  ;;  %v3875_v15 = vmax.f32 %v19199_v49, %v3718_v56  ;;  %v4514_v57 = vmax.f32 %v4386_v48, 0.0 }
 0x6dc   :  { %v15615_v32 = vpack.c.b16 %v4988_v63, %v4986_v8  ;;  %v4387_v23 = vadd.f32 %v15463_v54, %v3875_v15  ;;  %v3389_v38 = vpop.f32.mrf.mxu3  ;;  %v15618_v16 = vpack.c.b16 %v4987_v0, %v4985_v5  ;;  %v19200_v54 = vld [vmem:[#allocation22_spill] sm:$0xff]  ;;  %v19201_v63 = vmax.f32 %v19187_v6, %v15565_v33  ;;  %v19202_v15 = vld [vmem:[#allocation177_spill] sm:$0xff] }
 0x6dd   :  { %v15620_v19 = vadd.f32 %v3389_v38, %v3220_v11  ;;  %v3222_v46 = vpop.f32.mrf.mxu1 }
 0x6de   :  { %v4515_v56 = vmax.f32 %v4387_v23, 0.0  ;;  %v4388_v49 = vadd.f32 %v15479_v34, %v19201_v63 }
 0x6df   :  { %v3719_v5 = vpop.f32.mrf.mxu2 }
 0x6e0   :  { %v4636_v8 = vpack.c.bf16 %v4515_v56, %v4514_v57  ;;  %v3720_v11 = vadd.f32 %v3719_v5, %v3550_v17  ;;  %v3553_v0 = vpop.f32.mrf.mxu0  ;;  %v4019_v17 = vld [vmem:[%s17774_s2 + $0xe8] sm:$0xff]  ;;  %v4516_v33 = vmax.f32 %v4388_v49, 0.0  ;;  %v4102_v56 = vpop.permute.xlu1 %4101 }
 0x6e1   :  { %4201 = vperm.xlu1 %12375, %v4019_v17   ;;  %v19203_v57 = vld [vmem:[#allocation15_spill] sm:$0xff] }
 0x6e2   :  { %v3877_v38 = vmax.f32 %v19202_v15, %v3720_v11  ;;  %v19204_v11 = vld [vmem:[#allocation32_spill] sm:$0xff]  ;;  %v19205_v15 = vld [vmem:[#allocation23_spill] sm:$0xff]  ;;  %v5119_v49 = vunpack.c.h.b16 %v4636_v8 }
 0x6e3   :  { %3592 = vmatmul.bf16.gmra.mxu0 %v19188_v41 }
 0x6e4   :  { %v4389_v48 = vadd.f32 %v15479_v34, %v3877_v38  ;;  %v3391_v23 = vpop.f32.mrf.mxu3  ;;  %9742 = vmatmul.msk.bf16.gmra.mxu2 %vm481_vm0, %v19190_v42  ;;  %v4390_v42 = vadd.f32 %v15496_v13, %v3878_v55 }
 0x6e5   :  { %v15639_v44 = vadd.f32 %v3391_v23, %v3222_v46  ;;  %v3225_v40 = vpop.f32.mrf.mxu1  ;;  %v5118_v46 = vunpack.c.l.b16 %v4636_v8  ;;  %v19206_v23 = vld [vmem:[#allocation178_spill] sm:$0xff] }
 0x6e6   :  { %v4517_v6 = vmax.f32 %v4389_v48, 0.0  ;;  %v4518_v55 = vmax.f32 %v4390_v42, 0.0  ;;  %v12035_v42 = vld [vmem:[%s17775_s3 + $0x78] sm:$0xff] }
 0x6e7   :  { %v3722_v41 = vpop.f32.mrf.mxu2  ;;  %4827 = vmatpush.bf16.msra.mxu1 %v12035_v42  ;;  %v19214_v42 = vld [vmem:[#allocation180_spill] sm:$0xff] }
 0x6e8   :  { %v4637_v5 = vpack.c.bf16 %v4517_v6, %v4516_v33  ;;  %v3723_v34 = vadd.f32 %v3722_v41, %v3553_v0  ;;  %3264 = vmatmul.bf16.gmra.mxu1 %v19204_v11  ;;  %v3555_v63 = vpop.f32.mrf.mxu0 }
 0x6e9   :  { %9712 = vmatmul.msk.bf16.gmra.mxu3 %vm481_vm0, %v19205_v15 }
 0x6ea   :  { %v5120_v38 = vunpack.c.l.b16 %v4637_v5  ;;  %v5121_v48 = vunpack.c.h.b16 %v4637_v5  ;;  %v3879_v17 = vmax.f32 %v19206_v23, %v3723_v34 }
 0x6ec   :  { %v15654_v33 = vpack.c.b16 %v5121_v48, %v5119_v49  ;;  %v4391_v0 = vadd.f32 %v15496_v13, %v3879_v17  ;;  %v3394_v6 = vpop.f32.mrf.mxu3  ;;  %v15657_v41 = vpack.c.b16 %v5120_v38, %v5118_v46  ;;  %v19208_v49 = vmax.f32 %v19195_v58, %v15597_v4  ;;  %v19209_v13 = vld [vmem:[#allocation179_spill] sm:$0xff]  ;;  %v4107_v58 = vpop.permute.xlu1 %4106  ;;  %v19210_v38 = vld [vmem:[#allocation18_spill] sm:$0xff] }
 0x6ed   :  { %v15659_v25 = vadd.f32 %v3394_v6, %v3225_v40  ;;  %v3227_v18 = vpop.f32.mrf.mxu1  ;;  %v12046_v40 = vld [vmem:[%s17775_s3 + $0xd0] sm:$0xff] }
 0x6ee   :  { %v4519_v45 = vmax.f32 %v4391_v0, 0.0  ;;  %v4392_v48 = vadd.f32 %v4102_v56, %v19208_v49  ;;  %5066 = vmatpush.bf16.msra.mxu2 %v12046_v40 }
 0x6ef   :  { %v3886_v8 = vmax.f32 %v19207_v14, %v15659_v25  ;;  %v3724_v36 = vpop.f32.mrf.mxu2  ;;  %v4021_v14 = vld [vmem:[%s17774_s2 + $0xf8] sm:$0xff] }
 0x6f0   :  { %v4638_v5 = vpack.c.bf16 %v4519_v45, %v4518_v55  ;;  %v3725_v29 = vadd.f32 %v3724_v36, %v3555_v63  ;;  %v3558_v34 = vpop.f32.mrf.mxu0  ;;  %4211 = vperm.xlu2 %12376, %v4021_v14  }
 0x6f2   :  { %v3881_v23 = vmax.f32 %v19209_v13, %v3725_v29  ;;  %v4520_v29 = vmax.f32 %v4392_v48, 0.0  ;;  %v19213_v13 = vld [vmem:[#allocation29_spill] sm:$0xff]  ;;  %v5252_v48 = vunpack.c.h.b16 %v4638_v5 }
 0x6f3   :  { %3597 = vmatmul.bf16.gmra.mxu0 %v19196_v61  ;;  %v19211_v61 = vld [vmem:[#allocation38_spill] sm:$0xff] }
 0x6f4   :  { %v4393_v46 = vadd.f32 %v4102_v56, %v3881_v23  ;;  %v3396_v45 = vpop.f32.mrf.mxu3  ;;  %9743 = vmatmul.msk.bf16.gmra.mxu2 %vm481_vm0, %v19198_v1  ;;  %v19212_v1 = vmax.f32 %v19200_v54, %v15620_v19  ;;  %v4022_v54 = vld [vmem:[%s17774_s2 + $0x100] sm:$0xff] }
 0x6f5   :  { %v15676_v36 = vadd.f32 %v3396_v45, %v3227_v18  ;;  %v3230_v4 = vpop.f32.mrf.mxu1  ;;  %v5251_v18 = vunpack.c.l.b16 %v4638_v5  ;;  %v4112_v45 = vpop.permute.xlu2 %4111  ;;  %4216 = vperm.xlu1 %12375, %v4022_v54  }
 0x6f6   :  { %v4521_v63 = vmax.f32 %v4393_v46, 0.0  ;;  %v4394_v49 = vadd.f32 %v4107_v58, %v19212_v1  ;;  %v15708_v54 = vpop.permute.xlu0 %4126 }
 0x6f7   :  { %v3727_v0 = vpop.f32.mrf.mxu2 }
 0x6f8   :  { %v4639_v6 = vpack.c.bf16 %v4521_v63, %v4520_v29  ;;  %v3728_v55 = vadd.f32 %v3727_v0, %v3558_v34  ;;  %3269 = vmatmul.bf16.gmra.mxu1 %v19211_v61  ;;  %v3560_v56 = vpop.f32.mrf.mxu0  ;;  %v4522_v1 = vmax.f32 %v4394_v49, 0.0  ;;  %v12024_v49 = vld [vmem:[%s17775_s3 + $0x20] sm:$0xff] }
 0x6f9   :  { %9713 = vmatmul.msk.bf16.gmra.mxu3 %vm481_vm0, %v19213_v13  ;;  %4935 = vmatpush.bf16.msra.mxu0 %v12024_v49 }
 0x6fa   :  { %v5253_v23 = vunpack.c.l.b16 %v4639_v6  ;;  %v5254_v40 = vunpack.c.h.b16 %v4639_v6  ;;  %v3883_v46 = vmax.f32 %v19214_v42, %v3728_v55  ;;  %v19215_v6 = vld [vmem:[#allocation28_spill] sm:$0xff]  ;;  %v19221_v55 = vld [vmem:[#allocation182_spill] sm:$0xff] }
 0x6fc   :  { %v15687_v17 = vpack.c.b16 %v5254_v40, %v5252_v48  ;;  %v4395_v34 = vadd.f32 %v4107_v58, %v3883_v46  ;;  %v3399_v29 = vpop.f32.mrf.mxu3  ;;  %v15689_v63 = vpack.c.b16 %v5253_v23, %v5251_v18  ;;  %v19216_v18 = vmax.f32 %v19203_v57, %v15639_v44  ;;  %v19217_v23 = vld [vmem:[#allocation181_spill] sm:$0xff] }
 0x6fd   :  { %v15691_v0 = vadd.f32 %v3399_v29, %v3230_v4  ;;  %v3232_v19 = vpop.f32.mrf.mxu1  ;;  %v4117_v57 = vpop.permute.xlu2 %4116 }
 0x6fe   :  { %v4523_v5 = vmax.f32 %v4395_v34, 0.0  ;;  %v4396_v4 = vadd.f32 %v4112_v45, %v19216_v18 }
 0x6ff   :  { %v3729_v42 = vpop.f32.mrf.mxu2 }
 0x700   :  { %v4640_v48 = vpack.c.bf16 %v4523_v5, %v4522_v1  ;;  %v3730_v40 = vadd.f32 %v3729_v42, %v3560_v56  ;;  %v3563_v58 = vpop.f32.mrf.mxu0  ;;  %v4524_v44 = vmax.f32 %v4396_v4, 0.0 }
 0x702   :  { %v3885_v46 = vmax.f32 %v19217_v23, %v3730_v40  ;;  %v5385_v4 = vunpack.c.h.b16 %v4640_v48 }
 0x703   :  { %3602 = vmatmul.bf16.gmra.mxu0 %v19204_v11  ;;  %v19218_v11 = vld [vmem:[#allocation21_spill] sm:$0xff] }
 0x704   :  { %v4397_v34 = vadd.f32 %v4112_v45, %v3885_v46  ;;  %v3401_v29 = vpop.f32.mrf.mxu3  ;;  %9744 = vmatmul.msk.bf16.gmra.mxu2 %vm481_vm0, %v19205_v15  ;;  %v19219_v45 = vld [vmem:[#allocation44_spill] sm:$0xff]  ;;  %v4398_v15 = vadd.f32 %v4117_v57, %v3886_v8 }
 0x705   :  { %v15710_v56 = vadd.f32 %v3401_v29, %v3232_v19  ;;  %v3235_v1 = vpop.f32.mrf.mxu1  ;;  %v5384_v19 = vunpack.c.l.b16 %v4640_v48  ;;  %v19220_v29 = vld [vmem:[#allocation35_spill] sm:$0xff]  ;;  %v4122_v48 = vpop.permute.xlu0 %4121 }
 0x706   :  { %v4525_v5 = vmax.f32 %v4397_v34, 0.0  ;;  %v4526_v25 = vmax.f32 %v4398_v15, 0.0 }
 0x707   :  { %v3732_v40 = vpop.f32.mrf.mxu2 }
 0x708   :  { %v4641_v18 = vpack.c.bf16 %v4525_v5, %v4524_v44  ;;  %v3733_v23 = vadd.f32 %v3732_v40, %v3563_v58  ;;  %3274 = vmatmul.bf16.gmra.mxu1 %v19219_v45  ;;  %v3565_v46 = vpop.f32.mrf.mxu0 }
 0x709   :  { %9714 = vmatmul.msk.bf16.gmra.mxu3 %vm481_vm0, %v19220_v29 }
 0x70a   :  { %v5386_v49 = vunpack.c.l.b16 %v4641_v18  ;;  %v5387_v34 = vunpack.c.h.b16 %v4641_v18  ;;  %v3887_v2 = vmax.f32 %v19221_v55, %v3733_v23  ;;  %v19223_v18 = vld [vmem:[#allocation31_spill] sm:$0xff]  ;;  %v4132_v55 = vpop.permute.xlu1 %4131 }
 0x70c   :  { %v15721_v42 = vpack.c.b16 %v5387_v34, %v5385_v4  ;;  %v4399_v44 = vadd.f32 %v4117_v57, %v3887_v2  ;;  %v3404_v58 = vpop.f32.mrf.mxu3  ;;  %v15723_v5 = vpack.c.b16 %v5386_v49, %v5384_v19  ;;  %v19225_v49 = vld [vmem:[#allocation183_spill] sm:$0xff] }
 0x70d   :  { %v15725_v40 = vadd.f32 %v3404_v58, %v3235_v1  ;;  %v3237_v30 = vpop.f32.mrf.mxu1  ;;  %v19224_v1 = vmax.f32 %v19210_v38, %v15676_v36  ;;  %v4024_v36 = vld [vmem:[%s17774_s2 + $0x110] sm:$0xff] }
 0x70e   :  { %19222 = vst [vmem:[#allocation100_spill] sm:$0xff] %v15721_v42  ;;  %v4527_v8 = vmax.f32 %v4399_v44, 0.0  ;;  %4226 = vperm.xlu2 %12376, %v4024_v36   ;;  %v19230_v36 = vld [vmem:[#allocation184_spill] sm:$0xff]  ;;  %v19242_v42 = vld [vmem:[#allocation37_spill] sm:$0xff] }
 0x70f   :  { %v3734_v23 = vpop.f32.mrf.mxu2  ;;  %v4400_v19 = vadd.f32 %v4122_v48, %v19224_v1  ;;  %v19228_v1 = vmax.f32 %v19215_v6, %v15691_v0 }
 0x710   :  { %v4642_v4 = vpack.c.bf16 %v4527_v8, %v4526_v25  ;;  %v3735_v2 = vadd.f32 %v3734_v23, %v3565_v46  ;;  %v3568_v57 = vpop.f32.mrf.mxu0  ;;  %v4025_v46 = vld [vmem:[%s17774_s2 + $0x118] sm:$0xff]  ;;  %v19227_v23 = vld [vmem:[#allocation50_spill] sm:$0xff] }
 0x711   :  { %v4528_v38 = vmax.f32 %v4400_v19, 0.0  ;;  %4231 = vperm.xlu0 %12374, %v4025_v46  }
 0x712   :  { %v3889_v34 = vmax.f32 %v19225_v49, %v3735_v2  ;;  %v4402_v49 = vadd.f32 %v15708_v54, %v19228_v1  ;;  %v5518_v19 = vunpack.c.h.b16 %v4642_v4  ;;  %v4028_v1 = vld [vmem:[%s17774_s2 + $0x130] sm:$0xff] }
 0x713   :  { %3607 = vmatmul.bf16.gmra.mxu0 %v19211_v61  ;;  %v19226_v61 = vld [vmem:[#allocation24_spill] sm:$0xff] }
 0x714   :  { %v4401_v58 = vadd.f32 %v4122_v48, %v3889_v34  ;;  %v3406_v15 = vpop.f32.mrf.mxu3  ;;  %9745 = vmatmul.msk.bf16.gmra.mxu2 %vm481_vm0, %v19213_v13  ;;  %v5517_v34 = vunpack.c.l.b16 %v4642_v4  ;;  %v4023_v4 = vld [vmem:[%s17774_s2 + $0x108] sm:$0xff] }
 0x715   :  { %v15739_v44 = vadd.f32 %v3406_v15, %v3237_v30  ;;  %v3240_v14 = vpop.f32.mrf.mxu1  ;;  %v19229_v15 = vld [vmem:[#allocation41_spill] sm:$0xff] }
 0x716   :  { %v4529_v25 = vmax.f32 %v4401_v58, 0.0  ;;  %4221 = vperm.xlu2 %12376, %v4023_v4  }
 0x717   :  { %v3737_v48 = vpop.f32.mrf.mxu2 }
 0x718   :  { %v4643_v13 = vpack.c.bf16 %v4529_v25, %v4528_v38  ;;  %v3738_v30 = vadd.f32 %v3737_v48, %v3568_v57  ;;  %3279 = vmatmul.bf16.gmra.mxu1 %v19227_v23  ;;  %v3570_v2 = vpop.f32.mrf.mxu0 }
 0x719   :  { %9715 = vmatmul.msk.bf16.gmra.mxu3 %vm481_vm0, %v19229_v15  ;;  %4246 = vperm.xlu0 %12374, %v4028_v1  }
 0x71a   :  { %v5519_v58 = vunpack.c.l.b16 %v4643_v13  ;;  %v5520_v46 = vunpack.c.h.b16 %v4643_v13  ;;  %v3891_v8 = vmax.f32 %v19230_v36, %v3738_v30  ;;  %v4530_v13 = vmax.f32 %v4402_v49, 0.0 }
 0x71c   :  { %v15757_v38 = vpack.c.b16 %v5520_v46, %v5518_v19  ;;  %v4403_v57 = vadd.f32 %v15708_v54, %v3891_v8  ;;  %v3409_v25 = vpop.f32.mrf.mxu3  ;;  %v15760_v48 = vpack.c.b16 %v5519_v58, %v5517_v34  ;;  %v19233_v54 = vld [vmem:[#allocation34_spill] sm:$0xff]  ;;  %v19234_v46 = vmax.f32 %v19218_v11, %v15710_v56  ;;  %v4137_v11 = vpop.permute.xlu0 %4136 }
 0x71d   :  { %v15762_v0 = vadd.f32 %v3409_v25, %v3240_v14  ;;  %v3242_v6 = vpop.f32.mrf.mxu1  ;;  %v19235_v25 = vld [vmem:[#allocation185_spill] sm:$0xff]  ;;  %v19240_v8 = vld [vmem:[#allocation186_spill] sm:$0xff] }
 0x71e   :  { %19231 = vst [vmem:[#allocation229_spill] sm:$0xff] %v15757_v38  ;;  %v4531_v30 = vmax.f32 %v4403_v57, 0.0  ;;  %v4404_v36 = vadd.f32 %v4132_v55, %v19234_v46  ;;  %v15779_v57 = vpop.permute.xlu1 %4146 }
 0x71f   :  { %19232 = vst [vmem:[#allocation93_spill] sm:$0xff] %v15760_v48  ;;  %v3739_v34 = vpop.f32.mrf.mxu2 }
 0x720   :  { %v4644_v19 = vpack.c.bf16 %v4531_v30, %v4530_v13  ;;  %v3740_v14 = vadd.f32 %v3739_v34, %v3570_v2  ;;  %v3573_v58 = vpop.f32.mrf.mxu0  ;;  %v4027_v2 = vld [vmem:[%s17774_s2 + $0x128] sm:$0xff]  ;;  %v4532_v56 = vmax.f32 %v4404_v36, 0.0 }
 0x721   :  { %4241 = vperm.xlu0 %12374, %v4027_v2  }
 0x722   :  { %v3893_v9 = vmax.f32 %v19235_v25, %v3740_v14  ;;  %v5650_v25 = vunpack.c.l.b16 %v4644_v19  ;;  %v5651_v36 = vunpack.c.h.b16 %v4644_v19 }
 0x723   :  { %3612 = vmatmul.bf16.gmra.mxu0 %v19219_v45  ;;  %v19236_v45 = vld [vmem:[#allocation27_spill] sm:$0xff] }
 0x724   :  { %v4405_v3 = vadd.f32 %v4132_v55, %v3893_v9  ;;  %v3411_v49 = vpop.f32.mrf.mxu3  ;;  %9746 = vmatmul.msk.bf16.gmra.mxu2 %vm481_vm0, %v19220_v29  ;;  %v19237_v29 = vld [vmem:[#allocation56_spill] sm:$0xff] }
 0x725   :  { %v15781_v1 = vadd.f32 %v3411_v49, %v3242_v6  ;;  %v3245_v4 = vpop.f32.mrf.mxu1  ;;  %v19238_v6 = vmax.f32 %v19223_v18, %v15725_v40  ;;  %v19239_v49 = vld [vmem:[#allocation47_spill] sm:$0xff] }
 0x726   :  { %v4533_v13 = vmax.f32 %v4405_v3, 0.0 }
 0x727   :  { %v3742_v55 = vpop.f32.mrf.mxu2  ;;  %v4406_v46 = vadd.f32 %v4137_v11, %v19238_v6  ;;  %v4142_v6 = vpop.permute.xlu1 %4141 }
 0x728   :  { %v4645_v30 = vpack.c.bf16 %v4533_v13, %v4532_v56  ;;  %v3743_v34 = vadd.f32 %v3742_v55, %v3573_v58  ;;  %3284 = vmatmul.bf16.gmra.mxu1 %v19237_v29  ;;  %v3575_v14 = vpop.f32.mrf.mxu0 }
 0x729   :  { %9716 = vmatmul.msk.bf16.gmra.mxu3 %vm481_vm0, %v19239_v49  ;;  %v4534_v40 = vmax.f32 %v4406_v46, 0.0  ;;  %v12034_v46 = vld [vmem:[%s17775_s3 + $0x70] sm:$0xff] }
 0x72a   :  { %v5652_v3 = vunpack.c.l.b16 %v4645_v30  ;;  %v5653_v2 = vunpack.c.h.b16 %v4645_v30  ;;  %v3895_v10 = vmax.f32 %v19240_v8, %v3743_v34  ;;  %v19243_v8 = vmax.f32 %v19226_v61, %v15739_v44  ;;  %4828 = vmatpush.bf16.msra.mxu1 %v12034_v46 }
 0x72c   :  { %v15795_v9 = vpack.c.b16 %v5653_v2, %v5651_v36  ;;  %v4407_v56 = vadd.f32 %v4137_v11, %v3895_v10  ;;  %v3414_v58 = vpop.f32.mrf.mxu3  ;;  %v15797_v13 = vpack.c.b16 %v5652_v3, %v5650_v25  ;;  %v4408_v10 = vadd.f32 %v4142_v6, %v19243_v8  ;;  %v19244_v11 = vld [vmem:[#allocation187_spill] sm:$0xff]  ;;  %v4026_v3 = vld [vmem:[%s17774_s2 + $0x120] sm:$0xff] }
 0x72d   :  { %v15799_v55 = vadd.f32 %v3414_v58, %v3245_v4  ;;  %v3247_v48 = vpop.f32.mrf.mxu1  ;;  %v12045_v4 = vld [vmem:[%s17775_s3 + $0xc8] sm:$0xff]  ;;  %4236 = vperm.xlu2 %12376, %v4026_v3  }
 0x72e   :  { %19241 = vst [vmem:[#allocation230_spill] sm:$0xff] %v15797_v13  ;;  %v4535_v18 = vmax.f32 %v4407_v56, 0.0  ;;  %5067 = vmatpush.bf16.msra.mxu2 %v12045_v4  ;;  %v4536_v2 = vmax.f32 %v4408_v10, 0.0  ;;  %v19245_v56 = vld [vmem:[#allocation30_spill] sm:$0xff] }
 0x72f   :  { %v3902_v38 = vmax.f32 %v19242_v42, %v15799_v55  ;;  %v3744_v19 = vpop.f32.mrf.mxu2 }
 0x730   :  { %v4646_v20 = vpack.c.bf16 %v4535_v18, %v4534_v40  ;;  %v3745_v30 = vadd.f32 %v3744_v19, %v3575_v14  ;;  %v3578_v39 = vpop.f32.mrf.mxu0  ;;  %v4029_v14 = vld [vmem:[%s17774_s2 + $0x138] sm:$0xff] }
 0x731   :  { %4251 = vperm.xlu1 %12375, %v4029_v14   ;;  %v4152_v14 = vpop.permute.xlu2 %4151 }
 0x732   :  { %v3897_v34 = vmax.f32 %v19244_v11, %v3745_v30  ;;  %v19247_v30 = vmax.f32 %v19233_v54, %v15762_v0  ;;  %v5783_v10 = vunpack.c.l.b16 %v4646_v20  ;;  %v19248_v11 = vld [vmem:[#allocation53_spill] sm:$0xff] }
 0x733   :  { %3617 = vmatmul.bf16.gmra.mxu0 %v19227_v23 }
 0x734   :  { %v4409_v25 = vadd.f32 %v4142_v6, %v3897_v34  ;;  %v3416_v36 = vpop.f32.mrf.mxu3  ;;  %9747 = vmatmul.msk.bf16.gmra.mxu2 %vm481_vm0, %v19229_v15  ;;  %v19246_v6 = vld [vmem:[#allocation62_spill] sm:$0xff]  ;;  %v4410_v8 = vadd.f32 %v15779_v57, %v19247_v30  ;;  %v5784_v34 = vunpack.c.h.b16 %v4646_v20 }
 0x735   :  { %v15816_v44 = vadd.f32 %v3416_v36, %v3247_v48  ;;  %v3250_v61 = vpop.f32.mrf.mxu1  ;;  %v4030_v48 = vld [vmem:[%s17774_s2 + $0x140] sm:$0xff] }
 0x736   :  { %v4537_v23 = vmax.f32 %v4409_v25, 0.0  ;;  %4256 = vperm.xlu0 %12374, %v4030_v48   ;;  %v19249_v25 = vld [vmem:[#allocation188_spill] sm:$0xff]  ;;  %v4538_v20 = vmax.f32 %v4410_v8, 0.0 }
 0x737   :  { %v3747_v58 = vpop.f32.mrf.mxu2 }
 0x738   :  { %v4647_v40 = vpack.c.bf16 %v4537_v23, %v4536_v2  ;;  %v3748_v18 = vadd.f32 %v3747_v58, %v3578_v39  ;;  %3289 = vmatmul.bf16.gmra.mxu1 %v19246_v6  ;;  %v3580_v19 = vpop.f32.mrf.mxu0  ;;  %v4032_v58 = vld [vmem:[%s17774_s2 + $0x150] sm:$0xff] }
 0x739   :  { %9717 = vmatmul.msk.bf16.gmra.mxu3 %vm481_vm0, %v19248_v11  ;;  %4266 = vperm.xlu1 %12375, %v4032_v58  }
 0x73a   :  { %v5785_v4 = vunpack.c.l.b16 %v4647_v40  ;;  %v5786_v46 = vunpack.c.h.b16 %v4647_v40  ;;  %v3899_v36 = vmax.f32 %v19249_v25, %v3748_v18  ;;  %v19252_v40 = vld [vmem:[#allocation40_spill] sm:$0xff]  ;;  %v19254_v25 = vld [vmem:[#allocation189_spill] sm:$0xff] }
 0x73c   :  { %v15837_v39 = vpack.c.b16 %v5786_v46, %v5784_v34  ;;  %v4411_v3 = vadd.f32 %v15779_v57, %v3899_v36  ;;  %v3419_v2 = vpop.f32.mrf.mxu3  ;;  %v15840_v23 = vpack.c.b16 %v5785_v4, %v5783_v10  ;;  %v4037_v57 = vld [vmem:[%s17774_s2 + $0x178] sm:$0xff]  ;;  %v19253_v4 = vmax.f32 %v19236_v45, %v15781_v1  ;;  %v4031_v1 = vld [vmem:[%s17774_s2 + $0x148] sm:$0xff] }
 0x73d   :  { %v15842_v0 = vadd.f32 %v3419_v2, %v3250_v61  ;;  %v3252_v54 = vpop.f32.mrf.mxu1  ;;  %v12023_v36 = vld [vmem:[%s17775_s3 + $0x18] sm:$0xff] }
 0x73e   :  { %19250 = vst [vmem:[#allocation103_spill] sm:$0xff] %v15837_v39  ;;  %v4539_v48 = vmax.f32 %v4411_v3, 0.0  ;;  %4291 = vperm.xlu0 %12374, %v4037_v57   ;;  %v4412_v46 = vadd.f32 %v4152_v14, %v19253_v4  ;;  %4936 = vmatpush.bf16.msra.mxu0 %v12023_v36  ;;  %v19256_v4 = vld [vmem:[#allocation68_spill] sm:$0xff]  ;;  %v19257_v36 = vld [vmem:[#allocation59_spill] sm:$0xff] }
 0x73f   :  { %19251 = vst [vmem:[#allocation231_spill] sm:$0xff] %v15840_v23  ;;  %v3749_v30 = vpop.f32.mrf.mxu2  ;;  %v19261_v39 = vld [vmem:[#allocation43_spill] sm:$0xff] }
 0x740   :  { %v4648_v10 = vpack.c.bf16 %v4539_v48, %v4538_v20  ;;  %v3750_v34 = vadd.f32 %v3749_v30, %v3580_v19  ;;  %v3583_v61 = vpop.f32.mrf.mxu0  ;;  %v15862_v19 = vpop.permute.xlu2 %4166  ;;  %v4540_v45 = vmax.f32 %v4412_v46, 0.0  ;;  %v19258_v30 = vld [vmem:[#allocation190_spill] sm:$0xff] }
 0x741   :  { %4261 = vperm.xlu1 %12375, %v4031_v1  }
 0x742   :  { %v3901_v8 = vmax.f32 %v19254_v25, %v3750_v34 }
 0x743   :  { %3622 = vmatmul.bf16.gmra.mxu0 %v19237_v29  ;;  %v4157_v29 = vpop.permute.xlu1 %4156 }
 0x744   :  { %v4413_v3 = vadd.f32 %v4152_v14, %v3901_v8  ;;  %v3421_v2 = vpop.f32.mrf.mxu3  ;;  %9748 = vmatmul.msk.bf16.gmra.mxu2 %vm481_vm0, %v19239_v49  ;;  %v19255_v14 = vld [vmem:[#allocation33_spill] sm:$0xff]  ;;  %v4040_v49 = vld [vmem:[%s17774_s2 + $0x190] sm:$0xff]  ;;  %v4414_v46 = vadd.f32 %v4157_v29, %v3902_v38  ;;  %v5916_v8 = vunpack.c.l.b16 %v4648_v10 }
 0x745   :  { %v15864_v58 = vadd.f32 %v3421_v2, %v3252_v54  ;;  %v3255_v20 = vpop.f32.mrf.mxu1 }
 0x746   :  { %v4541_v48 = vmax.f32 %v4413_v3, 0.0  ;;  %4306 = vperm.xlu0 %12374, %v4040_v49   ;;  %v5917_v3 = vunpack.c.h.b16 %v4648_v10  ;;  %v4542_v42 = vmax.f32 %v4414_v46, 0.0 }
 0x747   :  { %v3752_v57 = vpop.f32.mrf.mxu2 }
 0x748   :  { %v4649_v54 = vpack.c.bf16 %v4541_v48, %v4540_v45  ;;  %v3753_v34 = vadd.f32 %v3752_v57, %v3583_v61  ;;  %3294 = vmatmul.bf16.gmra.mxu1 %v19256_v4  ;;  %v3585_v25 = vpop.f32.mrf.mxu0  ;;  %v4162_v55 = vpop.permute.xlu2 %4161 }
 0x749   :  { %9718 = vmatmul.msk.bf16.gmra.mxu3 %vm481_vm0, %v19257_v36 }
 0x74a   :  { %v5918_v2 = vunpack.c.l.b16 %v4649_v54  ;;  %v5919_v1 = vunpack.c.h.b16 %v4649_v54  ;;  %v3903_v18 = vmax.f32 %v19258_v30, %v3753_v34  ;;  %v4039_v30 = vld [vmem:[%s17774_s2 + $0x188] sm:$0xff] }
 0x74c   :  { %v15881_v15 = vpack.c.b16 %v5919_v1, %v5917_v3  ;;  %v4415_v61 = vadd.f32 %v4157_v29, %v3903_v18  ;;  %v3424_v45 = vpop.f32.mrf.mxu3  ;;  %v15883_v48 = vpack.c.b16 %v5918_v2, %v5916_v8  ;;  %v19263_v8 = vld [vmem:[#allocation191_spill] sm:$0xff] }
 0x74d   :  { %v15885_v57 = vadd.f32 %v3424_v45, %v3255_v20  ;;  %v3257_v49 = vpop.f32.mrf.mxu1  ;;  %v19262_v20 = vmax.f32 %v19245_v56, %v15816_v44  ;;  %v4034_v44 = vld [vmem:[%s17774_s2 + $0x160] sm:$0xff] }
 0x74e   :  { %19259 = vst [vmem:[#allocation96_spill] sm:$0xff] %v15881_v15  ;;  %v4543_v38 = vmax.f32 %v4415_v61, 0.0  ;;  %4301 = vperm.xlu0 %12374, %v4039_v30   ;;  %v4042_v56 = vld [vmem:[%s17774_s2 + $0x1a0] sm:$0xff]  ;;  %4276 = vperm.xlu1 %12375, %v4034_v44   ;;  %v19266_v30 = vmax.f32 %v19252_v40, %v15842_v0 }
 0x74f   :  { %19260 = vst [vmem:[#allocation232_spill] sm:$0xff] %v15883_v48  ;;  %v3754_v10 = vpop.f32.mrf.mxu2  ;;  %v4416_v29 = vadd.f32 %v4162_v55, %v19262_v20 }
 0x750   :  { %v4650_v54 = vpack.c.bf16 %v4543_v38, %v4542_v42  ;;  %v3755_v34 = vadd.f32 %v3754_v10, %v3585_v25  ;;  %v3588_v18 = vpop.f32.mrf.mxu0  ;;  %v19264_v42 = vld [vmem:[#allocation36_spill] sm:$0xff] }
 0x751   :  { %v4544_v45 = vmax.f32 %v4416_v29, 0.0  ;;  %v19267_v29 = vld [vmem:[#allocation65_spill] sm:$0xff] }
 0x752   :  { %v3905_v46 = vmax.f32 %v19263_v8, %v3755_v34  ;;  %v4418_v34 = vadd.f32 %v15862_v19, %v19266_v30  ;;  %v6049_v20 = vunpack.c.l.b16 %v4650_v54  ;;  %v6050_v8 = vunpack.c.h.b16 %v4650_v54  ;;  %v19278_v54 = vld [vmem:[#allocation194_spill] sm:$0xff] }
 0x753   :  { %3627 = vmatmul.bf16.gmra.mxu0 %v19246_v6 }
 0x754   :  { %v4417_v3 = vadd.f32 %v4162_v55, %v3905_v46  ;;  %v3426_v2 = vpop.f32.mrf.mxu3  ;;  %9749 = vmatmul.msk.bf16.gmra.mxu2 %vm481_vm0, %v19248_v11  ;;  %v19265_v11 = vld [vmem:[#allocation74_spill] sm:$0xff]  ;;  %v4546_v30 = vmax.f32 %v4418_v34, 0.0 }
 0x755   :  { %v15899_v1 = vadd.f32 %v3426_v2, %v3257_v49  ;;  %v3260_v61 = vpop.f32.mrf.mxu1  ;;  %v19268_v2 = vld [vmem:[#allocation192_spill] sm:$0xff] }
 0x756   :  { %v4545_v25 = vmax.f32 %v4417_v3, 0.0  ;;  %4316 = vperm.xlu0 %12374, %v4042_v56   ;;  %v19271_v56 = vld [vmem:[#allocation46_spill] sm:$0xff] }
 0x757   :  { %v3757_v10 = vpop.f32.mrf.mxu2 }
 0x758   :  { %v4651_v6 = vpack.c.bf16 %v4545_v25, %v4544_v45  ;;  %v3758_v55 = vadd.f32 %v3757_v10, %v3588_v18  ;;  %3299 = vmatmul.bf16.gmra.mxu1 %v19265_v11  ;;  %v3590_v49 = vpop.f32.mrf.mxu0  ;;  %v4172_v18 = vpop.permute.xlu0 %4171 }
 0x759   :  { %9719 = vmatmul.msk.bf16.gmra.mxu3 %vm481_vm0, %v19267_v29 }
 0x75a   :  { %v6051_v46 = vunpack.c.l.b16 %v4651_v6  ;;  %v6052_v3 = vunpack.c.h.b16 %v4651_v6  ;;  %v3907_v45 = vmax.f32 %v19268_v2, %v3758_v55  ;;  %v4041_v6 = vld [vmem:[%s17774_s2 + $0x198] sm:$0xff] }
 0x75b   :  { %4311 = vperm.xlu1 %12375, %v4041_v6  }
 0x75c   :  { %v15917_v25 = vpack.c.b16 %v6052_v3, %v6050_v8  ;;  %v4419_v10 = vadd.f32 %v15862_v19, %v3907_v45  ;;  %v3429_v44 = vpop.f32.mrf.mxu3  ;;  %v15920_v38 = vpack.c.b16 %v6051_v46, %v6049_v20  ;;  %v4049_v19 = vld [vmem:[%s17774_s2 + $0x1d8] sm:$0xff] }
 0x75d   :  { %v15922_v0 = vadd.f32 %v3429_v44, %v3260_v61  ;;  %v3262_v40 = vpop.f32.mrf.mxu1  ;;  %v19272_v61 = vmax.f32 %v19255_v14, %v15864_v58  ;;  %v19273_v46 = vld [vmem:[#allocation193_spill] sm:$0xff]  ;;  %v4177_v44 = vpop.permute.xlu2 %4176  ;;  %v19274_v58 = vld [vmem:[#allocation39_spill] sm:$0xff] }
 0x75e   :  { %19269 = vst [vmem:[#allocation106_spill] sm:$0xff] %v15917_v25  ;;  %v4547_v23 = vmax.f32 %v4419_v10, 0.0  ;;  %4351 = vperm.xlu0 %12374, %v4049_v19  }
 0x75f   :  { %19270 = vst [vmem:[#allocation233_spill] sm:$0xff] %v15920_v38  ;;  %v3759_v15 = vpop.f32.mrf.mxu2  ;;  %v4420_v34 = vadd.f32 %v4172_v18, %v19272_v61  ;;  %v19276_v61 = vmax.f32 %v19261_v39, %v15885_v57 }
 0x760   :  { %v4652_v55 = vpack.c.bf16 %v4547_v23, %v4546_v30  ;;  %v3760_v20 = vadd.f32 %v3759_v15, %v3590_v49  ;;  %v3593_v8 = vpop.f32.mrf.mxu0  ;;  %v15939_v10 = vpop.permute.xlu0 %4186 }
 0x761   :  { %v4548_v49 = vmax.f32 %v4420_v34, 0.0  ;;  %v4422_v34 = vadd.f32 %v4177_v44, %v19276_v61 }
 0x762   :  { %v3909_v3 = vmax.f32 %v19273_v46, %v3760_v20  ;;  %v6182_v46 = vunpack.c.l.b16 %v4652_v55 }
 0x763   :  { %3632 = vmatmul.bf16.gmra.mxu0 %v19256_v4  ;;  %v4044_v4 = vld [vmem:[%s17774_s2 + $0x1b0] sm:$0xff] }
 0x764   :  { %v4421_v2 = vadd.f32 %v4172_v18, %v3909_v3  ;;  %v3431_v45 = vpop.f32.mrf.mxu3  ;;  %9750 = vmatmul.msk.bf16.gmra.mxu2 %vm481_vm0, %v19257_v36  ;;  %v4052_v36 = vld [vmem:[%s17774_s2 + $0x1f0] sm:$0xff]  ;;  %4326 = vperm.xlu1 %12375, %v4044_v4   ;;  %v19277_v3 = vld [vmem:[#allocation71_spill] sm:$0xff] }
 0x765   :  { %v15941_v23 = vadd.f32 %v3431_v45, %v3262_v40  ;;  %v3265_v15 = vpop.f32.mrf.mxu1  ;;  %v19275_v40 = vld [vmem:[#allocation80_spill] sm:$0xff] }
 0x766   :  { %v4549_v30 = vmax.f32 %v4421_v2, 0.0  ;;  %4366 = vperm.xlu0 %12374, %v4052_v36   ;;  %v6183_v2 = vunpack.c.h.b16 %v4652_v55  ;;  %v4550_v36 = vmax.f32 %v4422_v34, 0.0  ;;  %v19282_v34 = vmax.f32 %v19264_v42, %v15899_v1  ;;  %v4036_v1 = vld [vmem:[%s17774_s2 + $0x170] sm:$0xff] }
 0x767   :  { %v3762_v6 = vpop.f32.mrf.mxu2 }
 0x768   :  { %v4653_v18 = vpack.c.bf16 %v4549_v30, %v4548_v49  ;;  %v3763_v19 = vadd.f32 %v3762_v6, %v3593_v8  ;;  %3304 = vmatmul.bf16.gmra.mxu1 %v19275_v40  ;;  %v3595_v20 = vpop.f32.mrf.mxu0  ;;  %v4033_v8 = vld [vmem:[%s17774_s2 + $0x158] sm:$0xff]  ;;  %v4182_v61 = vpop.permute.xlu0 %4181 }
 0x769   :  { %9720 = vmatmul.msk.bf16.gmra.mxu3 %vm481_vm0, %v19277_v3  ;;  %4271 = vperm.xlu2 %12376, %v4033_v8  }
 0x76a   :  { %v6184_v45 = vunpack.c.l.b16 %v4653_v18  ;;  %v6185_v14 = vunpack.c.h.b16 %v4653_v18  ;;  %v3911_v38 = vmax.f32 %v19278_v54, %v3763_v19  ;;  %v19281_v18 = vld [vmem:[#allocation49_spill] sm:$0xff] }
 0x76c   :  { %v15961_v49 = vpack.c.b16 %v6185_v14, %v6183_v2  ;;  %v4423_v30 = vadd.f32 %v4177_v44, %v3911_v38  ;;  %v3434_v6 = vpop.f32.mrf.mxu3  ;;  %v15963_v39 = vpack.c.b16 %v6184_v45, %v6182_v46  ;;  %v4043_v14 = vld [vmem:[%s17774_s2 + $0x1a8] sm:$0xff]  ;;  %v4424_v2 = vadd.f32 %v4182_v61, %v19282_v34 }
 0x76d   :  { %v15965_v57 = vadd.f32 %v3434_v6, %v3265_v15  ;;  %v3267_v4 = vpop.f32.mrf.mxu1  ;;  %v4051_v38 = vld [vmem:[%s17774_s2 + $0x1e8] sm:$0xff]  ;;  %4321 = vperm.xlu1 %12375, %v4043_v14  }
 0x76e   :  { %19279 = vst [vmem:[#allocation99_spill] sm:$0xff] %v15961_v49  ;;  %v4551_v55 = vmax.f32 %v4423_v30, 0.0  ;;  %4361 = vperm.xlu0 %12374, %v4051_v38   ;;  %v19283_v45 = vld [vmem:[#allocation195_spill] sm:$0xff]  ;;  %v12044_v30 = vld [vmem:[%s17775_s3 + $0xc0] sm:$0xff]  ;;  %v4552_v14 = vmax.f32 %v4424_v2, 0.0 }
 0x76f   :  { %19280 = vst [vmem:[#allocation234_spill] sm:$0xff] %v15963_v39  ;;  %v3764_v19 = vpop.f32.mrf.mxu2  ;;  %v12033_v6 = vld [vmem:[%s17775_s3 + $0x68] sm:$0xff]  ;;  %5068 = vmatpush.bf16.msra.mxu2 %v12044_v30  ;;  %v19286_v30 = vmax.f32 %v19271_v56, %v15922_v0 }
 0x770   :  { %v4654_v44 = vpack.c.bf16 %v4551_v55, %v4550_v36  ;;  %v3765_v46 = vadd.f32 %v3764_v19, %v3595_v20  ;;  %v3598_v15 = vpop.f32.mrf.mxu0  ;;  %v12039_v20 = vld [vmem:[%s17775_s3 + $0x98] sm:$0xff]  ;;  %4829 = vmatpush.bf16.msra.mxu1 %v12033_v6 }
 0x771   :  { %4845 = vmatpush.bf16.msra.mxu3 %v12039_v20  ;;  %4286 = vperm.xlu2 %12376, %v4036_v1   ;;  %v4426_v2 = vadd.f32 %v15939_v10, %v19286_v30  ;;  %v19287_v20 = vld [vmem:[#allocation77_spill] sm:$0xff] }
 0x772   :  { %v3913_v8 = vmax.f32 %v19283_v45, %v3765_v46  ;;  %v6315_v6 = vunpack.c.l.b16 %v4654_v44  ;;  %v6316_v1 = vunpack.c.h.b16 %v4654_v44  ;;  %v19288_v46 = vld [vmem:[#allocation196_spill] sm:$0xff] }
 0x773   :  { %3637 = vmatmul.bf16.gmra.mxu0 %v19265_v11  ;;  %v19284_v11 = vld [vmem:[#allocation42_spill] sm:$0xff]  ;;  %v4554_v44 = vmax.f32 %v4426_v2, 0.0 }
 0x774   :  { %v4425_v42 = vadd.f32 %v4182_v61, %v3913_v8  ;;  %v3436_v36 = vpop.f32.mrf.mxu3  ;;  %9751 = vmatmul.msk.bf16.gmra.mxu2 %vm481_vm0, %v19267_v29  ;;  %v4046_v61 = vld [vmem:[%s17774_s2 + $0x1c0] sm:$0xff] }
 0x775   :  { %v15994_v55 = vadd.f32 %v3436_v36, %v3267_v4  ;;  %v3270_v19 = vpop.f32.mrf.mxu1  ;;  %v19285_v29 = vld [vmem:[#allocation86_spill] sm:$0xff]  ;;  %4336 = vperm.xlu1 %12375, %v4046_v61  }
 0x776   :  { %v4553_v38 = vmax.f32 %v4425_v42, 0.0 }
 0x777   :  { %v3767_v34 = vpop.f32.mrf.mxu2 }
 0x778   :  { %v4655_v45 = vpack.c.bf16 %v4553_v38, %v4552_v14  ;;  %v3768_v8 = vadd.f32 %v3767_v34, %v3598_v15  ;;  %3309 = vmatmul.bf16.gmra.mxu1 %v19285_v29  ;;  %v3600_v4 = vpop.f32.mrf.mxu0  ;;  %v4192_v14 = vpop.permute.xlu1 %4191  ;;  %v4035_v15 = vld [vmem:[%s17774_s2 + $0x168] sm:$0xff] }
 0x779   :  { %9721 = vmatmul.msk.bf16.gmra.mxu3 %vm481_vm0, %v19287_v20  ;;  %4281 = vperm.xlu2 %12376, %v4035_v15   ;;  %v4038_v15 = vld [vmem:[%s17774_s2 + $0x180] sm:$0xff] }
 0x77a   :  { %v6317_v42 = vunpack.c.l.b16 %v4655_v45  ;;  %v6318_v36 = vunpack.c.h.b16 %v4655_v45  ;;  %v3915_v54 = vmax.f32 %v19288_v46, %v3768_v8  ;;  %v19291_v46 = vld [vmem:[#allocation52_spill] sm:$0xff] }
 0x77c   :  { %v16012_v38 = vpack.c.b16 %v6318_v36, %v6316_v1  ;;  %v4427_v0 = vadd.f32 %v15939_v10, %v3915_v54  ;;  %v3439_v56 = vpop.f32.mrf.mxu3  ;;  %v16015_v34 = vpack.c.b16 %v6317_v42, %v6315_v6  ;;  %v4053_v1 = vld [vmem:[%s17774_s2 + $0x1f8] sm:$0xff]  ;;  %v19292_v54 = vmax.f32 %v19274_v58, %v15941_v23  ;;  %v12022_v42 = vld [vmem:[%s17775_s3 + $0x10] sm:$0xff] }
 0x77d   :  { %v16017_v61 = vadd.f32 %v3439_v56, %v3270_v19  ;;  %v3272_v30 = vpop.f32.mrf.mxu1  ;;  %4371 = vperm.xlu1 %12375, %v4053_v1   ;;  %v19293_v6 = vld [vmem:[#allocation197_spill] sm:$0xff]  ;;  %4937 = vmatpush.bf16.msra.mxu0 %v12022_v42 }
 0x77e   :  { %19289 = vst [vmem:[#allocation109_spill] sm:$0xff] %v16012_v38  ;;  %v4555_v39 = vmax.f32 %v4427_v0, 0.0  ;;  %v4428_v19 = vadd.f32 %v4192_v14, %v19292_v54 }
 0x77f   :  { %19290 = vst [vmem:[#allocation235_spill] sm:$0xff] %v16015_v34  ;;  %v3769_v8 = vpop.f32.mrf.mxu2 }
 0x780   :  { %v4656_v36 = vpack.c.bf16 %v4555_v39, %v4554_v44  ;;  %v3770_v38 = vadd.f32 %v3769_v8, %v3600_v4  ;;  %v3603_v10 = vpop.f32.mrf.mxu0  ;;  %v16037_v0 = vpop.permute.xlu1 %4206  ;;  %v19294_v44 = vld [vmem:[#allocation45_spill] sm:$0xff] }
 0x781   :  { %4296 = vperm.xlu2 %12376, %v4038_v15  }
 0x782   :  { %v3917_v2 = vmax.f32 %v19293_v6, %v3770_v38  ;;  %v4197_v38 = vpop.permute.xlu0 %4196 }
 0x783   :  { %3642 = vmatmul.bf16.gmra.mxu0 %v19275_v40  ;;  %v4556_v40 = vmax.f32 %v4428_v19, 0.0  ;;  %v6449_v19 = vunpack.c.h.b16 %v4656_v36 }
 0x784   :  { %v4429_v39 = vadd.f32 %v4192_v14, %v3917_v2  ;;  %v3441_v4 = vpop.f32.mrf.mxu3  ;;  %9752 = vmatmul.msk.bf16.gmra.mxu2 %vm481_vm0, %v19277_v3  ;;  %v19295_v3 = vmax.f32 %v19281_v18, %v15965_v57  ;;  %v6448_v2 = vunpack.c.l.b16 %v4656_v36 }
 0x785   :  { %v16039_v23 = vadd.f32 %v3441_v4, %v3272_v30  ;;  %v3275_v58 = vpop.f32.mrf.mxu1  ;;  %v19296_v4 = vld [vmem:[#allocation83_spill] sm:$0xff] }
 0x786   :  { %v4557_v56 = vmax.f32 %v4429_v39, 0.0  ;;  %v4430_v30 = vadd.f32 %v4197_v38, %v19295_v3  ;;  %v19297_v39 = vld [vmem:[#allocation198_spill] sm:$0xff] }
 0x787   :  { %v3772_v1 = vpop.f32.mrf.mxu2 }
 0x788   :  { %v4657_v54 = vpack.c.bf16 %v4557_v56, %v4556_v40  ;;  %v3773_v14 = vadd.f32 %v3772_v1, %v3603_v10  ;;  %3314 = vmatmul.bf16.gmra.mxu1 %v18908_v24  ;;  %v3605_v6 = vpop.f32.mrf.mxu0  ;;  %v4045_v10 = vld [vmem:[%s17774_s2 + $0x1b8] sm:$0xff]  ;;  %v4558_v3 = vmax.f32 %v4430_v30, 0.0  ;;  %v4202_v36 = vpop.permute.xlu1 %4201 }
 0x789   :  { %9722 = vmatmul.msk.bf16.gmra.mxu3 %vm481_vm0, %v19296_v4  ;;  %4331 = vperm.xlu2 %12376, %v4045_v10  }
 0x78a   :  { %v6450_v42 = vunpack.c.l.b16 %v4657_v54  ;;  %v6451_v15 = vunpack.c.h.b16 %v4657_v54  ;;  %v3919_v45 = vmax.f32 %v19297_v39, %v3773_v14  ;;  %v19300_v54 = vld [vmem:[#allocation55_spill] sm:$0xff] }
 0x78c   :  { %v16053_v40 = vpack.c.b16 %v6451_v15, %v6449_v19  ;;  %v4431_v56 = vadd.f32 %v4197_v38, %v3919_v45  ;;  %v3444_v1 = vpop.f32.mrf.mxu3  ;;  %v16055_v8 = vpack.c.b16 %v6450_v42, %v6448_v2  ;;  %v19301_v45 = vmax.f32 %v19284_v11, %v15994_v55  ;;  %v19302_v2 = vld [vmem:[#allocation199_spill] sm:$0xff]  ;;  %v19303_v55 = vld [vmem:[#allocation48_spill] sm:$0xff] }
 0x78d   :  { %v16057_v57 = vadd.f32 %v3444_v1, %v3275_v58  ;;  %v3277_v18 = vpop.f32.mrf.mxu1  ;;  %v4048_v58 = vld [vmem:[%s17774_s2 + $0x1d0] sm:$0xff]  ;;  %v19304_v1 = vld [vmem:[#allocation98_spill] sm:$0xff] }
 0x78e   :  { %19298 = vst [vmem:[#allocation102_spill] sm:$0xff] %v16053_v40  ;;  %v4559_v34 = vmax.f32 %v4431_v56, 0.0  ;;  %v4432_v38 = vadd.f32 %v4202_v36, %v19301_v45 }
 0x78f   :  { %19299 = vst [vmem:[#allocation236_spill] sm:$0xff] %v16055_v8  ;;  %v3774_v39 = vpop.f32.mrf.mxu2 }
 0x790   :  { %v4658_v49 = vpack.c.bf16 %v4559_v34, %v4558_v3  ;;  %v3775_v25 = vadd.f32 %v3774_v39, %v3605_v6  ;;  %v3608_v48 = vpop.f32.mrf.mxu0  ;;  %v4560_v15 = vmax.f32 %v4432_v38, 0.0  ;;  %v19306_v39 = vld [vmem:[#allocation89_spill] sm:$0xff] }
 0x791   :  { %4346 = vperm.xlu2 %12376, %v4048_v58  }
 0x792   :  { %v3921_v19 = vmax.f32 %v19302_v2, %v3775_v25  ;;  %v6582_v45 = vunpack.c.h.b16 %v4658_v49 }
 0x793   :  { %3647 = vmatmul.bf16.gmra.mxu0 %v19285_v29 }
 0x794   :  { %v4433_v30 = vadd.f32 %v4202_v36, %v3921_v19  ;;  %v3446_v42 = vpop.f32.mrf.mxu3  ;;  %9753 = vmatmul.msk.bf16.gmra.mxu2 %vm481_vm0, %v19287_v20  ;;  %v19305_v36 = vmax.f32 %v19291_v46, %v16017_v61  ;;  %v19307_v19 = vld [vmem:[#allocation200_spill] sm:$0xff] }
 0x795   :  { %v16071_v34 = vadd.f32 %v3446_v42, %v3277_v18  ;;  %v3280_v6 = vpop.f32.mrf.mxu1  ;;  %v6581_v18 = vunpack.c.l.b16 %v4658_v49 }
 0x796   :  { %v4561_v10 = vmax.f32 %v4433_v30, 0.0  ;;  %v4434_v20 = vadd.f32 %v16037_v0, %v19305_v36  ;;  %v4212_v30 = vpop.permute.xlu2 %4211 }
 0x797   :  { %v3777_v11 = vpop.f32.mrf.mxu2 }
 0x798   :  { %v4659_v29 = vpack.c.bf16 %v4561_v10, %v4560_v15  ;;  %v3778_v56 = vadd.f32 %v3777_v11, %v3608_v48  ;;  %3319 = vmatmul.bf16.gmra.mxu1 %v19304_v1  ;;  %v3610_v3 = vpop.f32.mrf.mxu0  ;;  %v4047_v48 = vld [vmem:[%s17774_s2 + $0x1c8] sm:$0xff]  ;;  %v4562_v49 = vmax.f32 %v4434_v20, 0.0 }
 0x799   :  { %9723 = vmatmul.msk.bf16.gmra.mxu3 %vm481_vm0, %v19306_v39  ;;  %4341 = vperm.xlu2 %12376, %v4047_v48  }
 0x79a   :  { %v6583_v38 = vunpack.c.l.b16 %v4659_v29  ;;  %v6584_v2 = vunpack.c.h.b16 %v4659_v29  ;;  %v3923_v58 = vmax.f32 %v19307_v19, %v3778_v56  ;;  %v19310_v29 = vld [vmem:[#allocation58_spill] sm:$0xff] }
 0x79c   :  { %v16086_v42 = vpack.c.b16 %v6584_v2, %v6582_v45  ;;  %v4435_v61 = vadd.f32 %v16037_v0, %v3923_v58  ;;  %v3449_v46 = vpop.f32.mrf.mxu3  ;;  %v16089_v15 = vpack.c.b16 %v6583_v38, %v6581_v18  ;;  %v19311_v45 = vmax.f32 %v19294_v44, %v16039_v23  ;;  %v19312_v2 = vld [vmem:[#allocation201_spill] sm:$0xff]  ;;  %v4217_v44 = vpop.permute.xlu1 %4216 }
 0x79d   :  { %v16091_v10 = vadd.f32 %v3449_v46, %v3280_v6  ;;  %v3282_v11 = vpop.f32.mrf.mxu1  ;;  %v4050_v6 = vld [vmem:[%s17774_s2 + $0x1e0] sm:$0xff] }
 0x79e   :  { %19308 = vst [vmem:[#allocation112_spill] sm:$0xff] %v16086_v42  ;;  %v4563_v36 = vmax.f32 %v4435_v61, 0.0  ;;  %v4436_v0 = vadd.f32 %v4212_v30, %v19311_v45  ;;  %v16105_v58 = vpop.permute.xlu2 %4226 }
 0x79f   :  { %19309 = vst [vmem:[#allocation110_spill] sm:$0xff] %v16089_v15  ;;  %v3779_v19 = vpop.f32.mrf.mxu2  ;;  %v19318_v15 = vld [vmem:[#allocation61_spill] sm:$0xff] }
 0x7a0   :  { %v4660_v25 = vpack.c.bf16 %v4563_v36, %v4562_v49  ;;  %v3780_v14 = vadd.f32 %v3779_v19, %v3610_v3  ;;  %v3613_v40 = vpop.f32.mrf.mxu0  ;;  %v4564_v23 = vmax.f32 %v4436_v0, 0.0 }
 0x7a1   :  { %4356 = vperm.xlu2 %12376, %v4050_v6  }
 0x7a2   :  { %v3925_v18 = vmax.f32 %v19312_v2, %v3780_v14  ;;  %v19316_v2 = vld [vmem:[#allocation95_spill] sm:$0xff]  ;;  %v6715_v0 = vunpack.c.h.b16 %v4660_v25 }
 0x7a3   :  { %3652 = vmatmul.bf16.gmra.mxu0 %v18908_v24  ;;  %v19313_v24 = vld [vmem:[#allocation51_spill] sm:$0xff] }
 0x7a4   :  { %v4437_v20 = vadd.f32 %v4212_v30, %v3925_v18  ;;  %v3451_v38 = vpop.f32.mrf.mxu3  ;;  %9754 = vmatmul.msk.bf16.gmra.mxu2 %vm481_vm0, %v19296_v4  ;;  %v19314_v30 = vld [vmem:[#allocation104_spill] sm:$0xff]  ;;  %v19315_v4 = vmax.f32 %v19300_v54, %v16057_v57 }
 0x7a5   :  { %v16107_v3 = vadd.f32 %v3451_v38, %v3282_v11  ;;  %v3285_v48 = vpop.f32.mrf.mxu1  ;;  %v6714_v11 = vunpack.c.l.b16 %v4660_v25 }
 0x7a6   :  { %v4565_v61 = vmax.f32 %v4437_v20, 0.0  ;;  %v4438_v45 = vadd.f32 %v4217_v44, %v19315_v4  ;;  %v19317_v20 = vld [vmem:[#allocation202_spill] sm:$0xff]  ;;  %v4222_v4 = vpop.permute.xlu2 %4221 }
 0x7a7   :  { %v3782_v46 = vpop.f32.mrf.mxu2 }
 0x7a8   :  { %v4661_v49 = vpack.c.bf16 %v4565_v61, %v4564_v23  ;;  %v3783_v36 = vadd.f32 %v3782_v46, %v3613_v40  ;;  %3324 = vmatmul.bf16.gmra.mxu1 %v19314_v30  ;;  %v3615_v19 = vpop.f32.mrf.mxu0  ;;  %v4566_v57 = vmax.f32 %v4438_v45, 0.0  ;;  %v12032_v45 = vld [vmem:[%s17775_s3 + $0x60] sm:$0xff] }
 0x7a9   :  { %9724 = vmatmul.msk.bf16.gmra.mxu3 %vm481_vm0, %v19316_v2  ;;  %4830 = vmatpush.bf16.msra.mxu1 %v12032_v45 }
 0x7aa   :  { %v6716_v18 = vunpack.c.l.b16 %v4661_v49  ;;  %v6717_v6 = vunpack.c.h.b16 %v4661_v49  ;;  %v3927_v38 = vmax.f32 %v19317_v20, %v3783_v36  ;;  %v19319_v36 = vmax.f32 %v19303_v55, %v16071_v34 }
 0x7ac   :  { %v16118_v14 = vpack.c.b16 %v6717_v6, %v6715_v0  ;;  %v4439_v23 = vadd.f32 %v4217_v44, %v3927_v38  ;;  %v3454_v40 = vpop.f32.mrf.mxu3  ;;  %v16120_v61 = vpack.c.b16 %v6716_v18, %v6714_v11  ;;  %v4440_v44 = vadd.f32 %v4222_v4, %v19319_v36  ;;  %v19320_v0 = vld [vmem:[#allocation203_spill] sm:$0xff]  ;;  %v19321_v38 = vld [vmem:[#allocation54_spill] sm:$0xff] }
 0x7ad   :  { %v16122_v46 = vadd.f32 %v3454_v40, %v3285_v48  ;;  %v3287_v56 = vpop.f32.mrf.mxu1  ;;  %v12043_v48 = vld [vmem:[%s17775_s3 + $0xb8] sm:$0xff] }
 0x7ae   :  { %v4567_v54 = vmax.f32 %v4439_v23, 0.0  ;;  %5069 = vmatpush.bf16.msra.mxu2 %v12043_v48  ;;  %v4568_v55 = vmax.f32 %v4440_v44, 0.0  ;;  %v4232_v48 = vpop.permute.xlu0 %4231 }
 0x7af   :  { %v3934_v42 = vmax.f32 %v19318_v15, %v16122_v46  ;;  %v3784_v25 = vpop.f32.mrf.mxu2 }
 0x7b0   :  { %v4662_v8 = vpack.c.bf16 %v4567_v54, %v4566_v57  ;;  %v3785_v49 = vadd.f32 %v3784_v25, %v3615_v19  ;;  %v3618_v13 = vpop.f32.mrf.mxu0  ;;  %v19323_v25 = vld [vmem:[#allocation101_spill] sm:$0xff] }
 0x7b2   :  { %v3929_v11 = vmax.f32 %v19320_v0, %v3785_v49  ;;  %v6848_v49 = vunpack.c.h.b16 %v4662_v8  ;;  %v19324_v0 = vld [vmem:[#allocation204_spill] sm:$0xff] }
 0x7b3   :  { %3657 = vmatmul.bf16.gmra.mxu0 %v19304_v1 }
 0x7b4   :  { %v4441_v18 = vadd.f32 %v4222_v4, %v3929_v11  ;;  %v3456_v6 = vpop.f32.mrf.mxu3  ;;  %9755 = vmatmul.msk.bf16.gmra.mxu2 %vm481_vm0, %v19306_v39  ;;  %v19322_v4 = vmax.f32 %v19310_v29, %v16091_v10 }
 0x7b5   :  { %v16139_v19 = vadd.f32 %v3456_v6, %v3287_v56  ;;  %v3290_v34 = vpop.f32.mrf.mxu1  ;;  %v6847_v56 = vunpack.c.l.b16 %v4662_v8 }
 0x7b6   :  { %v4569_v20 = vmax.f32 %v4441_v18, 0.0  ;;  %v4442_v39 = vadd.f32 %v16105_v58, %v19322_v4 }
 0x7b7   :  { %v3787_v1 = vpop.f32.mrf.mxu2 }
 0x7b8   :  { %v4663_v40 = vpack.c.bf16 %v4569_v20, %v4568_v55  ;;  %v3788_v57 = vadd.f32 %v3787_v1, %v3618_v13  ;;  %3329 = vmatmul.bf16.gmra.mxu1 %v18547_v62  ;;  %v3620_v54 = vpop.f32.mrf.mxu0  ;;  %v4570_v55 = vmax.f32 %v4442_v39, 0.0  ;;  %v19325_v1 = vld [vmem:[#allocation64_spill] sm:$0xff] }
 0x7b9   :  { %9725 = vmatmul.msk.bf16.gmra.mxu3 %vm481_vm0, %v19323_v25 }
 0x7ba   :  { %v6849_v36 = vunpack.c.l.b16 %v4663_v40  ;;  %v6850_v44 = vunpack.c.h.b16 %v4663_v40  ;;  %v3931_v11 = vmax.f32 %v19324_v0, %v3788_v57 }
 0x7bc   :  { %v16151_v45 = vpack.c.b16 %v6850_v44, %v6848_v49  ;;  %v4443_v13 = vadd.f32 %v16105_v58, %v3931_v11  ;;  %v3459_v18 = vpop.f32.mrf.mxu3  ;;  %v16154_v6 = vpack.c.b16 %v6849_v36, %v6847_v56  ;;  %v19326_v49 = vmax.f32 %v19313_v24, %v16107_v3  ;;  %v19327_v58 = vld [vmem:[#allocation205_spill] sm:$0xff]  ;;  %v4247_v36 = vpop.permute.xlu0 %4246 }
 0x7bd   :  { %v16156_v10 = vadd.f32 %v3459_v18, %v3290_v34  ;;  %v3292_v29 = vpop.f32.mrf.mxu1  ;;  %v12021_v34 = vld [vmem:[%s17775_s3 + $0x8] sm:$0xff]  ;;  %v4237_v24 = vpop.permute.xlu2 %4236 }
 0x7be   :  { %v4571_v20 = vmax.f32 %v4443_v13, 0.0  ;;  %v4444_v44 = vadd.f32 %v4232_v48, %v19326_v49  ;;  %4938 = vmatpush.bf16.msra.mxu0 %v12021_v34  ;;  %v19329_v49 = vld [vmem:[#allocation206_spill] sm:$0xff] }
 0x7bf   :  { %v3938_v8 = vmax.f32 %v19325_v1, %v16156_v10  ;;  %v3789_v4 = vpop.f32.mrf.mxu2 }
 0x7c0   :  { %v4664_v40 = vpack.c.bf16 %v4571_v20, %v4570_v55  ;;  %v3790_v23 = vadd.f32 %v3789_v4, %v3620_v54  ;;  %v3623_v57 = vpop.f32.mrf.mxu0  ;;  %v4572_v3 = vmax.f32 %v4444_v44, 0.0 }
 0x7c2   :  { %v3933_v0 = vmax.f32 %v19327_v58, %v3790_v23  ;;  %v19328_v23 = vld [vmem:[#allocation57_spill] sm:$0xff]  ;;  %v6981_v20 = vunpack.c.h.b16 %v4664_v40 }
 0x7c3   :  { %3662 = vmatmul.bf16.gmra.mxu0 %v19314_v30 }
 0x7c4   :  { %v4445_v39 = vadd.f32 %v4232_v48, %v3933_v0  ;;  %v3461_v56 = vpop.f32.mrf.mxu3  ;;  %9756 = vmatmul.msk.bf16.gmra.mxu2 %vm481_vm0, %v19316_v2  ;;  %v4446_v2 = vadd.f32 %v4237_v24, %v3934_v42  ;;  %v4242_v46 = vpop.permute.xlu0 %4241 }
 0x7c5   :  { %v16170_v54 = vadd.f32 %v3461_v56, %v3292_v29  ;;  %v3295_v11 = vpop.f32.mrf.mxu1  ;;  %v6980_v29 = vunpack.c.l.b16 %v4664_v40 }
 0x7c6   :  { %v4573_v13 = vmax.f32 %v4445_v39, 0.0  ;;  %v4574_v15 = vmax.f32 %v4446_v2, 0.0 }
 0x7c7   :  { %v3792_v18 = vpop.f32.mrf.mxu2 }
 0x7c8   :  { %v4665_v10 = vpack.c.bf16 %v4573_v13, %v4572_v3  ;;  %v3793_v55 = vadd.f32 %v3792_v18, %v3623_v57  ;;  %3334 = vmatmul.bf16.gmra.mxu1 %v18979_v27  ;;  %v3625_v48 = vpop.f32.mrf.mxu0  ;;  %v19330_v3 = vld [vmem:[#allocation67_spill] sm:$0xff] }
 0x7c9   :  { %9726 = vmatmul.msk.bf16.gmra.mxu3 %vm481_vm0, %v18980_v47 }
 0x7ca   :  { %v6982_v1 = vunpack.c.l.b16 %v4665_v10  ;;  %v6983_v4 = vunpack.c.h.b16 %v4665_v10  ;;  %v3935_v44 = vmax.f32 %v19329_v49, %v3793_v55  ;;  %v19331_v55 = vmax.f32 %v19321_v38, %v16139_v19 }
 0x7cc   :  { %v16181_v58 = vpack.c.b16 %v6983_v4, %v6981_v20  ;;  %v4447_v0 = vadd.f32 %v4237_v24, %v3935_v44  ;;  %v3464_v57 = vpop.f32.mrf.mxu3  ;;  %v16183_v34 = vpack.c.b16 %v6982_v1, %v6980_v29  ;;  %v4448_v24 = vadd.f32 %v4242_v46, %v19331_v55  ;;  %v19332_v20 = vld [vmem:[#allocation207_spill] sm:$0xff]  ;;  %v9871_v55 = vld [vmem:[%s17775_s3 + $0x50] sm:$0xf] }
 0x7cd   :  { %v16185_v39 = vadd.f32 %v3464_v57, %v3295_v11  ;;  %v3297_v56 = vpop.f32.mrf.mxu1 }
 0x7ce   :  { %v4575_v42 = vmax.f32 %v4447_v0, 0.0  ;;  %v4576_v49 = vmax.f32 %v4448_v24, 0.0 }
 0x7cf   :  { %v3942_v13 = vmax.f32 %v19330_v3, %v16185_v39  ;;  %v3794_v40 = vpop.f32.mrf.mxu2  ;;  %v12020_v3 = vld [vmem:[%s17775_s3] sm:$0xff] }
 0x7d0   :  { %v4666_v18 = vpack.c.bf16 %v4575_v42, %v4574_v15  ;;  %v3795_v10 = vadd.f32 %v3794_v40, %v3625_v48  ;;  %v3628_v30 = vpop.f32.mrf.mxu0  ;;  %v19333_v48 = vld [vmem:[#allocation60_spill] sm:$0xff]  ;;  %4939 = vmatpush.bf16.msra.mxu0 %v12020_v3  ;;  %v19339_v3 = vld [vmem:[#allocation63_spill] sm:$0xff] }
 0x7d2   :  { %v3937_v29 = vmax.f32 %v19332_v20, %v3795_v10  ;;  %v7113_v42 = vunpack.c.l.b16 %v4666_v18  ;;  %v4252_v10 = vpop.permute.xlu1 %4251 }
 0x7d3   :  { %3667 = vmatmul.bf16.gmra.mxu0 %v18547_v62  ;;  %v4450_v62 = vadd.f32 %v4247_v36, %v3938_v8 }
 0x7d4   :  { %v4449_v11 = vadd.f32 %v4242_v46, %v3937_v29  ;;  %v3466_v1 = vpop.f32.mrf.mxu3  ;;  %9757 = vmatmul.msk.bf16.gmra.mxu2 %vm481_vm0, %v19323_v25  ;;  %v7114_v25 = vunpack.c.h.b16 %v4666_v18 }
 0x7d5   :  { %v16196_v2 = vadd.f32 %v3466_v1, %v3297_v56  ;;  %v3300_v4 = vpop.f32.mrf.mxu1 }
 0x7d6   :  { %v4577_v44 = vmax.f32 %v4449_v11, 0.0 }
 0x7d7   :  { %v3944_v0 = vmax.f32 %v19333_v48, %v16196_v2  ;;  %v3797_v57 = vpop.f32.mrf.mxu2  ;;  %v12069_v2 = vld [vmem:[%s17775_s3 + $0x188] sm:$0xff] }
 0x7d8   :  { %v4667_v19 = vpack.c.bf16 %v4577_v44, %v4576_v49  ;;  %v3798_v38 = vadd.f32 %v3797_v57, %v3628_v30  ;;  %3339 = vmatmul.bf16.gmra.mxu1 %v18567_v52  ;;  %v3630_v15 = vpop.f32.mrf.mxu0  ;;  %v12030_v30 = vld [vmem:[%s17775_s3 + $0x50] sm:$0x10]  ;;  %v4578_v49 = vmax.f32 %v4450_v62, 0.0  ;;  %v12029_v62 = vld [vmem:[%s17775_s3 + $0x48] sm:$0xff] }
 0x7d9   :  { %9727 = vmatmul.msk.bf16.gmra.mxu3 %vm481_vm0, %v18997_v53  ;;  %v9872_v29 = vor.u32 %v12030_v30, %v9871_v55 }
 0x7da   :  { %v7115_v56 = vunpack.c.l.b16 %v4667_v19  ;;  %v7116_v46 = vunpack.c.h.b16 %v4667_v19  ;;  %v3939_v40 = vmax.f32 %v15071_v35, %v3798_v38  ;;  %v12031_v35 = vld [vmem:[%s17775_s3 + $0x58] sm:$0xff] }
 0x7db   :  { %v4930_v57 = vand.u32 %v9872_v29, %v15216_v12  ;;  %4831 = vmatpush.bf16.msra.mxu1 %v12031_v35 }
 0x7dc   :  { %v16210_v24 = vpack.c.b16 %v7116_v46, %v7114_v25  ;;  %v4451_v8 = vadd.f32 %v4247_v36, %v3939_v40  ;;  %v3469_v20 = vpop.f32.mrf.mxu3  ;;  %v16212_v11 = vpack.c.b16 %v7115_v56, %v7113_v42  ;;  %v9938_v40 = vld [vmem:[%s17775_s3 + $0x100] sm:$0xf] }
 0x7dd   :  { %v16214_v18 = vadd.f32 %v3469_v20, %v3300_v4  ;;  %v3302_v1 = vpop.f32.mrf.mxu1  ;;  %v19334_v4 = vmax.f32 %v19328_v23, %v16170_v54 }
 0x7de   :  { %v4579_v44 = vmax.f32 %v4451_v8, 0.0 }
 0x7df   :  { %v3946_v19 = vmax.f32 %v15076_v43, %v16214_v18  ;;  %v3799_v38 = vpop.f32.mrf.mxu2  ;;  %4951 = vmatpush.bf16.msrb.mxu1 %v4930_v57  ;;  %v4452_v56 = vadd.f32 %v4252_v10, %v19334_v4  ;;  %v19335_v4 = vld [vmem:[#allocation119_spill] sm:$0xff] }
 0x7e0   :  { %v4668_v36 = vpack.c.bf16 %v4579_v44, %v4578_v49  ;;  %v3800_v25 = vadd.f32 %v3799_v38, %v3630_v15  ;;  %v3633_v42 = vpop.f32.mrf.mxu0  ;;  %v12052_v15 = vld [vmem:[%s17775_s3 + $0x100] sm:$0x10] }
 0x7e1   :  { %v9939_v55 = vor.u32 %v12052_v15, %v9938_v40  ;;  %v4580_v29 = vmax.f32 %v4452_v56, 0.0  ;;  %v12051_v56 = vld [vmem:[%s17775_s3 + $0xf8] sm:$0xff] }
 0x7e2   :  { %v3941_v46 = vmax.f32 %v15081_v50, %v3800_v25  ;;  %v16238_v50 = vpop.permute.xlu1 %4266  ;;  %v7246_v25 = vunpack.c.l.b16 %v4668_v36 }
 0x7e3   :  { %3672 = vmatmul.bf16.gmra.mxu0 %v18979_v27  ;;  %4952 = vmatpush.bf16.msrb.mxu1 %v12029_v62  ;;  %v5061_v20 = vand.u32 %v9939_v55, %v15216_v12  ;;  %v12028_v27 = vld [vmem:[%s17775_s3 + $0x40] sm:$0xff] }
 0x7e4   :  { %v4453_v30 = vadd.f32 %v4252_v10, %v3941_v46  ;;  %v3471_v54 = vpop.f32.mrf.mxu3  ;;  %9758 = vmatmul.msk.bf16.gmra.mxu2 %vm481_vm0, %v18980_v47  ;;  %v4257_v47 = vpop.permute.xlu0 %4256  ;;  %v7247_v46 = vunpack.c.h.b16 %v4668_v36  ;;  %v12050_v36 = vld [vmem:[%s17775_s3 + $0xf0] sm:$0xff] }
 0x7e5   :  { %v16240_v23 = vadd.f32 %v3471_v54, %v3302_v1  ;;  %v3305_v8 = vpop.f32.mrf.mxu1  ;;  %5082 = vmatpush.bf16.msrb.mxu3 %v5061_v20  ;;  %v4454_v38 = vadd.f32 %v4257_v47, %v3942_v13 }
 0x7e6   :  { %v4581_v35 = vmax.f32 %v4453_v30, 0.0 }
 0x7e7   :  { %v3948_v10 = vmax.f32 %v15095_v59, %v16240_v23  ;;  %v3802_v49 = vpop.f32.mrf.mxu2  ;;  %4953 = vmatpush.bf16.msrb.mxu1 %v12028_v27  ;;  %v12060_v23 = vld [vmem:[%s17775_s3 + $0x140] sm:$0xff] }
 0x7e8   :  { %v4669_v44 = vpack.c.bf16 %v4581_v35, %v4580_v29  ;;  %v3803_v57 = vadd.f32 %v3802_v49, %v3633_v42  ;;  %3344 = vmatmul.bf16.gmra.mxu1 %v13490_v22  ;;  %v3635_v1 = vpop.f32.mrf.mxu0  ;;  %v19336_v42 = vld [vmem:[#allocation208_spill] sm:$0xff]  ;;  %v12071_v29 = vld [vmem:[%s17775_s3 + $0x198] sm:$0xff]  ;;  %v4582_v35 = vmax.f32 %v4454_v38, 0.0 }
 0x7e9   :  { %9728 = vmatmul.msk.bf16.gmra.mxu3 %vm481_vm0, %v19335_v4  ;;  %5329 = vmatpush.bf16.msrb.mxu0 %v12071_v29 }
 0x7ea   :  { %v7248_v62 = vunpack.c.l.b16 %v4669_v44  ;;  %v7249_v40 = vunpack.c.h.b16 %v4669_v44  ;;  %v3943_v15 = vmax.f32 %v19336_v42, %v3803_v57  ;;  %5083 = vmatpush.bf16.msrb.mxu3 %v12051_v56  ;;  %v4262_v49 = vpop.permute.xlu1 %4261  ;;  %v12042_v42 = vld [vmem:[%s17775_s3 + $0xb0] sm:$0xff] }
 0x7eb   :  { %v4456_v38 = vadd.f32 %v4262_v49, %v3944_v0  ;;  %5070 = vmatpush.bf16.msra.mxu2 %v12042_v42 }
 0x7ec   :  { %v16258_v55 = vpack.c.b16 %v7249_v40, %v7247_v46  ;;  %v4455_v30 = vadd.f32 %v4257_v47, %v3943_v15  ;;  %v3474_v39 = vpop.f32.mrf.mxu3  ;;  %v16263_v13 = vpack.c.b16 %v7248_v62, %v7246_v25  ;;  %v19337_v47 = vld [vmem:[#allocation70_spill] sm:$0xff]  ;;  %v12070_v46 = vld [vmem:[%s17775_s3 + $0x190] sm:$0xff]  ;;  %v19338_v62 = vld [vmem:[#allocation209_spill] sm:$0xff] }
 0x7ed   :  { %v16265_v54 = vadd.f32 %v3474_v39, %v3305_v8  ;;  %v3307_v20 = vpop.f32.mrf.mxu1  ;;  %5330 = vmatpush.bf16.msrb.mxu0 %v12070_v46  ;;  %v4584_v48 = vmax.f32 %v4456_v38, 0.0  ;;  %v19340_v46 = vld [vmem:[#allocation210_spill] sm:$0xff] }
 0x7ee   :  { %v4583_v27 = vmax.f32 %v4455_v30, 0.0  ;;  %5084 = vmatpush.bf16.msrb.mxu3 %v12050_v36 }
 0x7ef   :  { %v3950_v44 = vmax.f32 %v19337_v47, %v16265_v54  ;;  %v3804_v57 = vpop.f32.mrf.mxu2  ;;  %v12062_v54 = vld [vmem:[%s17775_s3 + $0x150] sm:$0xff]  ;;  %v12072_v47 = vld [vmem:[%s17775_s3 + $0x1a0] sm:$0xff] }
 0x7f0   :  { %v4670_v8 = vpack.c.bf16 %v4583_v27, %v4582_v35  ;;  %v3805_v25 = vadd.f32 %v3804_v57, %v3635_v1  ;;  %v3638_v56 = vpop.f32.mrf.mxu0 }
 0x7f1   :  { %5331 = vmatpush.bf16.msrb.mxu0 %v12069_v2  ;;  %v10005_v2 = vld [vmem:[%s17775_s3 + $0x158] sm:$0xf] }
 0x7f2   :  { %v3945_v40 = vmax.f32 %v19338_v62, %v3805_v25  ;;  %v7379_v27 = vunpack.c.l.b16 %v4670_v8 }
 0x7f3   :  { %3677 = vmatmul.bf16.gmra.mxu0 %v18567_v52 }
 0x7f4   :  { %v4457_v15 = vadd.f32 %v4262_v49, %v3945_v40  ;;  %v3476_v30 = vpop.f32.mrf.mxu3  ;;  %9759 = vmatmul.msk.bf16.gmra.mxu2 %vm481_vm0, %v18997_v53  ;;  %v7380_v49 = vunpack.c.h.b16 %v4670_v8 }
 0x7f5   :  { %v16288_v1 = vadd.f32 %v3476_v30, %v3307_v20  ;;  %v3310_v39 = vpop.f32.mrf.mxu1  ;;  %v4458_v20 = vadd.f32 %v16238_v50, %v3946_v19  ;;  %v4272_v19 = vpop.permute.xlu2 %4271 }
 0x7f6   :  { %v4585_v0 = vmax.f32 %v4457_v15, 0.0 }
 0x7f7   :  { %v3952_v36 = vmax.f32 %v19339_v3, %v16288_v1  ;;  %v3807_v52 = vpop.f32.mrf.mxu2  ;;  %v4586_v15 = vmax.f32 %v4458_v20, 0.0 }
 0x7f8   :  { %v4671_v29 = vpack.c.bf16 %v4585_v0, %v4584_v48  ;;  %v3808_v35 = vadd.f32 %v3807_v52, %v3638_v56  ;;  %3349 = vmatmul.bf16.gmra.mxu1 %v18586_v51  ;;  %v3640_v53 = vpop.f32.mrf.mxu0  ;;  %v12068_v56 = vld [vmem:[%s17775_s3 + $0x180] sm:$0xff]  ;;  %v12067_v48 = vld [vmem:[%s17775_s3 + $0x178] sm:$0xff] }
 0x7f9   :  { %9729 = vmatmul.msk.bf16.gmra.mxu3 %vm481_vm0, %v18587_v60  ;;  %5332 = vmatpush.bf16.msrb.mxu0 %v12068_v56 }
 0x7fa   :  { %v7381_v57 = vunpack.c.l.b16 %v4671_v29  ;;  %v7382_v25 = vunpack.c.h.b16 %v4671_v29  ;;  %v3947_v38 = vmax.f32 %v19340_v46, %v3808_v35  ;;  %v10072_v29 = vld [vmem:[%s17775_s3 + $0x1b0] sm:$0xf]  ;;  %v12074_v35 = vld [vmem:[%s17775_s3 + $0x1b0] sm:$0x10]  ;;  %v19342_v46 = vld [vmem:[#allocation211_spill] sm:$0xff] }
 0x7fc   :  { %v16306_v62 = vpack.c.b16 %v7382_v25, %v7380_v49  ;;  %v4459_v40 = vadd.f32 %v16238_v50, %v3947_v38  ;;  %v3479_v43 = vpop.f32.mrf.mxu3  ;;  %v16309_v18 = vpack.c.b16 %v7381_v57, %v7379_v27  ;;  %v19341_v50 = vld [vmem:[#allocation73_spill] sm:$0xff]  ;;  %v10073_v57 = vor.u32 %v12074_v35, %v10072_v29  ;;  %v4277_v29 = vpop.permute.xlu1 %4276 }
 0x7fd   :  { %v16311_v42 = vadd.f32 %v3479_v43, %v3310_v39  ;;  %v3312_v8 = vpop.f32.mrf.mxu1  ;;  %v12063_v39 = vld [vmem:[%s17775_s3 + $0x158] sm:$0x10]  ;;  %5333 = vmatpush.bf16.msrb.mxu0 %v12067_v48  ;;  %v4460_v25 = vadd.f32 %v4272_v19, %v3948_v10 }
 0x7fe   :  { %v4587_v30 = vmax.f32 %v4459_v40, 0.0  ;;  %v10006_v56 = vor.u32 %v12063_v39, %v10005_v2  ;;  %v12066_v40 = vld [vmem:[%s17775_s3 + $0x170] sm:$0xff]  ;;  %v5327_v43 = vand.u32 %v10073_v57, %v15216_v12 }
 0x7ff   :  { %v3954_v0 = vmax.f32 %v19341_v50, %v16311_v42  ;;  %v3809_v52 = vpop.f32.mrf.mxu2  ;;  %v4588_v10 = vmax.f32 %v4460_v25, 0.0  ;;  %v4462_v25 = vadd.f32 %v4277_v29, %v3950_v44 }
 0x800   :  { %v4672_v20 = vpack.c.bf16 %v4587_v30, %v4586_v15  ;;  %v3810_v27 = vadd.f32 %v3809_v52, %v3640_v53  ;;  %v3643_v49 = vpop.f32.mrf.mxu0  ;;  %5348 = vmatpush.bf16.msrb.mxu2 %v5327_v43  ;;  %v5194_v48 = vand.u32 %v10006_v56, %v15216_v12 }
 0x801   :  { %5334 = vmatpush.bf16.msrb.mxu0 %v12066_v40 }
 0x802   :  { %v3949_v38 = vmax.f32 %v19342_v46, %v3810_v27  ;;  %v7512_v46 = vunpack.c.l.b16 %v4672_v20  ;;  %v7513_v56 = vunpack.c.h.b16 %v4672_v20 }
 0x803   :  { %3682 = vmatmul.bf16.gmra.mxu0 %v13490_v22  ;;  %v12065_v22 = vld [vmem:[%s17775_s3 + $0x168] sm:$0xff] }
 0x804   :  { %v4461_v15 = vadd.f32 %v4272_v19, %v3949_v38  ;;  %v3481_v53 = vpop.f32.mrf.mxu3  ;;  %9760 = vmatmul.msk.bf16.gmra.mxu2 %vm481_vm0, %v19335_v4  ;;  %v12073_v4 = vld [vmem:[%s17775_s3 + $0x1a8] sm:$0xff]  ;;  %v16353_v19 = vpop.permute.xlu2 %4286  ;;  %v12059_v38 = vld [vmem:[%s17775_s3 + $0x138] sm:$0xff] }
 0x805   :  { %v16341_v30 = vadd.f32 %v3481_v53, %v3312_v8  ;;  %v3315_v59 = vpop.f32.mrf.mxu1  ;;  %v19343_v8 = vld [vmem:[#allocation66_spill] sm:$0xff]  ;;  %5335 = vmatpush.bf16.msrb.mxu0 %v12065_v22  ;;  %5349 = vmatpush.bf16.msrb.mxu2 %v12073_v4  ;;  %v19344_v22 = vld [vmem:[#allocation212_spill] sm:$0xff] }
 0x806   :  { %v4589_v2 = vmax.f32 %v4461_v15, 0.0 }
 0x807   :  { %v3956_v52 = vmax.f32 %v19343_v8, %v16341_v30  ;;  %v3812_v39 = vpop.f32.mrf.mxu2  ;;  %v12095_v30 = vld [vmem:[%s17775_s3 + $0x258] sm:$0xff] }
 0x808   :  { %v4673_v35 = vpack.c.bf16 %v4589_v2, %v4588_v10  ;;  %v3813_v27 = vadd.f32 %v3812_v39, %v3643_v49  ;;  %4832 = vmatmul.bf16.vlgmr.msra.gmra.mxu1 %v15584_v37  ;;  %v3645_v57 = vpop.f32.mrf.mxu0  ;;  %v4590_v10 = vmax.f32 %v4462_v25, 0.0  ;;  %v12057_v25 = vld [vmem:[%s17775_s3 + $0x128] sm:$0xff] }
 0x809   :  { %9828 = vmatmul.msk.bf16.vlgmr.msra.gmra.mxu3 %vm4813_vm3, %v15579_v28  ;;  %5196 = vmatpush.bf16.msra.mxu1 %v12060_v23  ;;  %v12064_v28 = vld [vmem:[%s17775_s3 + $0x160] sm:$0xff]  ;;  %v12058_v23 = vld [vmem:[%s17775_s3 + $0x130] sm:$0xff] }
 0x80a   :  { %v7514_v40 = vunpack.c.l.b16 %v4673_v35  ;;  %v7515_v49 = vunpack.c.h.b16 %v4673_v35  ;;  %v3951_v37 = vmax.f32 %v15176_v7, %v3813_v27  ;;  %5215 = vmatpush.bf16.msra.mxu3 %v5194_v48  ;;  %5336 = vmatpush.bf16.msrb.mxu0 %v12064_v28  ;;  %v12061_v48 = vld [vmem:[%s17775_s3 + $0x148] sm:$0xff] }
 0x80b   :  { %5350 = vmatpush.bf16.msrb.mxu2 %v12072_v47 }
 0x80c   :  { %v16376_v44 = vpack.c.b16 %v7515_v49, %v7513_v56  ;;  %v4463_v20 = vadd.f32 %v4277_v29, %v3951_v37  ;;  %v3484_v43 = vpop.f32.mrf.mxu3  ;;  %v16378_v7 = vpack.c.b16 %v7514_v40, %v7512_v46  ;;  %v4282_v27 = vpop.permute.xlu2 %4281 }
 0x80d   :  { %v16380_v15 = vadd.f32 %v3484_v43, %v3315_v59  ;;  %5197 = vmatpush.bf16.msra.mxu1 %v12059_v38  ;;  %v3317_v53 = vpop.f32.mrf.mxu1  ;;  %v4464_v46 = vadd.f32 %v4282_v27, %v3952_v36  ;;  %v19345_v38 = vld [vmem:[#allocation76_spill] sm:$0xff] }
 0x80e   :  { %v4591_v2 = vmax.f32 %v4463_v20, 0.0  ;;  %5216 = vmatpush.bf16.msra.mxu3 %v12062_v54  ;;  %v12056_v54 = vld [vmem:[%s17775_s3 + $0x120] sm:$0xff]  ;;  %v12082_v36 = vld [vmem:[%s17775_s3 + $0x1f0] sm:$0xff] }
 0x80f   :  { %v3958_v4 = vmax.f32 %v19344_v22, %v16380_v15  ;;  %v3814_v39 = vpop.f32.mrf.mxu2  ;;  %v4592_v1 = vmax.f32 %v4464_v46, 0.0  ;;  %v12077_v15 = vld [vmem:[%s17775_s3 + $0x1c8] sm:$0xff] }
 0x810   :  { %v4674_v59 = vpack.c.bf16 %v4591_v2, %v4590_v10  ;;  %v3815_v29 = vadd.f32 %v3814_v39, %v3645_v57  ;;  %v3648_v35 = vpop.f32.mrf.mxu0  ;;  %v12055_v10 = vld [vmem:[%s17775_s3 + $0x118] sm:$0xff]  ;;  %v10206_v2 = vld [vmem:[%s17775_s3 + $0x260] sm:$0xf] }
 0x811   :  { %5198 = vmatpush.bf16.msra.mxu1 %v12058_v23 }
 0x812   :  { %v3953_v56 = vmax.f32 %v19345_v38, %v3815_v29  ;;  %5217 = vmatpush.bf16.msra.mxu3 %v12061_v48  ;;  %v7645_v23 = vunpack.c.l.b16 %v4674_v59  ;;  %v7646_v42 = vunpack.c.h.b16 %v4674_v59  ;;  %v19347_v48 = vld [vmem:[#allocation69_spill] sm:$0xff]  ;;  %v10139_v29 = vld [vmem:[%s17775_s3 + $0x208] sm:$0xf] }
 0x813   :  { %3687 = vmatmul.bf16.gmra.mxu0 %v18586_v51  ;;  %v19346_v51 = vld [vmem:[#allocation213_spill] sm:$0xff] }
 0x814   :  { %v4465_v40 = vadd.f32 %v4282_v27, %v3953_v56  ;;  %v3486_v49 = vpop.f32.mrf.mxu3  ;;  %9761 = vmatmul.msk.bf16.gmra.mxu2 %vm481_vm0, %v18587_v60  ;;  %v4292_v56 = vpop.permute.xlu0 %4291 }
 0x815   :  { %v16400_v57 = vadd.f32 %v3486_v49, %v3317_v53  ;;  %5199 = vmatpush.bf16.msra.mxu1 %v12057_v25  ;;  %v3320_v37 = vpop.f32.mrf.mxu1  ;;  %v4466_v53 = vadd.f32 %v16353_v19, %v3954_v0 }
 0x816   :  { %v4593_v3 = vmax.f32 %v4465_v40, 0.0 }
 0x817   :  { %v3960_v28 = vmax.f32 %v19346_v51, %v16400_v57  ;;  %v3817_v47 = vpop.f32.mrf.mxu2  ;;  %v12114_v57 = vld [vmem:[%s17775_s3 + $0x2f0] sm:$0xff] }
 0x818   :  { %v4675_v20 = vpack.c.bf16 %v4593_v3, %v4592_v1  ;;  %v3818_v60 = vadd.f32 %v3817_v47, %v3648_v35  ;;  %9873 = vmatmul.msk.bf16.vlgmr.msrb.gmra.mxu1 %vm4813_vm3, %v15538_v26  ;;  %v3650_v43 = vpop.f32.mrf.mxu0  ;;  %v12096_v26 = vld [vmem:[%s17775_s3 + $0x260] sm:$0x10]  ;;  %v12085_v35 = vld [vmem:[%s17775_s3 + $0x208] sm:$0x10]  ;;  %v4594_v3 = vmax.f32 %v4466_v53, 0.0 }
 0x819   :  { %9940 = vmatmul.msk.bf16.vlgmr.msrb.gmra.mxu3 %vm4813_vm3, %v15615_v32  ;;  %5200 = vmatpush.bf16.msra.mxu1 %v12056_v54  ;;  %v12081_v32 = vld [vmem:[%s17775_s3 + $0x1e8] sm:$0xff]  ;;  %v10207_v46 = vor.u32 %v12096_v26, %v10206_v2  ;;  %v12054_v54 = vld [vmem:[%s17775_s3 + $0x110] sm:$0xff]  ;;  %v10140_v1 = vor.u32 %v12085_v35, %v10139_v29  ;;  %v19348_v47 = vld [vmem:[#allocation214_spill] sm:$0xff] }
 0x81a   :  { %v7647_v50 = vunpack.c.l.b16 %v4675_v20  ;;  %v7648_v0 = vunpack.c.h.b16 %v4675_v20  ;;  %v3955_v39 = vmax.f32 %v19347_v48, %v3818_v60  ;;  %5462 = vmatpush.bf16.msrb.mxu3 %v12082_v36  ;;  %v12053_v53 = vld [vmem:[%s17775_s3 + $0x108] sm:$0xff]  ;;  %v12084_v29 = vld [vmem:[%s17775_s3 + $0x200] sm:$0xff] }
 0x81b   :  { %v5593_v2 = vand.u32 %v10207_v46, %v15216_v12  ;;  %v5460_v26 = vand.u32 %v10140_v1, %v15216_v12  ;;  %v12093_v48 = vld [vmem:[%s17775_s3 + $0x248] sm:$0xff] }
 0x81c   :  { %v16437_v27 = vpack.c.b16 %v7648_v0, %v7646_v42  ;;  %v4467_v59 = vadd.f32 %v16353_v19, %v3955_v39  ;;  %v3489_v25 = vpop.f32.mrf.mxu3  ;;  %v16440_v38 = vpack.c.b16 %v7647_v50, %v7645_v23  ;;  %v12080_v19 = vld [vmem:[%s17775_s3 + $0x1e0] sm:$0xff]  ;;  %v4468_v42 = vadd.f32 %v4292_v56, %v3956_v52  ;;  %v19349_v50 = vld [vmem:[#allocation79_spill] sm:$0xff] }
 0x81d   :  { %v16442_v40 = vadd.f32 %v3489_v25, %v3320_v37  ;;  %5201 = vmatpush.bf16.msra.mxu1 %v12055_v10  ;;  %v3322_v49 = vpop.f32.mrf.mxu1  ;;  %v16483_v25 = vpop.permute.xlu0 %4306  ;;  %v19350_v46 = vld [vmem:[#allocation215_spill] sm:$0xff] }
 0x81e   :  { %v4595_v36 = vmax.f32 %v4467_v59, 0.0  ;;  %5463 = vmatpush.bf16.msrb.mxu3 %v12081_v32  ;;  %v4596_v35 = vmax.f32 %v4468_v42, 0.0  ;;  %v12092_v59 = vld [vmem:[%s17775_s3 + $0x240] sm:$0xff] }
 0x81f   :  { %v3962_v20 = vmax.f32 %v19348_v47, %v16442_v40  ;;  %v3819_v60 = vpop.f32.mrf.mxu2  ;;  %v12087_v40 = vld [vmem:[%s17775_s3 + $0x218] sm:$0xff] }
 0x820   :  { %v4676_v37 = vpack.c.bf16 %v4595_v36, %v4594_v3  ;;  %v3820_v23 = vadd.f32 %v3819_v60, %v3650_v43  ;;  %v3653_v10 = vpop.f32.mrf.mxu0  ;;  %v12079_v43 = vld [vmem:[%s17775_s3 + $0x1d8] sm:$0xff] }
 0x821   :  { %5202 = vmatpush.bf16.msra.mxu1 %v12054_v54  ;;  %v4297_v54 = vpop.permute.xlu2 %4296 }
 0x822   :  { %v3957_v0 = vmax.f32 %v19349_v50, %v3820_v23  ;;  %5464 = vmatpush.bf16.msrb.mxu3 %v12080_v19  ;;  %v12094_v19 = vld [vmem:[%s17775_s3 + $0x250] sm:$0xff]  ;;  %v4470_v60 = vadd.f32 %v4297_v54, %v3958_v4  ;;  %v7778_v23 = vunpack.c.l.b16 %v4676_v37 }
 0x823   :  { %4940 = vmatmul.bf16.vlgmr.msra.gmra.mxu0 %v15541_v21 }
 0x824   :  { %v4469_v39 = vadd.f32 %v4292_v56, %v3957_v0  ;;  %v3491_v32 = vpop.f32.mrf.mxu3  ;;  %5071 = vmatmul.bf16.vlgmr.msra.gmra.mxu2 %v15618_v16  ;;  %5614 = vmatpush.bf16.msra.mxu0 %v5593_v2  ;;  %v12078_v16 = vld [vmem:[%s17775_s3 + $0x1d0] sm:$0xff]  ;;  %v12107_v0 = vld [vmem:[%s17775_s3 + $0x2b8] sm:$0x10] }
 0x825   :  { %v16472_v8 = vadd.f32 %v3491_v32, %v3322_v49  ;;  %5203 = vmatpush.bf16.msra.mxu1 %v12053_v53  ;;  %v3325_v52 = vpop.f32.mrf.mxu1  ;;  %5481 = vmatpush.bf16.msra.mxu2 %v5460_v26  ;;  %v19351_v26 = vld [vmem:[#allocation72_spill] sm:$0xff]  ;;  %v4598_v32 = vmax.f32 %v4470_v60, 0.0 }
 0x826   :  { %v4597_v21 = vmax.f32 %v4469_v39, 0.0  ;;  %5465 = vmatpush.bf16.msrb.mxu3 %v12079_v43 }
 0x827   :  { %v3964_v56 = vmax.f32 %v19350_v46, %v16472_v8  ;;  %v3822_v49 = vpop.f32.mrf.mxu2  ;;  %v19358_v8 = vld [vmem:[#allocation100_spill] sm:$0xff]  ;;  %v12124_v46 = vld [vmem:[%s17775_s3 + $0x340] sm:$0xff] }
 0x828   :  { %v4677_v1 = vpack.c.bf16 %v4597_v21, %v4596_v35  ;;  %v3823_v3 = vadd.f32 %v3822_v49, %v3653_v10  ;;  %5204 = vmatmul.bf16.vlgmr.msra.gmra.mxu1 %v15657_v41  ;;  %v3655_v36 = vpop.f32.mrf.mxu0  ;;  %5615 = vmatpush.bf16.msra.mxu0 %v12095_v30  ;;  %v12083_v10 = vld [vmem:[%s17775_s3 + $0x1f8] sm:$0xff]  ;;  %v7779_v41 = vunpack.c.h.b16 %v4676_v37  ;;  %v12090_v35 = vld [vmem:[%s17775_s3 + $0x230] sm:$0xff] }
 0x829   :  { %5595 = vmatpush.bf16.msrb.mxu1 %v12093_v48  ;;  %10007 = vmatmul.msk.bf16.vlgmr.msra.gmra.mxu3 %vm4813_vm3, %v15654_v33  ;;  %v12091_v33 = vld [vmem:[%s17775_s3 + $0x238] sm:$0xff] }
 0x82a   :  { %5482 = vmatpush.bf16.msra.mxu2 %v12084_v29  ;;  %v7780_v2 = vunpack.c.l.b16 %v4677_v1  ;;  %v7781_v53 = vunpack.c.h.b16 %v4677_v1  ;;  %v3959_v42 = vmax.f32 %v19351_v26, %v3823_v3  ;;  %5466 = vmatpush.bf16.msrb.mxu3 %v12078_v16  ;;  %v10273_v37 = vld [vmem:[%s17775_s3 + $0x2b8] sm:$0xf]  ;;  %v12076_v29 = vld [vmem:[%s17775_s3 + $0x1c0] sm:$0xff]  ;;  %v4302_v3 = vpop.permute.xlu0 %4301 }
 0x82b   :  { %v12115_v1 = vld [vmem:[%s17775_s3 + $0x2f8] sm:$0xff]  ;;  %v4472_v60 = vadd.f32 %v4302_v3, %v3960_v28 }
 0x82c   :  { %v16506_v22 = vpack.c.b16 %v7781_v53, %v7779_v41  ;;  %v4471_v4 = vadd.f32 %v4297_v54, %v3959_v42  ;;  %v3494_v50 = vpop.f32.mrf.mxu3  ;;  %5616 = vmatpush.bf16.msra.mxu0 %v12094_v19  ;;  %v16514_v43 = vpack.c.b16 %v7780_v2, %v7778_v23  ;;  %v12104_v19 = vld [vmem:[%s17775_s3 + $0x2a0] sm:$0xff]  ;;  %v19352_v23 = vld [vmem:[#allocation216_spill] sm:$0xff]  ;;  %v12089_v41 = vld [vmem:[%s17775_s3 + $0x228] sm:$0xff] }
 0x82d   :  { %5596 = vmatpush.bf16.msrb.mxu1 %v12092_v59  ;;  %v16516_v48 = vadd.f32 %v3494_v50, %v3325_v52  ;;  %v3327_v39 = vpop.f32.mrf.mxu1  ;;  %v10274_v52 = vor.u32 %v12107_v0, %v10273_v37  ;;  %v4600_v42 = vmax.f32 %v4472_v60, 0.0  ;;  %v12106_v37 = vld [vmem:[%s17775_s3 + $0x2b0] sm:$0xff] }
 0x82e   :  { %5483 = vmatpush.bf16.msra.mxu2 %v12083_v10  ;;  %v4599_v30 = vmax.f32 %v4471_v4, 0.0  ;;  %5467 = vmatpush.bf16.msrb.mxu3 %v12077_v15 }
 0x82f   :  { %v3966_v21 = vmax.f32 %v15257_v31, %v16516_v48  ;;  %v3824_v16 = vpop.f32.mrf.mxu2  ;;  %v5726_v2 = vand.u32 %v10274_v52, %v15216_v12  ;;  %v12109_v31 = vld [vmem:[%s17775_s3 + $0x2c8] sm:$0xff] }
 0x830   :  { %v4678_v59 = vpack.c.bf16 %v4599_v30, %v4598_v32  ;;  %v3825_v49 = vadd.f32 %v3824_v16, %v3655_v36  ;;  %v3658_v54 = vpop.f32.mrf.mxu0  ;;  %v12075_v36 = vld [vmem:[%s17775_s3 + $0x1b8] sm:$0xff]  ;;  %v12113_v30 = vld [vmem:[%s17775_s3 + $0x2e8] sm:$0xff]  ;;  %v4474_v16 = vadd.f32 %v16483_v25, %v3962_v20 }
 0x831   :  { %5597 = vmatpush.bf16.msrb.mxu1 %v12091_v33  ;;  %v19353_v33 = vld [vmem:[#allocation82_spill] sm:$0xff] }
 0x832   :  { %v3961_v10 = vmax.f32 %v19352_v23, %v3825_v49  ;;  %5468 = vmatpush.bf16.msrb.mxu3 %v12076_v29  ;;  %v10340_v29 = vld [vmem:[%s17775_s3 + $0x310] sm:$0xf]  ;;  %v7911_v52 = vunpack.c.l.b16 %v4678_v59 }
 0x833   :  { %5337 = vmatmul.bf16.vlgmr.msrb.gmra.mxu0 %v15689_v63  ;;  %v12103_v63 = vld [vmem:[%s17775_s3 + $0x298] sm:$0xff]  ;;  %v12102_v49 = vld [vmem:[%s17775_s3 + $0x290] sm:$0xff] }
 0x834   :  { %v4473_v53 = vadd.f32 %v4302_v3, %v3961_v10  ;;  %v3496_v26 = vpop.f32.mrf.mxu3  ;;  %10074 = vmatmul.msk.bf16.vlgmr.msrb.gmra.mxu2 %vm4813_vm3, %v15687_v17  ;;  %5861 = vmatpush.bf16.msrb.mxu0 %v12115_v1  ;;  %v12088_v17 = vld [vmem:[%s17775_s3 + $0x220] sm:$0xff]  ;;  %v12126_v10 = vld [vmem:[%s17775_s3 + $0x350] sm:$0xff] }
 0x835   :  { %5598 = vmatpush.bf16.msrb.mxu1 %v12090_v35  ;;  %v16549_v51 = vadd.f32 %v3496_v26, %v3327_v39  ;;  %5728 = vmatpush.bf16.msrb.mxu2 %v12104_v19  ;;  %v3330_v28 = vpop.f32.mrf.mxu1  ;;  %v12118_v35 = vld [vmem:[%s17775_s3 + $0x310] sm:$0x10]  ;;  %v19354_v19 = vld [vmem:[#allocation217_spill] sm:$0xff] }
 0x836   :  { %v4601_v15 = vmax.f32 %v4473_v53, 0.0  ;;  %5469 = vmatpush.bf16.msrb.mxu3 %v12075_v36  ;;  %v10341_v47 = vor.u32 %v12118_v35, %v10340_v29  ;;  %v12112_v36 = vld [vmem:[%s17775_s3 + $0x2e0] sm:$0xff] }
 0x837   :  { %v3968_v4 = vmax.f32 %v19353_v33, %v16549_v51  ;;  %v3827_v50 = vpop.f32.mrf.mxu2  ;;  %v12100_v29 = vld [vmem:[%s17775_s3 + $0x280] sm:$0xff]  ;;  %v12139_v51 = vld [vmem:[%s17775_s3 + $0x3b8] sm:$0xff] }
 0x838   :  { %v4679_v0 = vpack.c.bf16 %v4601_v15, %v4600_v42  ;;  %v3828_v39 = vadd.f32 %v3827_v50, %v3658_v54  ;;  %5862 = vmatpush.bf16.msrb.mxu0 %v12114_v57  ;;  %v3660_v32 = vpop.f32.mrf.mxu0  ;;  %v7912_v54 = vunpack.c.h.b16 %v4678_v59  ;;  %v4602_v57 = vmax.f32 %v4474_v16, 0.0  ;;  %v12086_v42 = vld [vmem:[%s17775_s3 + $0x210] sm:$0xff]  ;;  %v19355_v15 = vld [vmem:[#allocation75_spill] sm:$0xff]  ;;  %v19356_v16 = vld [vmem:[#allocation218_spill] sm:$0xff] }
 0x839   :  { %5599 = vmatpush.bf16.msrb.mxu1 %v12089_v41  ;;  %5470 = vmatmul.bf16.vlgmr.msrb.gmra.mxu3 %v15723_v5  ;;  %v12105_v5 = vld [vmem:[%s17775_s3 + $0x2a8] sm:$0xff]  ;;  %v5859_v50 = vand.u32 %v10341_v47, %v15216_v12 }
 0x83a   :  { %5747 = vmatpush.bf16.msra.mxu3 %v5726_v2  ;;  %5729 = vmatpush.bf16.msrb.mxu2 %v12103_v63  ;;  %v7913_v1 = vunpack.c.l.b16 %v4679_v0  ;;  %v7914_v3 = vunpack.c.h.b16 %v4679_v0  ;;  %v3963_v60 = vmax.f32 %v19354_v19, %v3828_v39  ;;  %v4312_v2 = vpop.permute.xlu1 %4311 }
 0x83b   :  { %v4476_v35 = vadd.f32 %v4312_v2, %v3964_v56  ;;  %v19359_v56 = vld [vmem:[#allocation93_spill] sm:$0xff] }
 0x83c   :  { %v16586_v20 = vpack.c.b16 %v7914_v3, %v7912_v54  ;;  %v4475_v23 = vadd.f32 %v16483_v25, %v3963_v60  ;;  %v3499_v59 = vpop.f32.mrf.mxu3  ;;  %5863 = vmatpush.bf16.msrb.mxu0 %v12113_v30  ;;  %v16595_v41 = vpack.c.b16 %v7913_v1, %v7911_v52  ;;  %v12101_v25 = vld [vmem:[%s17775_s3 + $0x288] sm:$0xff]  ;;  %v12099_v60 = vld [vmem:[%s17775_s3 + $0x278] sm:$0xff] }
 0x83d   :  { %5600 = vmatpush.bf16.msrb.mxu1 %v12088_v17  ;;  %v16597_v53 = vadd.f32 %v3499_v59, %v3330_v28  ;;  %v16599_v26 = vpop.f32.mrf.mxu1  ;;  %v12125_v30 = vld [vmem:[%s17775_s3 + $0x348] sm:$0xff] }
 0x83e   :  { %5748 = vmatpush.bf16.msra.mxu3 %v12106_v37  ;;  %5730 = vmatpush.bf16.msrb.mxu2 %v12102_v49  ;;  %v4603_v63 = vmax.f32 %v4475_v23, 0.0  ;;  %v19357_v49 = vld [vmem:[#allocation229_spill] sm:$0xff]  ;;  %v12117_v54 = vld [vmem:[%s17775_s3 + $0x308] sm:$0xff] }
 0x83f   :  { %v3970_v17 = vmax.f32 %v19355_v15, %v16597_v53  ;;  %v3829_v28 = vpop.f32.mrf.mxu2  ;;  %v10407_v23 = vld [vmem:[%s17775_s3 + $0x368] sm:$0xf]  ;;  %v12129_v59 = vld [vmem:[%s17775_s3 + $0x368] sm:$0x10]  ;;  %v12147_v53 = vld [vmem:[%s17775_s3 + $0x3f8] sm:$0xff] }
 0x840   :  { %v16610_v37 = vpack.c.bf16 %v4603_v63, %v4602_v57  ;;  %v3830_v0 = vadd.f32 %v3829_v28, %v3660_v32  ;;  %5864 = vmatpush.bf16.msrb.mxu0 %v12112_v36  ;;  %v3663_v39 = vpop.f32.mrf.mxu0  ;;  %v12111_v32 = vld [vmem:[%s17775_s3 + $0x2d8] sm:$0xff]  ;;  %v4317_v57 = vpop.permute.xlu0 %4316 }
 0x841   :  { %5601 = vmatpush.bf16.msrb.mxu1 %v12087_v40  ;;  %v12110_v40 = vld [vmem:[%s17775_s3 + $0x2d0] sm:$0xff] }
 0x842   :  { %5749 = vmatpush.bf16.msra.mxu3 %v12105_v5  ;;  %5731 = vmatpush.bf16.msrb.mxu2 %v12101_v25  ;;  %v3965_v52 = vmax.f32 %v19356_v16, %v3830_v0  ;;  %v4604_v5 = vmax.f32 %v4476_v35, 0.0  ;;  %v12123_v25 = vld [vmem:[%s17775_s3 + $0x338] sm:$0xff]  ;;  %v10474_v0 = vld [vmem:[%s17775_s3 + $0x3c0] sm:$0xf]  ;;  %v8044_v35 = vunpack.c.l.b16 %v16610_v37  ;;  %v10408_v16 = vor.u32 %v12129_v59, %v10407_v23 }
 0x843   :  { %10208 = vmatmul.msk.bf16.vlgmr.msra.gmra.mxu0 %vm4813_vm3, %v19357_v49  ;;  %v12108_v59 = vld [vmem:[%s17775_s3 + $0x2c0] sm:$0xff] }
 0x844   :  { %v4477_v1 = vadd.f32 %v4312_v2, %v3965_v52  ;;  %v16630_v3 = vpop.f32.mrf.mxu3  ;;  %10141 = vmatmul.msk.bf16.vlgmr.msra.gmra.mxu2 %vm4813_vm3, %v19358_v8  ;;  %5865 = vmatpush.bf16.msrb.mxu0 %v12111_v32  ;;  %v12116_v2 = vld [vmem:[%s17775_s3 + $0x300] sm:$0xff]  ;;  %v8045_v52 = vunpack.c.h.b16 %v16610_v37  ;;  %v12122_v37 = vld [vmem:[%s17775_s3 + $0x330] sm:$0xff] }
 0x845   :  { %5602 = vmatpush.bf16.msrb.mxu1 %v12086_v42  ;;  %v3335_v19 = vpop.f32.mrf.mxu1 }
 0x846   :  { %5994 = vmatpush.bf16.msrb.mxu3 %v12126_v10  ;;  %5732 = vmatpush.bf16.msrb.mxu2 %v12100_v29  ;;  %v4605_v47 = vmax.f32 %v4477_v1, 0.0  ;;  %v16650_v10 = vpop.permute.xlu1 %4326  ;;  %v4478_v29 = vadd.f32 %v4317_v57, %v3966_v21 }
 0x847   :  { %v3832_v36 = vpop.f32.mrf.mxu2 }
 0x848   :  { %5603 = vmatmul.bf16.vlgmr.msrb.gmra.mxu1 %v19359_v56  ;;  %v4681_v63 = vpack.c.bf16 %v4605_v47, %v4604_v5  ;;  %v3833_v42 = vadd.f32 %v3832_v36, %v3663_v39  ;;  %v3665_v28 = vpop.f32.mrf.mxu0  ;;  %v12098_v39 = vld [vmem:[%s17775_s3 + $0x270] sm:$0xff]  ;;  %5866 = vmatpush.bf16.msrb.mxu0 %v12110_v40  ;;  %v12097_v5 = vld [vmem:[%s17775_s3 + $0x268] sm:$0xff]  ;;  %v4606_v47 = vmax.f32 %v4478_v29, 0.0  ;;  %v5992_v36 = vand.u32 %v10408_v16, %v15216_v12 }
 0x849   :  { %5880 = vmatpush.bf16.msra.mxu1 %v5859_v50  ;;  %v12137_v50 = vld [vmem:[%s17775_s3 + $0x3a8] sm:$0xff]  ;;  %10275 = vmatmul.msk.bf16.vlgmr.msra.gmra.mxu3 %vm4813_vm3, %v15795_v9 }
 0x84a   :  { %5995 = vmatpush.bf16.msrb.mxu3 %v12125_v30  ;;  %v12140_v30 = vld [vmem:[%s17775_s3 + $0x3c0] sm:$0x10]  ;;  %5733 = vmatpush.bf16.msrb.mxu2 %v12099_v60  ;;  %v8046_v32 = vunpack.c.l.b16 %v4681_v63  ;;  %v8047_v49 = vunpack.c.h.b16 %v4681_v63 }
 0x84b   :  { %v10475_v48 = vor.u32 %v12140_v30, %v10474_v0  ;;  %v12121_v0 = vld [vmem:[%s17775_s3 + $0x328] sm:$0xff]  ;;  %v12135_v30 = vld [vmem:[%s17775_s3 + $0x398] sm:$0xff] }
 0x84c   :  { %v16681_v21 = vpack.c.b16 %v8047_v49, %v8045_v52  ;;  %v3504_v8 = vpop.f32.mrf.mxu3  ;;  %v16689_v56 = vpack.c.b16 %v8046_v32, %v8044_v35  ;;  %5867 = vmatpush.bf16.msrb.mxu0 %v12109_v31  ;;  %v10541_v52 = vld [vmem:[%s17775_s3 + $0x418] sm:$0xf]  ;;  %v12151_v32 = vld [vmem:[%s17775_s3 + $0x418] sm:$0x10]  ;;  %v12120_v49 = vld [vmem:[%s17775_s3 + $0x320] sm:$0xff] }
 0x84d   :  { %5881 = vmatpush.bf16.msra.mxu1 %v12117_v54  ;;  %v19360_v54 = vld [vmem:[#allocation219_spill] sm:$0xff]  ;;  %v16691_v60 = vadd.f32 %v3504_v8, %v3335_v19  ;;  %v16693_v40 = vpop.f32.mrf.mxu1 }
 0x84e   :  { %5996 = vmatpush.bf16.msrb.mxu3 %v12124_v46  ;;  %v3967_v1 = vmax.f32 %v19360_v54, %v3833_v42  ;;  %v12136_v46 = vld [vmem:[%s17775_s3 + $0x3a0] sm:$0xff]  ;;  %5734 = vmatpush.bf16.msrb.mxu2 %v12098_v39  ;;  %v4322_v29 = vpop.permute.xlu1 %4321  ;;  %v19362_v39 = vld [vmem:[#allocation220_spill] sm:$0xff]  ;;  %v19364_v31 = vld [vmem:[#allocation231_spill] sm:$0xff] }
 0x84f   :  { %v4480_v35 = vadd.f32 %v4322_v29, %v3968_v4  ;;  %v12134_v54 = vld [vmem:[%s17775_s3 + $0x390] sm:$0xff] }
 0x850   :  { %v4479_v9 = vadd.f32 %v4317_v57, %v3967_v1  ;;  %v6125_v57 = vand.u32 %v10475_v48, %v15216_v12  ;;  %5868 = vmatpush.bf16.msrb.mxu0 %v12108_v59  ;;  %v19363_v1 = vld [vmem:[#allocation230_spill] sm:$0xff] }
 0x851   :  { %5882 = vmatpush.bf16.msra.mxu1 %v12116_v2  ;;  %v19361_v2 = vld [vmem:[#allocation78_spill] sm:$0xff]  ;;  %v4608_v8 = vmax.f32 %v4480_v35, 0.0  ;;  %v12133_v35 = vld [vmem:[%s17775_s3 + $0x388] sm:$0xff] }
 0x852   :  { %5997 = vmatpush.bf16.msrb.mxu3 %v12123_v25  ;;  %v4607_v23 = vmax.f32 %v4479_v9, 0.0  ;;  %v3974_v19 = vmax.f32 %v19361_v2, %v16691_v60  ;;  %v3834_v25 = vpop.f32.mrf.mxu2  ;;  %5735 = vmatpush.bf16.msrb.mxu2 %v12097_v5  ;;  %v10542_v9 = vor.u32 %v12151_v32, %v10541_v52  ;;  %v12127_v5 = vld [vmem:[%s17775_s3 + $0x358] sm:$0xff]  ;;  %v12148_v59 = vld [vmem:[%s17775_s3 + $0x400] sm:$0xff] }
 0x853   :  { %v3835_v42 = vadd.f32 %v3834_v25, %v3665_v28  ;;  %v12128_v28 = vld [vmem:[%s17775_s3 + $0x360] sm:$0xff]  ;;  %5869 = vmatmul.bf16.vlgmr.msrb.gmra.mxu0 %v19364_v31  ;;  %v19366_v32 = vld [vmem:[#allocation221_spill] sm:$0xff] }
 0x854   :  { %v16705_v63 = vpack.c.bf16 %v4607_v23, %v4606_v47  ;;  %6146 = vmatpush.bf16.msra.mxu0 %v6125_v57  ;;  %v16729_v4 = vpop.f32.mrf.mxu3  ;;  %v12138_v23 = vld [vmem:[%s17775_s3 + $0x3b0] sm:$0xff]  ;;  %v12168_v60 = vld [vmem:[%s17775_s3 + $0x4a0] sm:$0xff] }
 0x855   :  { %6127 = vmatpush.bf16.msrb.mxu1 %v12137_v50  ;;  %v3668_v50 = vpop.f32.mrf.mxu0  ;;  %v3969_v16 = vmax.f32 %v19362_v39, %v3835_v42  ;;  %5736 = vmatmul.bf16.vlgmr.msrb.gmra.mxu2 %v19363_v1  ;;  %v3340_v48 = vpop.f32.mrf.mxu1  ;;  %v12119_v42 = vld [vmem:[%s17775_s3 + $0x318] sm:$0xff]  ;;  %v6258_v39 = vand.u32 %v10542_v9, %v15216_v12  ;;  %v12150_v1 = vld [vmem:[%s17775_s3 + $0x410] sm:$0xff] }
 0x856   :  { %5998 = vmatpush.bf16.msrb.mxu3 %v12122_v37  ;;  %6013 = vmatpush.bf16.msra.mxu2 %v5992_v36  ;;  %v19367_v9 = vld [vmem:[#allocation85_spill] sm:$0xff] }
 0x857   :  { %v4481_v33 = vadd.f32 %v4322_v29, %v3969_v16  ;;  %v3502_v29 = vadd.f32 %v16630_v3, %v16599_v26  ;;  %v8178_v16 = vunpack.c.h.b16 %v16705_v63  ;;  %v12158_v3 = vld [vmem:[%s17775_s3 + $0x450] sm:$0xff] }
 0x858   :  { %6147 = vmatpush.bf16.msra.mxu0 %v12139_v51 }
 0x859   :  { %6128 = vmatpush.bf16.msrb.mxu1 %v12136_v46  ;;  %v4609_v37 = vmax.f32 %v4481_v33, 0.0  ;;  %v19365_v46 = vld [vmem:[#allocation103_spill] sm:$0xff]  ;;  %v4332_v33 = vpop.permute.xlu2 %4331 }
 0x85a   :  { %5999 = vmatpush.bf16.msrb.mxu3 %v12121_v0  ;;  %10342 = vmatmul.msk.bf16.vlgmr.msra.gmra.mxu1 %vm4813_vm3, %v19365_v46  ;;  %v3837_v47 = vpop.f32.mrf.mxu2  ;;  %v12159_v0 = vld [vmem:[%s17775_s3 + $0x458] sm:$0xff] }
 0x85b   :  { %6014 = vmatpush.bf16.msra.mxu2 %v12128_v28  ;;  %v4683_v36 = vpack.c.bf16 %v4609_v37, %v4608_v8  ;;  %v3838_v25 = vadd.f32 %v3837_v47, %v3668_v50  ;;  %v8177_v50 = vunpack.c.l.b16 %v16705_v63  ;;  %v3972_v8 = vmax.f32 %v19367_v9, %v3502_v29  ;;  %v19368_v46 = vld [vmem:[#allocation81_spill] sm:$0xff] }
 0x85c   :  { %6148 = vmatpush.bf16.msra.mxu0 %v12138_v23  ;;  %v12146_v23 = vld [vmem:[%s17775_s3 + $0x3f0] sm:$0xff]  ;;  %v12131_v29 = vld [vmem:[%s17775_s3 + $0x378] sm:$0xff] }
 0x85d   :  { %6129 = vmatpush.bf16.msrb.mxu1 %v12135_v30  ;;  %v3670_v57 = vpop.f32.mrf.mxu0  ;;  %v4482_v30 = vadd.f32 %v16650_v10, %v3970_v17  ;;  %v8179_v28 = vunpack.c.l.b16 %v4683_v36  ;;  %v8180_v52 = vunpack.c.h.b16 %v4683_v36  ;;  %v3971_v51 = vmax.f32 %v19366_v32, %v3838_v25  ;;  %v3509_v17 = vpop.f32.mrf.mxu3  ;;  %v12162_v36 = vld [vmem:[%s17775_s3 + $0x470] sm:$0x10] }
 0x85e   :  { %6000 = vmatpush.bf16.msrb.mxu3 %v12120_v49  ;;  %v16780_v49 = vadd.f32 %v3509_v17, %v3340_v48  ;;  %v12130_v17 = vld [vmem:[%s17775_s3 + $0x370] sm:$0xff] }
 0x85f   :  { %6015 = vmatpush.bf16.msra.mxu2 %v12127_v5  ;;  %v16772_v26 = vpack.c.b16 %v8180_v52, %v8178_v16  ;;  %v4483_v15 = vadd.f32 %v16650_v10, %v3971_v51  ;;  %v16778_v63 = vpack.c.b16 %v8179_v28, %v8177_v50  ;;  %v12132_v10 = vld [vmem:[%s17775_s3 + $0x380] sm:$0xff]  ;;  %v4610_v31 = vmax.f32 %v4482_v30, 0.0  ;;  %v19369_v5 = vld [vmem:[#allocation232_spill] sm:$0xff]  ;;  %v12157_v30 = vld [vmem:[%s17775_s3 + $0x448] sm:$0xff] }
 0x860   :  { %6393 = vmatpush.bf16.msrb.mxu0 %v12159_v0  ;;  %v3978_v48 = vmax.f32 %v19368_v46, %v16780_v49  ;;  %v12149_v50 = vld [vmem:[%s17775_s3 + $0x408] sm:$0xff]  ;;  %v12183_v49 = vld [vmem:[%s17775_s3 + $0x518] sm:$0xff]  ;;  %v19380_v46 = vld [vmem:[#allocation234_spill] sm:$0xff] }
 0x861   :  { %6130 = vmatpush.bf16.msrb.mxu1 %v12134_v54  ;;  %v16782_v54 = vpop.f32.mrf.mxu1  ;;  %v4611_v37 = vmax.f32 %v4483_v15, 0.0  ;;  %v12145_v52 = vld [vmem:[%s17775_s3 + $0x3e8] sm:$0xff]  ;;  %v16832_v9 = vpop.permute.xlu2 %4346 }
 0x862   :  { %6001 = vmatpush.bf16.msrb.mxu3 %v12119_v42  ;;  %v3839_v47 = vpop.f32.mrf.mxu2 }
 0x863   :  { %6260 = vmatpush.bf16.msrb.mxu2 %v12148_v59  ;;  %v10608_v59 = vld [vmem:[%s17775_s3 + $0x470] sm:$0xf]  ;;  %v4684_v25 = vpack.c.bf16 %v4611_v37, %v4610_v31  ;;  %v3840_v42 = vadd.f32 %v3839_v47, %v3670_v57  ;;  %v12169_v37 = vld [vmem:[%s17775_s3 + $0x4a8] sm:$0xff]  ;;  %v4337_v47 = vpop.permute.xlu1 %4336 }
 0x864   :  { %6394 = vmatpush.bf16.msrb.mxu0 %v12158_v3  ;;  %v10609_v28 = vor.u32 %v12162_v36, %v10608_v59  ;;  %v12170_v57 = vld [vmem:[%s17775_s3 + $0x4b0] sm:$0xff] }
 0x865   :  { %6131 = vmatpush.bf16.msrb.mxu1 %v12133_v35  ;;  %6002 = vmatmul.bf16.vlgmr.msrb.gmra.mxu3 %v19369_v5  ;;  %v3673_v0 = vpop.f32.mrf.mxu0  ;;  %v4484_v35 = vadd.f32 %v4332_v33, %v3972_v8  ;;  %v16819_v51 = vpop.f32.mrf.mxu3  ;;  %v12144_v5 = vld [vmem:[%s17775_s3 + $0x3e0] sm:$0xff] }
 0x866   :  { %6279 = vmatpush.bf16.msra.mxu3 %v6258_v39  ;;  %v19370_v39 = vld [vmem:[#allocation222_spill] sm:$0xff]  ;;  %v6391_v31 = vand.u32 %v10609_v28, %v15216_v12  ;;  %v19373_v28 = vld [vmem:[#allocation223_spill] sm:$0xff] }
 0x867   :  { %6261 = vmatpush.bf16.msrb.mxu2 %v12147_v53  ;;  %v3973_v16 = vmax.f32 %v19370_v39, %v3840_v42  ;;  %v12156_v53 = vld [vmem:[%s17775_s3 + $0x440] sm:$0xff]  ;;  %v4612_v3 = vmax.f32 %v4484_v35, 0.0  ;;  %v12155_v42 = vld [vmem:[%s17775_s3 + $0x438] sm:$0xff]  ;;  %v8311_v35 = vunpack.c.h.b16 %v4684_v25 }
 0x868   :  { %6395 = vmatpush.bf16.msrb.mxu0 %v12157_v30  ;;  %v4486_v30 = vadd.f32 %v4337_v47, %v3974_v19 }
 0x869   :  { %6132 = vmatpush.bf16.msrb.mxu1 %v12132_v10  ;;  %v4485_v32 = vadd.f32 %v4332_v33, %v3973_v16  ;;  %v3345_v15 = vpop.f32.mrf.mxu1  ;;  %v19372_v33 = vld [vmem:[#allocation106_spill] sm:$0xff] }
 0x86a   :  { %6280 = vmatpush.bf16.msra.mxu3 %v12150_v1  ;;  %v19371_v1 = vld [vmem:[#allocation96_spill] sm:$0xff]  ;;  %10476 = vmatmul.msk.bf16.vlgmr.msra.gmra.mxu0 %vm4813_vm3, %v19372_v33  ;;  %v3842_v8 = vpop.f32.mrf.mxu2  ;;  %v4614_v33 = vmax.f32 %v4486_v30, 0.0  ;;  %v12181_v30 = vld [vmem:[%s17775_s3 + $0x508] sm:$0xff] }
 0x86b   :  { %6262 = vmatpush.bf16.msrb.mxu2 %v12146_v23  ;;  %v4613_v10 = vmax.f32 %v4485_v32, 0.0  ;;  %v3843_v59 = vadd.f32 %v3842_v8, %v3673_v0  ;;  %v12161_v0 = vld [vmem:[%s17775_s3 + $0x468] sm:$0xff] }
 0x86c   :  { %10409 = vmatmul.msk.bf16.vlgmr.msra.gmra.mxu2 %vm4813_vm3, %v19371_v1  ;;  %6396 = vmatpush.bf16.msrb.mxu0 %v12156_v53  ;;  %v12173_v1 = vld [vmem:[%s17775_s3 + $0x4c8] sm:$0x10] }
 0x86d   :  { %6133 = vmatpush.bf16.msrb.mxu1 %v12131_v29  ;;  %v4685_v23 = vpack.c.bf16 %v4613_v10, %v4612_v3  ;;  %v3675_v36 = vpop.f32.mrf.mxu0  ;;  %v3507_v29 = vadd.f32 %v16729_v4, %v16693_v40  ;;  %v12143_v40 = vld [vmem:[%s17775_s3 + $0x3d8] sm:$0xff]  ;;  %v12160_v3 = vld [vmem:[%s17775_s3 + $0x460] sm:$0xff]  ;;  %v10675_v10 = vld [vmem:[%s17775_s3 + $0x4c8] sm:$0xf] }
 0x86e   :  { %6281 = vmatpush.bf16.msra.mxu3 %v12149_v50  ;;  %v8310_v50 = vunpack.c.l.b16 %v4684_v25  ;;  %v19374_v4 = vld [vmem:[#allocation233_spill] sm:$0xff]  ;;  %v3514_v25 = vpop.f32.mrf.mxu3 }
 0x86f   :  { %6263 = vmatpush.bf16.msrb.mxu2 %v12145_v52  ;;  %v8312_v39 = vunpack.c.l.b16 %v4685_v23  ;;  %v8313_v16 = vunpack.c.h.b16 %v4685_v23  ;;  %v12154_v52 = vld [vmem:[%s17775_s3 + $0x430] sm:$0xff]  ;;  %v16866_v53 = vadd.f32 %v3514_v25, %v3345_v15  ;;  %v10742_v15 = vld [vmem:[%s17775_s3 + $0x520] sm:$0xf] }
 0x870   :  { %6397 = vmatpush.bf16.msrb.mxu0 %v12155_v42  ;;  %v12167_v42 = vld [vmem:[%s17775_s3 + $0x498] sm:$0xff]  ;;  %v12180_v25 = vld [vmem:[%s17775_s3 + $0x500] sm:$0xff] }
 0x871   :  { %6134 = vmatpush.bf16.msrb.mxu1 %v12130_v17  ;;  %v16858_v2 = vpack.c.b16 %v8313_v16, %v8311_v35  ;;  %v16864_v32 = vpack.c.b16 %v8312_v39, %v8310_v50  ;;  %v16868_v17 = vpop.f32.mrf.mxu1  ;;  %v19377_v50 = vld [vmem:[#allocation99_spill] sm:$0xff]  ;;  %v12142_v16 = vld [vmem:[%s17775_s3 + $0x3d0] sm:$0xff] }
 0x872   :  { %6526 = vmatpush.bf16.msrb.mxu3 %v12170_v57  ;;  %v3975_v57 = vmax.f32 %v19373_v28, %v3843_v59  ;;  %v3844_v59 = vpop.f32.mrf.mxu2  ;;  %v12153_v28 = vld [vmem:[%s17775_s3 + $0x428] sm:$0xff] }
 0x873   :  { %6264 = vmatpush.bf16.msrb.mxu2 %v12144_v5  ;;  %v12184_v5 = vld [vmem:[%s17775_s3 + $0x520] sm:$0x10]  ;;  %v3845_v35 = vadd.f32 %v3844_v59, %v3675_v36  ;;  %v12166_v36 = vld [vmem:[%s17775_s3 + $0x490] sm:$0xff]  ;;  %v12165_v59 = vld [vmem:[%s17775_s3 + $0x488] sm:$0xff] }
 0x874   :  { %v4487_v19 = vadd.f32 %v4337_v47, %v3975_v57  ;;  %6135 = vmatmul.bf16.vlgmr.msrb.gmra.mxu1 %v19374_v4  ;;  %v19376_v47 = vld [vmem:[#allocation92_spill] sm:$0xff]  ;;  %6398 = vmatpush.bf16.msrb.mxu0 %v12154_v52  ;;  %v4342_v57 = vpop.permute.xlu2 %4341 }
 0x875   :  { %6412 = vmatpush.bf16.msra.mxu1 %v6391_v31  ;;  %v19375_v31 = vld [vmem:[#allocation88_spill] sm:$0xff]  ;;  %v3982_v23 = vmax.f32 %v19376_v47, %v16866_v53  ;;  %10543 = vmatmul.msk.bf16.vlgmr.msra.gmra.mxu3 %vm4813_vm3, %v19377_v50  ;;  %v3678_v39 = vpop.f32.mrf.mxu0  ;;  %v19388_v47 = vld [vmem:[#allocation102_spill] sm:$0xff] }
 0x876   :  { %6527 = vmatpush.bf16.msrb.mxu3 %v12169_v37  ;;  %v3976_v8 = vmax.f32 %v19375_v31, %v3507_v29  ;;  %v4615_v37 = vmax.f32 %v4487_v19, 0.0  ;;  %v19378_v19 = vld [vmem:[#allocation84_spill] sm:$0xff] }
 0x877   :  { %6265 = vmatpush.bf16.msrb.mxu2 %v12143_v40  ;;  %v3977_v4 = vmax.f32 %v19378_v19, %v3845_v35  ;;  %v12179_v35 = vld [vmem:[%s17775_s3 + $0x4f8] sm:$0xff]  ;;  %v12214_v53 = vld [vmem:[%s17775_s3 + $0x610] sm:$0xff] }
 0x878   :  { %v4686_v29 = vpack.c.bf16 %v4615_v37, %v4614_v33  ;;  %v4488_v40 = vadd.f32 %v4342_v57, %v3976_v8  ;;  %6399 = vmatpush.bf16.msrb.mxu0 %v12153_v28  ;;  %v16909_v33 = vpop.f32.mrf.mxu3  ;;  %v12195_v28 = vld [vmem:[%s17775_s3 + $0x578] sm:$0x10] }
 0x879   :  { %6413 = vmatpush.bf16.msra.mxu1 %v12161_v0  ;;  %v10676_v0 = vor.u32 %v12173_v1, %v10675_v10  ;;  %v4489_v52 = vadd.f32 %v4342_v57, %v3977_v4  ;;  %v12141_v10 = vld [vmem:[%s17775_s3 + $0x3c8] sm:$0xff]  ;;  %v3350_v1 = vpop.f32.mrf.mxu1  ;;  %v4490_v57 = vadd.f32 %v16832_v9, %v3978_v48 }
 0x87a   :  { %6528 = vmatpush.bf16.msrb.mxu3 %v12168_v60  ;;  %v10743_v60 = vor.u32 %v12184_v5, %v10742_v15  ;;  %v4616_v37 = vmax.f32 %v4488_v40, 0.0  ;;  %v3847_v5 = vpop.f32.mrf.mxu2  ;;  %v8444_v40 = vunpack.c.h.b16 %v4686_v29 }
 0x87b   :  { %6266 = vmatpush.bf16.msrb.mxu2 %v12142_v16  ;;  %v6524_v31 = vand.u32 %v10676_v0, %v15216_v12  ;;  %v4617_v15 = vmax.f32 %v4489_v52, 0.0  ;;  %v10809_v16 = vld [vmem:[%s17775_s3 + $0x578] sm:$0xf]  ;;  %v8443_v0 = vunpack.c.l.b16 %v4686_v29  ;;  %v19381_v52 = vld [vmem:[#allocation235_spill] sm:$0xff] }
 0x87c   :  { %v6657_v8 = vand.u32 %v10743_v60, %v15216_v12  ;;  %v12172_v60 = vld [vmem:[%s17775_s3 + $0x4c0] sm:$0xff]  ;;  %v10810_v48 = vor.u32 %v12195_v28, %v10809_v16  ;;  %v12182_v16 = vld [vmem:[%s17775_s3 + $0x510] sm:$0xff]  ;;  %v19384_v28 = vld [vmem:[#allocation225_spill] sm:$0xff] }
 0x87d   :  { %6414 = vmatpush.bf16.msra.mxu1 %v12160_v3  ;;  %v12152_v3 = vld [vmem:[%s17775_s3 + $0x420] sm:$0xff]  ;;  %v3680_v50 = vpop.f32.mrf.mxu0 }
 0x87e   :  { %6529 = vmatpush.bf16.msrb.mxu3 %v12167_v42  ;;  %v4687_v42 = vpack.c.bf16 %v4617_v15, %v4616_v37  ;;  %6400 = vmatpush.bf16.msrb.mxu0 %v12152_v3  ;;  %v12178_v3 = vld [vmem:[%s17775_s3 + $0x4f0] sm:$0xff]  ;;  %v19382_v37 = vld [vmem:[#allocation109_spill] sm:$0xff] }
 0x87f   :  { %6267 = vmatpush.bf16.msrb.mxu2 %v12141_v10 }
 0x880   :  { %v8445_v19 = vunpack.c.l.b16 %v4687_v42  ;;  %v8446_v4 = vunpack.c.h.b16 %v4687_v42  ;;  %v3519_v10 = vpop.f32.mrf.mxu3  ;;  %v19383_v42 = vld [vmem:[#allocation91_spill] sm:$0xff] }
 0x881   :  { %6659 = vmatpush.bf16.msrb.mxu1 %v12181_v30  ;;  %v3848_v30 = vadd.f32 %v3847_v5, %v3678_v39  ;;  %v3512_v39 = vadd.f32 %v16819_v51, %v16782_v54  ;;  %v12164_v54 = vld [vmem:[%s17775_s3 + $0x480] sm:$0xff]  ;;  %6401 = vmatmul.bf16.vlgmr.msrb.gmra.mxu0 %v19381_v52  ;;  %v16959_v15 = vadd.f32 %v3519_v10, %v3350_v1  ;;  %v16961_v5 = vpop.f32.mrf.mxu1 }
 0x882   :  { %6530 = vmatpush.bf16.msrb.mxu3 %v12166_v36  ;;  %6678 = vmatpush.bf16.msra.mxu0 %v6657_v8  ;;  %v19379_v36 = vld [vmem:[#allocation94_spill] sm:$0xff]  ;;  %v16948_v51 = vpack.c.b16 %v8446_v4, %v8444_v40  ;;  %v4352_v8 = vpop.permute.xlu0 %4351 }
 0x883   :  { %6545 = vmatpush.bf16.msra.mxu2 %v6524_v31  ;;  %v16955_v31 = vpack.c.b16 %v8445_v19, %v8443_v0  ;;  %v12192_v1 = vld [vmem:[%s17775_s3 + $0x560] sm:$0xff]  ;;  %v3986_v0 = vmax.f32 %v19384_v28, %v16959_v15  ;;  %v12210_v15 = vld [vmem:[%s17775_s3 + $0x5f0] sm:$0xff] }
 0x884   :  { %6268 = vmatmul.bf16.vlgmr.msrb.gmra.mxu2 %v19380_v46  ;;  %10610 = vmatmul.msk.bf16.vlgmr.msra.gmra.mxu1 %vm4813_vm3, %v19382_v37  ;;  %v19385_v46 = vld [vmem:[#allocation87_spill] sm:$0xff]  ;;  %v12176_v10 = vld [vmem:[%s17775_s3 + $0x4e0] sm:$0xff] }
 0x885   :  { %6660 = vmatpush.bf16.msrb.mxu1 %v12180_v25  ;;  %v3979_v25 = vmax.f32 %v19379_v36, %v3848_v30  ;;  %v3980_v30 = vmax.f32 %v19383_v42, %v3512_v39  ;;  %v12203_v39 = vld [vmem:[%s17775_s3 + $0x5b8] sm:$0xff]  ;;  %v3683_v4 = vpop.f32.mrf.mxu0  ;;  %v12177_v36 = vld [vmem:[%s17775_s3 + $0x4e8] sm:$0xff]  ;;  %v12224_v28 = vld [vmem:[%s17775_s3 + $0x660] sm:$0xff] }
 0x886   :  { %6531 = vmatpush.bf16.msrb.mxu3 %v12165_v59  ;;  %v4618_v59 = vmax.f32 %v4490_v57, 0.0  ;;  %6679 = vmatpush.bf16.msra.mxu0 %v12183_v49  ;;  %v12163_v57 = vld [vmem:[%s17775_s3 + $0x478] sm:$0xff] }
 0x887   :  { %v4491_v29 = vadd.f32 %v16832_v9, %v3979_v25  ;;  %6546 = vmatpush.bf16.msra.mxu2 %v12172_v60  ;;  %v12171_v9 = vld [vmem:[%s17775_s3 + $0x4b8] sm:$0xff]  ;;  %v3849_v60 = vpop.f32.mrf.mxu2  ;;  %v6790_v25 = vand.u32 %v10810_v48, %v15216_v12  ;;  %v4492_v49 = vadd.f32 %v4352_v8, %v3980_v30  ;;  %v10876_v30 = vld [vmem:[%s17775_s3 + $0x5d0] sm:$0xf] }
 0x888   :  { %v3850_v19 = vadd.f32 %v3849_v60, %v3680_v50  ;;  %v12202_v50 = vld [vmem:[%s17775_s3 + $0x5b0] sm:$0xff]  ;;  %v16992_v48 = vpop.f32.mrf.mxu3  ;;  %v12201_v60 = vld [vmem:[%s17775_s3 + $0x5a8] sm:$0xff] }
 0x889   :  { %6661 = vmatpush.bf16.msrb.mxu1 %v12179_v35  ;;  %v4619_v35 = vmax.f32 %v4491_v29, 0.0  ;;  %v12191_v29 = vld [vmem:[%s17775_s3 + $0x558] sm:$0xff]  ;;  %v4833_v37 = vpop.f32.mrf.mxu1 }
 0x88a   :  { %6532 = vmatpush.bf16.msrb.mxu3 %v12164_v54  ;;  %v3981_v54 = vmax.f32 %v19385_v46, %v3850_v19  ;;  %6680 = vmatpush.bf16.msra.mxu0 %v12182_v16  ;;  %v17010_v16 = vpop.permute.xlu0 %4366  ;;  %v3517_v46 = vadd.f32 %v16909_v33, %v16868_v17  ;;  %v12189_v17 = vld [vmem:[%s17775_s3 + $0x548] sm:$0xff] }
 0x88b   :  { %v4688_v40 = vpack.c.bf16 %v4619_v35, %v4618_v59  ;;  %6547 = vmatpush.bf16.msra.mxu2 %v12171_v9  ;;  %v12190_v9 = vld [vmem:[%s17775_s3 + $0x550] sm:$0xff]  ;;  %v4620_v59 = vmax.f32 %v4492_v49, 0.0 }
 0x88c   :  { %v4493_v52 = vadd.f32 %v4352_v8, %v3981_v54  ;;  %v19386_v8 = vld [vmem:[#allocation236_spill] sm:$0xff] }
 0x88d   :  { %6662 = vmatpush.bf16.msrb.mxu1 %v12178_v3  ;;  %v12194_v3 = vld [vmem:[%s17775_s3 + $0x570] sm:$0xff]  ;;  %v8576_v54 = vunpack.c.l.b16 %v4688_v40 }
 0x88e   :  { %6533 = vmatpush.bf16.msrb.mxu3 %v12163_v57  ;;  %6925 = vmatpush.bf16.msrb.mxu0 %v12203_v39  ;;  %v4621_v42 = vmax.f32 %v4493_v52, 0.0  ;;  %v12206_v35 = vld [vmem:[%s17775_s3 + $0x5d0] sm:$0x10]  ;;  %v4357_v57 = vpop.permute.xlu2 %4356  ;;  %v8577_v52 = vunpack.c.h.b16 %v4688_v40 }
 0x88f   :  { %6792 = vmatpush.bf16.msrb.mxu2 %v12192_v1  ;;  %v3852_v1 = vpop.f32.mrf.mxu2  ;;  %v4494_v49 = vadd.f32 %v4357_v57, %v3982_v23  ;;  %v12200_v23 = vld [vmem:[%s17775_s3 + $0x5a0] sm:$0xff] }
 0x890   :  { %v4689_v39 = vpack.c.bf16 %v4621_v42, %v4620_v59  ;;  %v3853_v19 = vadd.f32 %v3852_v1, %v3683_v4  ;;  %v4847_v42 = vpop.f32.mrf.mxu3 }
 0x891   :  { %6663 = vmatpush.bf16.msrb.mxu1 %v12177_v36  ;;  %6534 = vmatmul.bf16.vlgmr.msrb.gmra.mxu3 %v19386_v8  ;;  %v3685_v36 = vpop.f32.mrf.mxu0  ;;  %v12174_v8 = vld [vmem:[%s17775_s3 + $0x4d0] sm:$0xff] }
 0x892   :  { %6811 = vmatpush.bf16.msra.mxu3 %v6790_v25  ;;  %6926 = vmatpush.bf16.msrb.mxu0 %v12202_v50  ;;  %v12175_v25 = vld [vmem:[%s17775_s3 + $0x4d8] sm:$0xff]  ;;  %v10877_v50 = vor.u32 %v12206_v35, %v10876_v30  ;;  %v8578_v4 = vunpack.c.l.b16 %v4689_v39  ;;  %v17047_v35 = vadd.f32 %v4847_v42, %v4833_v37  ;;  %v10943_v42 = vld [vmem:[%s17775_s3 + $0x628] sm:$0xf] }
 0x893   :  { %6793 = vmatpush.bf16.msrb.mxu2 %v12191_v29  ;;  %v12193_v29 = vld [vmem:[%s17775_s3 + $0x568] sm:$0xff] }
 0x894   :  { %10677 = vmatmul.msk.bf16.vlgmr.msra.gmra.mxu2 %vm4813_vm3, %v19388_v47  ;;  %v17045_v30 = vpack.c.b16 %v8578_v4, %v8576_v54  ;;  %v6923_v1 = vand.u32 %v10877_v50, %v15216_v12  ;;  %v12188_v54 = vld [vmem:[%s17775_s3 + $0x540] sm:$0xff]  ;;  %v4362_v4 = vpop.permute.xlu0 %4361 }
 0x895   :  { %6664 = vmatpush.bf16.msrb.mxu1 %v12176_v10  ;;  %v8579_v10 = vunpack.c.h.b16 %v4689_v39  ;;  %v19390_v39 = vld [vmem:[#allocation224_spill] sm:$0xff]  ;;  %v19392_v47 = vld [vmem:[#allocation110_spill] sm:$0xff] }
 0x896   :  { %6812 = vmatpush.bf16.msra.mxu3 %v12194_v3  ;;  %v19387_v3 = vld [vmem:[#allocation97_spill] sm:$0xff]  ;;  %6927 = vmatpush.bf16.msrb.mxu0 %v12201_v60  ;;  %v4622_v60 = vmax.f32 %v4494_v49, 0.0 }
 0x897   :  { %v3983_v59 = vmax.f32 %v19387_v3, %v3853_v19  ;;  %6794 = vmatpush.bf16.msrb.mxu2 %v12190_v9  ;;  %v17038_v33 = vpack.c.b16 %v8579_v10, %v8577_v52  ;;  %v19389_v9 = vld [vmem:[#allocation112_spill] sm:$0xff]  ;;  %v3984_v19 = vmax.f32 %v19390_v39, %v3517_v46  ;;  %v12213_v52 = vld [vmem:[%s17775_s3 + $0x608] sm:$0xff]  ;;  %v3854_v37 = vpop.f32.mrf.mxu2  ;;  %v12199_v49 = vld [vmem:[%s17775_s3 + $0x598] sm:$0xff] }
 0x898   :  { %10744 = vmatmul.msk.bf16.vlgmr.msra.gmra.mxu0 %vm4813_vm3, %v19389_v9  ;;  %v12205_v10 = vld [vmem:[%s17775_s3 + $0x5c8] sm:$0xff]  ;;  %v17078_v9 = vpop.f32.mrf.mxu3  ;;  %v12228_v39 = vld [vmem:[%s17775_s3 + $0x680] sm:$0x10] }
 0x899   :  { %v4495_v40 = vadd.f32 %v4357_v57, %v3983_v59  ;;  %6665 = vmatpush.bf16.msrb.mxu1 %v12175_v25  ;;  %v17051_v25 = vpop.f32.mrf.mxu1  ;;  %v3688_v50 = vpop.f32.mrf.mxu0  ;;  %v4496_v3 = vadd.f32 %v4362_v4, %v3984_v19  ;;  %v19391_v59 = vld [vmem:[#allocation227_spill] sm:$0xff] }
 0x89a   :  { %6813 = vmatpush.bf16.msra.mxu3 %v12193_v29  ;;  %6928 = vmatpush.bf16.msrb.mxu0 %v12200_v23  ;;  %v3855_v29 = vadd.f32 %v3854_v37, %v3685_v36  ;;  %v12187_v36 = vld [vmem:[%s17775_s3 + $0x538] sm:$0xff]  ;;  %v12198_v23 = vld [vmem:[%s17775_s3 + $0x590] sm:$0xff] }
 0x89b   :  { %v4623_v57 = vmax.f32 %v4495_v40, 0.0  ;;  %6795 = vmatpush.bf16.msrb.mxu2 %v12189_v17  ;;  %v12212_v17 = vld [vmem:[%s17775_s3 + $0x600] sm:$0xff]  ;;  %v4624_v19 = vmax.f32 %v4496_v3, 0.0 }
 0x89d   :  { %v17062_v46 = vpack.c.bf16 %v4623_v57, %v4622_v60  ;;  %6666 = vmatpush.bf16.msrb.mxu1 %v12174_v8  ;;  %v12217_v8 = vld [vmem:[%s17775_s3 + $0x628] sm:$0x10]  ;;  %v11010_v60 = vld [vmem:[%s17775_s3 + $0x680] sm:$0xf] }
 0x89e   :  { %7058 = vmatpush.bf16.msrb.mxu3 %v12214_v53  ;;  %v3985_v53 = vmax.f32 %v19391_v59, %v3855_v29  ;;  %6929 = vmatpush.bf16.msrb.mxu0 %v12199_v49  ;;  %v12186_v49 = vld [vmem:[%s17775_s3 + $0x530] sm:$0xff]  ;;  %v12197_v29 = vld [vmem:[%s17775_s3 + $0x588] sm:$0xff] }
 0x89f   :  { %6796 = vmatpush.bf16.msrb.mxu2 %v12188_v54  ;;  %v12225_v54 = vld [vmem:[%s17775_s3 + $0x668] sm:$0xff]  ;;  %v3857_v37 = vpop.f32.mrf.mxu2 }
 0x8a0   :  { %6667 = vmatmul.bf16.vlgmr.msrb.gmra.mxu1 %v19392_v47  ;;  %v4497_v40 = vadd.f32 %v4362_v4, %v3985_v53  ;;  %v10944_v4 = vor.u32 %v12217_v8, %v10943_v42  ;;  %v3858_v59 = vadd.f32 %v3857_v37, %v3688_v50  ;;  %v8709_v47 = vunpack.c.l.b16 %v17062_v46  ;;  %v19393_v8 = vld [vmem:[#allocation90_spill] sm:$0xff] }
 0x8a1   :  { %6944 = vmatpush.bf16.msra.mxu1 %v6923_v1  ;;  %v12204_v1 = vld [vmem:[%s17775_s3 + $0x5c0] sm:$0xff]  ;;  %10811 = vmatmul.msk.bf16.vlgmr.msra.gmra.mxu3 %vm4813_vm3, %v16118_v14  ;;  %v4955_v3 = vpop.f32.mrf.mxu1  ;;  %v3690_v53 = vpop.f32.mrf.mxu0  ;;  %v4498_v14 = vadd.f32 %v17010_v16, %v3986_v0 }
 0x8a2   :  { %7059 = vmatpush.bf16.msrb.mxu3 %v12213_v52  ;;  %v4625_v57 = vmax.f32 %v4497_v40, 0.0  ;;  %v12211_v52 = vld [vmem:[%s17775_s3 + $0x5f8] sm:$0xff]  ;;  %6930 = vmatpush.bf16.msrb.mxu0 %v12198_v23  ;;  %v8710_v23 = vunpack.c.h.b16 %v17062_v46  ;;  %v3987_v50 = vmax.f32 %v19393_v8, %v3858_v59  ;;  %v12196_v0 = vld [vmem:[%s17775_s3 + $0x580] sm:$0xff]  ;;  %v19395_v8 = vld [vmem:[#allocation228_spill] sm:$0xff] }
 0x8a3   :  { %6797 = vmatpush.bf16.msrb.mxu2 %v12187_v36  ;;  %v3522_v36 = vadd.f32 %v16992_v48, %v16961_v5  ;;  %v12185_v5 = vld [vmem:[%s17775_s3 + $0x528] sm:$0xff]  ;;  %v7056_v48 = vand.u32 %v10944_v4, %v15216_v12 }
 0x8a5   :  { %6945 = vmatpush.bf16.msra.mxu1 %v12205_v10  ;;  %v4691_v10 = vpack.c.bf16 %v4625_v57, %v4624_v19  ;;  %v4626_v57 = vmax.f32 %v4498_v14, 0.0  ;;  %v11077_v14 = vld [vmem:[%s17775_s3 + $0x6d8] sm:$0xf] }
 0x8a6   :  { %7060 = vmatpush.bf16.msrb.mxu3 %v12212_v17  ;;  %v11011_v17 = vor.u32 %v12228_v39, %v11010_v60  ;;  %6931 = vmatpush.bf16.msrb.mxu0 %v12197_v29  ;;  %v5086_v60 = vpop.f32.mrf.mxu3 }
 0x8a7   :  { %v8711_v40 = vunpack.c.l.b16 %v4691_v10  ;;  %v8712_v42 = vunpack.c.h.b16 %v4691_v10  ;;  %6798 = vmatpush.bf16.msrb.mxu2 %v12186_v49  ;;  %v12209_v49 = vld [vmem:[%s17775_s3 + $0x5e8] sm:$0xff]  ;;  %v3859_v29 = vpop.f32.mrf.mxu2 }
 0x8a8   :  { %v7189_v39 = vand.u32 %v11011_v17, %v15216_v12  ;;  %v3860_v10 = vadd.f32 %v3859_v29, %v3690_v53  ;;  %v12216_v17 = vld [vmem:[%s17775_s3 + $0x620] sm:$0xff]  ;;  %v12227_v53 = vld [vmem:[%s17775_s3 + $0x678] sm:$0xff] }
 0x8a9   :  { %6946 = vmatpush.bf16.msra.mxu1 %v12204_v1  ;;  %v17131_v46 = vpack.c.b16 %v8712_v42, %v8710_v23  ;;  %v4499_v1 = vadd.f32 %v17010_v16, %v3987_v50  ;;  %v17135_v19 = vpack.c.b16 %v8711_v40, %v8709_v47  ;;  %v12223_v16 = vld [vmem:[%s17775_s3 + $0x658] sm:$0xff]  ;;  %v4941_v59 = vpop.f32.mrf.mxu0  ;;  %v4372_v47 = vpop.permute.xlu1 %4371 }
 0x8aa   :  { %7061 = vmatpush.bf16.msrb.mxu3 %v12211_v52  ;;  %v19394_v52 = vld [vmem:[#allocation226_spill] sm:$0xff]  ;;  %6932 = vmatpush.bf16.msrb.mxu0 %v12196_v0  ;;  %v4942_v23 = vadd.f32 %v4941_v59, %v17047_v35  ;;  %v17157_v42 = vpop.f32.mrf.mxu1  ;;  %v3989_v50 = vmax.f32 %v19395_v8, %v3860_v10  ;;  %v12235_v59 = vld [vmem:[%s17775_s3 + $0x6b8] sm:$0xff] }
 0x8ab   :  { %v4627_v37 = vmax.f32 %v4499_v1, 0.0  ;;  %6799 = vmatpush.bf16.msrb.mxu2 %v12185_v5 }
 0x8ac   :  { %v4956_v35 = vadd.f32 %v4955_v3, %v4942_v23  ;;  %v4501_v0 = vadd.f32 %v4372_v47, %v3989_v50  ;;  %v12236_v3 = vld [vmem:[%s17775_s3 + $0x6c0] sm:$0xff]  ;;  %v12246_v23 = vld [vmem:[%s17775_s3 + $0x710] sm:$0xff] }
 0x8ad   :  { %7191 = vmatpush.bf16.msrb.mxu1 %v12225_v54  ;;  %v3988_v54 = vmax.f32 %v19394_v52, %v3522_v36  ;;  %v4692_v4 = vpack.c.bf16 %v4627_v37, %v4626_v57  ;;  %v12239_v36 = vld [vmem:[%s17775_s3 + $0x6d8] sm:$0x10]  ;;  %6933 = vmatmul.bf16.vlgmr.msrb.gmra.mxu0 %v16154_v6  ;;  %v12226_v6 = vld [vmem:[%s17775_s3 + $0x670] sm:$0xff] }
 0x8ae   :  { %7062 = vmatpush.bf16.msrb.mxu3 %v12210_v15  ;;  %7210 = vmatpush.bf16.msra.mxu0 %v7189_v39  ;;  %v12208_v15 = vld [vmem:[%s17775_s3 + $0x5e0] sm:$0xff]  ;;  %v11078_v5 = vor.u32 %v12239_v36, %v11077_v14  ;;  %v4629_v39 = vmax.f32 %v4501_v0, 0.0  ;;  %v12247_v57 = vld [vmem:[%s17775_s3 + $0x718] sm:$0xff]  ;;  %v12245_v0 = vld [vmem:[%s17775_s3 + $0x708] sm:$0xff] }
 0x8af   :  { %7077 = vmatpush.bf16.msra.mxu2 %v7056_v48  ;;  %v4500_v40 = vadd.f32 %v4372_v47, %v3988_v54  ;;  %v17170_v48 = vpop.f32.mrf.mxu3  ;;  %v5072_v52 = vpop.f32.mrf.mxu2  ;;  %v12221_v54 = vld [vmem:[%s17775_s3 + $0x648] sm:$0xff]  ;;  %v8842_v10 = vunpack.c.l.b16 %v4692_v4 }
 0x8b0   :  { %6800 = vmatmul.bf16.vlgmr.msrb.gmra.mxu2 %v16120_v61  ;;  %10878 = vmatmul.msk.bf16.vlgmr.msra.gmra.mxu1 %vm4813_vm3, %v16151_v45  ;;  %v12215_v61 = vld [vmem:[%s17775_s3 + $0x618] sm:$0xff]  ;;  %v7322_v37 = vand.u32 %v11078_v5, %v15216_v12  ;;  %v5087_v29 = vadd.f32 %v5086_v60, %v5072_v52  ;;  %v12220_v60 = vld [vmem:[%s17775_s3 + $0x640] sm:$0xff]  ;;  %v12250_v5 = vld [vmem:[%s17775_s3 + $0x730] sm:$0x10] }
 0x8b1   :  { %7192 = vmatpush.bf16.msrb.mxu1 %v12224_v28  ;;  %v12222_v28 = vld [vmem:[%s17775_s3 + $0x650] sm:$0xff]  ;;  %v4628_v1 = vmax.f32 %v4500_v40, 0.0  ;;  %v12207_v45 = vld [vmem:[%s17775_s3 + $0x5d8] sm:$0xff]  ;;  %v12244_v52 = vld [vmem:[%s17775_s3 + $0x700] sm:$0xff] }
 0x8b2   :  { %7063 = vmatpush.bf16.msrb.mxu3 %v12209_v49  ;;  %7211 = vmatpush.bf16.msra.mxu0 %v12227_v53  ;;  %v5091_v47 = vadd.f32 %v5087_v29, %v4956_v35  ;;  %v12238_v53 = vld [vmem:[%s17775_s3 + $0x6d0] sm:$0xff]  ;;  %v5205_v40 = vpop.f32.mrf.mxu1 }
 0x8b3   :  { %7078 = vmatpush.bf16.msra.mxu2 %v12216_v17  ;;  %v4693_v49 = vpack.c.bf16 %v4629_v39, %v4628_v1  ;;  %v8843_v17 = vunpack.c.h.b16 %v4692_v4  ;;  %v12234_v35 = vld [vmem:[%s17775_s3 + $0x6b0] sm:$0xff] }
 0x8b5   :  { %7193 = vmatpush.bf16.msrb.mxu1 %v12223_v16  ;;  %v17191_v16 = vpop.f32.mrf.mxu0  ;;  %v8844_v14 = vunpack.c.l.b16 %v4693_v49  ;;  %v8845_v36 = vunpack.c.h.b16 %v4693_v49  ;;  %v12232_v49 = vld [vmem:[%s17775_s3 + $0x6a0] sm:$0xff] }
 0x8b6   :  { %7064 = vmatpush.bf16.msrb.mxu3 %v12208_v15  ;;  %7212 = vmatpush.bf16.msra.mxu0 %v12226_v6  ;;  %v12219_v6 = vld [vmem:[%s17775_s3 + $0x638] sm:$0xff] }
 0x8b7   :  { %7079 = vmatpush.bf16.msra.mxu2 %v12215_v61  ;;  %v17205_v4 = vpack.c.b16 %v8845_v36, %v8843_v17  ;;  %v5219_v8 = vpop.f32.mrf.mxu3  ;;  %v17207_v50 = vpack.c.b16 %v8844_v14, %v8842_v10  ;;  %v17222_v61 = vpop.f32.mrf.mxu2  ;;  %v12249_v17 = vld [vmem:[%s17775_s3 + $0x728] sm:$0xff]  ;;  %v12256_v36 = vld [vmem:[%s17775_s3 + $0x760] sm:$0xff] }
 0x8b8   :  { %v5220_v15 = vadd.f32 %v5219_v8, %v5205_v40  ;;  %v12248_v40 = vld [vmem:[%s17775_s3 + $0x720] sm:$0xff]  ;;  %v11211_v8 = vld [vmem:[%s17775_s3 + $0x788] sm:$0xf] }
 0x8b9   :  { %7194 = vmatpush.bf16.msrb.mxu1 %v12222_v28  ;;  %v11144_v28 = vld [vmem:[%s17775_s3 + $0x730] sm:$0xf] }
 0x8ba   :  { %7065 = vmatpush.bf16.msrb.mxu3 %v12207_v45  ;;  %7457 = vmatpush.bf16.msrb.mxu0 %v12247_v57  ;;  %v11145_v39 = vor.u32 %v12250_v5, %v11144_v28  ;;  %v12258_v45 = vld [vmem:[%s17775_s3 + $0x770] sm:$0xff]  ;;  %v12233_v57 = vld [vmem:[%s17775_s3 + $0x6a8] sm:$0xff]  ;;  %v12255_v28 = vld [vmem:[%s17775_s3 + $0x758] sm:$0xff] }
 0x8bb   :  { %7324 = vmatpush.bf16.msrb.mxu2 %v12236_v3  ;;  %v12237_v3 = vld [vmem:[%s17775_s3 + $0x6c8] sm:$0xff] }
 0x8bc   :  { %v12269_v5 = vld [vmem:[%s17775_s3 + $0x7c8] sm:$0xff] }
 0x8bd   :  { %7195 = vmatpush.bf16.msrb.mxu1 %v12221_v54  ;;  %7066 = vmatmul.bf16.vlgmr.msrb.gmra.mxu3 %v16183_v34  ;;  %v5224_v34 = vadd.f32 %v5220_v15, %v5091_v47  ;;  %v5338_v1 = vpop.f32.mrf.mxu0  ;;  %v12218_v54 = vld [vmem:[%s17775_s3 + $0x630] sm:$0xff]  ;;  %v12231_v47 = vld [vmem:[%s17775_s3 + $0x698] sm:$0xff]  ;;  %v12261_v15 = vld [vmem:[%s17775_s3 + $0x788] sm:$0x10] }
 0x8be   :  { %7343 = vmatpush.bf16.msra.mxu3 %v7322_v37  ;;  %7458 = vmatpush.bf16.msrb.mxu0 %v12246_v23  ;;  %v7455_v37 = vand.u32 %v11145_v39, %v15216_v12  ;;  %v17269_v23 = vpop.f32.mrf.mxu1 }
 0x8bf   :  { %7325 = vmatpush.bf16.msrb.mxu2 %v12235_v59  ;;  %11012 = vmatmul.msk.bf16.vlgmr.msra.gmra.mxu0 %vm4813_vm3, %v16210_v24  ;;  %v17253_v29 = vpop.f32.mrf.mxu3  ;;  %v12243_v24 = vld [vmem:[%s17775_s3 + $0x6f8] sm:$0xff]  ;;  %v5352_v10 = vpop.f32.mrf.mxu2 }
 0x8c0   :  { %10945 = vmatmul.msk.bf16.vlgmr.msra.gmra.mxu2 %vm4813_vm3, %v16181_v58  ;;  %v12257_v58 = vld [vmem:[%s17775_s3 + $0x768] sm:$0xff]  ;;  %v5353_v59 = vadd.f32 %v5352_v10, %v5338_v1 }
 0x8c1   :  { %7196 = vmatpush.bf16.msrb.mxu1 %v12220_v60  ;;  %v12253_v10 = vld [vmem:[%s17775_s3 + $0x748] sm:$0xff] }
 0x8c2   :  { %7344 = vmatpush.bf16.msra.mxu3 %v12238_v53  ;;  %7459 = vmatpush.bf16.msrb.mxu0 %v12245_v0  ;;  %v5357_v60 = vadd.f32 %v5353_v59, %v5224_v34  ;;  %v12242_v53 = vld [vmem:[%s17775_s3 + $0x6f0] sm:$0xff]  ;;  %v12241_v34 = vld [vmem:[%s17775_s3 + $0x6e8] sm:$0xff]  ;;  %v12267_v59 = vld [vmem:[%s17775_s3 + $0x7b8] sm:$0xff] }
 0x8c3   :  { %7326 = vmatpush.bf16.msrb.mxu2 %v12234_v35  ;;  %v12272_v35 = vld [vmem:[%s17775_s3 + $0x7e0] sm:$0x10]  ;;  %v12230_v0 = vld [vmem:[%s17775_s3 + $0x690] sm:$0xff] }
 0x8c5   :  { %7197 = vmatpush.bf16.msrb.mxu1 %v12219_v6  ;;  %v17261_v14 = vpop.f32.mrf.mxu0 }
 0x8c6   :  { %7345 = vmatpush.bf16.msra.mxu3 %v12237_v3  ;;  %7460 = vmatpush.bf16.msrb.mxu0 %v12244_v52  ;;  %v11212_v3 = vor.u32 %v12261_v15, %v11211_v8  ;;  %v5604_v52 = vpop.f32.mrf.mxu1  ;;  %v12271_v8 = vld [vmem:[%s17775_s3 + $0x7d8] sm:$0xff] }
 0x8c7   :  { %7327 = vmatpush.bf16.msrb.mxu2 %v12233_v57  ;;  %v17304_v6 = vpop.f32.mrf.mxu2  ;;  %v5471_v39 = vpop.f32.mrf.mxu3  ;;  %v12268_v57 = vld [vmem:[%s17775_s3 + $0x7c0] sm:$0xff] }
 0x8c9   :  { %7198 = vmatpush.bf16.msrb.mxu1 %v12218_v54  ;;  %v12229_v54 = vld [vmem:[%s17775_s3 + $0x688] sm:$0xff] }
 0x8ca   :  { %7590 = vmatpush.bf16.msrb.mxu3 %v12258_v45  ;;  %7461 = vmatpush.bf16.msrb.mxu0 %v12243_v24 }
 0x8cb   :  { %7328 = vmatpush.bf16.msrb.mxu2 %v12232_v49  ;;  %v7588_v49 = vand.u32 %v11212_v3, %v15216_v12 }
 0x8cc   :  { %7199 = vmatmul.bf16.vlgmr.msrb.gmra.mxu1 %v16212_v11  ;;  %v11278_v11 = vld [vmem:[%s17775_s3 + $0x7e0] sm:$0xf] }
 0x8cd   :  { %7476 = vmatpush.bf16.msra.mxu1 %v7455_v37  ;;  %11079 = vmatmul.msk.bf16.vlgmr.msra.gmra.mxu3 %vm4813_vm3, %v16258_v55  ;;  %v11279_v1 = vor.u32 %v12272_v35, %v11278_v11  ;;  %v5618_v45 = vpop.f32.mrf.mxu0  ;;  %v12254_v55 = vld [vmem:[%s17775_s3 + $0x750] sm:$0xff]  ;;  %v12240_v37 = vld [vmem:[%s17775_s3 + $0x6e0] sm:$0xff] }
 0x8ce   :  { %7591 = vmatpush.bf16.msrb.mxu3 %v12257_v58  ;;  %7462 = vmatpush.bf16.msrb.mxu0 %v12242_v53  ;;  %v5619_v58 = vadd.f32 %v5618_v45, %v5604_v52  ;;  %v12283_v53 = vld [vmem:[%s17775_s3 + $0x838] sm:$0x10]  ;;  %v12252_v11 = vld [vmem:[%s17775_s3 + $0x740] sm:$0xff]  ;;  %v12290_v52 = vld [vmem:[%s17775_s3 + $0x870] sm:$0xff] }
 0x8cf   :  { %7329 = vmatpush.bf16.msrb.mxu2 %v12231_v47  ;;  %v7721_v24 = vand.u32 %v11279_v1, %v15216_v12  ;;  %v11345_v47 = vld [vmem:[%s17775_s3 + $0x838] sm:$0xf]  ;;  %v17344_v35 = vpop.f32.mrf.mxu3 }
 0x8d0   :  { %v12291_v1 = vld [vmem:[%s17775_s3 + $0x878] sm:$0xff] }
 0x8d1   :  { %7477 = vmatpush.bf16.msra.mxu1 %v12249_v17  ;;  %v5485_v17 = vpop.f32.mrf.mxu2 }
 0x8d2   :  { %7592 = vmatpush.bf16.msrb.mxu3 %v12256_v36  ;;  %7463 = vmatpush.bf16.msrb.mxu0 %v12241_v34  ;;  %v12260_v36 = vld [vmem:[%s17775_s3 + $0x780] sm:$0xff]  ;;  %v11346_v34 = vor.u32 %v12283_v53, %v11345_v47  ;;  %v12289_v47 = vld [vmem:[%s17775_s3 + $0x868] sm:$0xff] }
 0x8d3   :  { %7330 = vmatpush.bf16.msrb.mxu2 %v12230_v0  ;;  %v12266_v0 = vld [vmem:[%s17775_s3 + $0x7b0] sm:$0xff]  ;;  %v12281_v53 = vld [vmem:[%s17775_s3 + $0x828] sm:$0xff] }
 0x8d4   :  { %v7854_v45 = vand.u32 %v11346_v34, %v15216_v12  ;;  %v12288_v34 = vld [vmem:[%s17775_s3 + $0x860] sm:$0xff] }
 0x8d5   :  { %7478 = vmatpush.bf16.msra.mxu1 %v12248_v40  ;;  %v5486_v40 = vadd.f32 %v5485_v17, %v5471_v39  ;;  %v17338_v15 = vpop.f32.mrf.mxu0  ;;  %v12265_v39 = vld [vmem:[%s17775_s3 + $0x7a8] sm:$0xff]  ;;  %v11412_v17 = vld [vmem:[%s17775_s3 + $0x890] sm:$0xf] }
 0x8d6   :  { %7593 = vmatpush.bf16.msrb.mxu3 %v12255_v28  ;;  %7464 = vmatpush.bf16.msrb.mxu0 %v12240_v37  ;;  %v12264_v37 = vld [vmem:[%s17775_s3 + $0x7a0] sm:$0xff] }
 0x8d7   :  { %7331 = vmatpush.bf16.msrb.mxu2 %v12229_v54  ;;  %v5490_v28 = vadd.f32 %v5486_v40, %v5357_v60  ;;  %v12280_v60 = vld [vmem:[%s17775_s3 + $0x820] sm:$0xff] }
 0x8d9   :  { %7723 = vmatpush.bf16.msrb.mxu1 %v12269_v5  ;;  %7465 = vmatmul.bf16.vlgmr.msrb.gmra.mxu0 %v16309_v18  ;;  %v17347_v5 = vpop.f32.mrf.mxu1  ;;  %v12270_v18 = vld [vmem:[%s17775_s3 + $0x7d0] sm:$0xff]  ;;  %v5623_v3 = vadd.f32 %v5619_v58, %v5490_v28  ;;  %v12277_v28 = vld [vmem:[%s17775_s3 + $0x808] sm:$0xff] }
 0x8da   :  { %7594 = vmatpush.bf16.msrb.mxu3 %v12254_v55  ;;  %7742 = vmatpush.bf16.msra.mxu0 %v7721_v24  ;;  %v17373_v55 = vpop.f32.mrf.mxu2  ;;  %v12282_v58 = vld [vmem:[%s17775_s3 + $0x830] sm:$0xff]  ;;  %v5751_v24 = vpop.f32.mrf.mxu3 }
 0x8db   :  { %7609 = vmatpush.bf16.msra.mxu2 %v7588_v49 }
 0x8dc   :  { %7332 = vmatmul.bf16.vlgmr.msrb.gmra.mxu2 %v16263_v13  ;;  %11146 = vmatmul.msk.bf16.vlgmr.msra.gmra.mxu1 %vm4813_vm3, %v16306_v62  ;;  %v12259_v13 = vld [vmem:[%s17775_s3 + $0x778] sm:$0xff] }
 0x8dd   :  { %7724 = vmatpush.bf16.msrb.mxu1 %v12268_v57  ;;  %v12251_v62 = vld [vmem:[%s17775_s3 + $0x738] sm:$0xff]  ;;  %v5870_v54 = vpop.f32.mrf.mxu0 }
 0x8de   :  { %7595 = vmatpush.bf16.msrb.mxu3 %v12253_v10  ;;  %7743 = vmatpush.bf16.msra.mxu0 %v12271_v8  ;;  %v12279_v57 = vld [vmem:[%s17775_s3 + $0x818] sm:$0xff]  ;;  %v12302_v8 = vld [vmem:[%s17775_s3 + $0x8d0] sm:$0xff] }
 0x8df   :  { %7610 = vmatpush.bf16.msra.mxu2 %v12260_v36  ;;  %v12294_v36 = vld [vmem:[%s17775_s3 + $0x890] sm:$0x10] }
 0x8e0   :  { %v11413_v40 = vor.u32 %v12294_v36, %v11412_v17  ;;  %v12299_v17 = vld [vmem:[%s17775_s3 + $0x8b8] sm:$0xff]  ;;  %v12313_v36 = vld [vmem:[%s17775_s3 + $0x928] sm:$0xff] }
 0x8e1   :  { %7725 = vmatpush.bf16.msrb.mxu1 %v12267_v59  ;;  %v5884_v49 = vpop.f32.mrf.mxu1  ;;  %v12278_v59 = vld [vmem:[%s17775_s3 + $0x810] sm:$0xff] }
 0x8e2   :  { %7596 = vmatpush.bf16.msrb.mxu3 %v12252_v11  ;;  %7744 = vmatpush.bf16.msra.mxu0 %v12270_v18  ;;  %v5885_v10 = vadd.f32 %v5884_v49, %v5870_v54  ;;  %v5737_v11 = vpop.f32.mrf.mxu2 }
 0x8e3   :  { %7611 = vmatpush.bf16.msra.mxu2 %v12259_v13  ;;  %v4850_v13 = vadd.f32 %v17078_v9, %v17051_v25  ;;  %v12276_v25 = vld [vmem:[%s17775_s3 + $0x800] sm:$0xff]  ;;  %v12287_v9 = vld [vmem:[%s17775_s3 + $0x858] sm:$0xff] }
 0x8e5   :  { %7726 = vmatpush.bf16.msrb.mxu1 %v12266_v0  ;;  %v5752_v0 = vadd.f32 %v5751_v24, %v5737_v11  ;;  %v5872_v18 = vpop.f32.mrf.mxu0  ;;  %v12305_v24 = vld [vmem:[%s17775_s3 + $0x8e8] sm:$0x10] }
 0x8e6   :  { %7597 = vmatpush.bf16.msrb.mxu3 %v12251_v62  ;;  %7989 = vmatpush.bf16.msrb.mxu0 %v12291_v1  ;;  %v7987_v1 = vand.u32 %v11413_v40, %v15216_v12 }
 0x8e7   :  { %7856 = vmatpush.bf16.msrb.mxu2 %v12280_v60  ;;  %v12262_v60 = vld [vmem:[%s17775_s3 + $0x790] sm:$0xff]  ;;  %v5756_v62 = vadd.f32 %v5752_v0, %v5623_v3  ;;  %v5621_v0 = vadd.f32 %v17338_v15, %v17347_v5 }
 0x8e9   :  { %7727 = vmatpush.bf16.msrb.mxu1 %v12265_v39  ;;  %7598 = vmatmul.bf16.vlgmr.msrb.gmra.mxu3 %v16378_v7  ;;  %v12263_v7 = vld [vmem:[%s17775_s3 + $0x798] sm:$0xff]  ;;  %v4944_v39 = vadd.f32 %v17191_v16, %v4850_v13  ;;  %v5889_v3 = vadd.f32 %v5885_v10, %v5756_v62  ;;  %v5089_v16 = vadd.f32 %v17170_v48, %v17222_v61  ;;  %v11546_v10 = vld [vmem:[%s17775_s3 + $0x940] sm:$0xf] }
 0x8ea   :  { %7875 = vmatpush.bf16.msra.mxu3 %v7854_v45  ;;  %7990 = vmatpush.bf16.msrb.mxu0 %v12290_v52  ;;  %v12293_v52 = vld [vmem:[%s17775_s3 + $0x888] sm:$0xff]  ;;  %v5739_v49 = vpop.f32.mrf.mxu2  ;;  %v12275_v48 = vld [vmem:[%s17775_s3 + $0x7f8] sm:$0xff] }
 0x8eb   :  { %7857 = vmatpush.bf16.msrb.mxu2 %v12279_v57  ;;  %11280 = vmatmul.msk.bf16.vlgmr.msra.gmra.mxu0 %vm4813_vm3, %v16437_v27  ;;  %v12301_v27 = vld [vmem:[%s17775_s3 + $0x8c8] sm:$0xff]  ;;  %v5753_v57 = vpop.f32.mrf.mxu3  ;;  %v4958_v54 = vadd.f32 %v17157_v42, %v4944_v39  ;;  %v12286_v42 = vld [vmem:[%s17775_s3 + $0x850] sm:$0xff] }
 0x8ec   :  { %11213 = vmatmul.msk.bf16.vlgmr.msra.gmra.mxu2 %vm4813_vm3, %v16376_v44  ;;  %v5886_v44 = vpop.f32.mrf.mxu1 }
 0x8ed   :  { %7728 = vmatpush.bf16.msrb.mxu1 %v12264_v37  ;;  %v17426_v45 = vadd.f32 %v5886_v44, %v5872_v18  ;;  %v5222_v37 = vadd.f32 %v17253_v29, %v17269_v23  ;;  %v5092_v61 = vadd.f32 %v5089_v16, %v4958_v54  ;;  %v5355_v29 = vadd.f32 %v17304_v6, %v17261_v14  ;;  %v11479_v23 = vld [vmem:[%s17775_s3 + $0x8e8] sm:$0xf]  ;;  %v12316_v14 = vld [vmem:[%s17775_s3 + $0x940] sm:$0x10]  ;;  %v6150_v40 = vpop.f32.mrf.mxu0  ;;  %v12327_v54 = vld [vmem:[%s17775_s3 + $0x998] sm:$0x10] }
 0x8ee   :  { %7876 = vmatpush.bf16.msra.mxu3 %v12282_v58  ;;  %7991 = vmatpush.bf16.msrb.mxu0 %v12289_v47  ;;  %v12300_v58 = vld [vmem:[%s17775_s3 + $0x8c0] sm:$0xff]  ;;  %v12274_v47 = vld [vmem:[%s17775_s3 + $0x7f0] sm:$0xff]  ;;  %v12273_v18 = vld [vmem:[%s17775_s3 + $0x7e8] sm:$0xff]  ;;  %v5754_v44 = vadd.f32 %v5753_v57, %v5739_v49 }
 0x8ef   :  { %7858 = vmatpush.bf16.msrb.mxu2 %v12278_v59  ;;  %v5225_v6 = vadd.f32 %v5222_v37, %v5092_v61  ;;  %v5488_v59 = vadd.f32 %v17373_v55, %v17344_v35  ;;  %v12285_v35 = vld [vmem:[%s17775_s3 + $0x848] sm:$0xff]  ;;  %v11480_v55 = vor.u32 %v12305_v24, %v11479_v23  ;;  %v12315_v37 = vld [vmem:[%s17775_s3 + $0x938] sm:$0xff] }
 0x8f1   :  { %7729 = vmatpush.bf16.msrb.mxu1 %v12263_v7  ;;  %v5358_v7 = vadd.f32 %v5355_v29, %v5225_v6  ;;  %v8120_v62 = vand.u32 %v11480_v55, %v15216_v12  ;;  %v12310_v29 = vld [vmem:[%s17775_s3 + $0x910] sm:$0xff]  ;;  %v12335_v6 = vld [vmem:[%s17775_s3 + $0x9d8] sm:$0xff] }
 0x8f2   :  { %7877 = vmatpush.bf16.msra.mxu3 %v12281_v53  ;;  %7992 = vmatpush.bf16.msrb.mxu0 %v12288_v34  ;;  %v6017_v34 = vpop.f32.mrf.mxu2 }
 0x8f3   :  { %7859 = vmatpush.bf16.msrb.mxu2 %v12277_v28  ;;  %v6003_v53 = vpop.f32.mrf.mxu3  ;;  %v5491_v11 = vadd.f32 %v5488_v59, %v5358_v7  ;;  %v12312_v28 = vld [vmem:[%s17775_s3 + $0x920] sm:$0xff]  ;;  %v12309_v59 = vld [vmem:[%s17775_s3 + $0x908] sm:$0xff] }
 0x8f4   :  { %v6136_v13 = vpop.f32.mrf.mxu1  ;;  %v12308_v7 = vld [vmem:[%s17775_s3 + $0x900] sm:$0xff] }
 0x8f5   :  { %7730 = vmatpush.bf16.msrb.mxu1 %v12262_v60  ;;  %v12284_v60 = vld [vmem:[%s17775_s3 + $0x840] sm:$0xff]  ;;  %v6151_v39 = vadd.f32 %v6150_v40, %v6136_v13  ;;  %v5624_v15 = vadd.f32 %v5621_v0, %v5491_v11  ;;  %v6152_v49 = vpop.f32.mrf.mxu0  ;;  %v12338_v0 = vld [vmem:[%s17775_s3 + $0x9f0] sm:$0x10]  ;;  %v12325_v13 = vld [vmem:[%s17775_s3 + $0x988] sm:$0xff] }
 0x8f6   :  { %8122 = vmatpush.bf16.msrb.mxu3 %v12302_v8  ;;  %7993 = vmatpush.bf16.msrb.mxu0 %v12287_v9  ;;  %v11547_v8 = vor.u32 %v12316_v14, %v11546_v10  ;;  %v12311_v9 = vld [vmem:[%s17775_s3 + $0x918] sm:$0xff]  ;;  %v12314_v10 = vld [vmem:[%s17775_s3 + $0x930] sm:$0xff]  ;;  %v12324_v14 = vld [vmem:[%s17775_s3 + $0x980] sm:$0xff] }
 0x8f7   :  { %7860 = vmatpush.bf16.msrb.mxu2 %v12276_v25  ;;  %v12297_v25 = vld [vmem:[%s17775_s3 + $0x8a8] sm:$0xff]  ;;  %v5757_v16 = vadd.f32 %v5754_v44, %v5624_v15  ;;  %v12346_v44 = vld [vmem:[%s17775_s3 + $0xa30] sm:$0xff] }
 0x8f8   :  { %7731 = vmatmul.bf16.vlgmr.msrb.gmra.mxu1 %v16440_v38  ;;  %v12292_v38 = vld [vmem:[%s17775_s3 + $0x880] sm:$0xff] }
 0x8f9   :  { %8008 = vmatpush.bf16.msra.mxu1 %v7987_v1  ;;  %11347 = vmatmul.msk.bf16.vlgmr.msra.gmra.mxu3 %vm4813_vm3, %v16506_v22  ;;  %v12298_v22 = vld [vmem:[%s17775_s3 + $0x8b0] sm:$0xff]  ;;  %v6018_v1 = vadd.f32 %v6017_v34, %v6003_v53  ;;  %v12333_v34 = vld [vmem:[%s17775_s3 + $0x9c8] sm:$0xff] }
 0x8fa   :  { %8123 = vmatpush.bf16.msrb.mxu3 %v12301_v27  ;;  %7994 = vmatpush.bf16.msrb.mxu0 %v12286_v42  ;;  %v8253_v27 = vand.u32 %v11547_v8, %v15216_v12  ;;  %v6019_v42 = vpop.f32.mrf.mxu2  ;;  %v12326_v53 = vld [vmem:[%s17775_s3 + $0x990] sm:$0xff] }
 0x8fb   :  { %7861 = vmatpush.bf16.msrb.mxu2 %v12275_v48  ;;  %v6022_v5 = vadd.f32 %v6018_v1, %v5889_v3  ;;  %v12304_v3 = vld [vmem:[%s17775_s3 + $0x8e0] sm:$0xff]  ;;  %v12321_v1 = vld [vmem:[%s17775_s3 + $0x968] sm:$0xff] }
 0x8fc   :  { %v12296_v48 = vld [vmem:[%s17775_s3 + $0x8a0] sm:$0xff]  ;;  %v6138_v61 = vpop.f32.mrf.mxu1 }
 0x8fd   :  { %8009 = vmatpush.bf16.msra.mxu1 %v12293_v52  ;;  %v17510_v57 = vadd.f32 %v6151_v39, %v6022_v5  ;;  %v11613_v52 = vld [vmem:[%s17775_s3 + $0x998] sm:$0xf]  ;;  %v12332_v39 = vld [vmem:[%s17775_s3 + $0x9c0] sm:$0xff]  ;;  %v12306_v5 = vld [vmem:[%s17775_s3 + $0x8f0] sm:$0xff] }
 0x8fe   :  { %8124 = vmatpush.bf16.msrb.mxu3 %v12300_v58  ;;  %7995 = vmatpush.bf16.msrb.mxu0 %v12285_v35  ;;  %v6005_v58 = vpop.f32.mrf.mxu3  ;;  %v11614_v23 = vor.u32 %v12327_v54, %v11613_v52  ;;  %v12334_v35 = vld [vmem:[%s17775_s3 + $0x9d0] sm:$0xff]  ;;  %v6402_v55 = vpop.f32.mrf.mxu0  ;;  %v12331_v52 = vld [vmem:[%s17775_s3 + $0x9b8] sm:$0xff] }
 0x8ff   :  { %7862 = vmatpush.bf16.msrb.mxu2 %v12274_v47  ;;  %v6020_v24 = vadd.f32 %v6019_v42, %v6005_v58  ;;  %v12323_v47 = vld [vmem:[%s17775_s3 + $0x978] sm:$0xff]  ;;  %v12330_v42 = vld [vmem:[%s17775_s3 + $0x9b0] sm:$0xff] }
 0x901   :  { %8010 = vmatpush.bf16.msra.mxu1 %v12292_v38  ;;  %v6153_v38 = vadd.f32 %v6152_v49, %v6138_v61  ;;  %v12344_v49 = vld [vmem:[%s17775_s3 + $0xa20] sm:$0xff] }
 0x902   :  { %8125 = vmatpush.bf16.msrb.mxu3 %v12299_v17  ;;  %7996 = vmatpush.bf16.msrb.mxu0 %v12284_v60  ;;  %v8386_v17 = vand.u32 %v11614_v23, %v15216_v12  ;;  %v11747_v23 = vld [vmem:[%s17775_s3 + $0xa48] sm:$0xf] }
 0x903   :  { %7863 = vmatpush.bf16.msrb.mxu2 %v12273_v18 }
 0x904   :  { %v6416_v8 = vpop.f32.mrf.mxu1 }
 0x905   :  { %8255 = vmatpush.bf16.msrb.mxu1 %v12313_v36  ;;  %7997 = vmatmul.bf16.vlgmr.msrb.gmra.mxu0 %v16595_v41  ;;  %v12303_v41 = vld [vmem:[%s17775_s3 + $0x8d8] sm:$0xff]  ;;  %v6417_v11 = vadd.f32 %v6416_v8, %v6402_v55 }
 0x906   :  { %8126 = vmatpush.bf16.msrb.mxu3 %v12298_v22  ;;  %8274 = vmatpush.bf16.msra.mxu0 %v8253_v27  ;;  %v6283_v40 = vpop.f32.mrf.mxu3  ;;  %v12322_v22 = vld [vmem:[%s17775_s3 + $0x970] sm:$0xff]  ;;  %v6404_v15 = vpop.f32.mrf.mxu0 }
 0x907   :  { %8141 = vmatpush.bf16.msra.mxu2 %v8120_v62  ;;  %v6269_v18 = vpop.f32.mrf.mxu2 }
 0x908   :  { %7864 = vmatmul.bf16.vlgmr.msrb.gmra.mxu2 %v16514_v43  ;;  %11414 = vmatmul.msk.bf16.vlgmr.msra.gmra.mxu1 %vm4813_vm3, %v16586_v20  ;;  %v5890_v43 = vadd.f32 %v17426_v45, %v5757_v16  ;;  %v12295_v45 = vld [vmem:[%s17775_s3 + $0x898] sm:$0xff]  ;;  %v6284_v62 = vadd.f32 %v6283_v40, %v6269_v18  ;;  %v12345_v16 = vld [vmem:[%s17775_s3 + $0xa28] sm:$0xff] }
 0x909   :  { %8256 = vmatpush.bf16.msrb.mxu1 %v12312_v28  ;;  %v11680_v28 = vld [vmem:[%s17775_s3 + $0x9f0] sm:$0xf]  ;;  %v12371_v18 = vld [vmem:[%s17775_s3 + $0xaf8] sm:$0x10] }
 0x90a   :  { %8127 = vmatpush.bf16.msrb.mxu3 %v12297_v25  ;;  %8275 = vmatpush.bf16.msra.mxu0 %v12315_v37  ;;  %v6023_v20 = vadd.f32 %v6020_v24, %v5890_v43  ;;  %v11681_v60 = vor.u32 %v12338_v0, %v11680_v28  ;;  %v6288_v27 = vadd.f32 %v6284_v62, %v17510_v57  ;;  %v12337_v37 = vld [vmem:[%s17775_s3 + $0x9e8] sm:$0xff]  ;;  %v11814_v43 = vld [vmem:[%s17775_s3 + $0xaa0] sm:$0xf]  ;;  %v12360_v24 = vld [vmem:[%s17775_s3 + $0xaa0] sm:$0x10] }
 0x90b   :  { %8142 = vmatpush.bf16.msra.mxu2 %v12304_v3  ;;  %v12341_v0 = vld [vmem:[%s17775_s3 + $0xa08] sm:$0xff] }
 0x90c   :  { %v17554_v36 = vadd.f32 %v6153_v38, %v6023_v20  ;;  %v6418_v25 = vpop.f32.mrf.mxu1  ;;  %v6421_v57 = vadd.f32 %v6417_v11, %v6288_v27  ;;  %v12343_v38 = vld [vmem:[%s17775_s3 + $0xa18] sm:$0xff]  ;;  %v12318_v20 = vld [vmem:[%s17775_s3 + $0x950] sm:$0xff] }
 0x90d   :  { %8257 = vmatpush.bf16.msrb.mxu1 %v12311_v9  ;;  %v8519_v9 = vand.u32 %v11681_v60, %v15216_v12 }
 0x90e   :  { %8128 = vmatpush.bf16.msrb.mxu3 %v12296_v48  ;;  %8276 = vmatpush.bf16.msra.mxu0 %v12314_v10  ;;  %v6285_v3 = vpop.f32.mrf.mxu3  ;;  %v12319_v48 = vld [vmem:[%s17775_s3 + $0x958] sm:$0xff] }
 0x90f   :  { %8143 = vmatpush.bf16.msra.mxu2 %v12303_v41  ;;  %v6271_v54 = vpop.f32.mrf.mxu2  ;;  %v12357_v41 = vld [vmem:[%s17775_s3 + $0xa88] sm:$0xff] }
 0x910   :  { %v6286_v58 = vadd.f32 %v6285_v3, %v6271_v54 }
 0x911   :  { %8258 = vmatpush.bf16.msrb.mxu1 %v12310_v29  ;;  %v12336_v29 = vld [vmem:[%s17775_s3 + $0x9e0] sm:$0xff] }
 0x912   :  { %8129 = vmatpush.bf16.msrb.mxu3 %v12295_v45  ;;  %8521 = vmatpush.bf16.msrb.mxu0 %v12335_v6  ;;  %v6289_v61 = vadd.f32 %v6286_v58, %v17554_v36  ;;  %v12329_v45 = vld [vmem:[%s17775_s3 + $0x9a8] sm:$0xff]  ;;  %v12370_v58 = vld [vmem:[%s17775_s3 + $0xaf0] sm:$0xff] }
 0x913   :  { %8388 = vmatpush.bf16.msrb.mxu2 %v12324_v14 }
 0x915   :  { %8259 = vmatpush.bf16.msrb.mxu1 %v12309_v59  ;;  %8130 = vmatmul.bf16.vlgmr.msrb.gmra.mxu3 %v16689_v56  ;;  %v12307_v56 = vld [vmem:[%s17775_s3 + $0x8f8] sm:$0xff]  ;;  %v11815_v59 = vor.u32 %v12360_v24, %v11814_v43 }
 0x916   :  { %8407 = vmatpush.bf16.msra.mxu3 %v8386_v17  ;;  %8522 = vmatpush.bf16.msrb.mxu0 %v12334_v35  ;;  %v6535_v14 = vpop.f32.mrf.mxu3  ;;  %v6682_v17 = vpop.f32.mrf.mxu0  ;;  %v12356_v35 = vld [vmem:[%s17775_s3 + $0xa80] sm:$0xff] }
 0x917   :  { %8389 = vmatpush.bf16.msrb.mxu2 %v12323_v47  ;;  %11548 = vmatmul.msk.bf16.vlgmr.msra.gmra.mxu0 %vm4813_vm3, %v16772_v26  ;;  %v12320_v26 = vld [vmem:[%s17775_s3 + $0x960] sm:$0xff]  ;;  %v6549_v36 = vpop.f32.mrf.mxu2 }
 0x918   :  { %11481 = vmatmul.msk.bf16.vlgmr.msra.gmra.mxu2 %vm4813_vm3, %v16681_v21  ;;  %v6419_v21 = vadd.f32 %v6418_v25, %v6404_v15  ;;  %v6550_v47 = vadd.f32 %v6549_v36, %v6535_v14  ;;  %v12364_v14 = vld [vmem:[%s17775_s3 + $0xac0] sm:$0xff] }
 0x919   :  { %8260 = vmatpush.bf16.msrb.mxu1 %v12308_v7  ;;  %v12317_v7 = vld [vmem:[%s17775_s3 + $0x948] sm:$0xff] }
 0x91a   :  { %8408 = vmatpush.bf16.msra.mxu3 %v12326_v53  ;;  %8523 = vmatpush.bf16.msrb.mxu0 %v12333_v34  ;;  %v6422_v10 = vadd.f32 %v6419_v21, %v6289_v61  ;;  %v12328_v53 = vld [vmem:[%s17775_s3 + $0x9a0] sm:$0xff]  ;;  %v6554_v40 = vadd.f32 %v6550_v47, %v6421_v57  ;;  %v12355_v34 = vld [vmem:[%s17775_s3 + $0xa78] sm:$0xff]  ;;  %v12353_v57 = vld [vmem:[%s17775_s3 + $0xa68] sm:$0xff] }
 0x91b   :  { %8390 = vmatpush.bf16.msrb.mxu2 %v12322_v22  ;;  %v8785_v22 = vand.u32 %v11815_v59, %v15216_v12  ;;  %v12347_v21 = vld [vmem:[%s17775_s3 + $0xa38] sm:$0xff] }
 0x91c   :  { %v12351_v61 = vld [vmem:[%s17775_s3 + $0xa58] sm:$0xff] }
 0x91d   :  { %8261 = vmatpush.bf16.msrb.mxu1 %v12307_v56  ;;  %v6668_v55 = vpop.f32.mrf.mxu1  ;;  %v12348_v56 = vld [vmem:[%s17775_s3 + $0xa40] sm:$0xff] }
 0x91e   :  { %8409 = vmatpush.bf16.msra.mxu3 %v12325_v13  ;;  %8524 = vmatpush.bf16.msrb.mxu0 %v12332_v39  ;;  %v6683_v8 = vadd.f32 %v6682_v17, %v6668_v55  ;;  %v11881_v13 = vld [vmem:[%s17775_s3 + $0xaf8] sm:$0xf]  ;;  %v6537_v60 = vpop.f32.mrf.mxu3  ;;  %v12340_v39 = vld [vmem:[%s17775_s3 + $0xa00] sm:$0xff]  ;;  %v6684_v27 = vpop.f32.mrf.mxu0  ;;  %v12362_v17 = vld [vmem:[%s17775_s3 + $0xab0] sm:$0xff] }
 0x91f   :  { %8391 = vmatpush.bf16.msrb.mxu2 %v12321_v1  ;;  %v6551_v62 = vpop.f32.mrf.mxu2  ;;  %v11882_v25 = vor.u32 %v12371_v18, %v11881_v13 }
 0x920   :  { %v17671_v28 = vadd.f32 %v6683_v8, %v6554_v40  ;;  %v6552_v1 = vadd.f32 %v6551_v62, %v6537_v60 }
 0x921   :  { %8262 = vmatpush.bf16.msrb.mxu1 %v12306_v5  ;;  %v12354_v5 = vld [vmem:[%s17775_s3 + $0xa70] sm:$0xff]  ;;  %v8918_v3 = vand.u32 %v11882_v25, %v15216_v12 }
 0x922   :  { %8654 = vmatpush.bf16.msrb.mxu3 %v12346_v44  ;;  %8525 = vmatpush.bf16.msrb.mxu0 %v12331_v52  ;;  %v12359_v44 = vld [vmem:[%s17775_s3 + $0xa98] sm:$0xff] }
 0x923   :  { %8392 = vmatpush.bf16.msrb.mxu2 %v12320_v26  ;;  %v12367_v52 = vld [vmem:[%s17775_s3 + $0xad8] sm:$0xff] }
 0x924   :  { %8263 = vmatmul.bf16.vlgmr.msrb.gmra.mxu1 %v16778_v63  ;;  %v12349_v63 = vld [vmem:[%s17775_s3 + $0xa48] sm:$0x10] }
 0x925   :  { %8540 = vmatpush.bf16.msra.mxu1 %v8519_v9  ;;  %11615 = vmatmul.msk.bf16.vlgmr.msra.gmra.mxu3 %vm4813_vm3, %v16858_v2  ;;  %v11748_v6 = vor.u32 %v12349_v63, %v11747_v23  ;;  %v12342_v2 = vld [vmem:[%s17775_s3 + $0xa10] sm:$0xff]  ;;  %v6670_v15 = vpop.f32.mrf.mxu1  ;;  %v12369_v23 = vld [vmem:[%s17775_s3 + $0xae8] sm:$0xff] }
 0x926   :  { %8655 = vmatpush.bf16.msrb.mxu3 %v12345_v16  ;;  %8526 = vmatpush.bf16.msrb.mxu0 %v12330_v42  ;;  %v6685_v9 = vadd.f32 %v6684_v27, %v6670_v15  ;;  %v12358_v16 = vld [vmem:[%s17775_s3 + $0xa90] sm:$0xff] }
 0x927   :  { %8393 = vmatpush.bf16.msrb.mxu2 %v12319_v48  ;;  %v8652_v11 = vand.u32 %v11748_v6, %v15216_v12  ;;  %v6815_v12 = vpop.f32.mrf.mxu3  ;;  %v12366_v42 = vld [vmem:[%s17775_s3 + $0xad0] sm:$0xff]  ;;  %v12363_v6 = vld [vmem:[%s17775_s3 + $0xab8] sm:$0xff] }
 0x929   :  { %8541 = vmatpush.bf16.msra.mxu1 %v12337_v37  ;;  %v12352_v37 = vld [vmem:[%s17775_s3 + $0xa60] sm:$0xff] }
 0x92a   :  { %8656 = vmatpush.bf16.msrb.mxu3 %v12344_v49  ;;  %8527 = vmatpush.bf16.msrb.mxu0 %v12329_v45  ;;  %v6934_v54 = vpop.f32.mrf.mxu0 }
 0x92b   :  { %8394 = vmatpush.bf16.msrb.mxu2 %v12318_v20 }
 0x92d   :  { %8542 = vmatpush.bf16.msra.mxu1 %v12336_v29  ;;  %v6948_v49 = vpop.f32.mrf.mxu1 }
 0x92e   :  { %8657 = vmatpush.bf16.msrb.mxu3 %v12343_v38  ;;  %8528 = vmatpush.bf16.msrb.mxu0 %v12328_v53  ;;  %v6949_v48 = vadd.f32 %v6948_v49, %v6934_v54  ;;  %v12350_v38 = vld [vmem:[%s17775_s3 + $0xa50] sm:$0xff] }
 0x92f   :  { %8395 = vmatpush.bf16.msrb.mxu2 %v12317_v7  ;;  %v6817_v20 = vpop.f32.mrf.mxu3  ;;  %v12361_v7 = vld [vmem:[%s17775_s3 + $0xaa8] sm:$0xff] }
 0x931   :  { %8787 = vmatpush.bf16.msrb.mxu1 %v12357_v41  ;;  %8529 = vmatmul.bf16.vlgmr.msrb.gmra.mxu0 %v16955_v31  ;;  %v12368_v31 = vld [vmem:[%s17775_s3 + $0xae0] sm:$0xff] }
 0x932   :  { %8658 = vmatpush.bf16.msrb.mxu3 %v12342_v2  ;;  %8806 = vmatpush.bf16.msra.mxu0 %v8785_v22  ;;  %v6936_v24 = vpop.f32.mrf.mxu0 }
 0x933   :  { %8673 = vmatpush.bf16.msra.mxu2 %v8652_v11  ;;  %v6801_v29 = vpop.f32.mrf.mxu2 }
 0x934   :  { %8396 = vmatmul.bf16.vlgmr.msrb.gmra.mxu2 %v16864_v32  ;;  %11682 = vmatmul.msk.bf16.vlgmr.msra.gmra.mxu1 %vm4813_vm3, %v16948_v51  ;;  %v6555_v32 = vadd.f32 %v6552_v1, %v6422_v10  ;;  %v12339_v51 = vld [vmem:[%s17775_s3 + $0x9f8] sm:$0xff]  ;;  %v6816_v63 = vadd.f32 %v6815_v12, %v6801_v29 }
 0x935   :  { %8788 = vmatpush.bf16.msrb.mxu1 %v12356_v35  ;;  %v6950_v41 = vpop.f32.mrf.mxu1 }
 0x936   :  { %8659 = vmatpush.bf16.msrb.mxu3 %v12341_v0  ;;  %8807 = vmatpush.bf16.msra.mxu0 %v12359_v44  ;;  %v6688_v26 = vadd.f32 %v6685_v9, %v6555_v32  ;;  %v6820_v43 = vadd.f32 %v6816_v63, %v17671_v28  ;;  %v6951_v10 = vadd.f32 %v6950_v41, %v6936_v24 }
 0x937   :  { %8674 = vmatpush.bf16.msra.mxu2 %v12348_v56 }
 0x939   :  { %8789 = vmatpush.bf16.msrb.mxu1 %v12355_v34 }
 0x93a   :  { %8660 = vmatpush.bf16.msrb.mxu3 %v12340_v39  ;;  %8808 = vmatpush.bf16.msra.mxu0 %v12358_v16 }
 0x93b   :  { %8675 = vmatpush.bf16.msra.mxu2 %v12347_v21  ;;  %v6803_v45 = vpop.f32.mrf.mxu2 }
 0x93c   :  { %v7214_v2 = vpop.f32.mrf.mxu0 }
 0x93d   :  { %8790 = vmatpush.bf16.msrb.mxu1 %v12354_v5 }
 0x93e   :  { %8661 = vmatpush.bf16.msrb.mxu3 %v12339_v51 }
 0x93f   :  { %8920 = vmatpush.bf16.msrb.mxu2 %v12368_v31 }
 0x940   :  { %v7067_v47 = vpop.f32.mrf.mxu3 }
 0x941   :  { %8791 = vmatpush.bf16.msrb.mxu1 %v12353_v57  ;;  %8662 = vmatmul.bf16.vlgmr.msrb.gmra.mxu3 %v17045_v30  ;;  %v12365_v30 = vld [vmem:[%s17775_s3 + $0xac8] sm:$0xff] }
 0x942   :  { %8939 = vmatpush.bf16.msra.mxu3 %v8918_v3  ;;  %11816 = vmatmul.msk.bf16.vlgmr.msra.gmra.mxu0 %vm4813_vm3, %v17131_v46  ;;  %v6818_v46 = vadd.f32 %v6817_v20, %v6803_v45 }
 0x943   :  { %8921 = vmatpush.bf16.msrb.mxu2 %v12367_v52  ;;  %v7081_v35 = vpop.f32.mrf.mxu2 }
 0x944   :  { %11749 = vmatmul.msk.bf16.vlgmr.msra.gmra.mxu2 %vm4813_vm3, %v17038_v33  ;;  %v6953_v33 = vadd.f32 %v6949_v48, %v6820_v43  ;;  %v6821_v59 = vadd.f32 %v6818_v46, %v6688_v26  ;;  %v7082_v55 = vadd.f32 %v7081_v35, %v7067_v47  ;;  %v7216_v28 = vpop.f32.mrf.mxu0 }
 0x945   :  { %8792 = vmatpush.bf16.msrb.mxu1 %v12352_v37 }
 0x946   :  { %8940 = vmatpush.bf16.msra.mxu3 %v12370_v58  ;;  %v6954_v36 = vadd.f32 %v6951_v10, %v6821_v59  ;;  %v7086_v53 = vadd.f32 %v7082_v55, %v6953_v33 }
 0x947   :  { %8922 = vmatpush.bf16.msrb.mxu2 %v12366_v42 }
 0x949   :  { %8793 = vmatpush.bf16.msrb.mxu1 %v12351_v61 }
 0x94a   :  { %8941 = vmatpush.bf16.msra.mxu3 %v12369_v23 }
 0x94b   :  { %8923 = vmatpush.bf16.msrb.mxu2 %v12365_v30  ;;  %v7083_v11 = vpop.f32.mrf.mxu2 }
 0x94d   :  { %8794 = vmatpush.bf16.msrb.mxu1 %v12350_v38 }
 0x94f   :  { %8924 = vmatpush.bf16.msrb.mxu2 %v12364_v14 }
 0x950   :  { %8795 = vmatmul.bf16.vlgmr.msrb.gmra.mxu1 %v17135_v19  ;;  %v7200_v19 = vpop.f32.mrf.mxu1 }
 0x951   :  { %11883 = vmatmul.msk.bf16.vlgmr.msra.gmra.mxu3 %vm4813_vm3, %v17205_v4  ;;  %v7215_v40 = vadd.f32 %v7214_v2, %v7200_v19  ;;  %v7069_v4 = vpop.f32.mrf.mxu3 }
 0x952   :  { %v7084_v22 = vadd.f32 %v7083_v11, %v7069_v4 }
 0x953   :  { %8925 = vmatpush.bf16.msrb.mxu2 %v12363_v6  ;;  %v7219_v8 = vadd.f32 %v7215_v40, %v7086_v53 }
 0x954   :  { %v7087_v34 = vadd.f32 %v7084_v22, %v6954_v36 }
 0x956   :  { %v7466_v5 = vpop.f32.mrf.mxu0 }
 0x957   :  { %8926 = vmatpush.bf16.msrb.mxu2 %v12362_v17 }
 0x958   :  { %v7202_v0 = vpop.f32.mrf.mxu1 }
 0x959   :  { %v7217_v56 = vadd.f32 %v7216_v28, %v7202_v0  ;;  %v7347_v18 = vpop.f32.mrf.mxu3 }
 0x95b   :  { %8927 = vmatpush.bf16.msrb.mxu2 %v12361_v7  ;;  %v7220_v13 = vadd.f32 %v7217_v56, %v7087_v34 }
 0x95e   :  { %8928 = vmatmul.bf16.vlgmr.msrb.gmra.mxu2 %v17207_v50  ;;  %v7468_v50 = vpop.f32.mrf.mxu0 }
 0x95f   :  { %v7333_v60 = vpop.f32.mrf.mxu2 }
 0x960   :  { %v7348_v62 = vadd.f32 %v7347_v18, %v7333_v60  ;;  %v7480_v25 = vpop.f32.mrf.mxu1 }
 0x961   :  { %v7349_v1 = vpop.f32.mrf.mxu3  ;;  %v7481_v14 = vadd.f32 %v7480_v25, %v7466_v5 }
 0x962   :  { %v7352_v44 = vadd.f32 %v7348_v62, %v7219_v8 }
 0x964   :  { %v7485_v45 = vadd.f32 %v7481_v14, %v7352_v44 }
 0x967   :  { %v7335_v39 = vpop.f32.mrf.mxu2 }
 0x968   :  { %v7350_v27 = vadd.f32 %v7349_v1, %v7335_v39  ;;  %v7482_v21 = vpop.f32.mrf.mxu1  ;;  %v7746_v51 = vpop.f32.mrf.mxu0 }
 0x969   :  { %v7483_v2 = vadd.f32 %v7482_v21, %v7468_v50 }
 0x96a   :  { %v7353_v15 = vadd.f32 %v7350_v27, %v7220_v13 }
 0x96c   :  { %v7599_v32 = vpop.f32.mrf.mxu3  ;;  %v7486_v19 = vadd.f32 %v7483_v2, %v7353_v15 }
 0x96f   :  { %v7613_v9 = vpop.f32.mrf.mxu2 }
 0x970   :  { %v7748_v54 = vpop.f32.mrf.mxu0  ;;  %v7614_v33 = vadd.f32 %v7613_v9, %v7599_v32 }
 0x972   :  { %v7618_v6 = vadd.f32 %v7614_v33, %v7485_v45 }
 0x974   :  { %v7601_v31 = vpop.f32.mrf.mxu3 }
 0x975   :  { %v7732_v16 = vpop.f32.mrf.mxu1 }
 0x976   :  { %v7747_v59 = vadd.f32 %v7746_v51, %v7732_v16 }
 0x977   :  { %v7615_v26 = vpop.f32.mrf.mxu2 }
 0x978   :  { %v7751_v35 = vadd.f32 %v7747_v59, %v7618_v6  ;;  %v7616_v55 = vadd.f32 %v7615_v26, %v7601_v31 }
 0x97a   :  { %v7619_v40 = vadd.f32 %v7616_v55, %v7486_v19 }
 0x97c   :  { %v7879_v57 = vpop.f32.mrf.mxu3 }
 0x97d   :  { %v7734_v52 = vpop.f32.mrf.mxu1 }
 0x97e   :  { %v7749_v8 = vadd.f32 %v7748_v54, %v7734_v52 }
 0x980   :  { %v7752_v13 = vadd.f32 %v7749_v8, %v7619_v40 }
 0x982   :  { %v7998_v12 = vpop.f32.mrf.mxu0 }
 0x984   :  { %v7881_v37 = vpop.f32.mrf.mxu3 }
 0x985   :  { %v8012_v49 = vpop.f32.mrf.mxu1 }
 0x986   :  { %v8013_v4 = vadd.f32 %v8012_v49, %v7998_v12 }
 0x98a   :  { %v8000_v61 = vpop.f32.mrf.mxu0 }
 0x98b   :  { %v7865_v3 = vpop.f32.mrf.mxu2 }
 0x98c   :  { %v7880_v47 = vadd.f32 %v7879_v57, %v7865_v3 }
 0x98d   :  { %v8014_v29 = vpop.f32.mrf.mxu1 }
 0x98e   :  { %v7884_v53 = vadd.f32 %v7880_v47, %v7751_v35  ;;  %v8015_v39 = vadd.f32 %v8014_v29, %v8000_v61  ;;  %v12377_v29 = vld [vmem:[%s17776_s4] ss:$0 sm:$0xff] }
 0x990   :  { %v8017_v0 = vadd.f32 %v8013_v4, %v7884_v53 }
 0x993   :  { %v7867_v58 = vpop.f32.mrf.mxu2 }
 0x994   :  { %v8278_v43 = vpop.f32.mrf.mxu0  ;;  %v7882_v28 = vadd.f32 %v7881_v37, %v7867_v58 }
 0x996   :  { %v7885_v62 = vadd.f32 %v7882_v28, %v7752_v13 }
 0x998   :  { %v8131_v48 = vpop.f32.mrf.mxu3  ;;  %v8018_v15 = vadd.f32 %v8015_v39, %v7885_v62 }
 0x99b   :  { %v8145_v42 = vpop.f32.mrf.mxu2 }
 0x99c   :  { %v8280_v10 = vpop.f32.mrf.mxu0  ;;  %v8146_v11 = vadd.f32 %v8145_v42, %v8131_v48 }
 0x99e   :  { %v8150_v18 = vadd.f32 %v8146_v11, %v8017_v0 }
 0x9a0   :  { %v8133_v23 = vpop.f32.mrf.mxu3 }
 0x9a1   :  { %v8264_v63 = vpop.f32.mrf.mxu1 }
 0x9a2   :  { %v8279_v60 = vadd.f32 %v8278_v43, %v8264_v63 }
 0x9a3   :  { %v8147_v30 = vpop.f32.mrf.mxu2 }
 0x9a4   :  { %v8283_v27 = vadd.f32 %v8279_v60, %v8150_v18  ;;  %v8148_v5 = vadd.f32 %v8147_v30, %v8133_v23 }
 0x9a6   :  { %v8151_v50 = vadd.f32 %v8148_v5, %v8018_v15 }
 0x9a8   :  { %v8411_v24 = vpop.f32.mrf.mxu3 }
 0x9a9   :  { %v8266_v41 = vpop.f32.mrf.mxu1 }
 0x9aa   :  { %v8281_v21 = vadd.f32 %v8280_v10, %v8266_v41 }
 0x9ac   :  { %v8284_v3 = vadd.f32 %v8281_v21, %v8151_v50 }
 0x9ae   :  { %v8530_v17 = vpop.f32.mrf.mxu0 }
 0x9b0   :  { %v8413_v20 = vpop.f32.mrf.mxu3 }
 0x9b1   :  { %v8544_v36 = vpop.f32.mrf.mxu1 }
 0x9b2   :  { %v8545_v31 = vadd.f32 %v8544_v36, %v8530_v17 }
 0x9b6   :  { %v8532_v34 = vpop.f32.mrf.mxu0 }
 0x9b7   :  { %v8397_v38 = vpop.f32.mrf.mxu2 }
 0x9b8   :  { %v8412_v44 = vadd.f32 %v8411_v24, %v8397_v38 }
 0x9b9   :  { %v8546_v56 = vpop.f32.mrf.mxu1 }
 0x9ba   :  { %v8416_v25 = vadd.f32 %v8412_v44, %v8283_v27  ;;  %v8547_v49 = vadd.f32 %v8546_v56, %v8532_v34 }
 0x9bc   :  { %v8549_v57 = vadd.f32 %v8545_v31, %v8416_v25 }
 0x9bf   :  { %v8399_v46 = vpop.f32.mrf.mxu2  ;;  %v8810_v26 = vpop.f32.mrf.mxu0 }
 0x9c0   :  { %v8414_v51 = vadd.f32 %v8413_v20, %v8399_v46 }
 0x9c2   :  { %v8417_v58 = vadd.f32 %v8414_v51, %v8284_v3 }
 0x9c4   :  { %v8663_v7 = vpop.f32.mrf.mxu3  ;;  %v8550_v63 = vadd.f32 %v8547_v49, %v8417_v58 }
 0x9c7   :  { %v8677_v22 = vpop.f32.mrf.mxu2  ;;  %v8812_v43 = vpop.f32.mrf.mxu0 }
 0x9c8   :  { %v8678_v16 = vadd.f32 %v8677_v22, %v8663_v7 }
 0x9ca   :  { %v8682_v52 = vadd.f32 %v8678_v16, %v8549_v57 }
 0x9cc   :  { %v8665_v1 = vpop.f32.mrf.mxu3 }
 0x9cd   :  { %v8796_v32 = vpop.f32.mrf.mxu1 }
 0x9ce   :  { %v8811_v54 = vadd.f32 %v8810_v26, %v8796_v32 }
 0x9cf   :  { %v8679_v9 = vpop.f32.mrf.mxu2 }
 0x9d0   :  { %v8815_v48 = vadd.f32 %v8811_v54, %v8682_v52  ;;  %v8680_v42 = vadd.f32 %v8679_v9, %v8665_v1 }
 0x9d2   :  { %v8683_v24 = vadd.f32 %v8680_v42, %v8550_v63 }
 0x9d4   :  { %v8943_v37 = vpop.f32.mrf.mxu3 }
 0x9d5   :  { %v8798_v23 = vpop.f32.mrf.mxu1 }
 0x9d6   :  { %v8813_v38 = vadd.f32 %v8812_v43, %v8798_v23 }
 0x9d8   :  { %v8816_v33 = vadd.f32 %v8813_v38, %v8683_v24 }
 0x9dc   :  { %v8945_v10 = vpop.f32.mrf.mxu3 }
 0x9e1   :  { %v8929_v12 = vpop.f32.mrf.mxu2 }
 0x9e2   :  { %v8944_v61 = vadd.f32 %v8943_v37, %v8929_v12 }
 0x9e4   :  { %v8948_v30 = vadd.f32 %v8944_v61, %v8815_v48 }
 0x9e6   :  { %v8954_v41 = vadd.f32 %v12377_v29, %v8948_v30 }
 0x9e8   :  { %8956 = vst [vmem:[%s17777_s5] sm:$0xff] %v8954_v41 }
 0x9e9   :  { %v8931_v14 = vpop.f32.mrf.mxu2 }
 0x9ea   :  { %v8946_v20 = vadd.f32 %v8945_v10, %v8931_v14 }
 0x9ec   :  { %v8949_v45 = vadd.f32 %v8946_v20, %v8816_v33 }
 0x9ee   :  { %v8955_v46 = vadd.f32 %v12377_v29, %v8949_v45 }
 0x9f0   :  { %8957 = vst [vmem:[%s17777_s5 + $0x8] sm:$0xff] %v8955_v46 }

</bundles_post_ra>
